<compile_context>
chip_gen: v7x
topology: tpu7x:2x2x1
jax: 0.10.0
libtpu: 0.0.40
codegen_flags: <defaults>
</compile_context>

<pallas_src>
import functools

import numpy as np
import jax
import jax.numpy as jnp
from jax import lax
from jax.experimental import pallas as pl
from jax.experimental.pallas import tpu as pltpu

LEAKY_SLOPE = 0.2
IN_EPS = 1e-5
SCORE_LANES = 128      # fused (u, c) scores live in lanes 0 / 1 of one 128-lane row


class Cfg:
    ndf = 8
    ndl = 16
    dsc_layers = 2
    latent_dim = 32
    dsc_spectral = False
    smooth = 0.0
    target_real_label = 1.0
    target_fake_label = 0.0


# ------------------------- host-side constant builders -------------------------- #

def _bf16_round(a):
    """Round-trip through bfloat16 so kernel constants == NumPy reference values."""
    return np.asarray(
        jnp.asarray(np.asarray(a, np.float32)).astype(jnp.bfloat16).astype(jnp.float32))


def _reflect_idx(i, n):
    if i < 0:
        return -i
    if i >= n:
        return 2 * (n - 1) - i
    return i


def _conv_row_constants(w, h_in, w_in, stride):
    """Per-tap (row-select, col-mix) matrices for a reflect-padded conv.

    Activations use a "row layout": a (H, W*C) matrix with [i, j*C + c] =
    feature(i, j, c).  For tap t the conv contribution is (rowsel[t] @ x) @ m[t],
    so the whole conv is 2*ks*ks small MXU matmuls with reflection folded into
    the constants (no padded buffers, no im2col, no strided access).
    """
    ks, _, c_in, c_out = w.shape
    pad = ks // 2
    h_out = (h_in + 2 * pad - ks) // stride + 1
    w_out = (w_in + 2 * pad - ks) // stride + 1
    taps = ks * ks
    rowsel = np.zeros((taps, h_out, h_in), np.float32)
    m = np.zeros((taps, w_in * c_in, w_out * c_out), np.float32)
    for ky in range(ks):
        for kx in range(ks):
            t = ky * ks + kx
            for oi in range(h_out):
                rowsel[t, oi, _reflect_idx(stride * oi + ky - pad, h_in)] = 1.0
            for oj in range(w_out):
                sj = _reflect_idx(stride * oj + kx - pad, w_in)
                m[t, sj * c_in:(sj + 1) * c_in, oj * c_out:(oj + 1) * c_out] = w[ky, kx]
    return rowsel, m, h_out, w_out


def _norm_bcast_matrix(w_out, c_out):
    """(1, W*C) lane-wise means @ P == per-channel means broadcast back to (1, W*C)."""
    p = np.zeros((w_out * c_out, w_out * c_out), np.float32)
    for c in range(c_out):
        idx = c + c_out * np.arange(w_out)
        p[np.ix_(idx, idx)] = 1.0 / w_out
    return p


def _pool_matrix(w_out, c_out):
    a = np.zeros((w_out * c_out, c_out), np.float32)
    for j in range(w_out):
        a[j * c_out + np.arange(c_out), np.arange(c_out)] = 1.0 / w_out
    return a


# --------------------------------- Pallas kernel -------------------------------- #

def _conv_taps(x_bf16, rs_ref, m_ref):
    """sum_t (rowsel[t] @ x) @ m[t] -> (H_out, W_out*C_out) f32 accumulator."""
    taps, h_out, _ = rs_ref.shape
    lanes = m_ref.shape[2]
    acc = jnp.zeros((h_out, lanes), jnp.float32)
    for t in range(taps):
        sel = jnp.dot(rs_ref[t], x_bf16,
                      preferred_element_type=jnp.float32).astype(jnp.bfloat16)
        acc = acc + jnp.dot(sel, m_ref[t], preferred_element_type=jnp.float32)
    return acc


def _instnorm_lrelu(y, p_ref):
    """Per-channel InstanceNorm (biased var, eps inside sqrt) + LeakyReLU, f32."""
    p = p_ref[...]
    mean = jnp.dot(jnp.mean(y, axis=0, keepdims=True), p,
                   preferred_element_type=jnp.float32)
    cen = y - mean
    var = jnp.dot(jnp.mean(cen * cen, axis=0, keepdims=True), p,
                  preferred_element_type=jnp.float32)
    yn = cen * lax.rsqrt(var + IN_EPS)
    return jnp.where(yn >= 0, yn, LEAKY_SLOPE * yn)


def _make_fused_kernel(num_feature_layers):
    def kernel(*refs):
        x_ref, ct_ref = refs[0], refs[1]
        pos = 2

        x = x_ref[0].astype(jnp.bfloat16)                      # (H, W*C_in) of sample n
        for _ in range(num_feature_layers):
            rs_ref, m_ref, b_ref, p_ref = refs[pos:pos + 4]
            pos += 4
            y = _conv_taps(x, rs_ref, m_ref) + b_ref[...]
            x = _instnorm_lrelu(y, p_ref).astype(jnp.bfloat16)

        rsh_ref, mhf_ref, mht_ref, bh_ref, ph_ref, ah_ref, wl_ref = refs[pos:pos + 7]
        out_ref = refs[pos + 7]

        ct = ct_ref[0].astype(jnp.bfloat16)                    # (Hf, Wf*tc) text features
        # Both heads fused along output channels; u-head's text weights are zero.
        y = _conv_taps(x, rsh_ref, mhf_ref) + _conv_taps(ct, rsh_ref, mht_ref)
        yh = _instnorm_lrelu(y + bh_ref[...], ph_ref)
        pooled = jnp.dot(jnp.mean(yh, axis=0, keepdims=True), ah_ref[...],
                         preferred_element_type=jnp.float32)   # (1, 2*ndl) global avg pool
        scores = jnp.dot(pooled, wl_ref[...], preferred_element_type=jnp.float32)
        out_ref[0] = jnp.where(scores >= 0, scores, LEAKY_SLOPE * scores)
    return kernel


# ------------------------------ params & forward -------------------------------- #

def build_params(cfg, img_hw, seed=0):
    rng = np.random.default_rng(seed)

    def w_init(*shape):
        return _bf16_round(0.05 * rng.standard_normal(shape).astype(np.float32))

    def b_init(n):
        return _bf16_round(0.01 * rng.standard_normal((n,)).astype(np.float32))

    # feature extractor: ConvBlock(3->ndf, ks=7, s=1) then dsc_layers stride-2 blocks
    metas = [(7, 1, 3, cfg.ndf)]
    f, pf = 1, 1
    for _ in range(cfg.dsc_layers):
        f = min(8, f * 2)
        metas.append((3, 2, cfg.ndf * pf, cfg.ndf * f))
        pf = f

    feat_hw = img_hw // (2 ** cfg.dsc_layers)
    scale = feat_hw * feat_hw
    assert cfg.latent_dim % scale == 0, "latent_dim must be divisible by feat_hw**2"
    tc = cfg.latent_dim // scale
    fc = cfg.ndf * f

    ref = {"strides": [m[1] for m in metas], "tc": tc}
    layers = []
    cur_h = cur_w = img_hw
    for idx, (ks, stride, ci, co) in enumerate(metas):
        wgt, bia = w_init(ks, ks, ci, co), b_init(co)
        ref[f"w{idx}"], ref[f"b{idx}"] = wgt, bia
        rs, m, cur_h, cur_w = _conv_row_constants(wgt, cur_h, cur_w, stride)
        layers.append(dict(
            rs=jnp.asarray(rs, jnp.bfloat16),
            m=jnp.asarray(m, jnp.bfloat16),
            b=jnp.asarray(np.tile(bia, cur_w)[None, :], jnp.float32),
            p=jnp.asarray(_norm_bcast_matrix(cur_w, co), jnp.float32),
        ))
    assert cur_h == feat_hw and cur_w == feat_hw

    # u head conv sees only the fc feature channels; c head sees features + text.
    wu, bu = w_init(3, 3, fc, cfg.ndl), b_init(cfg.ndl)
    wc, bc = w_init(3, 3, fc + tc, cfg.ndl), b_init(cfg.ndl)
    wlu, wlc = w_init(cfg.ndl), w_init(cfg.ndl)
    ref.update(wu=wu, bu=bu, wc=wc, bc=bc, wlu=wlu, wlc=wlc)

    oc_h = 2 * cfg.ndl
    w_hf = np.zeros((3, 3, fc, oc_h), np.float32)      # feature-channel filters (u | c)
    w_hf[..., :cfg.ndl] = wu
    w_hf[..., cfg.ndl:] = wc[:, :, :fc, :]
    w_ht = np.zeros((3, 3, tc, oc_h), np.float32)      # text-channel filters (0 | c)
    w_ht[..., cfg.ndl:] = wc[:, :, fc:, :]
    bh = np.concatenate([bu, bc])

    rsh, mhf, _, wo = _conv_row_constants(w_hf, feat_hw, feat_hw, 1)
    _, mht, _, _ = _conv_row_constants(w_ht, feat_hw, feat_hw, 1)

    wl = np.zeros((oc_h, SCORE_LANES), np.float32)     # final Linear(ndl,1,bias=False) x2
    wl[:cfg.ndl, 0] = wlu
    wl[cfg.ndl:, 1] = wlc

    heads = dict(
        rs=jnp.asarray(rsh, jnp.bfloat16),
        mf=jnp.asarray(mhf, jnp.bfloat16),
        mt=jnp.asarray(mht, jnp.bfloat16),
        b=jnp.asarray(np.tile(bh, wo)[None, :], jnp.float32),
        p=jnp.asarray(_norm_bcast_matrix(wo, oc_h), jnp.float32),
        a=jnp.asarray(_pool_matrix(wo, oc_h), jnp.float32),
        wl=jnp.asarray(wl, jnp.float32),
    )
    shapes = dict(img_hw=img_hw, feat_hw=feat_hw, tc=tc, in_c=metas[0][2])
    return {"layers": layers, "heads": heads, "shapes": shapes, "ref": ref}


def forward(params, x_nchw, c_lat):
    shp = params["shapes"]
    n = x_nchw.shape[0]
    hw, fhw, tc, in_c = shp["img_hw"], shp["feat_hw"], shp["tc"], shp["in_c"]

    # NCHW image -> per-sample row layout (H, W*C); latent -> (Hf, Wf*tc) row layout.
    x_row = jnp.transpose(x_nchw.astype(jnp.float32), (0, 2, 3, 1)).reshape(n, hw, hw * in_c)
    ct_row = jnp.transpose(c_lat.astype(jnp.float32).reshape(n, tc, fhw, fhw),
                           (0, 2, 3, 1)).reshape(n, fhw, fhw * tc)

    consts = []
    for layer in params["layers"]:
        consts += [layer["rs"], layer["m"], layer["b"], layer["p"]]
    hd = params["heads"]
    consts += [hd["rs"], hd["mf"], hd["mt"], hd["b"], hd["p"], hd["a"], hd["wl"]]

    def batch_spec(arr):
        blk = (1,) + tuple(arr.shape[1:])
        zeros = (0,) * (len(blk) - 1)
        return pl.BlockSpec(blk, lambda i, _z=zeros: (i,) + _z)

    def const_spec(arr):
        blk = tuple(arr.shape)
        zeros = (0,) * len(blk)
        return pl.BlockSpec(blk, lambda i, _z=zeros: _z)

    out_lanes = hd["wl"].shape[1]
    out = pl.pallas_call(
        _make_fused_kernel(len(params["layers"])),
        out_shape=jax.ShapeDtypeStruct((n, 1, out_lanes), jnp.float32),
        grid=(n,),
        in_specs=[batch_spec(x_row), batch_spec(ct_row)] + [const_spec(a) for a in consts],
        out_specs=pl.BlockSpec((1, 1, out_lanes), lambda i: (i, 0, 0)),
        compiler_params=pltpu.CompilerParams(dimension_semantics=("parallel",)),
    )(x_row, ct_row, *consts)

    return {"u": out[:, 0, 0:1], "c": out[:, 0, 1:2]}


# ------------------------------ NumPy reference ---------------------------------- #

def _reference_forward(x_nchw, c_lat, ref):
    """Brute-force NumPy reference of the PyTorch module forward (bf16-rounded ops)."""
    def conv_block(x_hwc, w, b, stride):
        ks = w.shape[0]
        pad = ks // 2
        xp = np.pad(x_hwc, ((pad, pad), (pad, pad), (0, 0)), mode="reflect")
        h_out = (x_hwc.shape[0] + 2 * pad - ks) // stride + 1
        w_out = (x_hwc.shape[1] + 2 * pad - ks) // stride + 1
        y = np.zeros((h_out, w_out, w.shape[3]), np.float32)
        for oi in range(h_out):
            for oj in range(w_out):
                patch = xp[oi * stride:oi * stride + ks, oj * stride:oj * stride + ks, :]
                y[oi, oj] = np.tensordot(patch, w, axes=([0, 1, 2], [0, 1, 2]))
        y = y + b
        mean = y.mean(axis=(0, 1), keepdims=True)
        var = ((y - mean) ** 2).mean(axis=(0, 1), keepdims=True)
        y = (y - mean) / np.sqrt(var + IN_EPS)
        return np.where(y >= 0.0, y, LEAKY_SLOPE * y).astype(np.float32)

    def leaky(v):
        return v if v >= 0 else LEAKY_SLOPE * v

    n = x_nchw.shape[0]
    tc = ref["tc"]
    u_scores, c_scores = [], []
    for s in range(n):
        x = _bf16_round(np.transpose(x_nchw[s], (1, 2, 0)))
        for idx, stride in enumerate(ref["strides"]):
            x = _bf16_round(conv_block(x, ref[f"w{idx}"], ref[f"b{idx}"], stride))
        feat = x
        hf = feat.shape[0]
        cf = _bf16_round(c_lat[s].reshape(tc, hf, hf).transpose(1, 2, 0))

        yu = conv_block(feat, ref["wu"], ref["bu"], 1)
        su = leaky(float(yu.mean(axis=(0, 1)) @ ref["wlu"]))

        yc = conv_block(np.concatenate([feat, cf], axis=-1), ref["wc"], ref["bc"], 1)
        sc = leaky(float(yc.mean(axis=(0, 1)) @ ref["wlc"]))

        u_scores.append(su)
        c_scores.append(sc)
    return (np.asarray(u_scores, np.float32).reshape(n, 1),
            np.asarray(c_scores, np.float32).reshape(n, 1))


# ------------------------------------ main ---------------------------------------- #

if __name__ == "__main__":
    cfg = Cfg()
    key = jax.random.PRNGKey(0)
    kx, kc = jax.random.split(key)

    # Small shapes consistent with the module: NCHW image batch + flat latent code.
    x = jax.random.normal(kx, (2, 3, 16, 16), jnp.float32)
    c = jax.random.normal(kc, (2, cfg.latent_dim), jnp.float32)

    params = build_params(cfg, img_hw=16, seed=0)

    fwd = jax.jit(functools.partial(forward, params))
    out = fwd(x, c)
    jax.block_until_ready(out)

    assert out["u"].shape == (2, 1) and out["c"].shape == (2, 1)
    u_np, c_np = np.asarray(out["u"]), np.asarray(out["c"])
    assert np.all(np.isfinite(u_np)) and np.all(np.isfinite(c_np))

    ref_u, ref_c = _reference_forward(np.asarray(x), np.asarray(c), params["ref"])
    assert np.allclose(u_np, ref_u, rtol=0.1, atol=1e-2), (u_np, ref_u)
    assert np.allclose(c_np, ref_c, rtol=0.1, atol=1e-2), (c_np, ref_c)
    print("KERNEL_OK")
</pallas_src>

<mosaic_0001>
module attributes {stable_mosaic.version = 11 : i64} {
  func.func @kernel(%arg0: i32, %arg1: memref<1x16x48xf32, #tpu.memory_space<vmem>>, %arg2: memref<1x4x8xf32, #tpu.memory_space<vmem>>, %arg3: memref<49x16x16xbf16, #tpu.memory_space<vmem>>, %arg4: memref<49x48x128xbf16, #tpu.memory_space<vmem>>, %arg5: memref<1x128xf32, #tpu.memory_space<vmem>>, %arg6: memref<128x128xf32, #tpu.memory_space<vmem>>, %arg7: memref<9x8x16xbf16, #tpu.memory_space<vmem>>, %arg8: memref<9x128x128xbf16, #tpu.memory_space<vmem>>, %arg9: memref<1x128xf32, #tpu.memory_space<vmem>>, %arg10: memref<128x128xf32, #tpu.memory_space<vmem>>, %arg11: memref<9x4x8xbf16, #tpu.memory_space<vmem>>, %arg12: memref<9x128x128xbf16, #tpu.memory_space<vmem>>, %arg13: memref<1x128xf32, #tpu.memory_space<vmem>>, %arg14: memref<128x128xf32, #tpu.memory_space<vmem>>, %arg15: memref<9x4x4xbf16, #tpu.memory_space<vmem>>, %arg16: memref<9x128x128xbf16, #tpu.memory_space<vmem>>, %arg17: memref<9x8x128xbf16, #tpu.memory_space<vmem>>, %arg18: memref<1x128xf32, #tpu.memory_space<vmem>>, %arg19: memref<128x128xf32, #tpu.memory_space<vmem>>, %arg20: memref<128x32xf32, #tpu.memory_space<vmem>>, %arg21: memref<32x128xf32, #tpu.memory_space<vmem>>, %arg22: memref<1x1x128xf32, #tpu.memory_space<vmem>>) attributes {dimension_semantics = [#tpu.dimension_semantics<parallel>], iteration_bounds = array<i64: 2>, scalar_prefetch = 0 : i64, scratch_operands = 0 : i64, tpu.core_type = #tpu.core_type<tc>, window_params = [{transform_indices = @transform_0, window_bounds = array<i64: 1, 16, 48>}, {transform_indices = @transform_1, window_bounds = array<i64: 1, 4, 8>}, {pipeline_mode = #tpu.pipeline_mode<synchronous>, transform_indices = @transform_2, window_bounds = array<i64: 49, 16, 16>}, {pipeline_mode = #tpu.pipeline_mode<synchronous>, transform_indices = @transform_3, window_bounds = array<i64: 49, 48, 128>}, {pipeline_mode = #tpu.pipeline_mode<synchronous>, transform_indices = @transform_4, window_bounds = array<i64: 1, 128>}, {pipeline_mode = #tpu.pipeline_mode<synchronous>, transform_indices = @transform_5, window_bounds = array<i64: 128, 128>}, {pipeline_mode = #tpu.pipeline_mode<synchronous>, transform_indices = @transform_6, window_bounds = array<i64: 9, 8, 16>}, {pipeline_mode = #tpu.pipeline_mode<synchronous>, transform_indices = @transform_7, window_bounds = array<i64: 9, 128, 128>}, {pipeline_mode = #tpu.pipeline_mode<synchronous>, transform_indices = @transform_8, window_bounds = array<i64: 1, 128>}, {pipeline_mode = #tpu.pipeline_mode<synchronous>, transform_indices = @transform_9, window_bounds = array<i64: 128, 128>}, {pipeline_mode = #tpu.pipeline_mode<synchronous>, transform_indices = @transform_10, window_bounds = array<i64: 9, 4, 8>}, {pipeline_mode = #tpu.pipeline_mode<synchronous>, transform_indices = @transform_11, window_bounds = array<i64: 9, 128, 128>}, {pipeline_mode = #tpu.pipeline_mode<synchronous>, transform_indices = @transform_12, window_bounds = array<i64: 1, 128>}, {pipeline_mode = #tpu.pipeline_mode<synchronous>, transform_indices = @transform_13, window_bounds = array<i64: 128, 128>}, {pipeline_mode = #tpu.pipeline_mode<synchronous>, transform_indices = @transform_14, window_bounds = array<i64: 9, 4, 4>}, {pipeline_mode = #tpu.pipeline_mode<synchronous>, transform_indices = @transform_15, window_bounds = array<i64: 9, 128, 128>}, {pipeline_mode = #tpu.pipeline_mode<synchronous>, transform_indices = @transform_16, window_bounds = array<i64: 9, 8, 128>}, {pipeline_mode = #tpu.pipeline_mode<synchronous>, transform_indices = @transform_17, window_bounds = array<i64: 1, 128>}, {pipeline_mode = #tpu.pipeline_mode<synchronous>, transform_indices = @transform_18, window_bounds = array<i64: 128, 128>}, {pipeline_mode = #tpu.pipeline_mode<synchronous>, transform_indices = @transform_19, window_bounds = array<i64: 128, 32>}, {pipeline_mode = #tpu.pipeline_mode<synchronous>, transform_indices = @transform_20, window_bounds = array<i64: 32, 128>}, {transform_indices = @transform_21, window_bounds = array<i64: 1, 1, 128>}]} {
    %c0 = arith.constant 0 : index
    %c0_0 = arith.constant 0 : index
    %c0_1 = arith.constant 0 : index
    %0 = vector.load %arg1[%c0, %c0_0, %c0_1] : memref<1x16x48xf32, #tpu.memory_space<vmem>>, vector<1x16x48xf32>
    %1 = vector.shape_cast %0 : vector<1x16x48xf32> to vector<16x48xf32>
    %2 = arith.truncf %1 : vector<16x48xf32> to vector<16x48xbf16>
    %cst = arith.constant 0.000000e+00 : f32
    %3 = vector.broadcast %cst : f32 to vector<16x128xf32>
    %c0_2 = arith.constant 0 : index
    %c0_3 = arith.constant 0 : index
    %c0_4 = arith.constant 0 : index
    %4 = vector.load %arg3[%c0_2, %c0_3, %c0_4] : memref<49x16x16xbf16, #tpu.memory_space<vmem>>, vector<1x16x16xbf16>
    %5 = vector.shape_cast %4 : vector<1x16x16xbf16> to vector<16x16xbf16>
    %cst_5 = arith.constant dense<0.000000e+00> : vector<16x48xf32>
    %6 = tpu.matmul %5, %2, %cst_5 {dimension_numbers = #tpu.dot_dimension_numbers<[1], [0], [0], [1], [0, 0, 1, 1], [], []>} : vector<16x16xbf16>, vector<16x48xbf16>, vector<16x48xf32> -> vector<16x48xf32>
    %7 = arith.truncf %6 : vector<16x48xf32> to vector<16x48xbf16>
    %c0_6 = arith.constant 0 : index
    %c0_7 = arith.constant 0 : index
    %c0_8 = arith.constant 0 : index
    %8 = vector.load %arg4[%c0_6, %c0_7, %c0_8] : memref<49x48x128xbf16, #tpu.memory_space<vmem>>, vector<1x48x128xbf16>
    %9 = vector.shape_cast %8 : vector<1x48x128xbf16> to vector<48x128xbf16>
    %cst_9 = arith.constant dense<0.000000e+00> : vector<16x128xf32>
    %10 = tpu.matmul %7, %9, %cst_9 {dimension_numbers = #tpu.dot_dimension_numbers<[1], [0], [0], [1], [0, 0, 1, 1], [], []>} : vector<16x48xbf16>, vector<48x128xbf16>, vector<16x128xf32> -> vector<16x128xf32>
    %11 = arith.addf %3, %10 : vector<16x128xf32>
    %c1 = arith.constant 1 : index
    %c0_10 = arith.constant 0 : index
    %c0_11 = arith.constant 0 : index
    %12 = vector.load %arg3[%c1, %c0_10, %c0_11] : memref<49x16x16xbf16, #tpu.memory_space<vmem>>, vector<1x16x16xbf16>
    %13 = vector.shape_cast %12 : vector<1x16x16xbf16> to vector<16x16xbf16>
    %cst_12 = arith.constant dense<0.000000e+00> : vector<16x48xf32>
    %14 = tpu.matmul %13, %2, %cst_12 {dimension_numbers = #tpu.dot_dimension_numbers<[1], [0], [0], [1], [0, 0, 1, 1], [], []>} : vector<16x16xbf16>, vector<16x48xbf16>, vector<16x48xf32> -> vector<16x48xf32>
    %15 = arith.truncf %14 : vector<16x48xf32> to vector<16x48xbf16>
    %c1_13 = arith.constant 1 : index
    %c0_14 = arith.constant 0 : index
    %c0_15 = arith.constant 0 : index
    %16 = vector.load %arg4[%c1_13, %c0_14, %c0_15] : memref<49x48x128xbf16, #tpu.memory_space<vmem>>, vector<1x48x128xbf16>
    %17 = vector.shape_cast %16 : vector<1x48x128xbf16> to vector<48x128xbf16>
    %cst_16 = arith.constant dense<0.000000e+00> : vector<16x128xf32>
    %18 = tpu.matmul %15, %17, %cst_16 {dimension_numbers = #tpu.dot_dimension_numbers<[1], [0], [0], [1], [0, 0, 1, 1], [], []>} : vector<16x48xbf16>, vector<48x128xbf16>, vector<16x128xf32> -> vector<16x128xf32>
    %19 = arith.addf %11, %18 : vector<16x128xf32>
    %c2 = arith.constant 2 : index
    %c0_17 = arith.constant 0 : index
    %c0_18 = arith.constant 0 : index
    %20 = vector.load %arg3[%c2, %c0_17, %c0_18] : memref<49x16x16xbf16, #tpu.memory_space<vmem>>, vector<1x16x16xbf16>
    %21 = vector.shape_cast %20 : vector<1x16x16xbf16> to vector<16x16xbf16>
    %cst_19 = arith.constant dense<0.000000e+00> : vector<16x48xf32>
    %22 = tpu.matmul %21, %2, %cst_19 {dimension_numbers = #tpu.dot_dimension_numbers<[1], [0], [0], [1], [0, 0, 1, 1], [], []>} : vector<16x16xbf16>, vector<16x48xbf16>, vector<16x48xf32> -> vector<16x48xf32>
    %23 = arith.truncf %22 : vector<16x48xf32> to vector<16x48xbf16>
    %c2_20 = arith.constant 2 : index
    %c0_21 = arith.constant 0 : index
    %c0_22 = arith.constant 0 : index
    %24 = vector.load %arg4[%c2_20, %c0_21, %c0_22] : memref<49x48x128xbf16, #tpu.memory_space<vmem>>, vector<1x48x128xbf16>
    %25 = vector.shape_cast %24 : vector<1x48x128xbf16> to vector<48x128xbf16>
    %cst_23 = arith.constant dense<0.000000e+00> : vector<16x128xf32>
    %26 = tpu.matmul %23, %25, %cst_23 {dimension_numbers = #tpu.dot_dimension_numbers<[1], [0], [0], [1], [0, 0, 1, 1], [], []>} : vector<16x48xbf16>, vector<48x128xbf16>, vector<16x128xf32> -> vector<16x128xf32>
    %27 = arith.addf %19, %26 : vector<16x128xf32>
    %c3 = arith.constant 3 : index
    %c0_24 = arith.constant 0 : index
    %c0_25 = arith.constant 0 : index
    %28 = vector.load %arg3[%c3, %c0_24, %c0_25] : memref<49x16x16xbf16, #tpu.memory_space<vmem>>, vector<1x16x16xbf16>
    %29 = vector.shape_cast %28 : vector<1x16x16xbf16> to vector<16x16xbf16>
    %cst_26 = arith.constant dense<0.000000e+00> : vector<16x48xf32>
    %30 = tpu.matmul %29, %2, %cst_26 {dimension_numbers = #tpu.dot_dimension_numbers<[1], [0], [0], [1], [0, 0, 1, 1], [], []>} : vector<16x16xbf16>, vector<16x48xbf16>, vector<16x48xf32> -> vector<16x48xf32>
    %31 = arith.truncf %30 : vector<16x48xf32> to vector<16x48xbf16>
    %c3_27 = arith.constant 3 : index
    %c0_28 = arith.constant 0 : index
    %c0_29 = arith.constant 0 : index
    %32 = vector.load %arg4[%c3_27, %c0_28, %c0_29] : memref<49x48x128xbf16, #tpu.memory_space<vmem>>, vector<1x48x128xbf16>
    %33 = vector.shape_cast %32 : vector<1x48x128xbf16> to vector<48x128xbf16>
    %cst_30 = arith.constant dense<0.000000e+00> : vector<16x128xf32>
    %34 = tpu.matmul %31, %33, %cst_30 {dimension_numbers = #tpu.dot_dimension_numbers<[1], [0], [0], [1], [0, 0, 1, 1], [], []>} : vector<16x48xbf16>, vector<48x128xbf16>, vector<16x128xf32> -> vector<16x128xf32>
    %35 = arith.addf %27, %34 : vector<16x128xf32>
    %c4 = arith.constant 4 : index
    %c0_31 = arith.constant 0 : index
    %c0_32 = arith.constant 0 : index
    %36 = vector.load %arg3[%c4, %c0_31, %c0_32] : memref<49x16x16xbf16, #tpu.memory_space<vmem>>, vector<1x16x16xbf16>
    %37 = vector.shape_cast %36 : vector<1x16x16xbf16> to vector<16x16xbf16>
    %cst_33 = arith.constant dense<0.000000e+00> : vector<16x48xf32>
    %38 = tpu.matmul %37, %2, %cst_33 {dimension_numbers = #tpu.dot_dimension_numbers<[1], [0], [0], [1], [0, 0, 1, 1], [], []>} : vector<16x16xbf16>, vector<16x48xbf16>, vector<16x48xf32> -> vector<16x48xf32>
    %39 = arith.truncf %38 : vector<16x48xf32> to vector<16x48xbf16>
    %c4_34 = arith.constant 4 : index
    %c0_35 = arith.constant 0 : index
    %c0_36 = arith.constant 0 : index
    %40 = vector.load %arg4[%c4_34, %c0_35, %c0_36] : memref<49x48x128xbf16, #tpu.memory_space<vmem>>, vector<1x48x128xbf16>
    %41 = vector.shape_cast %40 : vector<1x48x128xbf16> to vector<48x128xbf16>
    %cst_37 = arith.constant dense<0.000000e+00> : vector<16x128xf32>
    %42 = tpu.matmul %39, %41, %cst_37 {dimension_numbers = #tpu.dot_dimension_numbers<[1], [0], [0], [1], [0, 0, 1, 1], [], []>} : vector<16x48xbf16>, vector<48x128xbf16>, vector<16x128xf32> -> vector<16x128xf32>
    %43 = arith.addf %35, %42 : vector<16x128xf32>
    %c5 = arith.constant 5 : index
    %c0_38 = arith.constant 0 : index
    %c0_39 = arith.constant 0 : index
    %44 = vector.load %arg3[%c5, %c0_38, %c0_39] : memref<49x16x16xbf16, #tpu.memory_space<vmem>>, vector<1x16x16xbf16>
    %45 = vector.shape_cast %44 : vector<1x16x16xbf16> to vector<16x16xbf16>
    %cst_40 = arith.constant dense<0.000000e+00> : vector<16x48xf32>
    %46 = tpu.matmul %45, %2, %cst_40 {dimension_numbers = #tpu.dot_dimension_numbers<[1], [0], [0], [1], [0, 0, 1, 1], [], []>} : vector<16x16xbf16>, vector<16x48xbf16>, vector<16x48xf32> -> vector<16x48xf32>
    %47 = arith.truncf %46 : vector<16x48xf32> to vector<16x48xbf16>
    %c5_41 = arith.constant 5 : index
    %c0_42 = arith.constant 0 : index
    %c0_43 = arith.constant 0 : index
    %48 = vector.load %arg4[%c5_41, %c0_42, %c0_43] : memref<49x48x128xbf16, #tpu.memory_space<vmem>>, vector<1x48x128xbf16>
    %49 = vector.shape_cast %48 : vector<1x48x128xbf16> to vector<48x128xbf16>
    %cst_44 = arith.constant dense<0.000000e+00> : vector<16x128xf32>
    %50 = tpu.matmul %47, %49, %cst_44 {dimension_numbers = #tpu.dot_dimension_numbers<[1], [0], [0], [1], [0, 0, 1, 1], [], []>} : vector<16x48xbf16>, vector<48x128xbf16>, vector<16x128xf32> -> vector<16x128xf32>
    %51 = arith.addf %43, %50 : vector<16x128xf32>
    %c6 = arith.constant 6 : index
    %c0_45 = arith.constant 0 : index
    %c0_46 = arith.constant 0 : index
    %52 = vector.load %arg3[%c6, %c0_45, %c0_46] : memref<49x16x16xbf16, #tpu.memory_space<vmem>>, vector<1x16x16xbf16>
    %53 = vector.shape_cast %52 : vector<1x16x16xbf16> to vector<16x16xbf16>
    %cst_47 = arith.constant dense<0.000000e+00> : vector<16x48xf32>
    %54 = tpu.matmul %53, %2, %cst_47 {dimension_numbers = #tpu.dot_dimension_numbers<[1], [0], [0], [1], [0, 0, 1, 1], [], []>} : vector<16x16xbf16>, vector<16x48xbf16>, vector<16x48xf32> -> vector<16x48xf32>
    %55 = arith.truncf %54 : vector<16x48xf32> to vector<16x48xbf16>
    %c6_48 = arith.constant 6 : index
    %c0_49 = arith.constant 0 : index
    %c0_50 = arith.constant 0 : index
    %56 = vector.load %arg4[%c6_48, %c0_49, %c0_50] : memref<49x48x128xbf16, #tpu.memory_space<vmem>>, vector<1x48x128xbf16>
    %57 = vector.shape_cast %56 : vector<1x48x128xbf16> to vector<48x128xbf16>
    %cst_51 = arith.constant dense<0.000000e+00> : vector<16x128xf32>
    %58 = tpu.matmul %55, %57, %cst_51 {dimension_numbers = #tpu.dot_dimension_numbers<[1], [0], [0], [1], [0, 0, 1, 1], [], []>} : vector<16x48xbf16>, vector<48x128xbf16>, vector<16x128xf32> -> vector<16x128xf32>
    %59 = arith.addf %51, %58 : vector<16x128xf32>
    %c7 = arith.constant 7 : index
    %c0_52 = arith.constant 0 : index
    %c0_53 = arith.constant 0 : index
    %60 = vector.load %arg3[%c7, %c0_52, %c0_53] : memref<49x16x16xbf16, #tpu.memory_space<vmem>>, vector<1x16x16xbf16>
    %61 = vector.shape_cast %60 : vector<1x16x16xbf16> to vector<16x16xbf16>
    %cst_54 = arith.constant dense<0.000000e+00> : vector<16x48xf32>
    %62 = tpu.matmul %61, %2, %cst_54 {dimension_numbers = #tpu.dot_dimension_numbers<[1], [0], [0], [1], [0, 0, 1, 1], [], []>} : vector<16x16xbf16>, vector<16x48xbf16>, vector<16x48xf32> -> vector<16x48xf32>
    %63 = arith.truncf %62 : vector<16x48xf32> to vector<16x48xbf16>
    %c7_55 = arith.constant 7 : index
    %c0_56 = arith.constant 0 : index
    %c0_57 = arith.constant 0 : index
    %64 = vector.load %arg4[%c7_55, %c0_56, %c0_57] : memref<49x48x128xbf16, #tpu.memory_space<vmem>>, vector<1x48x128xbf16>
    %65 = vector.shape_cast %64 : vector<1x48x128xbf16> to vector<48x128xbf16>
    %cst_58 = arith.constant dense<0.000000e+00> : vector<16x128xf32>
    %66 = tpu.matmul %63, %65, %cst_58 {dimension_numbers = #tpu.dot_dimension_numbers<[1], [0], [0], [1], [0, 0, 1, 1], [], []>} : vector<16x48xbf16>, vector<48x128xbf16>, vector<16x128xf32> -> vector<16x128xf32>
    %67 = arith.addf %59, %66 : vector<16x128xf32>
    %c8 = arith.constant 8 : index
    %c0_59 = arith.constant 0 : index
    %c0_60 = arith.constant 0 : index
    %68 = vector.load %arg3[%c8, %c0_59, %c0_60] : memref<49x16x16xbf16, #tpu.memory_space<vmem>>, vector<1x16x16xbf16>
    %69 = vector.shape_cast %68 : vector<1x16x16xbf16> to vector<16x16xbf16>
    %cst_61 = arith.constant dense<0.000000e+00> : vector<16x48xf32>
    %70 = tpu.matmul %69, %2, %cst_61 {dimension_numbers = #tpu.dot_dimension_numbers<[1], [0], [0], [1], [0, 0, 1, 1], [], []>} : vector<16x16xbf16>, vector<16x48xbf16>, vector<16x48xf32> -> vector<16x48xf32>
    %71 = arith.truncf %70 : vector<16x48xf32> to vector<16x48xbf16>
    %c8_62 = arith.constant 8 : index
    %c0_63 = arith.constant 0 : index
    %c0_64 = arith.constant 0 : index
    %72 = vector.load %arg4[%c8_62, %c0_63, %c0_64] : memref<49x48x128xbf16, #tpu.memory_space<vmem>>, vector<1x48x128xbf16>
    %73 = vector.shape_cast %72 : vector<1x48x128xbf16> to vector<48x128xbf16>
    %cst_65 = arith.constant dense<0.000000e+00> : vector<16x128xf32>
    %74 = tpu.matmul %71, %73, %cst_65 {dimension_numbers = #tpu.dot_dimension_numbers<[1], [0], [0], [1], [0, 0, 1, 1], [], []>} : vector<16x48xbf16>, vector<48x128xbf16>, vector<16x128xf32> -> vector<16x128xf32>
    %75 = arith.addf %67, %74 : vector<16x128xf32>
    %c9 = arith.constant 9 : index
    %c0_66 = arith.constant 0 : index
    %c0_67 = arith.constant 0 : index
    %76 = vector.load %arg3[%c9, %c0_66, %c0_67] : memref<49x16x16xbf16, #tpu.memory_space<vmem>>, vector<1x16x16xbf16>
    %77 = vector.shape_cast %76 : vector<1x16x16xbf16> to vector<16x16xbf16>
    %cst_68 = arith.constant dense<0.000000e+00> : vector<16x48xf32>
    %78 = tpu.matmul %77, %2, %cst_68 {dimension_numbers = #tpu.dot_dimension_numbers<[1], [0], [0], [1], [0, 0, 1, 1], [], []>} : vector<16x16xbf16>, vector<16x48xbf16>, vector<16x48xf32> -> vector<16x48xf32>
    %79 = arith.truncf %78 : vector<16x48xf32> to vector<16x48xbf16>
    %c9_69 = arith.constant 9 : index
    %c0_70 = arith.constant 0 : index
    %c0_71 = arith.constant 0 : index
    %80 = vector.load %arg4[%c9_69, %c0_70, %c0_71] : memref<49x48x128xbf16, #tpu.memory_space<vmem>>, vector<1x48x128xbf16>
    %81 = vector.shape_cast %80 : vector<1x48x128xbf16> to vector<48x128xbf16>
    %cst_72 = arith.constant dense<0.000000e+00> : vector<16x128xf32>
    %82 = tpu.matmul %79, %81, %cst_72 {dimension_numbers = #tpu.dot_dimension_numbers<[1], [0], [0], [1], [0, 0, 1, 1], [], []>} : vector<16x48xbf16>, vector<48x128xbf16>, vector<16x128xf32> -> vector<16x128xf32>
    %83 = arith.addf %75, %82 : vector<16x128xf32>
    %c10 = arith.constant 10 : index
    %c0_73 = arith.constant 0 : index
    %c0_74 = arith.constant 0 : index
    %84 = vector.load %arg3[%c10, %c0_73, %c0_74] : memref<49x16x16xbf16, #tpu.memory_space<vmem>>, vector<1x16x16xbf16>
    %85 = vector.shape_cast %84 : vector<1x16x16xbf16> to vector<16x16xbf16>
    %cst_75 = arith.constant dense<0.000000e+00> : vector<16x48xf32>
    %86 = tpu.matmul %85, %2, %cst_75 {dimension_numbers = #tpu.dot_dimension_numbers<[1], [0], [0], [1], [0, 0, 1, 1], [], []>} : vector<16x16xbf16>, vector<16x48xbf16>, vector<16x48xf32> -> vector<16x48xf32>
    %87 = arith.truncf %86 : vector<16x48xf32> to vector<16x48xbf16>
    %c10_76 = arith.constant 10 : index
    %c0_77 = arith.constant 0 : index
    %c0_78 = arith.constant 0 : index
    %88 = vector.load %arg4[%c10_76, %c0_77, %c0_78] : memref<49x48x128xbf16, #tpu.memory_space<vmem>>, vector<1x48x128xbf16>
    %89 = vector.shape_cast %88 : vector<1x48x128xbf16> to vector<48x128xbf16>
    %cst_79 = arith.constant dense<0.000000e+00> : vector<16x128xf32>
    %90 = tpu.matmul %87, %89, %cst_79 {dimension_numbers = #tpu.dot_dimension_numbers<[1], [0], [0], [1], [0, 0, 1, 1], [], []>} : vector<16x48xbf16>, vector<48x128xbf16>, vector<16x128xf32> -> vector<16x128xf32>
    %91 = arith.addf %83, %90 : vector<16x128xf32>
    %c11 = arith.constant 11 : index
    %c0_80 = arith.constant 0 : index
    %c0_81 = arith.constant 0 : index
    %92 = vector.load %arg3[%c11, %c0_80, %c0_81] : memref<49x16x16xbf16, #tpu.memory_space<vmem>>, vector<1x16x16xbf16>
    %93 = vector.shape_cast %92 : vector<1x16x16xbf16> to vector<16x16xbf16>
    %cst_82 = arith.constant dense<0.000000e+00> : vector<16x48xf32>
    %94 = tpu.matmul %93, %2, %cst_82 {dimension_numbers = #tpu.dot_dimension_numbers<[1], [0], [0], [1], [0, 0, 1, 1], [], []>} : vector<16x16xbf16>, vector<16x48xbf16>, vector<16x48xf32> -> vector<16x48xf32>
    %95 = arith.truncf %94 : vector<16x48xf32> to vector<16x48xbf16>
    %c11_83 = arith.constant 11 : index
    %c0_84 = arith.constant 0 : index
    %c0_85 = arith.constant 0 : index
    %96 = vector.load %arg4[%c11_83, %c0_84, %c0_85] : memref<49x48x128xbf16, #tpu.memory_space<vmem>>, vector<1x48x128xbf16>
    %97 = vector.shape_cast %96 : vector<1x48x128xbf16> to vector<48x128xbf16>
    %cst_86 = arith.constant dense<0.000000e+00> : vector<16x128xf32>
    %98 = tpu.matmul %95, %97, %cst_86 {dimension_numbers = #tpu.dot_dimension_numbers<[1], [0], [0], [1], [0, 0, 1, 1], [], []>} : vector<16x48xbf16>, vector<48x128xbf16>, vector<16x128xf32> -> vector<16x128xf32>
    %99 = arith.addf %91, %98 : vector<16x128xf32>
    %c12 = arith.constant 12 : index
    %c0_87 = arith.constant 0 : index
    %c0_88 = arith.constant 0 : index
    %100 = vector.load %arg3[%c12, %c0_87, %c0_88] : memref<49x16x16xbf16, #tpu.memory_space<vmem>>, vector<1x16x16xbf16>
    %101 = vector.shape_cast %100 : vector<1x16x16xbf16> to vector<16x16xbf16>
    %cst_89 = arith.constant dense<0.000000e+00> : vector<16x48xf32>
    %102 = tpu.matmul %101, %2, %cst_89 {dimension_numbers = #tpu.dot_dimension_numbers<[1], [0], [0], [1], [0, 0, 1, 1], [], []>} : vector<16x16xbf16>, vector<16x48xbf16>, vector<16x48xf32> -> vector<16x48xf32>
    %103 = arith.truncf %102 : vector<16x48xf32> to vector<16x48xbf16>
    %c12_90 = arith.constant 12 : index
    %c0_91 = arith.constant 0 : index
    %c0_92 = arith.constant 0 : index
    %104 = vector.load %arg4[%c12_90, %c0_91, %c0_92] : memref<49x48x128xbf16, #tpu.memory_space<vmem>>, vector<1x48x128xbf16>
    %105 = vector.shape_cast %104 : vector<1x48x128xbf16> to vector<48x128xbf16>
    %cst_93 = arith.constant dense<0.000000e+00> : vector<16x128xf32>
    %106 = tpu.matmul %103, %105, %cst_93 {dimension_numbers = #tpu.dot_dimension_numbers<[1], [0], [0], [1], [0, 0, 1, 1], [], []>} : vector<16x48xbf16>, vector<48x128xbf16>, vector<16x128xf32> -> vector<16x128xf32>
    %107 = arith.addf %99, %106 : vector<16x128xf32>
    %c13 = arith.constant 13 : index
    %c0_94 = arith.constant 0 : index
    %c0_95 = arith.constant 0 : index
    %108 = vector.load %arg3[%c13, %c0_94, %c0_95] : memref<49x16x16xbf16, #tpu.memory_space<vmem>>, vector<1x16x16xbf16>
    %109 = vector.shape_cast %108 : vector<1x16x16xbf16> to vector<16x16xbf16>
    %cst_96 = arith.constant dense<0.000000e+00> : vector<16x48xf32>
    %110 = tpu.matmul %109, %2, %cst_96 {dimension_numbers = #tpu.dot_dimension_numbers<[1], [0], [0], [1], [0, 0, 1, 1], [], []>} : vector<16x16xbf16>, vector<16x48xbf16>, vector<16x48xf32> -> vector<16x48xf32>
    %111 = arith.truncf %110 : vector<16x48xf32> to vector<16x48xbf16>
    %c13_97 = arith.constant 13 : index
    %c0_98 = arith.constant 0 : index
    %c0_99 = arith.constant 0 : index
    %112 = vector.load %arg4[%c13_97, %c0_98, %c0_99] : memref<49x48x128xbf16, #tpu.memory_space<vmem>>, vector<1x48x128xbf16>
    %113 = vector.shape_cast %112 : vector<1x48x128xbf16> to vector<48x128xbf16>
    %cst_100 = arith.constant dense<0.000000e+00> : vector<16x128xf32>
    %114 = tpu.matmul %111, %113, %cst_100 {dimension_numbers = #tpu.dot_dimension_numbers<[1], [0], [0], [1], [0, 0, 1, 1], [], []>} : vector<16x48xbf16>, vector<48x128xbf16>, vector<16x128xf32> -> vector<16x128xf32>
    %115 = arith.addf %107, %114 : vector<16x128xf32>
    %c14 = arith.constant 14 : index
    %c0_101 = arith.constant 0 : index
    %c0_102 = arith.constant 0 : index
    %116 = vector.load %arg3[%c14, %c0_101, %c0_102] : memref<49x16x16xbf16, #tpu.memory_space<vmem>>, vector<1x16x16xbf16>
    %117 = vector.shape_cast %116 : vector<1x16x16xbf16> to vector<16x16xbf16>
    %cst_103 = arith.constant dense<0.000000e+00> : vector<16x48xf32>
    %118 = tpu.matmul %117, %2, %cst_103 {dimension_numbers = #tpu.dot_dimension_numbers<[1], [0], [0], [1], [0, 0, 1, 1], [], []>} : vector<16x16xbf16>, vector<16x48xbf16>, vector<16x48xf32> -> vector<16x48xf32>
    %119 = arith.truncf %118 : vector<16x48xf32> to vector<16x48xbf16>
    %c14_104 = arith.constant 14 : index
    %c0_105 = arith.constant 0 : index
    %c0_106 = arith.constant 0 : index
    %120 = vector.load %arg4[%c14_104, %c0_105, %c0_106] : memref<49x48x128xbf16, #tpu.memory_space<vmem>>, vector<1x48x128xbf16>
    %121 = vector.shape_cast %120 : vector<1x48x128xbf16> to vector<48x128xbf16>
    %cst_107 = arith.constant dense<0.000000e+00> : vector<16x128xf32>
    %122 = tpu.matmul %119, %121, %cst_107 {dimension_numbers = #tpu.dot_dimension_numbers<[1], [0], [0], [1], [0, 0, 1, 1], [], []>} : vector<16x48xbf16>, vector<48x128xbf16>, vector<16x128xf32> -> vector<16x128xf32>
    %123 = arith.addf %115, %122 : vector<16x128xf32>
    %c15 = arith.constant 15 : index
    %c0_108 = arith.constant 0 : index
    %c0_109 = arith.constant 0 : index
    %124 = vector.load %arg3[%c15, %c0_108, %c0_109] : memref<49x16x16xbf16, #tpu.memory_space<vmem>>, vector<1x16x16xbf16>
    %125 = vector.shape_cast %124 : vector<1x16x16xbf16> to vector<16x16xbf16>
    %cst_110 = arith.constant dense<0.000000e+00> : vector<16x48xf32>
    %126 = tpu.matmul %125, %2, %cst_110 {dimension_numbers = #tpu.dot_dimension_numbers<[1], [0], [0], [1], [0, 0, 1, 1], [], []>} : vector<16x16xbf16>, vector<16x48xbf16>, vector<16x48xf32> -> vector<16x48xf32>
    %127 = arith.truncf %126 : vector<16x48xf32> to vector<16x48xbf16>
    %c15_111 = arith.constant 15 : index
    %c0_112 = arith.constant 0 : index
    %c0_113 = arith.constant 0 : index
    %128 = vector.load %arg4[%c15_111, %c0_112, %c0_113] : memref<49x48x128xbf16, #tpu.memory_space<vmem>>, vector<1x48x128xbf16>
    %129 = vector.shape_cast %128 : vector<1x48x128xbf16> to vector<48x128xbf16>
    %cst_114 = arith.constant dense<0.000000e+00> : vector<16x128xf32>
    %130 = tpu.matmul %127, %129, %cst_114 {dimension_numbers = #tpu.dot_dimension_numbers<[1], [0], [0], [1], [0, 0, 1, 1], [], []>} : vector<16x48xbf16>, vector<48x128xbf16>, vector<16x128xf32> -> vector<16x128xf32>
    %131 = arith.addf %123, %130 : vector<16x128xf32>
    %c16 = arith.constant 16 : index
    %c0_115 = arith.constant 0 : index
    %c0_116 = arith.constant 0 : index
    %132 = vector.load %arg3[%c16, %c0_115, %c0_116] : memref<49x16x16xbf16, #tpu.memory_space<vmem>>, vector<1x16x16xbf16>
    %133 = vector.shape_cast %132 : vector<1x16x16xbf16> to vector<16x16xbf16>
    %cst_117 = arith.constant dense<0.000000e+00> : vector<16x48xf32>
    %134 = tpu.matmul %133, %2, %cst_117 {dimension_numbers = #tpu.dot_dimension_numbers<[1], [0], [0], [1], [0, 0, 1, 1], [], []>} : vector<16x16xbf16>, vector<16x48xbf16>, vector<16x48xf32> -> vector<16x48xf32>
    %135 = arith.truncf %134 : vector<16x48xf32> to vector<16x48xbf16>
    %c16_118 = arith.constant 16 : index
    %c0_119 = arith.constant 0 : index
    %c0_120 = arith.constant 0 : index
    %136 = vector.load %arg4[%c16_118, %c0_119, %c0_120] : memref<49x48x128xbf16, #tpu.memory_space<vmem>>, vector<1x48x128xbf16>
    %137 = vector.shape_cast %136 : vector<1x48x128xbf16> to vector<48x128xbf16>
    %cst_121 = arith.constant dense<0.000000e+00> : vector<16x128xf32>
    %138 = tpu.matmul %135, %137, %cst_121 {dimension_numbers = #tpu.dot_dimension_numbers<[1], [0], [0], [1], [0, 0, 1, 1], [], []>} : vector<16x48xbf16>, vector<48x128xbf16>, vector<16x128xf32> -> vector<16x128xf32>
    %139 = arith.addf %131, %138 : vector<16x128xf32>
    %c17 = arith.constant 17 : index
    %c0_122 = arith.constant 0 : index
    %c0_123 = arith.constant 0 : index
    %140 = vector.load %arg3[%c17, %c0_122, %c0_123] : memref<49x16x16xbf16, #tpu.memory_space<vmem>>, vector<1x16x16xbf16>
    %141 = vector.shape_cast %140 : vector<1x16x16xbf16> to vector<16x16xbf16>
    %cst_124 = arith.constant dense<0.000000e+00> : vector<16x48xf32>
    %142 = tpu.matmul %141, %2, %cst_124 {dimension_numbers = #tpu.dot_dimension_numbers<[1], [0], [0], [1], [0, 0, 1, 1], [], []>} : vector<16x16xbf16>, vector<16x48xbf16>, vector<16x48xf32> -> vector<16x48xf32>
    %143 = arith.truncf %142 : vector<16x48xf32> to vector<16x48xbf16>
    %c17_125 = arith.constant 17 : index
    %c0_126 = arith.constant 0 : index
    %c0_127 = arith.constant 0 : index
    %144 = vector.load %arg4[%c17_125, %c0_126, %c0_127] : memref<49x48x128xbf16, #tpu.memory_space<vmem>>, vector<1x48x128xbf16>
    %145 = vector.shape_cast %144 : vector<1x48x128xbf16> to vector<48x128xbf16>
    %cst_128 = arith.constant dense<0.000000e+00> : vector<16x128xf32>
    %146 = tpu.matmul %143, %145, %cst_128 {dimension_numbers = #tpu.dot_dimension_numbers<[1], [0], [0], [1], [0, 0, 1, 1], [], []>} : vector<16x48xbf16>, vector<48x128xbf16>, vector<16x128xf32> -> vector<16x128xf32>
    %147 = arith.addf %139, %146 : vector<16x128xf32>
    %c18 = arith.constant 18 : index
    %c0_129 = arith.constant 0 : index
    %c0_130 = arith.constant 0 : index
    %148 = vector.load %arg3[%c18, %c0_129, %c0_130] : memref<49x16x16xbf16, #tpu.memory_space<vmem>>, vector<1x16x16xbf16>
    %149 = vector.shape_cast %148 : vector<1x16x16xbf16> to vector<16x16xbf16>
    %cst_131 = arith.constant dense<0.000000e+00> : vector<16x48xf32>
    %150 = tpu.matmul %149, %2, %cst_131 {dimension_numbers = #tpu.dot_dimension_numbers<[1], [0], [0], [1], [0, 0, 1, 1], [], []>} : vector<16x16xbf16>, vector<16x48xbf16>, vector<16x48xf32> -> vector<16x48xf32>
    %151 = arith.truncf %150 : vector<16x48xf32> to vector<16x48xbf16>
    %c18_132 = arith.constant 18 : index
    %c0_133 = arith.constant 0 : index
    %c0_134 = arith.constant 0 : index
    %152 = vector.load %arg4[%c18_132, %c0_133, %c0_134] : memref<49x48x128xbf16, #tpu.memory_space<vmem>>, vector<1x48x128xbf16>
    %153 = vector.shape_cast %152 : vector<1x48x128xbf16> to vector<48x128xbf16>
    %cst_135 = arith.constant dense<0.000000e+00> : vector<16x128xf32>
    %154 = tpu.matmul %151, %153, %cst_135 {dimension_numbers = #tpu.dot_dimension_numbers<[1], [0], [0], [1], [0, 0, 1, 1], [], []>} : vector<16x48xbf16>, vector<48x128xbf16>, vector<16x128xf32> -> vector<16x128xf32>
    %155 = arith.addf %147, %154 : vector<16x128xf32>
    %c19 = arith.constant 19 : index
    %c0_136 = arith.constant 0 : index
    %c0_137 = arith.constant 0 : index
    %156 = vector.load %arg3[%c19, %c0_136, %c0_137] : memref<49x16x16xbf16, #tpu.memory_space<vmem>>, vector<1x16x16xbf16>
    %157 = vector.shape_cast %156 : vector<1x16x16xbf16> to vector<16x16xbf16>
    %cst_138 = arith.constant dense<0.000000e+00> : vector<16x48xf32>
    %158 = tpu.matmul %157, %2, %cst_138 {dimension_numbers = #tpu.dot_dimension_numbers<[1], [0], [0], [1], [0, 0, 1, 1], [], []>} : vector<16x16xbf16>, vector<16x48xbf16>, vector<16x48xf32> -> vector<16x48xf32>
    %159 = arith.truncf %158 : vector<16x48xf32> to vector<16x48xbf16>
    %c19_139 = arith.constant 19 : index
    %c0_140 = arith.constant 0 : index
    %c0_141 = arith.constant 0 : index
    %160 = vector.load %arg4[%c19_139, %c0_140, %c0_141] : memref<49x48x128xbf16, #tpu.memory_space<vmem>>, vector<1x48x128xbf16>
    %161 = vector.shape_cast %160 : vector<1x48x128xbf16> to vector<48x128xbf16>
    %cst_142 = arith.constant dense<0.000000e+00> : vector<16x128xf32>
    %162 = tpu.matmul %159, %161, %cst_142 {dimension_numbers = #tpu.dot_dimension_numbers<[1], [0], [0], [1], [0, 0, 1, 1], [], []>} : vector<16x48xbf16>, vector<48x128xbf16>, vector<16x128xf32> -> vector<16x128xf32>
    %163 = arith.addf %155, %162 : vector<16x128xf32>
    %c20 = arith.constant 20 : index
    %c0_143 = arith.constant 0 : index
    %c0_144 = arith.constant 0 : index
    %164 = vector.load %arg3[%c20, %c0_143, %c0_144] : memref<49x16x16xbf16, #tpu.memory_space<vmem>>, vector<1x16x16xbf16>
    %165 = vector.shape_cast %164 : vector<1x16x16xbf16> to vector<16x16xbf16>
    %cst_145 = arith.constant dense<0.000000e+00> : vector<16x48xf32>
    %166 = tpu.matmul %165, %2, %cst_145 {dimension_numbers = #tpu.dot_dimension_numbers<[1], [0], [0], [1], [0, 0, 1, 1], [], []>} : vector<16x16xbf16>, vector<16x48xbf16>, vector<16x48xf32> -> vector<16x48xf32>
    %167 = arith.truncf %166 : vector<16x48xf32> to vector<16x48xbf16>
    %c20_146 = arith.constant 20 : index
    %c0_147 = arith.constant 0 : index
    %c0_148 = arith.constant 0 : index
    %168 = vector.load %arg4[%c20_146, %c0_147, %c0_148] : memref<49x48x128xbf16, #tpu.memory_space<vmem>>, vector<1x48x128xbf16>
    %169 = vector.shape_cast %168 : vector<1x48x128xbf16> to vector<48x128xbf16>
    %cst_149 = arith.constant dense<0.000000e+00> : vector<16x128xf32>
    %170 = tpu.matmul %167, %169, %cst_149 {dimension_numbers = #tpu.dot_dimension_numbers<[1], [0], [0], [1], [0, 0, 1, 1], [], []>} : vector<16x48xbf16>, vector<48x128xbf16>, vector<16x128xf32> -> vector<16x128xf32>
    %171 = arith.addf %163, %170 : vector<16x128xf32>
    %c21 = arith.constant 21 : index
    %c0_150 = arith.constant 0 : index
    %c0_151 = arith.constant 0 : index
    %172 = vector.load %arg3[%c21, %c0_150, %c0_151] : memref<49x16x16xbf16, #tpu.memory_space<vmem>>, vector<1x16x16xbf16>
    %173 = vector.shape_cast %172 : vector<1x16x16xbf16> to vector<16x16xbf16>
    %cst_152 = arith.constant dense<0.000000e+00> : vector<16x48xf32>
    %174 = tpu.matmul %173, %2, %cst_152 {dimension_numbers = #tpu.dot_dimension_numbers<[1], [0], [0], [1], [0, 0, 1, 1], [], []>} : vector<16x16xbf16>, vector<16x48xbf16>, vector<16x48xf32> -> vector<16x48xf32>
    %175 = arith.truncf %174 : vector<16x48xf32> to vector<16x48xbf16>
    %c21_153 = arith.constant 21 : index
    %c0_154 = arith.constant 0 : index
    %c0_155 = arith.constant 0 : index
    %176 = vector.load %arg4[%c21_153, %c0_154, %c0_155] : memref<49x48x128xbf16, #tpu.memory_space<vmem>>, vector<1x48x128xbf16>
    %177 = vector.shape_cast %176 : vector<1x48x128xbf16> to vector<48x128xbf16>
    %cst_156 = arith.constant dense<0.000000e+00> : vector<16x128xf32>
    %178 = tpu.matmul %175, %177, %cst_156 {dimension_numbers = #tpu.dot_dimension_numbers<[1], [0], [0], [1], [0, 0, 1, 1], [], []>} : vector<16x48xbf16>, vector<48x128xbf16>, vector<16x128xf32> -> vector<16x128xf32>
    %179 = arith.addf %171, %178 : vector<16x128xf32>
    %c22 = arith.constant 22 : index
    %c0_157 = arith.constant 0 : index
    %c0_158 = arith.constant 0 : index
    %180 = vector.load %arg3[%c22, %c0_157, %c0_158] : memref<49x16x16xbf16, #tpu.memory_space<vmem>>, vector<1x16x16xbf16>
    %181 = vector.shape_cast %180 : vector<1x16x16xbf16> to vector<16x16xbf16>
    %cst_159 = arith.constant dense<0.000000e+00> : vector<16x48xf32>
    %182 = tpu.matmul %181, %2, %cst_159 {dimension_numbers = #tpu.dot_dimension_numbers<[1], [0], [0], [1], [0, 0, 1, 1], [], []>} : vector<16x16xbf16>, vector<16x48xbf16>, vector<16x48xf32> -> vector<16x48xf32>
    %183 = arith.truncf %182 : vector<16x48xf32> to vector<16x48xbf16>
    %c22_160 = arith.constant 22 : index
    %c0_161 = arith.constant 0 : index
    %c0_162 = arith.constant 0 : index
    %184 = vector.load %arg4[%c22_160, %c0_161, %c0_162] : memref<49x48x128xbf16, #tpu.memory_space<vmem>>, vector<1x48x128xbf16>
    %185 = vector.shape_cast %184 : vector<1x48x128xbf16> to vector<48x128xbf16>
    %cst_163 = arith.constant dense<0.000000e+00> : vector<16x128xf32>
    %186 = tpu.matmul %183, %185, %cst_163 {dimension_numbers = #tpu.dot_dimension_numbers<[1], [0], [0], [1], [0, 0, 1, 1], [], []>} : vector<16x48xbf16>, vector<48x128xbf16>, vector<16x128xf32> -> vector<16x128xf32>
    %187 = arith.addf %179, %186 : vector<16x128xf32>
    %c23 = arith.constant 23 : index
    %c0_164 = arith.constant 0 : index
    %c0_165 = arith.constant 0 : index
    %188 = vector.load %arg3[%c23, %c0_164, %c0_165] : memref<49x16x16xbf16, #tpu.memory_space<vmem>>, vector<1x16x16xbf16>
    %189 = vector.shape_cast %188 : vector<1x16x16xbf16> to vector<16x16xbf16>
    %cst_166 = arith.constant dense<0.000000e+00> : vector<16x48xf32>
    %190 = tpu.matmul %189, %2, %cst_166 {dimension_numbers = #tpu.dot_dimension_numbers<[1], [0], [0], [1], [0, 0, 1, 1], [], []>} : vector<16x16xbf16>, vector<16x48xbf16>, vector<16x48xf32> -> vector<16x48xf32>
    %191 = arith.truncf %190 : vector<16x48xf32> to vector<16x48xbf16>
    %c23_167 = arith.constant 23 : index
    %c0_168 = arith.constant 0 : index
    %c0_169 = arith.constant 0 : index
    %192 = vector.load %arg4[%c23_167, %c0_168, %c0_169] : memref<49x48x128xbf16, #tpu.memory_space<vmem>>, vector<1x48x128xbf16>
    %193 = vector.shape_cast %192 : vector<1x48x128xbf16> to vector<48x128xbf16>
    %cst_170 = arith.constant dense<0.000000e+00> : vector<16x128xf32>
    %194 = tpu.matmul %191, %193, %cst_170 {dimension_numbers = #tpu.dot_dimension_numbers<[1], [0], [0], [1], [0, 0, 1, 1], [], []>} : vector<16x48xbf16>, vector<48x128xbf16>, vector<16x128xf32> -> vector<16x128xf32>
    %195 = arith.addf %187, %194 : vector<16x128xf32>
    %c24 = arith.constant 24 : index
    %c0_171 = arith.constant 0 : index
    %c0_172 = arith.constant 0 : index
    %196 = vector.load %arg3[%c24, %c0_171, %c0_172] : memref<49x16x16xbf16, #tpu.memory_space<vmem>>, vector<1x16x16xbf16>
    %197 = vector.shape_cast %196 : vector<1x16x16xbf16> to vector<16x16xbf16>
    %cst_173 = arith.constant dense<0.000000e+00> : vector<16x48xf32>
    %198 = tpu.matmul %197, %2, %cst_173 {dimension_numbers = #tpu.dot_dimension_numbers<[1], [0], [0], [1], [0, 0, 1, 1], [], []>} : vector<16x16xbf16>, vector<16x48xbf16>, vector<16x48xf32> -> vector<16x48xf32>
    %199 = arith.truncf %198 : vector<16x48xf32> to vector<16x48xbf16>
    %c24_174 = arith.constant 24 : index
    %c0_175 = arith.constant 0 : index
    %c0_176 = arith.constant 0 : index
    %200 = vector.load %arg4[%c24_174, %c0_175, %c0_176] : memref<49x48x128xbf16, #tpu.memory_space<vmem>>, vector<1x48x128xbf16>
    %201 = vector.shape_cast %200 : vector<1x48x128xbf16> to vector<48x128xbf16>
    %cst_177 = arith.constant dense<0.000000e+00> : vector<16x128xf32>
    %202 = tpu.matmul %199, %201, %cst_177 {dimension_numbers = #tpu.dot_dimension_numbers<[1], [0], [0], [1], [0, 0, 1, 1], [], []>} : vector<16x48xbf16>, vector<48x128xbf16>, vector<16x128xf32> -> vector<16x128xf32>
    %203 = arith.addf %195, %202 : vector<16x128xf32>
    %c25 = arith.constant 25 : index
    %c0_178 = arith.constant 0 : index
    %c0_179 = arith.constant 0 : index
    %204 = vector.load %arg3[%c25, %c0_178, %c0_179] : memref<49x16x16xbf16, #tpu.memory_space<vmem>>, vector<1x16x16xbf16>
    %205 = vector.shape_cast %204 : vector<1x16x16xbf16> to vector<16x16xbf16>
    %cst_180 = arith.constant dense<0.000000e+00> : vector<16x48xf32>
    %206 = tpu.matmul %205, %2, %cst_180 {dimension_numbers = #tpu.dot_dimension_numbers<[1], [0], [0], [1], [0, 0, 1, 1], [], []>} : vector<16x16xbf16>, vector<16x48xbf16>, vector<16x48xf32> -> vector<16x48xf32>
    %207 = arith.truncf %206 : vector<16x48xf32> to vector<16x48xbf16>
    %c25_181 = arith.constant 25 : index
    %c0_182 = arith.constant 0 : index
    %c0_183 = arith.constant 0 : index
    %208 = vector.load %arg4[%c25_181, %c0_182, %c0_183] : memref<49x48x128xbf16, #tpu.memory_space<vmem>>, vector<1x48x128xbf16>
    %209 = vector.shape_cast %208 : vector<1x48x128xbf16> to vector<48x128xbf16>
    %cst_184 = arith.constant dense<0.000000e+00> : vector<16x128xf32>
    %210 = tpu.matmul %207, %209, %cst_184 {dimension_numbers = #tpu.dot_dimension_numbers<[1], [0], [0], [1], [0, 0, 1, 1], [], []>} : vector<16x48xbf16>, vector<48x128xbf16>, vector<16x128xf32> -> vector<16x128xf32>
    %211 = arith.addf %203, %210 : vector<16x128xf32>
    %c26 = arith.constant 26 : index
    %c0_185 = arith.constant 0 : index
    %c0_186 = arith.constant 0 : index
    %212 = vector.load %arg3[%c26, %c0_185, %c0_186] : memref<49x16x16xbf16, #tpu.memory_space<vmem>>, vector<1x16x16xbf16>
    %213 = vector.shape_cast %212 : vector<1x16x16xbf16> to vector<16x16xbf16>
    %cst_187 = arith.constant dense<0.000000e+00> : vector<16x48xf32>
    %214 = tpu.matmul %213, %2, %cst_187 {dimension_numbers = #tpu.dot_dimension_numbers<[1], [0], [0], [1], [0, 0, 1, 1], [], []>} : vector<16x16xbf16>, vector<16x48xbf16>, vector<16x48xf32> -> vector<16x48xf32>
    %215 = arith.truncf %214 : vector<16x48xf32> to vector<16x48xbf16>
    %c26_188 = arith.constant 26 : index
    %c0_189 = arith.constant 0 : index
    %c0_190 = arith.constant 0 : index
    %216 = vector.load %arg4[%c26_188, %c0_189, %c0_190] : memref<49x48x128xbf16, #tpu.memory_space<vmem>>, vector<1x48x128xbf16>
    %217 = vector.shape_cast %216 : vector<1x48x128xbf16> to vector<48x128xbf16>
    %cst_191 = arith.constant dense<0.000000e+00> : vector<16x128xf32>
    %218 = tpu.matmul %215, %217, %cst_191 {dimension_numbers = #tpu.dot_dimension_numbers<[1], [0], [0], [1], [0, 0, 1, 1], [], []>} : vector<16x48xbf16>, vector<48x128xbf16>, vector<16x128xf32> -> vector<16x128xf32>
    %219 = arith.addf %211, %218 : vector<16x128xf32>
    %c27 = arith.constant 27 : index
    %c0_192 = arith.constant 0 : index
    %c0_193 = arith.constant 0 : index
    %220 = vector.load %arg3[%c27, %c0_192, %c0_193] : memref<49x16x16xbf16, #tpu.memory_space<vmem>>, vector<1x16x16xbf16>
    %221 = vector.shape_cast %220 : vector<1x16x16xbf16> to vector<16x16xbf16>
    %cst_194 = arith.constant dense<0.000000e+00> : vector<16x48xf32>
    %222 = tpu.matmul %221, %2, %cst_194 {dimension_numbers = #tpu.dot_dimension_numbers<[1], [0], [0], [1], [0, 0, 1, 1], [], []>} : vector<16x16xbf16>, vector<16x48xbf16>, vector<16x48xf32> -> vector<16x48xf32>
    %223 = arith.truncf %222 : vector<16x48xf32> to vector<16x48xbf16>
    %c27_195 = arith.constant 27 : index
    %c0_196 = arith.constant 0 : index
    %c0_197 = arith.constant 0 : index
    %224 = vector.load %arg4[%c27_195, %c0_196, %c0_197] : memref<49x48x128xbf16, #tpu.memory_space<vmem>>, vector<1x48x128xbf16>
    %225 = vector.shape_cast %224 : vector<1x48x128xbf16> to vector<48x128xbf16>
    %cst_198 = arith.constant dense<0.000000e+00> : vector<16x128xf32>
    %226 = tpu.matmul %223, %225, %cst_198 {dimension_numbers = #tpu.dot_dimension_numbers<[1], [0], [0], [1], [0, 0, 1, 1], [], []>} : vector<16x48xbf16>, vector<48x128xbf16>, vector<16x128xf32> -> vector<16x128xf32>
    %227 = arith.addf %219, %226 : vector<16x128xf32>
    %c28 = arith.constant 28 : index
    %c0_199 = arith.constant 0 : index
    %c0_200 = arith.constant 0 : index
    %228 = vector.load %arg3[%c28, %c0_199, %c0_200] : memref<49x16x16xbf16, #tpu.memory_space<vmem>>, vector<1x16x16xbf16>
    %229 = vector.shape_cast %228 : vector<1x16x16xbf16> to vector<16x16xbf16>
    %cst_201 = arith.constant dense<0.000000e+00> : vector<16x48xf32>
    %230 = tpu.matmul %229, %2, %cst_201 {dimension_numbers = #tpu.dot_dimension_numbers<[1], [0], [0], [1], [0, 0, 1, 1], [], []>} : vector<16x16xbf16>, vector<16x48xbf16>, vector<16x48xf32> -> vector<16x48xf32>
    %231 = arith.truncf %230 : vector<16x48xf32> to vector<16x48xbf16>
    %c28_202 = arith.constant 28 : index
    %c0_203 = arith.constant 0 : index
    %c0_204 = arith.constant 0 : index
    %232 = vector.load %arg4[%c28_202, %c0_203, %c0_204] : memref<49x48x128xbf16, #tpu.memory_space<vmem>>, vector<1x48x128xbf16>
    %233 = vector.shape_cast %232 : vector<1x48x128xbf16> to vector<48x128xbf16>
    %cst_205 = arith.constant dense<0.000000e+00> : vector<16x128xf32>
    %234 = tpu.matmul %231, %233, %cst_205 {dimension_numbers = #tpu.dot_dimension_numbers<[1], [0], [0], [1], [0, 0, 1, 1], [], []>} : vector<16x48xbf16>, vector<48x128xbf16>, vector<16x128xf32> -> vector<16x128xf32>
    %235 = arith.addf %227, %234 : vector<16x128xf32>
    %c29 = arith.constant 29 : index
    %c0_206 = arith.constant 0 : index
    %c0_207 = arith.constant 0 : index
    %236 = vector.load %arg3[%c29, %c0_206, %c0_207] : memref<49x16x16xbf16, #tpu.memory_space<vmem>>, vector<1x16x16xbf16>
    %237 = vector.shape_cast %236 : vector<1x16x16xbf16> to vector<16x16xbf16>
    %cst_208 = arith.constant dense<0.000000e+00> : vector<16x48xf32>
    %238 = tpu.matmul %237, %2, %cst_208 {dimension_numbers = #tpu.dot_dimension_numbers<[1], [0], [0], [1], [0, 0, 1, 1], [], []>} : vector<16x16xbf16>, vector<16x48xbf16>, vector<16x48xf32> -> vector<16x48xf32>
    %239 = arith.truncf %238 : vector<16x48xf32> to vector<16x48xbf16>
    %c29_209 = arith.constant 29 : index
    %c0_210 = arith.constant 0 : index
    %c0_211 = arith.constant 0 : index
    %240 = vector.load %arg4[%c29_209, %c0_210, %c0_211] : memref<49x48x128xbf16, #tpu.memory_space<vmem>>, vector<1x48x128xbf16>
    %241 = vector.shape_cast %240 : vector<1x48x128xbf16> to vector<48x128xbf16>
    %cst_212 = arith.constant dense<0.000000e+00> : vector<16x128xf32>
    %242 = tpu.matmul %239, %241, %cst_212 {dimension_numbers = #tpu.dot_dimension_numbers<[1], [0], [0], [1], [0, 0, 1, 1], [], []>} : vector<16x48xbf16>, vector<48x128xbf16>, vector<16x128xf32> -> vector<16x128xf32>
    %243 = arith.addf %235, %242 : vector<16x128xf32>
    %c30 = arith.constant 30 : index
    %c0_213 = arith.constant 0 : index
    %c0_214 = arith.constant 0 : index
    %244 = vector.load %arg3[%c30, %c0_213, %c0_214] : memref<49x16x16xbf16, #tpu.memory_space<vmem>>, vector<1x16x16xbf16>
    %245 = vector.shape_cast %244 : vector<1x16x16xbf16> to vector<16x16xbf16>
    %cst_215 = arith.constant dense<0.000000e+00> : vector<16x48xf32>
    %246 = tpu.matmul %245, %2, %cst_215 {dimension_numbers = #tpu.dot_dimension_numbers<[1], [0], [0], [1], [0, 0, 1, 1], [], []>} : vector<16x16xbf16>, vector<16x48xbf16>, vector<16x48xf32> -> vector<16x48xf32>
    %247 = arith.truncf %246 : vector<16x48xf32> to vector<16x48xbf16>
    %c30_216 = arith.constant 30 : index
    %c0_217 = arith.constant 0 : index
    %c0_218 = arith.constant 0 : index
    %248 = vector.load %arg4[%c30_216, %c0_217, %c0_218] : memref<49x48x128xbf16, #tpu.memory_space<vmem>>, vector<1x48x128xbf16>
    %249 = vector.shape_cast %248 : vector<1x48x128xbf16> to vector<48x128xbf16>
    %cst_219 = arith.constant dense<0.000000e+00> : vector<16x128xf32>
    %250 = tpu.matmul %247, %249, %cst_219 {dimension_numbers = #tpu.dot_dimension_numbers<[1], [0], [0], [1], [0, 0, 1, 1], [], []>} : vector<16x48xbf16>, vector<48x128xbf16>, vector<16x128xf32> -> vector<16x128xf32>
    %251 = arith.addf %243, %250 : vector<16x128xf32>
    %c31 = arith.constant 31 : index
    %c0_220 = arith.constant 0 : index
    %c0_221 = arith.constant 0 : index
    %252 = vector.load %arg3[%c31, %c0_220, %c0_221] : memref<49x16x16xbf16, #tpu.memory_space<vmem>>, vector<1x16x16xbf16>
    %253 = vector.shape_cast %252 : vector<1x16x16xbf16> to vector<16x16xbf16>
    %cst_222 = arith.constant dense<0.000000e+00> : vector<16x48xf32>
    %254 = tpu.matmul %253, %2, %cst_222 {dimension_numbers = #tpu.dot_dimension_numbers<[1], [0], [0], [1], [0, 0, 1, 1], [], []>} : vector<16x16xbf16>, vector<16x48xbf16>, vector<16x48xf32> -> vector<16x48xf32>
    %255 = arith.truncf %254 : vector<16x48xf32> to vector<16x48xbf16>
    %c31_223 = arith.constant 31 : index
    %c0_224 = arith.constant 0 : index
    %c0_225 = arith.constant 0 : index
    %256 = vector.load %arg4[%c31_223, %c0_224, %c0_225] : memref<49x48x128xbf16, #tpu.memory_space<vmem>>, vector<1x48x128xbf16>
    %257 = vector.shape_cast %256 : vector<1x48x128xbf16> to vector<48x128xbf16>
    %cst_226 = arith.constant dense<0.000000e+00> : vector<16x128xf32>
    %258 = tpu.matmul %255, %257, %cst_226 {dimension_numbers = #tpu.dot_dimension_numbers<[1], [0], [0], [1], [0, 0, 1, 1], [], []>} : vector<16x48xbf16>, vector<48x128xbf16>, vector<16x128xf32> -> vector<16x128xf32>
    %259 = arith.addf %251, %258 : vector<16x128xf32>
    %c32 = arith.constant 32 : index
    %c0_227 = arith.constant 0 : index
    %c0_228 = arith.constant 0 : index
    %260 = vector.load %arg3[%c32, %c0_227, %c0_228] : memref<49x16x16xbf16, #tpu.memory_space<vmem>>, vector<1x16x16xbf16>
    %261 = vector.shape_cast %260 : vector<1x16x16xbf16> to vector<16x16xbf16>
    %cst_229 = arith.constant dense<0.000000e+00> : vector<16x48xf32>
    %262 = tpu.matmul %261, %2, %cst_229 {dimension_numbers = #tpu.dot_dimension_numbers<[1], [0], [0], [1], [0, 0, 1, 1], [], []>} : vector<16x16xbf16>, vector<16x48xbf16>, vector<16x48xf32> -> vector<16x48xf32>
    %263 = arith.truncf %262 : vector<16x48xf32> to vector<16x48xbf16>
    %c32_230 = arith.constant 32 : index
    %c0_231 = arith.constant 0 : index
    %c0_232 = arith.constant 0 : index
    %264 = vector.load %arg4[%c32_230, %c0_231, %c0_232] : memref<49x48x128xbf16, #tpu.memory_space<vmem>>, vector<1x48x128xbf16>
    %265 = vector.shape_cast %264 : vector<1x48x128xbf16> to vector<48x128xbf16>
    %cst_233 = arith.constant dense<0.000000e+00> : vector<16x128xf32>
    %266 = tpu.matmul %263, %265, %cst_233 {dimension_numbers = #tpu.dot_dimension_numbers<[1], [0], [0], [1], [0, 0, 1, 1], [], []>} : vector<16x48xbf16>, vector<48x128xbf16>, vector<16x128xf32> -> vector<16x128xf32>
    %267 = arith.addf %259, %266 : vector<16x128xf32>
    %c33 = arith.constant 33 : index
    %c0_234 = arith.constant 0 : index
    %c0_235 = arith.constant 0 : index
    %268 = vector.load %arg3[%c33, %c0_234, %c0_235] : memref<49x16x16xbf16, #tpu.memory_space<vmem>>, vector<1x16x16xbf16>
    %269 = vector.shape_cast %268 : vector<1x16x16xbf16> to vector<16x16xbf16>
    %cst_236 = arith.constant dense<0.000000e+00> : vector<16x48xf32>
    %270 = tpu.matmul %269, %2, %cst_236 {dimension_numbers = #tpu.dot_dimension_numbers<[1], [0], [0], [1], [0, 0, 1, 1], [], []>} : vector<16x16xbf16>, vector<16x48xbf16>, vector<16x48xf32> -> vector<16x48xf32>
    %271 = arith.truncf %270 : vector<16x48xf32> to vector<16x48xbf16>
    %c33_237 = arith.constant 33 : index
    %c0_238 = arith.constant 0 : index
    %c0_239 = arith.constant 0 : index
    %272 = vector.load %arg4[%c33_237, %c0_238, %c0_239] : memref<49x48x128xbf16, #tpu.memory_space<vmem>>, vector<1x48x128xbf16>
    %273 = vector.shape_cast %272 : vector<1x48x128xbf16> to vector<48x128xbf16>
    %cst_240 = arith.constant dense<0.000000e+00> : vector<16x128xf32>
    %274 = tpu.matmul %271, %273, %cst_240 {dimension_numbers = #tpu.dot_dimension_numbers<[1], [0], [0], [1], [0, 0, 1, 1], [], []>} : vector<16x48xbf16>, vector<48x128xbf16>, vector<16x128xf32> -> vector<16x128xf32>
    %275 = arith.addf %267, %274 : vector<16x128xf32>
    %c34 = arith.constant 34 : index
    %c0_241 = arith.constant 0 : index
    %c0_242 = arith.constant 0 : index
    %276 = vector.load %arg3[%c34, %c0_241, %c0_242] : memref<49x16x16xbf16, #tpu.memory_space<vmem>>, vector<1x16x16xbf16>
    %277 = vector.shape_cast %276 : vector<1x16x16xbf16> to vector<16x16xbf16>
    %cst_243 = arith.constant dense<0.000000e+00> : vector<16x48xf32>
    %278 = tpu.matmul %277, %2, %cst_243 {dimension_numbers = #tpu.dot_dimension_numbers<[1], [0], [0], [1], [0, 0, 1, 1], [], []>} : vector<16x16xbf16>, vector<16x48xbf16>, vector<16x48xf32> -> vector<16x48xf32>
    %279 = arith.truncf %278 : vector<16x48xf32> to vector<16x48xbf16>
    %c34_244 = arith.constant 34 : index
    %c0_245 = arith.constant 0 : index
    %c0_246 = arith.constant 0 : index
    %280 = vector.load %arg4[%c34_244, %c0_245, %c0_246] : memref<49x48x128xbf16, #tpu.memory_space<vmem>>, vector<1x48x128xbf16>
    %281 = vector.shape_cast %280 : vector<1x48x128xbf16> to vector<48x128xbf16>
    %cst_247 = arith.constant dense<0.000000e+00> : vector<16x128xf32>
    %282 = tpu.matmul %279, %281, %cst_247 {dimension_numbers = #tpu.dot_dimension_numbers<[1], [0], [0], [1], [0, 0, 1, 1], [], []>} : vector<16x48xbf16>, vector<48x128xbf16>, vector<16x128xf32> -> vector<16x128xf32>
    %283 = arith.addf %275, %282 : vector<16x128xf32>
    %c35 = arith.constant 35 : index
    %c0_248 = arith.constant 0 : index
    %c0_249 = arith.constant 0 : index
    %284 = vector.load %arg3[%c35, %c0_248, %c0_249] : memref<49x16x16xbf16, #tpu.memory_space<vmem>>, vector<1x16x16xbf16>
    %285 = vector.shape_cast %284 : vector<1x16x16xbf16> to vector<16x16xbf16>
    %cst_250 = arith.constant dense<0.000000e+00> : vector<16x48xf32>
    %286 = tpu.matmul %285, %2, %cst_250 {dimension_numbers = #tpu.dot_dimension_numbers<[1], [0], [0], [1], [0, 0, 1, 1], [], []>} : vector<16x16xbf16>, vector<16x48xbf16>, vector<16x48xf32> -> vector<16x48xf32>
    %287 = arith.truncf %286 : vector<16x48xf32> to vector<16x48xbf16>
    %c35_251 = arith.constant 35 : index
    %c0_252 = arith.constant 0 : index
    %c0_253 = arith.constant 0 : index
    %288 = vector.load %arg4[%c35_251, %c0_252, %c0_253] : memref<49x48x128xbf16, #tpu.memory_space<vmem>>, vector<1x48x128xbf16>
    %289 = vector.shape_cast %288 : vector<1x48x128xbf16> to vector<48x128xbf16>
    %cst_254 = arith.constant dense<0.000000e+00> : vector<16x128xf32>
    %290 = tpu.matmul %287, %289, %cst_254 {dimension_numbers = #tpu.dot_dimension_numbers<[1], [0], [0], [1], [0, 0, 1, 1], [], []>} : vector<16x48xbf16>, vector<48x128xbf16>, vector<16x128xf32> -> vector<16x128xf32>
    %291 = arith.addf %283, %290 : vector<16x128xf32>
    %c36 = arith.constant 36 : index
    %c0_255 = arith.constant 0 : index
    %c0_256 = arith.constant 0 : index
    %292 = vector.load %arg3[%c36, %c0_255, %c0_256] : memref<49x16x16xbf16, #tpu.memory_space<vmem>>, vector<1x16x16xbf16>
    %293 = vector.shape_cast %292 : vector<1x16x16xbf16> to vector<16x16xbf16>
    %cst_257 = arith.constant dense<0.000000e+00> : vector<16x48xf32>
    %294 = tpu.matmul %293, %2, %cst_257 {dimension_numbers = #tpu.dot_dimension_numbers<[1], [0], [0], [1], [0, 0, 1, 1], [], []>} : vector<16x16xbf16>, vector<16x48xbf16>, vector<16x48xf32> -> vector<16x48xf32>
    %295 = arith.truncf %294 : vector<16x48xf32> to vector<16x48xbf16>
    %c36_258 = arith.constant 36 : index
    %c0_259 = arith.constant 0 : index
    %c0_260 = arith.constant 0 : index
    %296 = vector.load %arg4[%c36_258, %c0_259, %c0_260] : memref<49x48x128xbf16, #tpu.memory_space<vmem>>, vector<1x48x128xbf16>
    %297 = vector.shape_cast %296 : vector<1x48x128xbf16> to vector<48x128xbf16>
    %cst_261 = arith.constant dense<0.000000e+00> : vector<16x128xf32>
    %298 = tpu.matmul %295, %297, %cst_261 {dimension_numbers = #tpu.dot_dimension_numbers<[1], [0], [0], [1], [0, 0, 1, 1], [], []>} : vector<16x48xbf16>, vector<48x128xbf16>, vector<16x128xf32> -> vector<16x128xf32>
    %299 = arith.addf %291, %298 : vector<16x128xf32>
    %c37 = arith.constant 37 : index
    %c0_262 = arith.constant 0 : index
    %c0_263 = arith.constant 0 : index
    %300 = vector.load %arg3[%c37, %c0_262, %c0_263] : memref<49x16x16xbf16, #tpu.memory_space<vmem>>, vector<1x16x16xbf16>
    %301 = vector.shape_cast %300 : vector<1x16x16xbf16> to vector<16x16xbf16>
    %cst_264 = arith.constant dense<0.000000e+00> : vector<16x48xf32>
    %302 = tpu.matmul %301, %2, %cst_264 {dimension_numbers = #tpu.dot_dimension_numbers<[1], [0], [0], [1], [0, 0, 1, 1], [], []>} : vector<16x16xbf16>, vector<16x48xbf16>, vector<16x48xf32> -> vector<16x48xf32>
    %303 = arith.truncf %302 : vector<16x48xf32> to vector<16x48xbf16>
    %c37_265 = arith.constant 37 : index
    %c0_266 = arith.constant 0 : index
    %c0_267 = arith.constant 0 : index
    %304 = vector.load %arg4[%c37_265, %c0_266, %c0_267] : memref<49x48x128xbf16, #tpu.memory_space<vmem>>, vector<1x48x128xbf16>
    %305 = vector.shape_cast %304 : vector<1x48x128xbf16> to vector<48x128xbf16>
    %cst_268 = arith.constant dense<0.000000e+00> : vector<16x128xf32>
    %306 = tpu.matmul %303, %305, %cst_268 {dimension_numbers = #tpu.dot_dimension_numbers<[1], [0], [0], [1], [0, 0, 1, 1], [], []>} : vector<16x48xbf16>, vector<48x128xbf16>, vector<16x128xf32> -> vector<16x128xf32>
    %307 = arith.addf %299, %306 : vector<16x128xf32>
    %c38 = arith.constant 38 : index
    %c0_269 = arith.constant 0 : index
    %c0_270 = arith.constant 0 : index
    %308 = vector.load %arg3[%c38, %c0_269, %c0_270] : memref<49x16x16xbf16, #tpu.memory_space<vmem>>, vector<1x16x16xbf16>
    %309 = vector.shape_cast %308 : vector<1x16x16xbf16> to vector<16x16xbf16>
    %cst_271 = arith.constant dense<0.000000e+00> : vector<16x48xf32>
    %310 = tpu.matmul %309, %2, %cst_271 {dimension_numbers = #tpu.dot_dimension_numbers<[1], [0], [0], [1], [0, 0, 1, 1], [], []>} : vector<16x16xbf16>, vector<16x48xbf16>, vector<16x48xf32> -> vector<16x48xf32>
    %311 = arith.truncf %310 : vector<16x48xf32> to vector<16x48xbf16>
    %c38_272 = arith.constant 38 : index
    %c0_273 = arith.constant 0 : index
    %c0_274 = arith.constant 0 : index
    %312 = vector.load %arg4[%c38_272, %c0_273, %c0_274] : memref<49x48x128xbf16, #tpu.memory_space<vmem>>, vector<1x48x128xbf16>
    %313 = vector.shape_cast %312 : vector<1x48x128xbf16> to vector<48x128xbf16>
    %cst_275 = arith.constant dense<0.000000e+00> : vector<16x128xf32>
    %314 = tpu.matmul %311, %313, %cst_275 {dimension_numbers = #tpu.dot_dimension_numbers<[1], [0], [0], [1], [0, 0, 1, 1], [], []>} : vector<16x48xbf16>, vector<48x128xbf16>, vector<16x128xf32> -> vector<16x128xf32>
    %315 = arith.addf %307, %314 : vector<16x128xf32>
    %c39 = arith.constant 39 : index
    %c0_276 = arith.constant 0 : index
    %c0_277 = arith.constant 0 : index
    %316 = vector.load %arg3[%c39, %c0_276, %c0_277] : memref<49x16x16xbf16, #tpu.memory_space<vmem>>, vector<1x16x16xbf16>
    %317 = vector.shape_cast %316 : vector<1x16x16xbf16> to vector<16x16xbf16>
    %cst_278 = arith.constant dense<0.000000e+00> : vector<16x48xf32>
    %318 = tpu.matmul %317, %2, %cst_278 {dimension_numbers = #tpu.dot_dimension_numbers<[1], [0], [0], [1], [0, 0, 1, 1], [], []>} : vector<16x16xbf16>, vector<16x48xbf16>, vector<16x48xf32> -> vector<16x48xf32>
    %319 = arith.truncf %318 : vector<16x48xf32> to vector<16x48xbf16>
    %c39_279 = arith.constant 39 : index
    %c0_280 = arith.constant 0 : index
    %c0_281 = arith.constant 0 : index
    %320 = vector.load %arg4[%c39_279, %c0_280, %c0_281] : memref<49x48x128xbf16, #tpu.memory_space<vmem>>, vector<1x48x128xbf16>
    %321 = vector.shape_cast %320 : vector<1x48x128xbf16> to vector<48x128xbf16>
    %cst_282 = arith.constant dense<0.000000e+00> : vector<16x128xf32>
    %322 = tpu.matmul %319, %321, %cst_282 {dimension_numbers = #tpu.dot_dimension_numbers<[1], [0], [0], [1], [0, 0, 1, 1], [], []>} : vector<16x48xbf16>, vector<48x128xbf16>, vector<16x128xf32> -> vector<16x128xf32>
    %323 = arith.addf %315, %322 : vector<16x128xf32>
    %c40 = arith.constant 40 : index
    %c0_283 = arith.constant 0 : index
    %c0_284 = arith.constant 0 : index
    %324 = vector.load %arg3[%c40, %c0_283, %c0_284] : memref<49x16x16xbf16, #tpu.memory_space<vmem>>, vector<1x16x16xbf16>
    %325 = vector.shape_cast %324 : vector<1x16x16xbf16> to vector<16x16xbf16>
    %cst_285 = arith.constant dense<0.000000e+00> : vector<16x48xf32>
    %326 = tpu.matmul %325, %2, %cst_285 {dimension_numbers = #tpu.dot_dimension_numbers<[1], [0], [0], [1], [0, 0, 1, 1], [], []>} : vector<16x16xbf16>, vector<16x48xbf16>, vector<16x48xf32> -> vector<16x48xf32>
    %327 = arith.truncf %326 : vector<16x48xf32> to vector<16x48xbf16>
    %c40_286 = arith.constant 40 : index
    %c0_287 = arith.constant 0 : index
    %c0_288 = arith.constant 0 : index
    %328 = vector.load %arg4[%c40_286, %c0_287, %c0_288] : memref<49x48x128xbf16, #tpu.memory_space<vmem>>, vector<1x48x128xbf16>
    %329 = vector.shape_cast %328 : vector<1x48x128xbf16> to vector<48x128xbf16>
    %cst_289 = arith.constant dense<0.000000e+00> : vector<16x128xf32>
    %330 = tpu.matmul %327, %329, %cst_289 {dimension_numbers = #tpu.dot_dimension_numbers<[1], [0], [0], [1], [0, 0, 1, 1], [], []>} : vector<16x48xbf16>, vector<48x128xbf16>, vector<16x128xf32> -> vector<16x128xf32>
    %331 = arith.addf %323, %330 : vector<16x128xf32>
    %c41 = arith.constant 41 : index
    %c0_290 = arith.constant 0 : index
    %c0_291 = arith.constant 0 : index
    %332 = vector.load %arg3[%c41, %c0_290, %c0_291] : memref<49x16x16xbf16, #tpu.memory_space<vmem>>, vector<1x16x16xbf16>
    %333 = vector.shape_cast %332 : vector<1x16x16xbf16> to vector<16x16xbf16>
    %cst_292 = arith.constant dense<0.000000e+00> : vector<16x48xf32>
    %334 = tpu.matmul %333, %2, %cst_292 {dimension_numbers = #tpu.dot_dimension_numbers<[1], [0], [0], [1], [0, 0, 1, 1], [], []>} : vector<16x16xbf16>, vector<16x48xbf16>, vector<16x48xf32> -> vector<16x48xf32>
    %335 = arith.truncf %334 : vector<16x48xf32> to vector<16x48xbf16>
    %c41_293 = arith.constant 41 : index
    %c0_294 = arith.constant 0 : index
    %c0_295 = arith.constant 0 : index
    %336 = vector.load %arg4[%c41_293, %c0_294, %c0_295] : memref<49x48x128xbf16, #tpu.memory_space<vmem>>, vector<1x48x128xbf16>
    %337 = vector.shape_cast %336 : vector<1x48x128xbf16> to vector<48x128xbf16>
    %cst_296 = arith.constant dense<0.000000e+00> : vector<16x128xf32>
    %338 = tpu.matmul %335, %337, %cst_296 {dimension_numbers = #tpu.dot_dimension_numbers<[1], [0], [0], [1], [0, 0, 1, 1], [], []>} : vector<16x48xbf16>, vector<48x128xbf16>, vector<16x128xf32> -> vector<16x128xf32>
    %339 = arith.addf %331, %338 : vector<16x128xf32>
    %c42 = arith.constant 42 : index
    %c0_297 = arith.constant 0 : index
    %c0_298 = arith.constant 0 : index
    %340 = vector.load %arg3[%c42, %c0_297, %c0_298] : memref<49x16x16xbf16, #tpu.memory_space<vmem>>, vector<1x16x16xbf16>
    %341 = vector.shape_cast %340 : vector<1x16x16xbf16> to vector<16x16xbf16>
    %cst_299 = arith.constant dense<0.000000e+00> : vector<16x48xf32>
    %342 = tpu.matmul %341, %2, %cst_299 {dimension_numbers = #tpu.dot_dimension_numbers<[1], [0], [0], [1], [0, 0, 1, 1], [], []>} : vector<16x16xbf16>, vector<16x48xbf16>, vector<16x48xf32> -> vector<16x48xf32>
    %343 = arith.truncf %342 : vector<16x48xf32> to vector<16x48xbf16>
    %c42_300 = arith.constant 42 : index
    %c0_301 = arith.constant 0 : index
    %c0_302 = arith.constant 0 : index
    %344 = vector.load %arg4[%c42_300, %c0_301, %c0_302] : memref<49x48x128xbf16, #tpu.memory_space<vmem>>, vector<1x48x128xbf16>
    %345 = vector.shape_cast %344 : vector<1x48x128xbf16> to vector<48x128xbf16>
    %cst_303 = arith.constant dense<0.000000e+00> : vector<16x128xf32>
    %346 = tpu.matmul %343, %345, %cst_303 {dimension_numbers = #tpu.dot_dimension_numbers<[1], [0], [0], [1], [0, 0, 1, 1], [], []>} : vector<16x48xbf16>, vector<48x128xbf16>, vector<16x128xf32> -> vector<16x128xf32>
    %347 = arith.addf %339, %346 : vector<16x128xf32>
    %c43 = arith.constant 43 : index
    %c0_304 = arith.constant 0 : index
    %c0_305 = arith.constant 0 : index
    %348 = vector.load %arg3[%c43, %c0_304, %c0_305] : memref<49x16x16xbf16, #tpu.memory_space<vmem>>, vector<1x16x16xbf16>
    %349 = vector.shape_cast %348 : vector<1x16x16xbf16> to vector<16x16xbf16>
    %cst_306 = arith.constant dense<0.000000e+00> : vector<16x48xf32>
    %350 = tpu.matmul %349, %2, %cst_306 {dimension_numbers = #tpu.dot_dimension_numbers<[1], [0], [0], [1], [0, 0, 1, 1], [], []>} : vector<16x16xbf16>, vector<16x48xbf16>, vector<16x48xf32> -> vector<16x48xf32>
    %351 = arith.truncf %350 : vector<16x48xf32> to vector<16x48xbf16>
    %c43_307 = arith.constant 43 : index
    %c0_308 = arith.constant 0 : index
    %c0_309 = arith.constant 0 : index
    %352 = vector.load %arg4[%c43_307, %c0_308, %c0_309] : memref<49x48x128xbf16, #tpu.memory_space<vmem>>, vector<1x48x128xbf16>
    %353 = vector.shape_cast %352 : vector<1x48x128xbf16> to vector<48x128xbf16>
    %cst_310 = arith.constant dense<0.000000e+00> : vector<16x128xf32>
    %354 = tpu.matmul %351, %353, %cst_310 {dimension_numbers = #tpu.dot_dimension_numbers<[1], [0], [0], [1], [0, 0, 1, 1], [], []>} : vector<16x48xbf16>, vector<48x128xbf16>, vector<16x128xf32> -> vector<16x128xf32>
    %355 = arith.addf %347, %354 : vector<16x128xf32>
    %c44 = arith.constant 44 : index
    %c0_311 = arith.constant 0 : index
    %c0_312 = arith.constant 0 : index
    %356 = vector.load %arg3[%c44, %c0_311, %c0_312] : memref<49x16x16xbf16, #tpu.memory_space<vmem>>, vector<1x16x16xbf16>
    %357 = vector.shape_cast %356 : vector<1x16x16xbf16> to vector<16x16xbf16>
    %cst_313 = arith.constant dense<0.000000e+00> : vector<16x48xf32>
    %358 = tpu.matmul %357, %2, %cst_313 {dimension_numbers = #tpu.dot_dimension_numbers<[1], [0], [0], [1], [0, 0, 1, 1], [], []>} : vector<16x16xbf16>, vector<16x48xbf16>, vector<16x48xf32> -> vector<16x48xf32>
    %359 = arith.truncf %358 : vector<16x48xf32> to vector<16x48xbf16>
    %c44_314 = arith.constant 44 : index
    %c0_315 = arith.constant 0 : index
    %c0_316 = arith.constant 0 : index
    %360 = vector.load %arg4[%c44_314, %c0_315, %c0_316] : memref<49x48x128xbf16, #tpu.memory_space<vmem>>, vector<1x48x128xbf16>
    %361 = vector.shape_cast %360 : vector<1x48x128xbf16> to vector<48x128xbf16>
    %cst_317 = arith.constant dense<0.000000e+00> : vector<16x128xf32>
    %362 = tpu.matmul %359, %361, %cst_317 {dimension_numbers = #tpu.dot_dimension_numbers<[1], [0], [0], [1], [0, 0, 1, 1], [], []>} : vector<16x48xbf16>, vector<48x128xbf16>, vector<16x128xf32> -> vector<16x128xf32>
    %363 = arith.addf %355, %362 : vector<16x128xf32>
    %c45 = arith.constant 45 : index
    %c0_318 = arith.constant 0 : index
    %c0_319 = arith.constant 0 : index
    %364 = vector.load %arg3[%c45, %c0_318, %c0_319] : memref<49x16x16xbf16, #tpu.memory_space<vmem>>, vector<1x16x16xbf16>
    %365 = vector.shape_cast %364 : vector<1x16x16xbf16> to vector<16x16xbf16>
    %cst_320 = arith.constant dense<0.000000e+00> : vector<16x48xf32>
    %366 = tpu.matmul %365, %2, %cst_320 {dimension_numbers = #tpu.dot_dimension_numbers<[1], [0], [0], [1], [0, 0, 1, 1], [], []>} : vector<16x16xbf16>, vector<16x48xbf16>, vector<16x48xf32> -> vector<16x48xf32>
    %367 = arith.truncf %366 : vector<16x48xf32> to vector<16x48xbf16>
    %c45_321 = arith.constant 45 : index
    %c0_322 = arith.constant 0 : index
    %c0_323 = arith.constant 0 : index
    %368 = vector.load %arg4[%c45_321, %c0_322, %c0_323] : memref<49x48x128xbf16, #tpu.memory_space<vmem>>, vector<1x48x128xbf16>
    %369 = vector.shape_cast %368 : vector<1x48x128xbf16> to vector<48x128xbf16>
    %cst_324 = arith.constant dense<0.000000e+00> : vector<16x128xf32>
    %370 = tpu.matmul %367, %369, %cst_324 {dimension_numbers = #tpu.dot_dimension_numbers<[1], [0], [0], [1], [0, 0, 1, 1], [], []>} : vector<16x48xbf16>, vector<48x128xbf16>, vector<16x128xf32> -> vector<16x128xf32>
    %371 = arith.addf %363, %370 : vector<16x128xf32>
    %c46 = arith.constant 46 : index
    %c0_325 = arith.constant 0 : index
    %c0_326 = arith.constant 0 : index
    %372 = vector.load %arg3[%c46, %c0_325, %c0_326] : memref<49x16x16xbf16, #tpu.memory_space<vmem>>, vector<1x16x16xbf16>
    %373 = vector.shape_cast %372 : vector<1x16x16xbf16> to vector<16x16xbf16>
    %cst_327 = arith.constant dense<0.000000e+00> : vector<16x48xf32>
    %374 = tpu.matmul %373, %2, %cst_327 {dimension_numbers = #tpu.dot_dimension_numbers<[1], [0], [0], [1], [0, 0, 1, 1], [], []>} : vector<16x16xbf16>, vector<16x48xbf16>, vector<16x48xf32> -> vector<16x48xf32>
    %375 = arith.truncf %374 : vector<16x48xf32> to vector<16x48xbf16>
    %c46_328 = arith.constant 46 : index
    %c0_329 = arith.constant 0 : index
    %c0_330 = arith.constant 0 : index
    %376 = vector.load %arg4[%c46_328, %c0_329, %c0_330] : memref<49x48x128xbf16, #tpu.memory_space<vmem>>, vector<1x48x128xbf16>
    %377 = vector.shape_cast %376 : vector<1x48x128xbf16> to vector<48x128xbf16>
    %cst_331 = arith.constant dense<0.000000e+00> : vector<16x128xf32>
    %378 = tpu.matmul %375, %377, %cst_331 {dimension_numbers = #tpu.dot_dimension_numbers<[1], [0], [0], [1], [0, 0, 1, 1], [], []>} : vector<16x48xbf16>, vector<48x128xbf16>, vector<16x128xf32> -> vector<16x128xf32>
    %379 = arith.addf %371, %378 : vector<16x128xf32>
    %c47 = arith.constant 47 : index
    %c0_332 = arith.constant 0 : index
    %c0_333 = arith.constant 0 : index
    %380 = vector.load %arg3[%c47, %c0_332, %c0_333] : memref<49x16x16xbf16, #tpu.memory_space<vmem>>, vector<1x16x16xbf16>
    %381 = vector.shape_cast %380 : vector<1x16x16xbf16> to vector<16x16xbf16>
    %cst_334 = arith.constant dense<0.000000e+00> : vector<16x48xf32>
    %382 = tpu.matmul %381, %2, %cst_334 {dimension_numbers = #tpu.dot_dimension_numbers<[1], [0], [0], [1], [0, 0, 1, 1], [], []>} : vector<16x16xbf16>, vector<16x48xbf16>, vector<16x48xf32> -> vector<16x48xf32>
    %383 = arith.truncf %382 : vector<16x48xf32> to vector<16x48xbf16>
    %c47_335 = arith.constant 47 : index
    %c0_336 = arith.constant 0 : index
    %c0_337 = arith.constant 0 : index
    %384 = vector.load %arg4[%c47_335, %c0_336, %c0_337] : memref<49x48x128xbf16, #tpu.memory_space<vmem>>, vector<1x48x128xbf16>
    %385 = vector.shape_cast %384 : vector<1x48x128xbf16> to vector<48x128xbf16>
    %cst_338 = arith.constant dense<0.000000e+00> : vector<16x128xf32>
    %386 = tpu.matmul %383, %385, %cst_338 {dimension_numbers = #tpu.dot_dimension_numbers<[1], [0], [0], [1], [0, 0, 1, 1], [], []>} : vector<16x48xbf16>, vector<48x128xbf16>, vector<16x128xf32> -> vector<16x128xf32>
    %387 = arith.addf %379, %386 : vector<16x128xf32>
    %c48 = arith.constant 48 : index
    %c0_339 = arith.constant 0 : index
    %c0_340 = arith.constant 0 : index
    %388 = vector.load %arg3[%c48, %c0_339, %c0_340] : memref<49x16x16xbf16, #tpu.memory_space<vmem>>, vector<1x16x16xbf16>
    %389 = vector.shape_cast %388 : vector<1x16x16xbf16> to vector<16x16xbf16>
    %cst_341 = arith.constant dense<0.000000e+00> : vector<16x48xf32>
    %390 = tpu.matmul %389, %2, %cst_341 {dimension_numbers = #tpu.dot_dimension_numbers<[1], [0], [0], [1], [0, 0, 1, 1], [], []>} : vector<16x16xbf16>, vector<16x48xbf16>, vector<16x48xf32> -> vector<16x48xf32>
    %391 = arith.truncf %390 : vector<16x48xf32> to vector<16x48xbf16>
    %c48_342 = arith.constant 48 : index
    %c0_343 = arith.constant 0 : index
    %c0_344 = arith.constant 0 : index
    %392 = vector.load %arg4[%c48_342, %c0_343, %c0_344] : memref<49x48x128xbf16, #tpu.memory_space<vmem>>, vector<1x48x128xbf16>
    %393 = vector.shape_cast %392 : vector<1x48x128xbf16> to vector<48x128xbf16>
    %cst_345 = arith.constant dense<0.000000e+00> : vector<16x128xf32>
    %394 = tpu.matmul %391, %393, %cst_345 {dimension_numbers = #tpu.dot_dimension_numbers<[1], [0], [0], [1], [0, 0, 1, 1], [], []>} : vector<16x48xbf16>, vector<48x128xbf16>, vector<16x128xf32> -> vector<16x128xf32>
    %395 = arith.addf %387, %394 : vector<16x128xf32>
    %c0_346 = arith.constant 0 : index
    %c0_347 = arith.constant 0 : index
    %396 = vector.load %arg5[%c0_346, %c0_347] : memref<1x128xf32, #tpu.memory_space<vmem>>, vector<1x128xf32>
    %397 = vector.broadcast %396 : vector<1x128xf32> to vector<16x128xf32>
    %398 = arith.addf %395, %397 : vector<16x128xf32>
    %c0_348 = arith.constant 0 : index
    %c0_349 = arith.constant 0 : index
    %399 = vector.load %arg6[%c0_348, %c0_349] : memref<128x128xf32, #tpu.memory_space<vmem>>, vector<128x128xf32>
    %cst_350 = arith.constant dense<0.000000e+00> : vector<128xf32>
    %400 = vector.multi_reduction <add>, %398, %cst_350 [0] : vector<16x128xf32> to vector<128xf32>
    %401 = vector.shape_cast %400 : vector<128xf32> to vector<1x128xf32>
    %cst_351 = arith.constant 1.600000e+01 : f32
    %402 = vector.broadcast %cst_351 : f32 to vector<1x128xf32>
    %403 = arith.divf %401, %402 : vector<1x128xf32>
    %cst_352 = arith.constant dense<0.000000e+00> : vector<1x128xf32>
    %404 = tpu.matmul %403, %399, %cst_352 {dimension_numbers = #tpu.dot_dimension_numbers<[1], [0], [0], [1], [0, 0, 1, 1], [], []>} : vector<1x128xf32>, vector<128x128xf32>, vector<1x128xf32> -> vector<1x128xf32>
    %405 = vector.broadcast %404 : vector<1x128xf32> to vector<16x128xf32>
    %406 = arith.subf %398, %405 : vector<16x128xf32>
    %407 = arith.mulf %406, %406 : vector<16x128xf32>
    %cst_353 = arith.constant dense<0.000000e+00> : vector<128xf32>
    %408 = vector.multi_reduction <add>, %407, %cst_353 [0] : vector<16x128xf32> to vector<128xf32>
    %409 = vector.shape_cast %408 : vector<128xf32> to vector<1x128xf32>
    %cst_354 = arith.constant 1.600000e+01 : f32
    %410 = vector.broadcast %cst_354 : f32 to vector<1x128xf32>
    %411 = arith.divf %409, %410 : vector<1x128xf32>
    %cst_355 = arith.constant dense<0.000000e+00> : vector<1x128xf32>
    %412 = tpu.matmul %411, %399, %cst_355 {dimension_numbers = #tpu.dot_dimension_numbers<[1], [0], [0], [1], [0, 0, 1, 1], [], []>} : vector<1x128xf32>, vector<128x128xf32>, vector<1x128xf32> -> vector<1x128xf32>
    %cst_356 = arith.constant 9.99999974E-6 : f32
    %413 = vector.broadcast %cst_356 : f32 to vector<1x128xf32>
    %414 = arith.addf %412, %413 : vector<1x128xf32>
    %415 = math.rsqrt %414 : vector<1x128xf32>
    %416 = vector.broadcast %415 : vector<1x128xf32> to vector<16x128xf32>
    %417 = arith.mulf %406, %416 : vector<16x128xf32>
    %cst_357 = arith.constant 0.000000e+00 : f32
    %418 = vector.broadcast %cst_357 : f32 to vector<16x128xf32>
    %419 = arith.cmpf oge, %417, %418 : vector<16x128xf32>
    %cst_358 = arith.constant 2.000000e-01 : f32
    %420 = vector.broadcast %cst_358 : f32 to vector<16x128xf32>
    %421 = arith.mulf %420, %417 : vector<16x128xf32>
    %422 = arith.select %419, %417, %421 : vector<16x128xi1>, vector<16x128xf32>
    %423 = arith.truncf %422 : vector<16x128xf32> to vector<16x128xbf16>
    %cst_359 = arith.constant 0.000000e+00 : f32
    %424 = vector.broadcast %cst_359 : f32 to vector<8x128xf32>
    %c0_360 = arith.constant 0 : index
    %c0_361 = arith.constant 0 : index
    %c0_362 = arith.constant 0 : index
    %425 = vector.load %arg7[%c0_360, %c0_361, %c0_362] : memref<9x8x16xbf16, #tpu.memory_space<vmem>>, vector<1x8x16xbf16>
    %426 = vector.shape_cast %425 : vector<1x8x16xbf16> to vector<8x16xbf16>
    %cst_363 = arith.constant dense<0.000000e+00> : vector<8x128xf32>
    %427 = tpu.matmul %426, %423, %cst_363 {dimension_numbers = #tpu.dot_dimension_numbers<[1], [0], [0], [1], [0, 0, 1, 1], [], []>} : vector<8x16xbf16>, vector<16x128xbf16>, vector<8x128xf32> -> vector<8x128xf32>
    %428 = arith.truncf %427 : vector<8x128xf32> to vector<8x128xbf16>
    %c0_364 = arith.constant 0 : index
    %c0_365 = arith.constant 0 : index
    %c0_366 = arith.constant 0 : index
    %429 = vector.load %arg8[%c0_364, %c0_365, %c0_366] : memref<9x128x128xbf16, #tpu.memory_space<vmem>>, vector<1x128x128xbf16>
    %430 = vector.shape_cast %429 : vector<1x128x128xbf16> to vector<128x128xbf16>
    %cst_367 = arith.constant dense<0.000000e+00> : vector<8x128xf32>
    %431 = tpu.matmul %428, %430, %cst_367 {dimension_numbers = #tpu.dot_dimension_numbers<[1], [0], [0], [1], [0, 0, 1, 1], [], []>} : vector<8x128xbf16>, vector<128x128xbf16>, vector<8x128xf32> -> vector<8x128xf32>
    %432 = arith.addf %424, %431 : vector<8x128xf32>
    %c1_368 = arith.constant 1 : index
    %c0_369 = arith.constant 0 : index
    %c0_370 = arith.constant 0 : index
    %433 = vector.load %arg7[%c1_368, %c0_369, %c0_370] : memref<9x8x16xbf16, #tpu.memory_space<vmem>>, vector<1x8x16xbf16>
    %434 = vector.shape_cast %433 : vector<1x8x16xbf16> to vector<8x16xbf16>
    %cst_371 = arith.constant dense<0.000000e+00> : vector<8x128xf32>
    %435 = tpu.matmul %434, %423, %cst_371 {dimension_numbers = #tpu.dot_dimension_numbers<[1], [0], [0], [1], [0, 0, 1, 1], [], []>} : vector<8x16xbf16>, vector<16x128xbf16>, vector<8x128xf32> -> vector<8x128xf32>
    %436 = arith.truncf %435 : vector<8x128xf32> to vector<8x128xbf16>
    %c1_372 = arith.constant 1 : index
    %c0_373 = arith.constant 0 : index
    %c0_374 = arith.constant 0 : index
    %437 = vector.load %arg8[%c1_372, %c0_373, %c0_374] : memref<9x128x128xbf16, #tpu.memory_space<vmem>>, vector<1x128x128xbf16>
    %438 = vector.shape_cast %437 : vector<1x128x128xbf16> to vector<128x128xbf16>
    %cst_375 = arith.constant dense<0.000000e+00> : vector<8x128xf32>
    %439 = tpu.matmul %436, %438, %cst_375 {dimension_numbers = #tpu.dot_dimension_numbers<[1], [0], [0], [1], [0, 0, 1, 1], [], []>} : vector<8x128xbf16>, vector<128x128xbf16>, vector<8x128xf32> -> vector<8x128xf32>
    %440 = arith.addf %432, %439 : vector<8x128xf32>
    %c2_376 = arith.constant 2 : index
    %c0_377 = arith.constant 0 : index
    %c0_378 = arith.constant 0 : index
    %441 = vector.load %arg7[%c2_376, %c0_377, %c0_378] : memref<9x8x16xbf16, #tpu.memory_space<vmem>>, vector<1x8x16xbf16>
    %442 = vector.shape_cast %441 : vector<1x8x16xbf16> to vector<8x16xbf16>
    %cst_379 = arith.constant dense<0.000000e+00> : vector<8x128xf32>
    %443 = tpu.matmul %442, %423, %cst_379 {dimension_numbers = #tpu.dot_dimension_numbers<[1], [0], [0], [1], [0, 0, 1, 1], [], []>} : vector<8x16xbf16>, vector<16x128xbf16>, vector<8x128xf32> -> vector<8x128xf32>
    %444 = arith.truncf %443 : vector<8x128xf32> to vector<8x128xbf16>
    %c2_380 = arith.constant 2 : index
    %c0_381 = arith.constant 0 : index
    %c0_382 = arith.constant 0 : index
    %445 = vector.load %arg8[%c2_380, %c0_381, %c0_382] : memref<9x128x128xbf16, #tpu.memory_space<vmem>>, vector<1x128x128xbf16>
    %446 = vector.shape_cast %445 : vector<1x128x128xbf16> to vector<128x128xbf16>
    %cst_383 = arith.constant dense<0.000000e+00> : vector<8x128xf32>
    %447 = tpu.matmul %444, %446, %cst_383 {dimension_numbers = #tpu.dot_dimension_numbers<[1], [0], [0], [1], [0, 0, 1, 1], [], []>} : vector<8x128xbf16>, vector<128x128xbf16>, vector<8x128xf32> -> vector<8x128xf32>
    %448 = arith.addf %440, %447 : vector<8x128xf32>
    %c3_384 = arith.constant 3 : index
    %c0_385 = arith.constant 0 : index
    %c0_386 = arith.constant 0 : index
    %449 = vector.load %arg7[%c3_384, %c0_385, %c0_386] : memref<9x8x16xbf16, #tpu.memory_space<vmem>>, vector<1x8x16xbf16>
    %450 = vector.shape_cast %449 : vector<1x8x16xbf16> to vector<8x16xbf16>
    %cst_387 = arith.constant dense<0.000000e+00> : vector<8x128xf32>
    %451 = tpu.matmul %450, %423, %cst_387 {dimension_numbers = #tpu.dot_dimension_numbers<[1], [0], [0], [1], [0, 0, 1, 1], [], []>} : vector<8x16xbf16>, vector<16x128xbf16>, vector<8x128xf32> -> vector<8x128xf32>
    %452 = arith.truncf %451 : vector<8x128xf32> to vector<8x128xbf16>
    %c3_388 = arith.constant 3 : index
    %c0_389 = arith.constant 0 : index
    %c0_390 = arith.constant 0 : index
    %453 = vector.load %arg8[%c3_388, %c0_389, %c0_390] : memref<9x128x128xbf16, #tpu.memory_space<vmem>>, vector<1x128x128xbf16>
    %454 = vector.shape_cast %453 : vector<1x128x128xbf16> to vector<128x128xbf16>
    %cst_391 = arith.constant dense<0.000000e+00> : vector<8x128xf32>
    %455 = tpu.matmul %452, %454, %cst_391 {dimension_numbers = #tpu.dot_dimension_numbers<[1], [0], [0], [1], [0, 0, 1, 1], [], []>} : vector<8x128xbf16>, vector<128x128xbf16>, vector<8x128xf32> -> vector<8x128xf32>
    %456 = arith.addf %448, %455 : vector<8x128xf32>
    %c4_392 = arith.constant 4 : index
    %c0_393 = arith.constant 0 : index
    %c0_394 = arith.constant 0 : index
    %457 = vector.load %arg7[%c4_392, %c0_393, %c0_394] : memref<9x8x16xbf16, #tpu.memory_space<vmem>>, vector<1x8x16xbf16>
    %458 = vector.shape_cast %457 : vector<1x8x16xbf16> to vector<8x16xbf16>
    %cst_395 = arith.constant dense<0.000000e+00> : vector<8x128xf32>
    %459 = tpu.matmul %458, %423, %cst_395 {dimension_numbers = #tpu.dot_dimension_numbers<[1], [0], [0], [1], [0, 0, 1, 1], [], []>} : vector<8x16xbf16>, vector<16x128xbf16>, vector<8x128xf32> -> vector<8x128xf32>
    %460 = arith.truncf %459 : vector<8x128xf32> to vector<8x128xbf16>
    %c4_396 = arith.constant 4 : index
    %c0_397 = arith.constant 0 : index
    %c0_398 = arith.constant 0 : index
    %461 = vector.load %arg8[%c4_396, %c0_397, %c0_398] : memref<9x128x128xbf16, #tpu.memory_space<vmem>>, vector<1x128x128xbf16>
    %462 = vector.shape_cast %461 : vector<1x128x128xbf16> to vector<128x128xbf16>
    %cst_399 = arith.constant dense<0.000000e+00> : vector<8x128xf32>
    %463 = tpu.matmul %460, %462, %cst_399 {dimension_numbers = #tpu.dot_dimension_numbers<[1], [0], [0], [1], [0, 0, 1, 1], [], []>} : vector<8x128xbf16>, vector<128x128xbf16>, vector<8x128xf32> -> vector<8x128xf32>
    %464 = arith.addf %456, %463 : vector<8x128xf32>
    %c5_400 = arith.constant 5 : index
    %c0_401 = arith.constant 0 : index
    %c0_402 = arith.constant 0 : index
    %465 = vector.load %arg7[%c5_400, %c0_401, %c0_402] : memref<9x8x16xbf16, #tpu.memory_space<vmem>>, vector<1x8x16xbf16>
    %466 = vector.shape_cast %465 : vector<1x8x16xbf16> to vector<8x16xbf16>
    %cst_403 = arith.constant dense<0.000000e+00> : vector<8x128xf32>
    %467 = tpu.matmul %466, %423, %cst_403 {dimension_numbers = #tpu.dot_dimension_numbers<[1], [0], [0], [1], [0, 0, 1, 1], [], []>} : vector<8x16xbf16>, vector<16x128xbf16>, vector<8x128xf32> -> vector<8x128xf32>
    %468 = arith.truncf %467 : vector<8x128xf32> to vector<8x128xbf16>
    %c5_404 = arith.constant 5 : index
    %c0_405 = arith.constant 0 : index
    %c0_406 = arith.constant 0 : index
    %469 = vector.load %arg8[%c5_404, %c0_405, %c0_406] : memref<9x128x128xbf16, #tpu.memory_space<vmem>>, vector<1x128x128xbf16>
    %470 = vector.shape_cast %469 : vector<1x128x128xbf16> to vector<128x128xbf16>
    %cst_407 = arith.constant dense<0.000000e+00> : vector<8x128xf32>
    %471 = tpu.matmul %468, %470, %cst_407 {dimension_numbers = #tpu.dot_dimension_numbers<[1], [0], [0], [1], [0, 0, 1, 1], [], []>} : vector<8x128xbf16>, vector<128x128xbf16>, vector<8x128xf32> -> vector<8x128xf32>
    %472 = arith.addf %464, %471 : vector<8x128xf32>
    %c6_408 = arith.constant 6 : index
    %c0_409 = arith.constant 0 : index
    %c0_410 = arith.constant 0 : index
    %473 = vector.load %arg7[%c6_408, %c0_409, %c0_410] : memref<9x8x16xbf16, #tpu.memory_space<vmem>>, vector<1x8x16xbf16>
    %474 = vector.shape_cast %473 : vector<1x8x16xbf16> to vector<8x16xbf16>
    %cst_411 = arith.constant dense<0.000000e+00> : vector<8x128xf32>
    %475 = tpu.matmul %474, %423, %cst_411 {dimension_numbers = #tpu.dot_dimension_numbers<[1], [0], [0], [1], [0, 0, 1, 1], [], []>} : vector<8x16xbf16>, vector<16x128xbf16>, vector<8x128xf32> -> vector<8x128xf32>
    %476 = arith.truncf %475 : vector<8x128xf32> to vector<8x128xbf16>
    %c6_412 = arith.constant 6 : index
    %c0_413 = arith.constant 0 : index
    %c0_414 = arith.constant 0 : index
    %477 = vector.load %arg8[%c6_412, %c0_413, %c0_414] : memref<9x128x128xbf16, #tpu.memory_space<vmem>>, vector<1x128x128xbf16>
    %478 = vector.shape_cast %477 : vector<1x128x128xbf16> to vector<128x128xbf16>
    %cst_415 = arith.constant dense<0.000000e+00> : vector<8x128xf32>
    %479 = tpu.matmul %476, %478, %cst_415 {dimension_numbers = #tpu.dot_dimension_numbers<[1], [0], [0], [1], [0, 0, 1, 1], [], []>} : vector<8x128xbf16>, vector<128x128xbf16>, vector<8x128xf32> -> vector<8x128xf32>
    %480 = arith.addf %472, %479 : vector<8x128xf32>
    %c7_416 = arith.constant 7 : index
    %c0_417 = arith.constant 0 : index
    %c0_418 = arith.constant 0 : index
    %481 = vector.load %arg7[%c7_416, %c0_417, %c0_418] : memref<9x8x16xbf16, #tpu.memory_space<vmem>>, vector<1x8x16xbf16>
    %482 = vector.shape_cast %481 : vector<1x8x16xbf16> to vector<8x16xbf16>
    %cst_419 = arith.constant dense<0.000000e+00> : vector<8x128xf32>
    %483 = tpu.matmul %482, %423, %cst_419 {dimension_numbers = #tpu.dot_dimension_numbers<[1], [0], [0], [1], [0, 0, 1, 1], [], []>} : vector<8x16xbf16>, vector<16x128xbf16>, vector<8x128xf32> -> vector<8x128xf32>
    %484 = arith.truncf %483 : vector<8x128xf32> to vector<8x128xbf16>
    %c7_420 = arith.constant 7 : index
    %c0_421 = arith.constant 0 : index
    %c0_422 = arith.constant 0 : index
    %485 = vector.load %arg8[%c7_420, %c0_421, %c0_422] : memref<9x128x128xbf16, #tpu.memory_space<vmem>>, vector<1x128x128xbf16>
    %486 = vector.shape_cast %485 : vector<1x128x128xbf16> to vector<128x128xbf16>
    %cst_423 = arith.constant dense<0.000000e+00> : vector<8x128xf32>
    %487 = tpu.matmul %484, %486, %cst_423 {dimension_numbers = #tpu.dot_dimension_numbers<[1], [0], [0], [1], [0, 0, 1, 1], [], []>} : vector<8x128xbf16>, vector<128x128xbf16>, vector<8x128xf32> -> vector<8x128xf32>
    %488 = arith.addf %480, %487 : vector<8x128xf32>
    %c8_424 = arith.constant 8 : index
    %c0_425 = arith.constant 0 : index
    %c0_426 = arith.constant 0 : index
    %489 = vector.load %arg7[%c8_424, %c0_425, %c0_426] : memref<9x8x16xbf16, #tpu.memory_space<vmem>>, vector<1x8x16xbf16>
    %490 = vector.shape_cast %489 : vector<1x8x16xbf16> to vector<8x16xbf16>
    %cst_427 = arith.constant dense<0.000000e+00> : vector<8x128xf32>
    %491 = tpu.matmul %490, %423, %cst_427 {dimension_numbers = #tpu.dot_dimension_numbers<[1], [0], [0], [1], [0, 0, 1, 1], [], []>} : vector<8x16xbf16>, vector<16x128xbf16>, vector<8x128xf32> -> vector<8x128xf32>
    %492 = arith.truncf %491 : vector<8x128xf32> to vector<8x128xbf16>
    %c8_428 = arith.constant 8 : index
    %c0_429 = arith.constant 0 : index
    %c0_430 = arith.constant 0 : index
    %493 = vector.load %arg8[%c8_428, %c0_429, %c0_430] : memref<9x128x128xbf16, #tpu.memory_space<vmem>>, vector<1x128x128xbf16>
    %494 = vector.shape_cast %493 : vector<1x128x128xbf16> to vector<128x128xbf16>
    %cst_431 = arith.constant dense<0.000000e+00> : vector<8x128xf32>
    %495 = tpu.matmul %492, %494, %cst_431 {dimension_numbers = #tpu.dot_dimension_numbers<[1], [0], [0], [1], [0, 0, 1, 1], [], []>} : vector<8x128xbf16>, vector<128x128xbf16>, vector<8x128xf32> -> vector<8x128xf32>
    %496 = arith.addf %488, %495 : vector<8x128xf32>
    %c0_432 = arith.constant 0 : index
    %c0_433 = arith.constant 0 : index
    %497 = vector.load %arg9[%c0_432, %c0_433] : memref<1x128xf32, #tpu.memory_space<vmem>>, vector<1x128xf32>
    %498 = vector.broadcast %497 : vector<1x128xf32> to vector<8x128xf32>
    %499 = arith.addf %496, %498 : vector<8x128xf32>
    %c0_434 = arith.constant 0 : index
    %c0_435 = arith.constant 0 : index
    %500 = vector.load %arg10[%c0_434, %c0_435] : memref<128x128xf32, #tpu.memory_space<vmem>>, vector<128x128xf32>
    %cst_436 = arith.constant dense<0.000000e+00> : vector<128xf32>
    %501 = vector.multi_reduction <add>, %499, %cst_436 [0] : vector<8x128xf32> to vector<128xf32>
    %502 = vector.shape_cast %501 : vector<128xf32> to vector<1x128xf32>
    %cst_437 = arith.constant 8.000000e+00 : f32
    %503 = vector.broadcast %cst_437 : f32 to vector<1x128xf32>
    %504 = arith.divf %502, %503 : vector<1x128xf32>
    %cst_438 = arith.constant dense<0.000000e+00> : vector<1x128xf32>
    %505 = tpu.matmul %504, %500, %cst_438 {dimension_numbers = #tpu.dot_dimension_numbers<[1], [0], [0], [1], [0, 0, 1, 1], [], []>} : vector<1x128xf32>, vector<128x128xf32>, vector<1x128xf32> -> vector<1x128xf32>
    %506 = vector.broadcast %505 : vector<1x128xf32> to vector<8x128xf32>
    %507 = arith.subf %499, %506 : vector<8x128xf32>
    %508 = arith.mulf %507, %507 : vector<8x128xf32>
    %cst_439 = arith.constant dense<0.000000e+00> : vector<128xf32>
    %509 = vector.multi_reduction <add>, %508, %cst_439 [0] : vector<8x128xf32> to vector<128xf32>
    %510 = vector.shape_cast %509 : vector<128xf32> to vector<1x128xf32>
    %cst_440 = arith.constant 8.000000e+00 : f32
    %511 = vector.broadcast %cst_440 : f32 to vector<1x128xf32>
    %512 = arith.divf %510, %511 : vector<1x128xf32>
    %cst_441 = arith.constant dense<0.000000e+00> : vector<1x128xf32>
    %513 = tpu.matmul %512, %500, %cst_441 {dimension_numbers = #tpu.dot_dimension_numbers<[1], [0], [0], [1], [0, 0, 1, 1], [], []>} : vector<1x128xf32>, vector<128x128xf32>, vector<1x128xf32> -> vector<1x128xf32>
    %cst_442 = arith.constant 9.99999974E-6 : f32
    %514 = vector.broadcast %cst_442 : f32 to vector<1x128xf32>
    %515 = arith.addf %513, %514 : vector<1x128xf32>
    %516 = math.rsqrt %515 : vector<1x128xf32>
    %517 = vector.broadcast %516 : vector<1x128xf32> to vector<8x128xf32>
    %518 = arith.mulf %507, %517 : vector<8x128xf32>
    %cst_443 = arith.constant 0.000000e+00 : f32
    %519 = vector.broadcast %cst_443 : f32 to vector<8x128xf32>
    %520 = arith.cmpf oge, %518, %519 : vector<8x128xf32>
    %cst_444 = arith.constant 2.000000e-01 : f32
    %521 = vector.broadcast %cst_444 : f32 to vector<8x128xf32>
    %522 = arith.mulf %521, %518 : vector<8x128xf32>
    %523 = arith.select %520, %518, %522 : vector<8x128xi1>, vector<8x128xf32>
    %524 = arith.truncf %523 : vector<8x128xf32> to vector<8x128xbf16>
    %cst_445 = arith.constant 0.000000e+00 : f32
    %525 = vector.broadcast %cst_445 : f32 to vector<4x128xf32>
    %c0_446 = arith.constant 0 : index
    %c0_447 = arith.constant 0 : index
    %c0_448 = arith.constant 0 : index
    %526 = vector.load %arg11[%c0_446, %c0_447, %c0_448] : memref<9x4x8xbf16, #tpu.memory_space<vmem>>, vector<1x4x8xbf16>
    %527 = vector.shape_cast %526 : vector<1x4x8xbf16> to vector<4x8xbf16>
    %cst_449 = arith.constant dense<0.000000e+00> : vector<4x128xf32>
    %528 = tpu.matmul %527, %524, %cst_449 {dimension_numbers = #tpu.dot_dimension_numbers<[1], [0], [0], [1], [0, 0, 1, 1], [], []>} : vector<4x8xbf16>, vector<8x128xbf16>, vector<4x128xf32> -> vector<4x128xf32>
    %529 = arith.truncf %528 : vector<4x128xf32> to vector<4x128xbf16>
    %c0_450 = arith.constant 0 : index
    %c0_451 = arith.constant 0 : index
    %c0_452 = arith.constant 0 : index
    %530 = vector.load %arg12[%c0_450, %c0_451, %c0_452] : memref<9x128x128xbf16, #tpu.memory_space<vmem>>, vector<1x128x128xbf16>
    %531 = vector.shape_cast %530 : vector<1x128x128xbf16> to vector<128x128xbf16>
    %cst_453 = arith.constant dense<0.000000e+00> : vector<4x128xf32>
    %532 = tpu.matmul %529, %531, %cst_453 {dimension_numbers = #tpu.dot_dimension_numbers<[1], [0], [0], [1], [0, 0, 1, 1], [], []>} : vector<4x128xbf16>, vector<128x128xbf16>, vector<4x128xf32> -> vector<4x128xf32>
    %533 = arith.addf %525, %532 : vector<4x128xf32>
    %c1_454 = arith.constant 1 : index
    %c0_455 = arith.constant 0 : index
    %c0_456 = arith.constant 0 : index
    %534 = vector.load %arg11[%c1_454, %c0_455, %c0_456] : memref<9x4x8xbf16, #tpu.memory_space<vmem>>, vector<1x4x8xbf16>
    %535 = vector.shape_cast %534 : vector<1x4x8xbf16> to vector<4x8xbf16>
    %cst_457 = arith.constant dense<0.000000e+00> : vector<4x128xf32>
    %536 = tpu.matmul %535, %524, %cst_457 {dimension_numbers = #tpu.dot_dimension_numbers<[1], [0], [0], [1], [0, 0, 1, 1], [], []>} : vector<4x8xbf16>, vector<8x128xbf16>, vector<4x128xf32> -> vector<4x128xf32>
    %537 = arith.truncf %536 : vector<4x128xf32> to vector<4x128xbf16>
    %c1_458 = arith.constant 1 : index
    %c0_459 = arith.constant 0 : index
    %c0_460 = arith.constant 0 : index
    %538 = vector.load %arg12[%c1_458, %c0_459, %c0_460] : memref<9x128x128xbf16, #tpu.memory_space<vmem>>, vector<1x128x128xbf16>
    %539 = vector.shape_cast %538 : vector<1x128x128xbf16> to vector<128x128xbf16>
    %cst_461 = arith.constant dense<0.000000e+00> : vector<4x128xf32>
    %540 = tpu.matmul %537, %539, %cst_461 {dimension_numbers = #tpu.dot_dimension_numbers<[1], [0], [0], [1], [0, 0, 1, 1], [], []>} : vector<4x128xbf16>, vector<128x128xbf16>, vector<4x128xf32> -> vector<4x128xf32>
    %541 = arith.addf %533, %540 : vector<4x128xf32>
    %c2_462 = arith.constant 2 : index
    %c0_463 = arith.constant 0 : index
    %c0_464 = arith.constant 0 : index
    %542 = vector.load %arg11[%c2_462, %c0_463, %c0_464] : memref<9x4x8xbf16, #tpu.memory_space<vmem>>, vector<1x4x8xbf16>
    %543 = vector.shape_cast %542 : vector<1x4x8xbf16> to vector<4x8xbf16>
    %cst_465 = arith.constant dense<0.000000e+00> : vector<4x128xf32>
    %544 = tpu.matmul %543, %524, %cst_465 {dimension_numbers = #tpu.dot_dimension_numbers<[1], [0], [0], [1], [0, 0, 1, 1], [], []>} : vector<4x8xbf16>, vector<8x128xbf16>, vector<4x128xf32> -> vector<4x128xf32>
    %545 = arith.truncf %544 : vector<4x128xf32> to vector<4x128xbf16>
    %c2_466 = arith.constant 2 : index
    %c0_467 = arith.constant 0 : index
    %c0_468 = arith.constant 0 : index
    %546 = vector.load %arg12[%c2_466, %c0_467, %c0_468] : memref<9x128x128xbf16, #tpu.memory_space<vmem>>, vector<1x128x128xbf16>
    %547 = vector.shape_cast %546 : vector<1x128x128xbf16> to vector<128x128xbf16>
    %cst_469 = arith.constant dense<0.000000e+00> : vector<4x128xf32>
    %548 = tpu.matmul %545, %547, %cst_469 {dimension_numbers = #tpu.dot_dimension_numbers<[1], [0], [0], [1], [0, 0, 1, 1], [], []>} : vector<4x128xbf16>, vector<128x128xbf16>, vector<4x128xf32> -> vector<4x128xf32>
    %549 = arith.addf %541, %548 : vector<4x128xf32>
    %c3_470 = arith.constant 3 : index
    %c0_471 = arith.constant 0 : index
    %c0_472 = arith.constant 0 : index
    %550 = vector.load %arg11[%c3_470, %c0_471, %c0_472] : memref<9x4x8xbf16, #tpu.memory_space<vmem>>, vector<1x4x8xbf16>
    %551 = vector.shape_cast %550 : vector<1x4x8xbf16> to vector<4x8xbf16>
    %cst_473 = arith.constant dense<0.000000e+00> : vector<4x128xf32>
    %552 = tpu.matmul %551, %524, %cst_473 {dimension_numbers = #tpu.dot_dimension_numbers<[1], [0], [0], [1], [0, 0, 1, 1], [], []>} : vector<4x8xbf16>, vector<8x128xbf16>, vector<4x128xf32> -> vector<4x128xf32>
    %553 = arith.truncf %552 : vector<4x128xf32> to vector<4x128xbf16>
    %c3_474 = arith.constant 3 : index
    %c0_475 = arith.constant 0 : index
    %c0_476 = arith.constant 0 : index
    %554 = vector.load %arg12[%c3_474, %c0_475, %c0_476] : memref<9x128x128xbf16, #tpu.memory_space<vmem>>, vector<1x128x128xbf16>
    %555 = vector.shape_cast %554 : vector<1x128x128xbf16> to vector<128x128xbf16>
    %cst_477 = arith.constant dense<0.000000e+00> : vector<4x128xf32>
    %556 = tpu.matmul %553, %555, %cst_477 {dimension_numbers = #tpu.dot_dimension_numbers<[1], [0], [0], [1], [0, 0, 1, 1], [], []>} : vector<4x128xbf16>, vector<128x128xbf16>, vector<4x128xf32> -> vector<4x128xf32>
    %557 = arith.addf %549, %556 : vector<4x128xf32>
    %c4_478 = arith.constant 4 : index
    %c0_479 = arith.constant 0 : index
    %c0_480 = arith.constant 0 : index
    %558 = vector.load %arg11[%c4_478, %c0_479, %c0_480] : memref<9x4x8xbf16, #tpu.memory_space<vmem>>, vector<1x4x8xbf16>
    %559 = vector.shape_cast %558 : vector<1x4x8xbf16> to vector<4x8xbf16>
    %cst_481 = arith.constant dense<0.000000e+00> : vector<4x128xf32>
    %560 = tpu.matmul %559, %524, %cst_481 {dimension_numbers = #tpu.dot_dimension_numbers<[1], [0], [0], [1], [0, 0, 1, 1], [], []>} : vector<4x8xbf16>, vector<8x128xbf16>, vector<4x128xf32> -> vector<4x128xf32>
    %561 = arith.truncf %560 : vector<4x128xf32> to vector<4x128xbf16>
    %c4_482 = arith.constant 4 : index
    %c0_483 = arith.constant 0 : index
    %c0_484 = arith.constant 0 : index
    %562 = vector.load %arg12[%c4_482, %c0_483, %c0_484] : memref<9x128x128xbf16, #tpu.memory_space<vmem>>, vector<1x128x128xbf16>
    %563 = vector.shape_cast %562 : vector<1x128x128xbf16> to vector<128x128xbf16>
    %cst_485 = arith.constant dense<0.000000e+00> : vector<4x128xf32>
    %564 = tpu.matmul %561, %563, %cst_485 {dimension_numbers = #tpu.dot_dimension_numbers<[1], [0], [0], [1], [0, 0, 1, 1], [], []>} : vector<4x128xbf16>, vector<128x128xbf16>, vector<4x128xf32> -> vector<4x128xf32>
    %565 = arith.addf %557, %564 : vector<4x128xf32>
    %c5_486 = arith.constant 5 : index
    %c0_487 = arith.constant 0 : index
    %c0_488 = arith.constant 0 : index
    %566 = vector.load %arg11[%c5_486, %c0_487, %c0_488] : memref<9x4x8xbf16, #tpu.memory_space<vmem>>, vector<1x4x8xbf16>
    %567 = vector.shape_cast %566 : vector<1x4x8xbf16> to vector<4x8xbf16>
    %cst_489 = arith.constant dense<0.000000e+00> : vector<4x128xf32>
    %568 = tpu.matmul %567, %524, %cst_489 {dimension_numbers = #tpu.dot_dimension_numbers<[1], [0], [0], [1], [0, 0, 1, 1], [], []>} : vector<4x8xbf16>, vector<8x128xbf16>, vector<4x128xf32> -> vector<4x128xf32>
    %569 = arith.truncf %568 : vector<4x128xf32> to vector<4x128xbf16>
    %c5_490 = arith.constant 5 : index
    %c0_491 = arith.constant 0 : index
    %c0_492 = arith.constant 0 : index
    %570 = vector.load %arg12[%c5_490, %c0_491, %c0_492] : memref<9x128x128xbf16, #tpu.memory_space<vmem>>, vector<1x128x128xbf16>
    %571 = vector.shape_cast %570 : vector<1x128x128xbf16> to vector<128x128xbf16>
    %cst_493 = arith.constant dense<0.000000e+00> : vector<4x128xf32>
    %572 = tpu.matmul %569, %571, %cst_493 {dimension_numbers = #tpu.dot_dimension_numbers<[1], [0], [0], [1], [0, 0, 1, 1], [], []>} : vector<4x128xbf16>, vector<128x128xbf16>, vector<4x128xf32> -> vector<4x128xf32>
    %573 = arith.addf %565, %572 : vector<4x128xf32>
    %c6_494 = arith.constant 6 : index
    %c0_495 = arith.constant 0 : index
    %c0_496 = arith.constant 0 : index
    %574 = vector.load %arg11[%c6_494, %c0_495, %c0_496] : memref<9x4x8xbf16, #tpu.memory_space<vmem>>, vector<1x4x8xbf16>
    %575 = vector.shape_cast %574 : vector<1x4x8xbf16> to vector<4x8xbf16>
    %cst_497 = arith.constant dense<0.000000e+00> : vector<4x128xf32>
    %576 = tpu.matmul %575, %524, %cst_497 {dimension_numbers = #tpu.dot_dimension_numbers<[1], [0], [0], [1], [0, 0, 1, 1], [], []>} : vector<4x8xbf16>, vector<8x128xbf16>, vector<4x128xf32> -> vector<4x128xf32>
    %577 = arith.truncf %576 : vector<4x128xf32> to vector<4x128xbf16>
    %c6_498 = arith.constant 6 : index
    %c0_499 = arith.constant 0 : index
    %c0_500 = arith.constant 0 : index
    %578 = vector.load %arg12[%c6_498, %c0_499, %c0_500] : memref<9x128x128xbf16, #tpu.memory_space<vmem>>, vector<1x128x128xbf16>
    %579 = vector.shape_cast %578 : vector<1x128x128xbf16> to vector<128x128xbf16>
    %cst_501 = arith.constant dense<0.000000e+00> : vector<4x128xf32>
    %580 = tpu.matmul %577, %579, %cst_501 {dimension_numbers = #tpu.dot_dimension_numbers<[1], [0], [0], [1], [0, 0, 1, 1], [], []>} : vector<4x128xbf16>, vector<128x128xbf16>, vector<4x128xf32> -> vector<4x128xf32>
    %581 = arith.addf %573, %580 : vector<4x128xf32>
    %c7_502 = arith.constant 7 : index
    %c0_503 = arith.constant 0 : index
    %c0_504 = arith.constant 0 : index
    %582 = vector.load %arg11[%c7_502, %c0_503, %c0_504] : memref<9x4x8xbf16, #tpu.memory_space<vmem>>, vector<1x4x8xbf16>
    %583 = vector.shape_cast %582 : vector<1x4x8xbf16> to vector<4x8xbf16>
    %cst_505 = arith.constant dense<0.000000e+00> : vector<4x128xf32>
    %584 = tpu.matmul %583, %524, %cst_505 {dimension_numbers = #tpu.dot_dimension_numbers<[1], [0], [0], [1], [0, 0, 1, 1], [], []>} : vector<4x8xbf16>, vector<8x128xbf16>, vector<4x128xf32> -> vector<4x128xf32>
    %585 = arith.truncf %584 : vector<4x128xf32> to vector<4x128xbf16>
    %c7_506 = arith.constant 7 : index
    %c0_507 = arith.constant 0 : index
    %c0_508 = arith.constant 0 : index
    %586 = vector.load %arg12[%c7_506, %c0_507, %c0_508] : memref<9x128x128xbf16, #tpu.memory_space<vmem>>, vector<1x128x128xbf16>
    %587 = vector.shape_cast %586 : vector<1x128x128xbf16> to vector<128x128xbf16>
    %cst_509 = arith.constant dense<0.000000e+00> : vector<4x128xf32>
    %588 = tpu.matmul %585, %587, %cst_509 {dimension_numbers = #tpu.dot_dimension_numbers<[1], [0], [0], [1], [0, 0, 1, 1], [], []>} : vector<4x128xbf16>, vector<128x128xbf16>, vector<4x128xf32> -> vector<4x128xf32>
    %589 = arith.addf %581, %588 : vector<4x128xf32>
    %c8_510 = arith.constant 8 : index
    %c0_511 = arith.constant 0 : index
    %c0_512 = arith.constant 0 : index
    %590 = vector.load %arg11[%c8_510, %c0_511, %c0_512] : memref<9x4x8xbf16, #tpu.memory_space<vmem>>, vector<1x4x8xbf16>
    %591 = vector.shape_cast %590 : vector<1x4x8xbf16> to vector<4x8xbf16>
    %cst_513 = arith.constant dense<0.000000e+00> : vector<4x128xf32>
    %592 = tpu.matmul %591, %524, %cst_513 {dimension_numbers = #tpu.dot_dimension_numbers<[1], [0], [0], [1], [0, 0, 1, 1], [], []>} : vector<4x8xbf16>, vector<8x128xbf16>, vector<4x128xf32> -> vector<4x128xf32>
    %593 = arith.truncf %592 : vector<4x128xf32> to vector<4x128xbf16>
    %c8_514 = arith.constant 8 : index
    %c0_515 = arith.constant 0 : index
    %c0_516 = arith.constant 0 : index
    %594 = vector.load %arg12[%c8_514, %c0_515, %c0_516] : memref<9x128x128xbf16, #tpu.memory_space<vmem>>, vector<1x128x128xbf16>
    %595 = vector.shape_cast %594 : vector<1x128x128xbf16> to vector<128x128xbf16>
    %cst_517 = arith.constant dense<0.000000e+00> : vector<4x128xf32>
    %596 = tpu.matmul %593, %595, %cst_517 {dimension_numbers = #tpu.dot_dimension_numbers<[1], [0], [0], [1], [0, 0, 1, 1], [], []>} : vector<4x128xbf16>, vector<128x128xbf16>, vector<4x128xf32> -> vector<4x128xf32>
    %597 = arith.addf %589, %596 : vector<4x128xf32>
    %c0_518 = arith.constant 0 : index
    %c0_519 = arith.constant 0 : index
    %598 = vector.load %arg13[%c0_518, %c0_519] : memref<1x128xf32, #tpu.memory_space<vmem>>, vector<1x128xf32>
    %599 = vector.broadcast %598 : vector<1x128xf32> to vector<4x128xf32>
    %600 = arith.addf %597, %599 : vector<4x128xf32>
    %c0_520 = arith.constant 0 : index
    %c0_521 = arith.constant 0 : index
    %601 = vector.load %arg14[%c0_520, %c0_521] : memref<128x128xf32, #tpu.memory_space<vmem>>, vector<128x128xf32>
    %cst_522 = arith.constant dense<0.000000e+00> : vector<128xf32>
    %602 = vector.multi_reduction <add>, %600, %cst_522 [0] : vector<4x128xf32> to vector<128xf32>
    %603 = vector.shape_cast %602 : vector<128xf32> to vector<1x128xf32>
    %cst_523 = arith.constant 4.000000e+00 : f32
    %604 = vector.broadcast %cst_523 : f32 to vector<1x128xf32>
    %605 = arith.divf %603, %604 : vector<1x128xf32>
    %cst_524 = arith.constant dense<0.000000e+00> : vector<1x128xf32>
    %606 = tpu.matmul %605, %601, %cst_524 {dimension_numbers = #tpu.dot_dimension_numbers<[1], [0], [0], [1], [0, 0, 1, 1], [], []>} : vector<1x128xf32>, vector<128x128xf32>, vector<1x128xf32> -> vector<1x128xf32>
    %607 = vector.broadcast %606 : vector<1x128xf32> to vector<4x128xf32>
    %608 = arith.subf %600, %607 : vector<4x128xf32>
    %609 = arith.mulf %608, %608 : vector<4x128xf32>
    %cst_525 = arith.constant dense<0.000000e+00> : vector<128xf32>
    %610 = vector.multi_reduction <add>, %609, %cst_525 [0] : vector<4x128xf32> to vector<128xf32>
    %611 = vector.shape_cast %610 : vector<128xf32> to vector<1x128xf32>
    %cst_526 = arith.constant 4.000000e+00 : f32
    %612 = vector.broadcast %cst_526 : f32 to vector<1x128xf32>
    %613 = arith.divf %611, %612 : vector<1x128xf32>
    %cst_527 = arith.constant dense<0.000000e+00> : vector<1x128xf32>
    %614 = tpu.matmul %613, %601, %cst_527 {dimension_numbers = #tpu.dot_dimension_numbers<[1], [0], [0], [1], [0, 0, 1, 1], [], []>} : vector<1x128xf32>, vector<128x128xf32>, vector<1x128xf32> -> vector<1x128xf32>
    %cst_528 = arith.constant 9.99999974E-6 : f32
    %615 = vector.broadcast %cst_528 : f32 to vector<1x128xf32>
    %616 = arith.addf %614, %615 : vector<1x128xf32>
    %617 = math.rsqrt %616 : vector<1x128xf32>
    %618 = vector.broadcast %617 : vector<1x128xf32> to vector<4x128xf32>
    %619 = arith.mulf %608, %618 : vector<4x128xf32>
    %cst_529 = arith.constant 0.000000e+00 : f32
    %620 = vector.broadcast %cst_529 : f32 to vector<4x128xf32>
    %621 = arith.cmpf oge, %619, %620 : vector<4x128xf32>
    %cst_530 = arith.constant 2.000000e-01 : f32
    %622 = vector.broadcast %cst_530 : f32 to vector<4x128xf32>
    %623 = arith.mulf %622, %619 : vector<4x128xf32>
    %624 = arith.select %621, %619, %623 : vector<4x128xi1>, vector<4x128xf32>
    %625 = arith.truncf %624 : vector<4x128xf32> to vector<4x128xbf16>
    %c0_531 = arith.constant 0 : index
    %c0_532 = arith.constant 0 : index
    %c0_533 = arith.constant 0 : index
    %626 = vector.load %arg2[%c0_531, %c0_532, %c0_533] : memref<1x4x8xf32, #tpu.memory_space<vmem>>, vector<1x4x8xf32>
    %627 = vector.shape_cast %626 : vector<1x4x8xf32> to vector<4x8xf32>
    %628 = arith.truncf %627 : vector<4x8xf32> to vector<4x8xbf16>
    %cst_534 = arith.constant 0.000000e+00 : f32
    %629 = vector.broadcast %cst_534 : f32 to vector<4x128xf32>
    %c0_535 = arith.constant 0 : index
    %c0_536 = arith.constant 0 : index
    %c0_537 = arith.constant 0 : index
    %630 = vector.load %arg15[%c0_535, %c0_536, %c0_537] : memref<9x4x4xbf16, #tpu.memory_space<vmem>>, vector<1x4x4xbf16>
    %631 = vector.shape_cast %630 : vector<1x4x4xbf16> to vector<4x4xbf16>
    %cst_538 = arith.constant dense<0.000000e+00> : vector<4x128xf32>
    %632 = tpu.matmul %631, %625, %cst_538 {dimension_numbers = #tpu.dot_dimension_numbers<[1], [0], [0], [1], [0, 0, 1, 1], [], []>} : vector<4x4xbf16>, vector<4x128xbf16>, vector<4x128xf32> -> vector<4x128xf32>
    %633 = arith.truncf %632 : vector<4x128xf32> to vector<4x128xbf16>
    %c0_539 = arith.constant 0 : index
    %c0_540 = arith.constant 0 : index
    %c0_541 = arith.constant 0 : index
    %634 = vector.load %arg16[%c0_539, %c0_540, %c0_541] : memref<9x128x128xbf16, #tpu.memory_space<vmem>>, vector<1x128x128xbf16>
    %635 = vector.shape_cast %634 : vector<1x128x128xbf16> to vector<128x128xbf16>
    %cst_542 = arith.constant dense<0.000000e+00> : vector<4x128xf32>
    %636 = tpu.matmul %633, %635, %cst_542 {dimension_numbers = #tpu.dot_dimension_numbers<[1], [0], [0], [1], [0, 0, 1, 1], [], []>} : vector<4x128xbf16>, vector<128x128xbf16>, vector<4x128xf32> -> vector<4x128xf32>
    %637 = arith.addf %629, %636 : vector<4x128xf32>
    %c1_543 = arith.constant 1 : index
    %c0_544 = arith.constant 0 : index
    %c0_545 = arith.constant 0 : index
    %638 = vector.load %arg15[%c1_543, %c0_544, %c0_545] : memref<9x4x4xbf16, #tpu.memory_space<vmem>>, vector<1x4x4xbf16>
    %639 = vector.shape_cast %638 : vector<1x4x4xbf16> to vector<4x4xbf16>
    %cst_546 = arith.constant dense<0.000000e+00> : vector<4x128xf32>
    %640 = tpu.matmul %639, %625, %cst_546 {dimension_numbers = #tpu.dot_dimension_numbers<[1], [0], [0], [1], [0, 0, 1, 1], [], []>} : vector<4x4xbf16>, vector<4x128xbf16>, vector<4x128xf32> -> vector<4x128xf32>
    %641 = arith.truncf %640 : vector<4x128xf32> to vector<4x128xbf16>
    %c1_547 = arith.constant 1 : index
    %c0_548 = arith.constant 0 : index
    %c0_549 = arith.constant 0 : index
    %642 = vector.load %arg16[%c1_547, %c0_548, %c0_549] : memref<9x128x128xbf16, #tpu.memory_space<vmem>>, vector<1x128x128xbf16>
    %643 = vector.shape_cast %642 : vector<1x128x128xbf16> to vector<128x128xbf16>
    %cst_550 = arith.constant dense<0.000000e+00> : vector<4x128xf32>
    %644 = tpu.matmul %641, %643, %cst_550 {dimension_numbers = #tpu.dot_dimension_numbers<[1], [0], [0], [1], [0, 0, 1, 1], [], []>} : vector<4x128xbf16>, vector<128x128xbf16>, vector<4x128xf32> -> vector<4x128xf32>
    %645 = arith.addf %637, %644 : vector<4x128xf32>
    %c2_551 = arith.constant 2 : index
    %c0_552 = arith.constant 0 : index
    %c0_553 = arith.constant 0 : index
    %646 = vector.load %arg15[%c2_551, %c0_552, %c0_553] : memref<9x4x4xbf16, #tpu.memory_space<vmem>>, vector<1x4x4xbf16>
    %647 = vector.shape_cast %646 : vector<1x4x4xbf16> to vector<4x4xbf16>
    %cst_554 = arith.constant dense<0.000000e+00> : vector<4x128xf32>
    %648 = tpu.matmul %647, %625, %cst_554 {dimension_numbers = #tpu.dot_dimension_numbers<[1], [0], [0], [1], [0, 0, 1, 1], [], []>} : vector<4x4xbf16>, vector<4x128xbf16>, vector<4x128xf32> -> vector<4x128xf32>
    %649 = arith.truncf %648 : vector<4x128xf32> to vector<4x128xbf16>
    %c2_555 = arith.constant 2 : index
    %c0_556 = arith.constant 0 : index
    %c0_557 = arith.constant 0 : index
    %650 = vector.load %arg16[%c2_555, %c0_556, %c0_557] : memref<9x128x128xbf16, #tpu.memory_space<vmem>>, vector<1x128x128xbf16>
    %651 = vector.shape_cast %650 : vector<1x128x128xbf16> to vector<128x128xbf16>
    %cst_558 = arith.constant dense<0.000000e+00> : vector<4x128xf32>
    %652 = tpu.matmul %649, %651, %cst_558 {dimension_numbers = #tpu.dot_dimension_numbers<[1], [0], [0], [1], [0, 0, 1, 1], [], []>} : vector<4x128xbf16>, vector<128x128xbf16>, vector<4x128xf32> -> vector<4x128xf32>
    %653 = arith.addf %645, %652 : vector<4x128xf32>
    %c3_559 = arith.constant 3 : index
    %c0_560 = arith.constant 0 : index
    %c0_561 = arith.constant 0 : index
    %654 = vector.load %arg15[%c3_559, %c0_560, %c0_561] : memref<9x4x4xbf16, #tpu.memory_space<vmem>>, vector<1x4x4xbf16>
    %655 = vector.shape_cast %654 : vector<1x4x4xbf16> to vector<4x4xbf16>
    %cst_562 = arith.constant dense<0.000000e+00> : vector<4x128xf32>
    %656 = tpu.matmul %655, %625, %cst_562 {dimension_numbers = #tpu.dot_dimension_numbers<[1], [0], [0], [1], [0, 0, 1, 1], [], []>} : vector<4x4xbf16>, vector<4x128xbf16>, vector<4x128xf32> -> vector<4x128xf32>
    %657 = arith.truncf %656 : vector<4x128xf32> to vector<4x128xbf16>
    %c3_563 = arith.constant 3 : index
    %c0_564 = arith.constant 0 : index
    %c0_565 = arith.constant 0 : index
    %658 = vector.load %arg16[%c3_563, %c0_564, %c0_565] : memref<9x128x128xbf16, #tpu.memory_space<vmem>>, vector<1x128x128xbf16>
    %659 = vector.shape_cast %658 : vector<1x128x128xbf16> to vector<128x128xbf16>
    %cst_566 = arith.constant dense<0.000000e+00> : vector<4x128xf32>
    %660 = tpu.matmul %657, %659, %cst_566 {dimension_numbers = #tpu.dot_dimension_numbers<[1], [0], [0], [1], [0, 0, 1, 1], [], []>} : vector<4x128xbf16>, vector<128x128xbf16>, vector<4x128xf32> -> vector<4x128xf32>
    %661 = arith.addf %653, %660 : vector<4x128xf32>
    %c4_567 = arith.constant 4 : index
    %c0_568 = arith.constant 0 : index
    %c0_569 = arith.constant 0 : index
    %662 = vector.load %arg15[%c4_567, %c0_568, %c0_569] : memref<9x4x4xbf16, #tpu.memory_space<vmem>>, vector<1x4x4xbf16>
    %663 = vector.shape_cast %662 : vector<1x4x4xbf16> to vector<4x4xbf16>
    %cst_570 = arith.constant dense<0.000000e+00> : vector<4x128xf32>
    %664 = tpu.matmul %663, %625, %cst_570 {dimension_numbers = #tpu.dot_dimension_numbers<[1], [0], [0], [1], [0, 0, 1, 1], [], []>} : vector<4x4xbf16>, vector<4x128xbf16>, vector<4x128xf32> -> vector<4x128xf32>
    %665 = arith.truncf %664 : vector<4x128xf32> to vector<4x128xbf16>
    %c4_571 = arith.constant 4 : index
    %c0_572 = arith.constant 0 : index
    %c0_573 = arith.constant 0 : index
    %666 = vector.load %arg16[%c4_571, %c0_572, %c0_573] : memref<9x128x128xbf16, #tpu.memory_space<vmem>>, vector<1x128x128xbf16>
    %667 = vector.shape_cast %666 : vector<1x128x128xbf16> to vector<128x128xbf16>
    %cst_574 = arith.constant dense<0.000000e+00> : vector<4x128xf32>
    %668 = tpu.matmul %665, %667, %cst_574 {dimension_numbers = #tpu.dot_dimension_numbers<[1], [0], [0], [1], [0, 0, 1, 1], [], []>} : vector<4x128xbf16>, vector<128x128xbf16>, vector<4x128xf32> -> vector<4x128xf32>
    %669 = arith.addf %661, %668 : vector<4x128xf32>
    %c5_575 = arith.constant 5 : index
    %c0_576 = arith.constant 0 : index
    %c0_577 = arith.constant 0 : index
    %670 = vector.load %arg15[%c5_575, %c0_576, %c0_577] : memref<9x4x4xbf16, #tpu.memory_space<vmem>>, vector<1x4x4xbf16>
    %671 = vector.shape_cast %670 : vector<1x4x4xbf16> to vector<4x4xbf16>
    %cst_578 = arith.constant dense<0.000000e+00> : vector<4x128xf32>
    %672 = tpu.matmul %671, %625, %cst_578 {dimension_numbers = #tpu.dot_dimension_numbers<[1], [0], [0], [1], [0, 0, 1, 1], [], []>} : vector<4x4xbf16>, vector<4x128xbf16>, vector<4x128xf32> -> vector<4x128xf32>
    %673 = arith.truncf %672 : vector<4x128xf32> to vector<4x128xbf16>
    %c5_579 = arith.constant 5 : index
    %c0_580 = arith.constant 0 : index
    %c0_581 = arith.constant 0 : index
    %674 = vector.load %arg16[%c5_579, %c0_580, %c0_581] : memref<9x128x128xbf16, #tpu.memory_space<vmem>>, vector<1x128x128xbf16>
    %675 = vector.shape_cast %674 : vector<1x128x128xbf16> to vector<128x128xbf16>
    %cst_582 = arith.constant dense<0.000000e+00> : vector<4x128xf32>
    %676 = tpu.matmul %673, %675, %cst_582 {dimension_numbers = #tpu.dot_dimension_numbers<[1], [0], [0], [1], [0, 0, 1, 1], [], []>} : vector<4x128xbf16>, vector<128x128xbf16>, vector<4x128xf32> -> vector<4x128xf32>
    %677 = arith.addf %669, %676 : vector<4x128xf32>
    %c6_583 = arith.constant 6 : index
    %c0_584 = arith.constant 0 : index
    %c0_585 = arith.constant 0 : index
    %678 = vector.load %arg15[%c6_583, %c0_584, %c0_585] : memref<9x4x4xbf16, #tpu.memory_space<vmem>>, vector<1x4x4xbf16>
    %679 = vector.shape_cast %678 : vector<1x4x4xbf16> to vector<4x4xbf16>
    %cst_586 = arith.constant dense<0.000000e+00> : vector<4x128xf32>
    %680 = tpu.matmul %679, %625, %cst_586 {dimension_numbers = #tpu.dot_dimension_numbers<[1], [0], [0], [1], [0, 0, 1, 1], [], []>} : vector<4x4xbf16>, vector<4x128xbf16>, vector<4x128xf32> -> vector<4x128xf32>
    %681 = arith.truncf %680 : vector<4x128xf32> to vector<4x128xbf16>
    %c6_587 = arith.constant 6 : index
    %c0_588 = arith.constant 0 : index
    %c0_589 = arith.constant 0 : index
    %682 = vector.load %arg16[%c6_587, %c0_588, %c0_589] : memref<9x128x128xbf16, #tpu.memory_space<vmem>>, vector<1x128x128xbf16>
    %683 = vector.shape_cast %682 : vector<1x128x128xbf16> to vector<128x128xbf16>
    %cst_590 = arith.constant dense<0.000000e+00> : vector<4x128xf32>
    %684 = tpu.matmul %681, %683, %cst_590 {dimension_numbers = #tpu.dot_dimension_numbers<[1], [0], [0], [1], [0, 0, 1, 1], [], []>} : vector<4x128xbf16>, vector<128x128xbf16>, vector<4x128xf32> -> vector<4x128xf32>
    %685 = arith.addf %677, %684 : vector<4x128xf32>
    %c7_591 = arith.constant 7 : index
    %c0_592 = arith.constant 0 : index
    %c0_593 = arith.constant 0 : index
    %686 = vector.load %arg15[%c7_591, %c0_592, %c0_593] : memref<9x4x4xbf16, #tpu.memory_space<vmem>>, vector<1x4x4xbf16>
    %687 = vector.shape_cast %686 : vector<1x4x4xbf16> to vector<4x4xbf16>
    %cst_594 = arith.constant dense<0.000000e+00> : vector<4x128xf32>
    %688 = tpu.matmul %687, %625, %cst_594 {dimension_numbers = #tpu.dot_dimension_numbers<[1], [0], [0], [1], [0, 0, 1, 1], [], []>} : vector<4x4xbf16>, vector<4x128xbf16>, vector<4x128xf32> -> vector<4x128xf32>
    %689 = arith.truncf %688 : vector<4x128xf32> to vector<4x128xbf16>
    %c7_595 = arith.constant 7 : index
    %c0_596 = arith.constant 0 : index
    %c0_597 = arith.constant 0 : index
    %690 = vector.load %arg16[%c7_595, %c0_596, %c0_597] : memref<9x128x128xbf16, #tpu.memory_space<vmem>>, vector<1x128x128xbf16>
    %691 = vector.shape_cast %690 : vector<1x128x128xbf16> to vector<128x128xbf16>
    %cst_598 = arith.constant dense<0.000000e+00> : vector<4x128xf32>
    %692 = tpu.matmul %689, %691, %cst_598 {dimension_numbers = #tpu.dot_dimension_numbers<[1], [0], [0], [1], [0, 0, 1, 1], [], []>} : vector<4x128xbf16>, vector<128x128xbf16>, vector<4x128xf32> -> vector<4x128xf32>
    %693 = arith.addf %685, %692 : vector<4x128xf32>
    %c8_599 = arith.constant 8 : index
    %c0_600 = arith.constant 0 : index
    %c0_601 = arith.constant 0 : index
    %694 = vector.load %arg15[%c8_599, %c0_600, %c0_601] : memref<9x4x4xbf16, #tpu.memory_space<vmem>>, vector<1x4x4xbf16>
    %695 = vector.shape_cast %694 : vector<1x4x4xbf16> to vector<4x4xbf16>
    %cst_602 = arith.constant dense<0.000000e+00> : vector<4x128xf32>
    %696 = tpu.matmul %695, %625, %cst_602 {dimension_numbers = #tpu.dot_dimension_numbers<[1], [0], [0], [1], [0, 0, 1, 1], [], []>} : vector<4x4xbf16>, vector<4x128xbf16>, vector<4x128xf32> -> vector<4x128xf32>
    %697 = arith.truncf %696 : vector<4x128xf32> to vector<4x128xbf16>
    %c8_603 = arith.constant 8 : index
    %c0_604 = arith.constant 0 : index
    %c0_605 = arith.constant 0 : index
    %698 = vector.load %arg16[%c8_603, %c0_604, %c0_605] : memref<9x128x128xbf16, #tpu.memory_space<vmem>>, vector<1x128x128xbf16>
    %699 = vector.shape_cast %698 : vector<1x128x128xbf16> to vector<128x128xbf16>
    %cst_606 = arith.constant dense<0.000000e+00> : vector<4x128xf32>
    %700 = tpu.matmul %697, %699, %cst_606 {dimension_numbers = #tpu.dot_dimension_numbers<[1], [0], [0], [1], [0, 0, 1, 1], [], []>} : vector<4x128xbf16>, vector<128x128xbf16>, vector<4x128xf32> -> vector<4x128xf32>
    %701 = arith.addf %693, %700 : vector<4x128xf32>
    %cst_607 = arith.constant 0.000000e+00 : f32
    %702 = vector.broadcast %cst_607 : f32 to vector<4x128xf32>
    %c0_608 = arith.constant 0 : index
    %c0_609 = arith.constant 0 : index
    %c0_610 = arith.constant 0 : index
    %703 = vector.load %arg15[%c0_608, %c0_609, %c0_610] : memref<9x4x4xbf16, #tpu.memory_space<vmem>>, vector<1x4x4xbf16>
    %704 = vector.shape_cast %703 : vector<1x4x4xbf16> to vector<4x4xbf16>
    %cst_611 = arith.constant dense<0.000000e+00> : vector<4x8xf32>
    %705 = tpu.matmul %704, %628, %cst_611 {dimension_numbers = #tpu.dot_dimension_numbers<[1], [0], [0], [1], [0, 0, 1, 1], [], []>} : vector<4x4xbf16>, vector<4x8xbf16>, vector<4x8xf32> -> vector<4x8xf32>
    %706 = arith.truncf %705 : vector<4x8xf32> to vector<4x8xbf16>
    %c0_612 = arith.constant 0 : index
    %c0_613 = arith.constant 0 : index
    %c0_614 = arith.constant 0 : index
    %707 = vector.load %arg17[%c0_612, %c0_613, %c0_614] : memref<9x8x128xbf16, #tpu.memory_space<vmem>>, vector<1x8x128xbf16>
    %708 = vector.shape_cast %707 : vector<1x8x128xbf16> to vector<8x128xbf16>
    %cst_615 = arith.constant dense<0.000000e+00> : vector<4x128xf32>
    %709 = tpu.matmul %706, %708, %cst_615 {dimension_numbers = #tpu.dot_dimension_numbers<[1], [0], [0], [1], [0, 0, 1, 1], [], []>} : vector<4x8xbf16>, vector<8x128xbf16>, vector<4x128xf32> -> vector<4x128xf32>
    %710 = arith.addf %702, %709 : vector<4x128xf32>
    %c1_616 = arith.constant 1 : index
    %c0_617 = arith.constant 0 : index
    %c0_618 = arith.constant 0 : index
    %711 = vector.load %arg15[%c1_616, %c0_617, %c0_618] : memref<9x4x4xbf16, #tpu.memory_space<vmem>>, vector<1x4x4xbf16>
    %712 = vector.shape_cast %711 : vector<1x4x4xbf16> to vector<4x4xbf16>
    %cst_619 = arith.constant dense<0.000000e+00> : vector<4x8xf32>
    %713 = tpu.matmul %712, %628, %cst_619 {dimension_numbers = #tpu.dot_dimension_numbers<[1], [0], [0], [1], [0, 0, 1, 1], [], []>} : vector<4x4xbf16>, vector<4x8xbf16>, vector<4x8xf32> -> vector<4x8xf32>
    %714 = arith.truncf %713 : vector<4x8xf32> to vector<4x8xbf16>
    %c1_620 = arith.constant 1 : index
    %c0_621 = arith.constant 0 : index
    %c0_622 = arith.constant 0 : index
    %715 = vector.load %arg17[%c1_620, %c0_621, %c0_622] : memref<9x8x128xbf16, #tpu.memory_space<vmem>>, vector<1x8x128xbf16>
    %716 = vector.shape_cast %715 : vector<1x8x128xbf16> to vector<8x128xbf16>
    %cst_623 = arith.constant dense<0.000000e+00> : vector<4x128xf32>
    %717 = tpu.matmul %714, %716, %cst_623 {dimension_numbers = #tpu.dot_dimension_numbers<[1], [0], [0], [1], [0, 0, 1, 1], [], []>} : vector<4x8xbf16>, vector<8x128xbf16>, vector<4x128xf32> -> vector<4x128xf32>
    %718 = arith.addf %710, %717 : vector<4x128xf32>
    %c2_624 = arith.constant 2 : index
    %c0_625 = arith.constant 0 : index
    %c0_626 = arith.constant 0 : index
    %719 = vector.load %arg15[%c2_624, %c0_625, %c0_626] : memref<9x4x4xbf16, #tpu.memory_space<vmem>>, vector<1x4x4xbf16>
    %720 = vector.shape_cast %719 : vector<1x4x4xbf16> to vector<4x4xbf16>
    %cst_627 = arith.constant dense<0.000000e+00> : vector<4x8xf32>
    %721 = tpu.matmul %720, %628, %cst_627 {dimension_numbers = #tpu.dot_dimension_numbers<[1], [0], [0], [1], [0, 0, 1, 1], [], []>} : vector<4x4xbf16>, vector<4x8xbf16>, vector<4x8xf32> -> vector<4x8xf32>
    %722 = arith.truncf %721 : vector<4x8xf32> to vector<4x8xbf16>
    %c2_628 = arith.constant 2 : index
    %c0_629 = arith.constant 0 : index
    %c0_630 = arith.constant 0 : index
    %723 = vector.load %arg17[%c2_628, %c0_629, %c0_630] : memref<9x8x128xbf16, #tpu.memory_space<vmem>>, vector<1x8x128xbf16>
    %724 = vector.shape_cast %723 : vector<1x8x128xbf16> to vector<8x128xbf16>
    %cst_631 = arith.constant dense<0.000000e+00> : vector<4x128xf32>
    %725 = tpu.matmul %722, %724, %cst_631 {dimension_numbers = #tpu.dot_dimension_numbers<[1], [0], [0], [1], [0, 0, 1, 1], [], []>} : vector<4x8xbf16>, vector<8x128xbf16>, vector<4x128xf32> -> vector<4x128xf32>
    %726 = arith.addf %718, %725 : vector<4x128xf32>
    %c3_632 = arith.constant 3 : index
    %c0_633 = arith.constant 0 : index
    %c0_634 = arith.constant 0 : index
    %727 = vector.load %arg15[%c3_632, %c0_633, %c0_634] : memref<9x4x4xbf16, #tpu.memory_space<vmem>>, vector<1x4x4xbf16>
    %728 = vector.shape_cast %727 : vector<1x4x4xbf16> to vector<4x4xbf16>
    %cst_635 = arith.constant dense<0.000000e+00> : vector<4x8xf32>
    %729 = tpu.matmul %728, %628, %cst_635 {dimension_numbers = #tpu.dot_dimension_numbers<[1], [0], [0], [1], [0, 0, 1, 1], [], []>} : vector<4x4xbf16>, vector<4x8xbf16>, vector<4x8xf32> -> vector<4x8xf32>
    %730 = arith.truncf %729 : vector<4x8xf32> to vector<4x8xbf16>
    %c3_636 = arith.constant 3 : index
    %c0_637 = arith.constant 0 : index
    %c0_638 = arith.constant 0 : index
    %731 = vector.load %arg17[%c3_636, %c0_637, %c0_638] : memref<9x8x128xbf16, #tpu.memory_space<vmem>>, vector<1x8x128xbf16>
    %732 = vector.shape_cast %731 : vector<1x8x128xbf16> to vector<8x128xbf16>
    %cst_639 = arith.constant dense<0.000000e+00> : vector<4x128xf32>
    %733 = tpu.matmul %730, %732, %cst_639 {dimension_numbers = #tpu.dot_dimension_numbers<[1], [0], [0], [1], [0, 0, 1, 1], [], []>} : vector<4x8xbf16>, vector<8x128xbf16>, vector<4x128xf32> -> vector<4x128xf32>
    %734 = arith.addf %726, %733 : vector<4x128xf32>
    %c4_640 = arith.constant 4 : index
    %c0_641 = arith.constant 0 : index
    %c0_642 = arith.constant 0 : index
    %735 = vector.load %arg15[%c4_640, %c0_641, %c0_642] : memref<9x4x4xbf16, #tpu.memory_space<vmem>>, vector<1x4x4xbf16>
    %736 = vector.shape_cast %735 : vector<1x4x4xbf16> to vector<4x4xbf16>
    %cst_643 = arith.constant dense<0.000000e+00> : vector<4x8xf32>
    %737 = tpu.matmul %736, %628, %cst_643 {dimension_numbers = #tpu.dot_dimension_numbers<[1], [0], [0], [1], [0, 0, 1, 1], [], []>} : vector<4x4xbf16>, vector<4x8xbf16>, vector<4x8xf32> -> vector<4x8xf32>
    %738 = arith.truncf %737 : vector<4x8xf32> to vector<4x8xbf16>
    %c4_644 = arith.constant 4 : index
    %c0_645 = arith.constant 0 : index
    %c0_646 = arith.constant 0 : index
    %739 = vector.load %arg17[%c4_644, %c0_645, %c0_646] : memref<9x8x128xbf16, #tpu.memory_space<vmem>>, vector<1x8x128xbf16>
    %740 = vector.shape_cast %739 : vector<1x8x128xbf16> to vector<8x128xbf16>
    %cst_647 = arith.constant dense<0.000000e+00> : vector<4x128xf32>
    %741 = tpu.matmul %738, %740, %cst_647 {dimension_numbers = #tpu.dot_dimension_numbers<[1], [0], [0], [1], [0, 0, 1, 1], [], []>} : vector<4x8xbf16>, vector<8x128xbf16>, vector<4x128xf32> -> vector<4x128xf32>
    %742 = arith.addf %734, %741 : vector<4x128xf32>
    %c5_648 = arith.constant 5 : index
    %c0_649 = arith.constant 0 : index
    %c0_650 = arith.constant 0 : index
    %743 = vector.load %arg15[%c5_648, %c0_649, %c0_650] : memref<9x4x4xbf16, #tpu.memory_space<vmem>>, vector<1x4x4xbf16>
    %744 = vector.shape_cast %743 : vector<1x4x4xbf16> to vector<4x4xbf16>
    %cst_651 = arith.constant dense<0.000000e+00> : vector<4x8xf32>
    %745 = tpu.matmul %744, %628, %cst_651 {dimension_numbers = #tpu.dot_dimension_numbers<[1], [0], [0], [1], [0, 0, 1, 1], [], []>} : vector<4x4xbf16>, vector<4x8xbf16>, vector<4x8xf32> -> vector<4x8xf32>
    %746 = arith.truncf %745 : vector<4x8xf32> to vector<4x8xbf16>
    %c5_652 = arith.constant 5 : index
    %c0_653 = arith.constant 0 : index
    %c0_654 = arith.constant 0 : index
    %747 = vector.load %arg17[%c5_652, %c0_653, %c0_654] : memref<9x8x128xbf16, #tpu.memory_space<vmem>>, vector<1x8x128xbf16>
    %748 = vector.shape_cast %747 : vector<1x8x128xbf16> to vector<8x128xbf16>
    %cst_655 = arith.constant dense<0.000000e+00> : vector<4x128xf32>
    %749 = tpu.matmul %746, %748, %cst_655 {dimension_numbers = #tpu.dot_dimension_numbers<[1], [0], [0], [1], [0, 0, 1, 1], [], []>} : vector<4x8xbf16>, vector<8x128xbf16>, vector<4x128xf32> -> vector<4x128xf32>
    %750 = arith.addf %742, %749 : vector<4x128xf32>
    %c6_656 = arith.constant 6 : index
    %c0_657 = arith.constant 0 : index
    %c0_658 = arith.constant 0 : index
    %751 = vector.load %arg15[%c6_656, %c0_657, %c0_658] : memref<9x4x4xbf16, #tpu.memory_space<vmem>>, vector<1x4x4xbf16>
    %752 = vector.shape_cast %751 : vector<1x4x4xbf16> to vector<4x4xbf16>
    %cst_659 = arith.constant dense<0.000000e+00> : vector<4x8xf32>
    %753 = tpu.matmul %752, %628, %cst_659 {dimension_numbers = #tpu.dot_dimension_numbers<[1], [0], [0], [1], [0, 0, 1, 1], [], []>} : vector<4x4xbf16>, vector<4x8xbf16>, vector<4x8xf32> -> vector<4x8xf32>
    %754 = arith.truncf %753 : vector<4x8xf32> to vector<4x8xbf16>
    %c6_660 = arith.constant 6 : index
    %c0_661 = arith.constant 0 : index
    %c0_662 = arith.constant 0 : index
    %755 = vector.load %arg17[%c6_660, %c0_661, %c0_662] : memref<9x8x128xbf16, #tpu.memory_space<vmem>>, vector<1x8x128xbf16>
    %756 = vector.shape_cast %755 : vector<1x8x128xbf16> to vector<8x128xbf16>
    %cst_663 = arith.constant dense<0.000000e+00> : vector<4x128xf32>
    %757 = tpu.matmul %754, %756, %cst_663 {dimension_numbers = #tpu.dot_dimension_numbers<[1], [0], [0], [1], [0, 0, 1, 1], [], []>} : vector<4x8xbf16>, vector<8x128xbf16>, vector<4x128xf32> -> vector<4x128xf32>
    %758 = arith.addf %750, %757 : vector<4x128xf32>
    %c7_664 = arith.constant 7 : index
    %c0_665 = arith.constant 0 : index
    %c0_666 = arith.constant 0 : index
    %759 = vector.load %arg15[%c7_664, %c0_665, %c0_666] : memref<9x4x4xbf16, #tpu.memory_space<vmem>>, vector<1x4x4xbf16>
    %760 = vector.shape_cast %759 : vector<1x4x4xbf16> to vector<4x4xbf16>
    %cst_667 = arith.constant dense<0.000000e+00> : vector<4x8xf32>
    %761 = tpu.matmul %760, %628, %cst_667 {dimension_numbers = #tpu.dot_dimension_numbers<[1], [0], [0], [1], [0, 0, 1, 1], [], []>} : vector<4x4xbf16>, vector<4x8xbf16>, vector<4x8xf32> -> vector<4x8xf32>
    %762 = arith.truncf %761 : vector<4x8xf32> to vector<4x8xbf16>
    %c7_668 = arith.constant 7 : index
    %c0_669 = arith.constant 0 : index
    %c0_670 = arith.constant 0 : index
    %763 = vector.load %arg17[%c7_668, %c0_669, %c0_670] : memref<9x8x128xbf16, #tpu.memory_space<vmem>>, vector<1x8x128xbf16>
    %764 = vector.shape_cast %763 : vector<1x8x128xbf16> to vector<8x128xbf16>
    %cst_671 = arith.constant dense<0.000000e+00> : vector<4x128xf32>
    %765 = tpu.matmul %762, %764, %cst_671 {dimension_numbers = #tpu.dot_dimension_numbers<[1], [0], [0], [1], [0, 0, 1, 1], [], []>} : vector<4x8xbf16>, vector<8x128xbf16>, vector<4x128xf32> -> vector<4x128xf32>
    %766 = arith.addf %758, %765 : vector<4x128xf32>
    %c8_672 = arith.constant 8 : index
    %c0_673 = arith.constant 0 : index
    %c0_674 = arith.constant 0 : index
    %767 = vector.load %arg15[%c8_672, %c0_673, %c0_674] : memref<9x4x4xbf16, #tpu.memory_space<vmem>>, vector<1x4x4xbf16>
    %768 = vector.shape_cast %767 : vector<1x4x4xbf16> to vector<4x4xbf16>
    %cst_675 = arith.constant dense<0.000000e+00> : vector<4x8xf32>
    %769 = tpu.matmul %768, %628, %cst_675 {dimension_numbers = #tpu.dot_dimension_numbers<[1], [0], [0], [1], [0, 0, 1, 1], [], []>} : vector<4x4xbf16>, vector<4x8xbf16>, vector<4x8xf32> -> vector<4x8xf32>
    %770 = arith.truncf %769 : vector<4x8xf32> to vector<4x8xbf16>
    %c8_676 = arith.constant 8 : index
    %c0_677 = arith.constant 0 : index
    %c0_678 = arith.constant 0 : index
    %771 = vector.load %arg17[%c8_676, %c0_677, %c0_678] : memref<9x8x128xbf16, #tpu.memory_space<vmem>>, vector<1x8x128xbf16>
    %772 = vector.shape_cast %771 : vector<1x8x128xbf16> to vector<8x128xbf16>
    %cst_679 = arith.constant dense<0.000000e+00> : vector<4x128xf32>
    %773 = tpu.matmul %770, %772, %cst_679 {dimension_numbers = #tpu.dot_dimension_numbers<[1], [0], [0], [1], [0, 0, 1, 1], [], []>} : vector<4x8xbf16>, vector<8x128xbf16>, vector<4x128xf32> -> vector<4x128xf32>
    %774 = arith.addf %766, %773 : vector<4x128xf32>
    %775 = arith.addf %701, %774 : vector<4x128xf32>
    %c0_680 = arith.constant 0 : index
    %c0_681 = arith.constant 0 : index
    %776 = vector.load %arg18[%c0_680, %c0_681] : memref<1x128xf32, #tpu.memory_space<vmem>>, vector<1x128xf32>
    %777 = vector.broadcast %776 : vector<1x128xf32> to vector<4x128xf32>
    %778 = arith.addf %775, %777 : vector<4x128xf32>
    %c0_682 = arith.constant 0 : index
    %c0_683 = arith.constant 0 : index
    %779 = vector.load %arg19[%c0_682, %c0_683] : memref<128x128xf32, #tpu.memory_space<vmem>>, vector<128x128xf32>
    %cst_684 = arith.constant dense<0.000000e+00> : vector<128xf32>
    %780 = vector.multi_reduction <add>, %778, %cst_684 [0] : vector<4x128xf32> to vector<128xf32>
    %781 = vector.shape_cast %780 : vector<128xf32> to vector<1x128xf32>
    %cst_685 = arith.constant 4.000000e+00 : f32
    %782 = vector.broadcast %cst_685 : f32 to vector<1x128xf32>
    %783 = arith.divf %781, %782 : vector<1x128xf32>
    %cst_686 = arith.constant dense<0.000000e+00> : vector<1x128xf32>
    %784 = tpu.matmul %783, %779, %cst_686 {dimension_numbers = #tpu.dot_dimension_numbers<[1], [0], [0], [1], [0, 0, 1, 1], [], []>} : vector<1x128xf32>, vector<128x128xf32>, vector<1x128xf32> -> vector<1x128xf32>
    %785 = vector.broadcast %784 : vector<1x128xf32> to vector<4x128xf32>
    %786 = arith.subf %778, %785 : vector<4x128xf32>
    %787 = arith.mulf %786, %786 : vector<4x128xf32>
    %cst_687 = arith.constant dense<0.000000e+00> : vector<128xf32>
    %788 = vector.multi_reduction <add>, %787, %cst_687 [0] : vector<4x128xf32> to vector<128xf32>
    %789 = vector.shape_cast %788 : vector<128xf32> to vector<1x128xf32>
    %cst_688 = arith.constant 4.000000e+00 : f32
    %790 = vector.broadcast %cst_688 : f32 to vector<1x128xf32>
    %791 = arith.divf %789, %790 : vector<1x128xf32>
    %cst_689 = arith.constant dense<0.000000e+00> : vector<1x128xf32>
    %792 = tpu.matmul %791, %779, %cst_689 {dimension_numbers = #tpu.dot_dimension_numbers<[1], [0], [0], [1], [0, 0, 1, 1], [], []>} : vector<1x128xf32>, vector<128x128xf32>, vector<1x128xf32> -> vector<1x128xf32>
    %cst_690 = arith.constant 9.99999974E-6 : f32
    %793 = vector.broadcast %cst_690 : f32 to vector<1x128xf32>
    %794 = arith.addf %792, %793 : vector<1x128xf32>
    %795 = math.rsqrt %794 : vector<1x128xf32>
    %796 = vector.broadcast %795 : vector<1x128xf32> to vector<4x128xf32>
    %797 = arith.mulf %786, %796 : vector<4x128xf32>
    %cst_691 = arith.constant 0.000000e+00 : f32
    %798 = vector.broadcast %cst_691 : f32 to vector<4x128xf32>
    %799 = arith.cmpf oge, %797, %798 : vector<4x128xf32>
    %cst_692 = arith.constant 2.000000e-01 : f32
    %800 = vector.broadcast %cst_692 : f32 to vector<4x128xf32>
    %801 = arith.mulf %800, %797 : vector<4x128xf32>
    %802 = arith.select %799, %797, %801 : vector<4x128xi1>, vector<4x128xf32>
    %cst_693 = arith.constant dense<0.000000e+00> : vector<128xf32>
    %803 = vector.multi_reduction <add>, %802, %cst_693 [0] : vector<4x128xf32> to vector<128xf32>
    %804 = vector.shape_cast %803 : vector<128xf32> to vector<1x128xf32>
    %cst_694 = arith.constant 4.000000e+00 : f32
    %805 = vector.broadcast %cst_694 : f32 to vector<1x128xf32>
    %806 = arith.divf %804, %805 : vector<1x128xf32>
    %c0_695 = arith.constant 0 : index
    %c0_696 = arith.constant 0 : index
    %807 = vector.load %arg20[%c0_695, %c0_696] : memref<128x32xf32, #tpu.memory_space<vmem>>, vector<128x32xf32>
    %cst_697 = arith.constant dense<0.000000e+00> : vector<1x32xf32>
    %808 = tpu.matmul %806, %807, %cst_697 {dimension_numbers = #tpu.dot_dimension_numbers<[1], [0], [0], [1], [0, 0, 1, 1], [], []>} : vector<1x128xf32>, vector<128x32xf32>, vector<1x32xf32> -> vector<1x32xf32>
    %c0_698 = arith.constant 0 : index
    %c0_699 = arith.constant 0 : index
    %809 = vector.load %arg21[%c0_698, %c0_699] : memref<32x128xf32, #tpu.memory_space<vmem>>, vector<32x128xf32>
    %cst_700 = arith.constant dense<0.000000e+00> : vector<1x128xf32>
    %810 = tpu.matmul %808, %809, %cst_700 {dimension_numbers = #tpu.dot_dimension_numbers<[1], [0], [0], [1], [0, 0, 1, 1], [], []>} : vector<1x32xf32>, vector<32x128xf32>, vector<1x128xf32> -> vector<1x128xf32>
    %cst_701 = arith.constant 0.000000e+00 : f32
    %811 = vector.broadcast %cst_701 : f32 to vector<1x128xf32>
    %812 = arith.cmpf oge, %810, %811 : vector<1x128xf32>
    %cst_702 = arith.constant 2.000000e-01 : f32
    %813 = vector.broadcast %cst_702 : f32 to vector<1x128xf32>
    %814 = arith.mulf %813, %810 : vector<1x128xf32>
    %815 = arith.select %812, %810, %814 : vector<1x128xi1>, vector<1x128xf32>
    %c0_703 = arith.constant 0 : index
    %c0_704 = arith.constant 0 : index
    %c0_705 = arith.constant 0 : index
    %816 = vector.load %arg22[%c0_703, %c0_704, %c0_705] : memref<1x1x128xf32, #tpu.memory_space<vmem>>, vector<1x1x128xf32>
    %817 = vector.shape_cast %816 : vector<1x1x128xf32> to vector<1x128xf32>
    %818 = vector.shape_cast %815 : vector<1x128xf32> to vector<1x1x128xf32>
    tpu.vector_store %arg22[%c0_703, %c0_704, %c0_705], %818 {strides = array<i32>} : memref<1x1x128xf32, #tpu.memory_space<vmem>>, vector<1x1x128xf32>,
    return
  }
  func.func @transform_0(%arg0: i32) -> (i32, i32, i32) {
    %c0_i32 = arith.constant 0 : i32
    %c0_i32_0 = arith.constant 0 : i32
    %c0_i32_1 = arith.constant 0 : i32
    return %arg0, %c0_i32, %c0_i32_0 : i32, i32, i32
  }
  func.func @transform_1(%arg0: i32) -> (i32, i32, i32) {
    %c0_i32 = arith.constant 0 : i32
    %c0_i32_0 = arith.constant 0 : i32
    %c0_i32_1 = arith.constant 0 : i32
    return %arg0, %c0_i32, %c0_i32_0 : i32, i32, i32
  }
  func.func @transform_2(%arg0: i32) -> (i32, i32, i32) {
    %c0_i32 = arith.constant 0 : i32
    %c0_i32_0 = arith.constant 0 : i32
    %c0_i32_1 = arith.constant 0 : i32
    %c0_i32_2 = arith.constant 0 : i32
    return %c0_i32, %c0_i32_0, %c0_i32_1 : i32, i32, i32
  }
  func.func @transform_3(%arg0: i32) -> (i32, i32, i32) {
    %c0_i32 = arith.constant 0 : i32
    %c0_i32_0 = arith.constant 0 : i32
    %c0_i32_1 = arith.constant 0 : i32
    %c0_i32_2 = arith.constant 0 : i32
    return %c0_i32, %c0_i32_0, %c0_i32_1 : i32, i32, i32
  }
  func.func @transform_4(%arg0: i32) -> (i32, i32) {
    %c0_i32 = arith.constant 0 : i32
    %c0_i32_0 = arith.constant 0 : i32
    %c0_i32_1 = arith.constant 0 : i32
    return %c0_i32, %c0_i32_0 : i32, i32
  }
  func.func @transform_5(%arg0: i32) -> (i32, i32) {
    %c0_i32 = arith.constant 0 : i32
    %c0_i32_0 = arith.constant 0 : i32
    %c0_i32_1 = arith.constant 0 : i32
    return %c0_i32, %c0_i32_0 : i32, i32
  }
  func.func @transform_6(%arg0: i32) -> (i32, i32, i32) {
    %c0_i32 = arith.constant 0 : i32
    %c0_i32_0 = arith.constant 0 : i32
    %c0_i32_1 = arith.constant 0 : i32
    %c0_i32_2 = arith.constant 0 : i32
    return %c0_i32, %c0_i32_0, %c0_i32_1 : i32, i32, i32
  }
  func.func @transform_7(%arg0: i32) -> (i32, i32, i32) {
    %c0_i32 = arith.constant 0 : i32
    %c0_i32_0 = arith.constant 0 : i32
    %c0_i32_1 = arith.constant 0 : i32
    %c0_i32_2 = arith.constant 0 : i32
    return %c0_i32, %c0_i32_0, %c0_i32_1 : i32, i32, i32
  }
  func.func @transform_8(%arg0: i32) -> (i32, i32) {
    %c0_i32 = arith.constant 0 : i32
    %c0_i32_0 = arith.constant 0 : i32
    %c0_i32_1 = arith.constant 0 : i32
    return %c0_i32, %c0_i32_0 : i32, i32
  }
  func.func @transform_9(%arg0: i32) -> (i32, i32) {
    %c0_i32 = arith.constant 0 : i32
    %c0_i32_0 = arith.constant 0 : i32
    %c0_i32_1 = arith.constant 0 : i32
    return %c0_i32, %c0_i32_0 : i32, i32
  }
  func.func @transform_10(%arg0: i32) -> (i32, i32, i32) {
    %c0_i32 = arith.constant 0 : i32
    %c0_i32_0 = arith.constant 0 : i32
    %c0_i32_1 = arith.constant 0 : i32
    %c0_i32_2 = arith.constant 0 : i32
    return %c0_i32, %c0_i32_0, %c0_i32_1 : i32, i32, i32
  }
  func.func @transform_11(%arg0: i32) -> (i32, i32, i32) {
    %c0_i32 = arith.constant 0 : i32
    %c0_i32_0 = arith.constant 0 : i32
    %c0_i32_1 = arith.constant 0 : i32
    %c0_i32_2 = arith.constant 0 : i32
    return %c0_i32, %c0_i32_0, %c0_i32_1 : i32, i32, i32
  }
  func.func @transform_12(%arg0: i32) -> (i32, i32) {
    %c0_i32 = arith.constant 0 : i32
    %c0_i32_0 = arith.constant 0 : i32
    %c0_i32_1 = arith.constant 0 : i32
    return %c0_i32, %c0_i32_0 : i32, i32
  }
  func.func @transform_13(%arg0: i32) -> (i32, i32) {
    %c0_i32 = arith.constant 0 : i32
    %c0_i32_0 = arith.constant 0 : i32
    %c0_i32_1 = arith.constant 0 : i32
    return %c0_i32, %c0_i32_0 : i32, i32
  }
  func.func @transform_14(%arg0: i32) -> (i32, i32, i32) {
    %c0_i32 = arith.constant 0 : i32
    %c0_i32_0 = arith.constant 0 : i32
    %c0_i32_1 = arith.constant 0 : i32
    %c0_i32_2 = arith.constant 0 : i32
    return %c0_i32, %c0_i32_0, %c0_i32_1 : i32, i32, i32
  }
  func.func @transform_15(%arg0: i32) -> (i32, i32, i32) {
    %c0_i32 = arith.constant 0 : i32
    %c0_i32_0 = arith.constant 0 : i32
    %c0_i32_1 = arith.constant 0 : i32
    %c0_i32_2 = arith.constant 0 : i32
    return %c0_i32, %c0_i32_0, %c0_i32_1 : i32, i32, i32
  }
  func.func @transform_16(%arg0: i32) -> (i32, i32, i32) {
    %c0_i32 = arith.constant 0 : i32
    %c0_i32_0 = arith.constant 0 : i32
    %c0_i32_1 = arith.constant 0 : i32
    %c0_i32_2 = arith.constant 0 : i32
    return %c0_i32, %c0_i32_0, %c0_i32_1 : i32, i32, i32
  }
  func.func @transform_17(%arg0: i32) -> (i32, i32) {
    %c0_i32 = arith.constant 0 : i32
    %c0_i32_0 = arith.constant 0 : i32
    %c0_i32_1 = arith.constant 0 : i32
    return %c0_i32, %c0_i32_0 : i32, i32
  }
  func.func @transform_18(%arg0: i32) -> (i32, i32) {
    %c0_i32 = arith.constant 0 : i32
    %c0_i32_0 = arith.constant 0 : i32
    %c0_i32_1 = arith.constant 0 : i32
    return %c0_i32, %c0_i32_0 : i32, i32
  }
  func.func @transform_19(%arg0: i32) -> (i32, i32) {
    %c0_i32 = arith.constant 0 : i32
    %c0_i32_0 = arith.constant 0 : i32
    %c0_i32_1 = arith.constant 0 : i32
    return %c0_i32, %c0_i32_0 : i32, i32
  }
  func.func @transform_20(%arg0: i32) -> (i32, i32) {
    %c0_i32 = arith.constant 0 : i32
    %c0_i32_0 = arith.constant 0 : i32
    %c0_i32_1 = arith.constant 0 : i32
    return %c0_i32, %c0_i32_0 : i32, i32
  }
  func.func @transform_21(%arg0: i32) -> (i32, i32, i32) {
    %c0_i32 = arith.constant 0 : i32
    %c0_i32_0 = arith.constant 0 : i32
    %c0_i32_1 = arith.constant 0 : i32
    return %arg0, %c0_i32, %c0_i32_0 : i32, i32, i32
  }
}

</mosaic_0001>

<bundles_post_ra>
// kernel: forward.1
= control target key start
LH: loop header
LB: loop body
LE: loop exit
PB: predicated region body
PF: predicated region fallthrough
CT: control target
= control target key end

     0   :  { %s19233_s0 = inlined_call_operand.vmem [shape: f32[2,16,48], index: 0, kind: input, shape index: {}]   ;;  %s19234_s1 = inlined_call_operand.vmem [shape: f32[2,4,8], index: 1, kind: input, shape index: {}]   ;;  %s19235_s2 = inlined_call_operand.hbm [shape: bf16[49,16,16], index: 2, kind: input, shape index: {}]   ;;  %s19236_s3 = inlined_call_operand.hbm [shape: bf16[49,48,128], index: 3, kind: input, shape index: {}]   ;;  %s19237_s4 = inlined_call_operand.vmem [shape: f32[1,128], index: 4, kind: input, shape index: {}]   ;;  %s19238_s5 = inlined_call_operand.vmem [shape: f32[128,128], index: 5, kind: input, shape index: {}]   ;;  %s19239_s6 = inlined_call_operand.vmem [shape: bf16[9,8,16], index: 6, kind: input, shape index: {}]   ;;  %s19240_s7 = inlined_call_operand.hbm [shape: bf16[9,128,128], index: 7, kind: input, shape index: {}]   ;;  %s19241_s8 = inlined_call_operand.vmem [shape: f32[1,128], index: 8, kind: input, shape index: {}]   ;;  %s19242_s9 = inlined_call_operand.vmem [shape: f32[128,128], index: 9, kind: input, shape index: {}]   ;;  %s19243_s10 = inlined_call_operand.vmem [shape: bf16[9,4,8], index: 10, kind: input, shape index: {}]   ;;  %s19244_s11 = inlined_call_operand.hbm [shape: bf16[9,128,128], index: 11, kind: input, shape index: {}]   ;;  %s19245_s12 = inlined_call_operand.vmem [shape: f32[1,128], index: 12, kind: input, shape index: {}]   ;;  %s19246_s13 = inlined_call_operand.vmem [shape: f32[128,128], index: 13, kind: input, shape index: {}, may-alias: {13,18}]   ;;  %s19247_s14 = inlined_call_operand.hbm [shape: bf16[9,4,4], index: 14, kind: input, shape index: {}]   ;;  %s19248_s15 = inlined_call_operand.hbm [shape: bf16[9,128,128], index: 15, kind: input, shape index: {}]   ;;  %s19249_s16 = inlined_call_operand.hbm [shape: bf16[9,8,128], index: 16, kind: input, shape index: {}]   ;;  %s19250_s17 = inlined_call_operand.hbm [shape: f32[1,128], index: 17, kind: input, shape index: {}]   ;;  %s19251_s18 = inlined_call_operand.vmem [shape: f32[128,128], index: 18, kind: input, shape index: {}, may-alias: {13,18}]   ;;  %s19252_s19 = inlined_call_operand.hbm [shape: f32[128,32], index: 19, kind: input, shape index: {}]   ;;  %s19253_s20 = inlined_call_operand.hbm [shape: f32[32,128], index: 20, kind: input, shape index: {}]   ;;  %s19254_s21 = inlined_call_operand.vmem [shape: f32[2,1,128], index: 21, kind: output, shape index: {}]  }
   0x1   :  { %19268 = sst [smem:[#allocation25_spill]] %s19233_s0 }
   0x2   :  { %19269 = sst [smem:[#allocation26_spill]] %s19234_s1 }
   0x3   :  { %19270 = sst [smem:[#allocation27_spill]] %s19235_s2 }
   0x4   :  { %19271 = sst [smem:[#allocation28_spill]] %s19236_s3 }
   0x5   :  { %19272 = sst [smem:[#allocation29_spill]] %s19237_s4 }
   0x6   :  { %19273 = sst [smem:[#allocation30_spill]] %s19238_s5 }
   0x7   :  { %19274 = sst [smem:[#allocation31_spill]] %s19243_s10 }
   0x8   :  { %19275 = sst [smem:[#allocation32_spill]] %s19245_s12 }
   0x9   :  { %19276 = sst [smem:[#allocation33_spill]] %s19246_s13 }
   0xa   :  { %19277 = sst [smem:[#allocation34_spill]] %s19251_s18 }
   0xb   :  { %19278 = sst [smem:[#allocation35_spill]] %s19254_s21 }
   0xc   :  { %26 = vsyncpa [#allocation3], 0 }
   0xd   :  { %27 = vsyncpa [#allocation5], 0 }
   0xe   :  { %28 = vsyncpa [#allocation8], 0 }
   0xf   :  { %29 = vsyncpa [#allocation11], 0 }
  0x10   :  { %30 = vsyncpa [#allocation14], 0 }
  0x11   :  { %31 = vsyncpa [#allocation17], 0  ;;  %s17442_s2 = smov 0  }
  0x12 LB: > { %19279 = sst [smem:[#allocation24_spill]] %s17311_s2  ;;  %s17448_s25 = sadd.s32 4294967295, %s17311_s2   ;;  %s17311_s2 = sphi %s17442_s2, %s37_s2  }
  0x13   : > { %p12931_p0 = scmp.ge.s32.totalorder %s17311_s2, 1  ;;  %p519_p1 = scmp.lt.s32.totalorder %s17311_s2, 3 }
  0x14   : > { %p19262_p2 = scmp.eq.s32.totalorder %s17448_s25, 0  ;;  %s17313_s27 = smov [#allocation4]  }
  0x15   : > { %p17453_p3 = pnand %p12931_p0, %p519_p1  ;;  %s544_s3 = sshll.u32 %s17313_s27, 4  ;;  %s17457_s3 = int_to_ptr.vmem [resolvable:$true] %s544_s3 }
  0x16   : > { %s17314_s28 = smov [#allocation7]   ;;  %s17315_s4 = smov [#allocation10]  }
  0x17   : > { %s19280_s26 = scalar_select %p17453_p3, 1, 0 }
  0x18   : > { %p16503_p4 = pneg %p17453_p3  ;;  %s588_s29 = sshll.u32 %s17314_s28, 4  ;;  %s17461_s29 = int_to_ptr.vmem [resolvable:$true] %s588_s29 }
  0x19   : > { %s620_s30 = sshll.u32 %s17315_s4, 4  ;;  %s17316_s5 = smov [#allocation13]   ;;  %s17469_s30 = int_to_ptr.vmem [resolvable:$true] %s620_s30 }
  0x1a   : > { %p17465_p5 = pnand %p19262_p2, %p16503_p4  ;;  %s17471_s22 = sshll.u32 %s17316_s5, 4  ;;  %s648_s22 = int_to_ptr.vmem [resolvable:$true] %s17471_s22 }
  0x1b   : > { %s19282_s24 = sld [smem:[#allocation28_spill]] }
  0x1c   : > { %p17481_p7 = pneg %p17465_p5 }
  0x21   : > { %s17001_s27 = scalar_lea.hbm %s19282_s24, 18816 }
  0x22   : > { %p17002_p6 = scmp.ne.s32.totalorder %s19282_s24, %s17001_s27  ;;  %p17008_p10 = scmp.lt.u32.totalorder %s17001_s27, %s19282_s24 }
  0x24   : > { %p17004_p8 = pnand %p17481_p7, %p17002_p6 }
  0x26   : > { %p17005_p9 = pneg %p17004_p8 }
  0x28   : > { %p17010_p11 = pnand %p17008_p10, %p17005_p9 }
  0x2a   : > { %17013 = shalt.err (!%p17010_p11)
}
  0x2b   : > { %s17014_s2 = scalar_lea.vmem %s17457_s3, 18816  ;;  %p17022_p1 = scmp.lt.s32.totalorder %s17457_s3, %s17457_s3 }
  0x2c   : > { %p17015_p12 = scmp.ne.s32.totalorder %s17457_s3, %s17014_s2  ;;  %p17023_p4 = scmp.lt.s32.totalorder %s17014_s2, %s17014_s2 }
  0x2e   : > { %p17017_p13 = pnand %p17015_p12, %p17481_p7  ;;  %p17024_p6 = por %p17023_p4, %p17022_p1 }
  0x30   : > { %p17018_p0 = pneg %p17017_p13 }
  0x32   : > { %p17025_p8 = pnand %p17024_p6, %p17018_p0 }
  0x34   : > { %17028 = shalt.err (!%p17025_p8)
}
  0x35   : > { %s19264_s23 = smov 64   ;;  %s19266_s1 = smov 4  }
  0x36   : > { %16509 = dma.hbm_to_vmem [thread:$0]  (!%p17465_p5), %s19282_s24, 18816, %s17457_s3, [#allocation5], %s19264_s23, %s19264_s23, %s19266_s1  }
  0x37   : > { %s17029_s2 = scalar_lea.hbm %s19244_s11, 9216 }
  0x38   : > { %p17030_p9 = scmp.ne.s32.totalorder %s19244_s11, %s17029_s2  ;;  %p17036_p12 = scmp.lt.u32.totalorder %s17029_s2, %s19244_s11 }
  0x3a   : > { %p17032_p10 = pnand %p17030_p9, %p17481_p7 }
  0x3c   : > { %p17033_p11 = pneg %p17032_p10 }
  0x3e   : > { %p17038_p13 = pnand %p17036_p12, %p17033_p11 }
  0x40   : > { %17041 = shalt.err (!%p17038_p13)
}
  0x41   : > { %s17042_s3 = scalar_lea.vmem %s17461_s29, 9216  ;;  %p17050_p6 = scmp.lt.s32.totalorder %s17461_s29, %s17461_s29 }
  0x42   : > { %p17043_p0 = scmp.ne.s32.totalorder %s17461_s29, %s17042_s3  ;;  %p17051_p8 = scmp.lt.s32.totalorder %s17042_s3, %s17042_s3 }
  0x44   : > { %p17045_p1 = pnand %p17043_p0, %p17481_p7  ;;  %p17052_p9 = por %p17051_p8, %p17050_p6 }
  0x46   : > { %p17046_p4 = pneg %p17045_p1 }
  0x48   : > { %p17053_p10 = pnand %p17052_p9, %p17046_p4 }
  0x4a   : > { %17056 = shalt.err (!%p17053_p10)
}
  0x4b   : > { %16515 = dma.hbm_to_vmem [thread:$0]  (!%p17465_p5), %s19244_s11, 9216, %s17461_s29, [#allocation8], %s19264_s23, %s19264_s23, %s19266_s1  }
  0x4c   : > { %s17057_s27 = scalar_lea.hbm %s19248_s15, 9216 }
  0x4d   : > { %p17058_p11 = scmp.ne.s32.totalorder %s19248_s15, %s17057_s27  ;;  %p17064_p0 = scmp.lt.u32.totalorder %s17057_s27, %s19248_s15 }
  0x4f   : > { %p17060_p12 = pnand %p17058_p11, %p17481_p7 }
  0x51   : > { %p17061_p13 = pneg %p17060_p12 }
  0x53   : > { %p17066_p1 = pnand %p17064_p0, %p17061_p13 }
  0x55   : > { %17069 = shalt.err (!%p17066_p1)
}
  0x56   : > { %s17070_s29 = scalar_lea.vmem %s17469_s30, 9216  ;;  %p17078_p9 = scmp.lt.s32.totalorder %s17469_s30, %s17469_s30 }
  0x57   : > { %p17071_p4 = scmp.ne.s32.totalorder %s17469_s30, %s17070_s29  ;;  %p17079_p10 = scmp.lt.s32.totalorder %s17070_s29, %s17070_s29 }
  0x59   : > { %p17073_p6 = pnand %p17071_p4, %p17481_p7  ;;  %p17080_p11 = por %p17079_p10, %p17078_p9 }
  0x5b   : > { %p17074_p8 = pneg %p17073_p6 }
  0x5d   : > { %p17081_p12 = pnand %p17080_p11, %p17074_p8 }
  0x5f   : > { %17084 = shalt.err (!%p17081_p12)
}
  0x60   : > { %16521 = dma.hbm_to_vmem [thread:$0]  (!%p17465_p5), %s19248_s15, 9216, %s17469_s30, [#allocation11], %s19264_s23, %s19264_s23, %s19266_s1  }
  0x61   : > { %s17085_s18 = scalar_lea.hbm %s19250_s17, 16 }
  0x62   : > { %p17086_p13 = scmp.ne.s32.totalorder %s19250_s17, %s17085_s18  ;;  %p17092_p4 = scmp.lt.u32.totalorder %s17085_s18, %s19250_s17 }
  0x64   : > { %p17088_p0 = pnand %p17086_p13, %p17481_p7 }
  0x66   : > { %p17089_p1 = pneg %p17088_p0 }
  0x68   : > { %p17094_p6 = pnand %p17092_p4, %p17089_p1 }
  0x6a   : > { %17097 = shalt.err (!%p17094_p6)
}
  0x6b   : > { %s17098_s2 = scalar_lea.vmem %s648_s22, 16  ;;  %s17105_s30 = scalar_lea.vmem %s648_s22, 32 }
  0x6c   : > { %p17099_p8 = scmp.ne.s32.totalorder %s648_s22, %s17098_s2  ;;  %p17106_p11 = scmp.lt.s32.totalorder %s648_s22, %s648_s22 }
  0x6d   : > { %p17107_p12 = scmp.lt.s32.totalorder %s17105_s30, %s17098_s2 }
  0x6e   : > { %p17101_p9 = pnand %p17099_p8, %p17481_p7 }
  0x6f   : > { %p17108_p2 = por %p17107_p12, %p17106_p11 }
  0x70   : > { %p17102_p10 = pneg %p17101_p9 }
  0x72   : > { %p17109_p3 = pnand %p17108_p2, %p17102_p10 }
  0x74   : > { %17112 = shalt.err (!%p17109_p3)
}
  0x75   : > { %16527 = dma.hbm_to_vmem [thread:$0]  (!%p17465_p5), %s19250_s17, 16, %s648_s22, [#allocation14]  }
  0x76   : > { %s17319_s10 = smov [#allocation2]   ;;  %s17320_s13 = smov [#allocation6]  }
  0x77   : > { %s531_s12 = sshll.u32 %s17319_s10, 4  ;;  %s566_s18 = sshll.u32 %s17320_s13, 4  ;;  %s532_s12 = int_to_ptr.vmem [resolvable:$true] %s531_s12  ;;  %s567_s18 = int_to_ptr.vmem [resolvable:$true] %s566_s18 }
  0x78   : > { %s19284_s4 = sld [smem:[#allocation27_spill]] }
  0x7e   : > { %s17113_s5 = scalar_lea.hbm %s19284_s4, 6272 }
  0x7f   : > { %p17114_p2 = scmp.ne.s32.totalorder %s19284_s4, %s17113_s5  ;;  %p17120_p0 = scmp.lt.u32.totalorder %s17113_s5, %s19284_s4 }
  0x81   : > { %p17116_p3 = pnand %p17114_p2, %p17481_p7 }
  0x83   : > { %p17117_p13 = pneg %p17116_p3 }
  0x85   : > { %p17122_p1 = pnand %p17120_p0, %p17117_p13 }
  0x87   : > { %17125 = shalt.err (!%p17122_p1)
}
  0x88   : > { %s17126_s22 = scalar_lea.vmem %s532_s12, 6272  ;;  %p17134_p9 = scmp.lt.s32.totalorder %s532_s12, %s532_s12 }
  0x89   : > { %p17127_p4 = scmp.ne.s32.totalorder %s532_s12, %s17126_s22  ;;  %p17135_p10 = scmp.lt.s32.totalorder %s17126_s22, %s17126_s22 }
  0x8b   : > { %p17129_p6 = pnand %p17127_p4, %p17481_p7  ;;  %p17136_p11 = por %p17135_p10, %p17134_p9 }
  0x8d   : > { %p17130_p8 = pneg %p17129_p6 }
  0x8f   : > { %p17137_p12 = pnand %p17136_p11, %p17130_p8 }
  0x91   : > { %17140 = shalt.err (!%p17137_p12)
}
  0x92   : > { %s19285_s3 = smov 64   ;;  %s17141_s28 = scalar_lea.hbm %s19240_s7, 9216 }
  0x93   : > { %16506 = dma.hbm_to_vmem [thread:$0]  (!%p17465_p5), %s19284_s4, 6272, %s532_s12, [#allocation3], %s19285_s3, %s19285_s3, %s19266_s1  }
  0x94   : > { %p17142_p2 = scmp.ne.s32.totalorder %s19240_s7, %s17141_s28  ;;  %p17148_p0 = scmp.lt.u32.totalorder %s17141_s28, %s19240_s7 }
  0x96   : > { %p17144_p3 = pnand %p17142_p2, %p17481_p7 }
  0x98   : > { %p17145_p13 = pneg %p17144_p3 }
  0x9a   : > { %p17150_p1 = pnand %p17148_p0, %p17145_p13 }
  0x9c   : > { %17153 = shalt.err (!%p17150_p1)
}
  0x9d   : > { %s17154_s22 = scalar_lea.vmem %s567_s18, 9216  ;;  %p17162_p9 = scmp.lt.s32.totalorder %s567_s18, %s567_s18 }
  0x9e   : > { %p17155_p4 = scmp.ne.s32.totalorder %s567_s18, %s17154_s22  ;;  %p17163_p10 = scmp.lt.s32.totalorder %s17154_s22, %s17154_s22 }
  0xa0   : > { %p17157_p6 = pnand %p17155_p4, %p17481_p7  ;;  %p17164_p11 = por %p17163_p10, %p17162_p9 }
  0xa2   : > { %p17158_p8 = pneg %p17157_p6 }
  0xa4   : > { %p17165_p12 = pnand %p17164_p11, %p17158_p8 }
  0xa6   : > { %17168 = shalt.err (!%p17165_p12)
}
  0xa7   : > { %16512 = dma.hbm_to_vmem [thread:$0]  (!%p17465_p5), %s19240_s7, 9216, %s567_s18, [#allocation5], %s19285_s3, %s19285_s3, %s19266_s1  }
  0xa8   : > { %s17321_s10 = smov [#allocation9]   ;;  %s17169_s5 = scalar_lea.hbm %s19247_s14, 288 }
  0xa9   : > { %s607_s13 = sshll.u32 %s17321_s10, 4  ;;  %p17170_p2 = scmp.ne.s32.totalorder %s19247_s14, %s17169_s5  ;;  %s608_s13 = int_to_ptr.vmem [resolvable:$true] %s607_s13 }
  0xaa   : > { %p17176_p0 = scmp.lt.u32.totalorder %s17169_s5, %s19247_s14 }
  0xab   : > { %p17172_p3 = pnand %p17170_p2, %p17481_p7 }
  0xad   : > { %p17173_p13 = pneg %p17172_p3 }
  0xaf   : > { %p17178_p1 = pnand %p17176_p0, %p17173_p13 }
  0xb1   : > { %17181 = shalt.err (!%p17178_p1)
}
  0xb2   : > { %s17182_s18 = scalar_lea.vmem %s608_s13, 288  ;;  %p17190_p9 = scmp.lt.s32.totalorder %s608_s13, %s608_s13 }
  0xb3   : > { %p17183_p4 = scmp.ne.s32.totalorder %s608_s13, %s17182_s18  ;;  %p17191_p10 = scmp.lt.s32.totalorder %s17182_s18, %s17182_s18 }
  0xb5   : > { %p17185_p6 = pnand %p17183_p4, %p17481_p7  ;;  %p17192_p11 = por %p17191_p10, %p17190_p9 }
  0xb7   : > { %p17186_p8 = pneg %p17185_p6 }
  0xb9   : > { %p17193_p12 = pnand %p17192_p11, %p17186_p8 }
  0xbb   : > { %17196 = shalt.err (!%p17193_p12)
}
  0xbc   : > { %s17322_s12 = smov 32   ;;  %s17323_s23 = smov 2  }
  0xbd   : > { %16518 = dma.hbm_to_vmem [thread:$0]  (!%p17465_p5), %s19247_s14, 288, %s608_s13, [#allocation8], %s17322_s12, %s17322_s12, %s17323_s23  }
  0xbe   : > { %s17324_s28 = smov [#allocation12]   ;;  %s17325_s2 = smov [#allocation15]  }
  0xbf   : > { %s633_s5 = sshll.u32 %s17324_s28, 4  ;;  %s660_s30 = sshll.u32 %s17325_s2, 4  ;;  %s634_s5 = int_to_ptr.vmem [resolvable:$true] %s633_s5  ;;  %s17636_s30 = int_to_ptr.vmem [resolvable:$true] %s660_s30 }
  0xc0   : > { %s17197_s18 = scalar_lea.hbm %s19249_s16, 576 }
  0xc1   : > { %p17198_p2 = scmp.ne.s32.totalorder %s19249_s16, %s17197_s18  ;;  %p17204_p0 = scmp.lt.u32.totalorder %s17197_s18, %s19249_s16 }
  0xc3   : > { %p17200_p3 = pnand %p17198_p2, %p17481_p7 }
  0xc5   : > { %p17201_p13 = pneg %p17200_p3 }
  0xc7   : > { %p17206_p1 = pnand %p17204_p0, %p17201_p13 }
  0xc9   : > { %17209 = shalt.err (!%p17206_p1)
}
  0xca   : > { %s17210_s12 = scalar_lea.vmem %s634_s5, 576  ;;  %p17218_p9 = scmp.lt.s32.totalorder %s634_s5, %s634_s5 }
  0xcb   : > { %p17211_p4 = scmp.ne.s32.totalorder %s634_s5, %s17210_s12  ;;  %p17219_p10 = scmp.lt.s32.totalorder %s17210_s12, %s17210_s12 }
  0xcd   : > { %p17213_p6 = pnand %p17211_p4, %p17481_p7  ;;  %p17220_p11 = por %p17219_p10, %p17218_p9 }
  0xcf   : > { %p17214_p8 = pneg %p17213_p6 }
  0xd1   : > { %p17221_p12 = pnand %p17220_p11, %p17214_p8 }
  0xd3   : > { %17224 = shalt.err (!%p17221_p12)
}
  0xd4   : > { %s19286_s1 = smov 4   ;;  %s17225_s2 = scalar_lea.hbm %s19252_s19, 2048 }
  0xd5   : > { %16524 = dma.hbm_to_vmem [thread:$0]  (!%p17465_p5), %s19249_s16, 576, %s634_s5, [#allocation11], %s19285_s3, %s19285_s3, %s19286_s1  }
  0xd6   : > { %p17226_p2 = scmp.ne.s32.totalorder %s19252_s19, %s17225_s2  ;;  %p17232_p0 = scmp.lt.u32.totalorder %s17225_s2, %s19252_s19 }
  0xd8   : > { %p17228_p3 = pnand %p17226_p2, %p17481_p7 }
  0xda   : > { %p17229_p13 = pneg %p17228_p3 }
  0xdc   : > { %p17234_p1 = pnand %p17232_p0, %p17229_p13 }
  0xde   : > { %17237 = shalt.err (!%p17234_p1)
}
  0xdf   : > { %s17238_s3 = scalar_lea.vmem %s17636_s30, 2048  ;;  %p17246_p9 = scmp.lt.s32.totalorder %s17636_s30, %s17636_s30 }
  0xe0   : > { %p17239_p4 = scmp.ne.s32.totalorder %s17636_s30, %s17238_s3  ;;  %p17247_p10 = scmp.lt.s32.totalorder %s17238_s3, %s17238_s3 }
  0xe2   : > { %p17241_p6 = pnand %p17239_p4, %p17481_p7  ;;  %p17248_p11 = por %p17247_p10, %p17246_p9 }
  0xe4   : > { %p17242_p8 = pneg %p17241_p6 }
  0xe6   : > { %p17249_p12 = pnand %p17248_p11, %p17242_p8 }
  0xe8   : > { %17252 = shalt.err (!%p17249_p12)
}
  0xe9   : > { %s17326_s5 = smov 128   ;;  %s17327_s13 = smov 8  }
  0xea   : > { %16530 = dma.hbm_to_vmem [thread:$0]  (!%p17465_p5), %s19252_s19, 2048, %s17636_s30, [#allocation14], %s17326_s5, %s17326_s5, %s17327_s13  }
  0xeb   : > { %s17328_s4 = smov [#allocation16]   ;;  %s17253_s2 = scalar_lea.hbm %s19253_s20, 512 }
  0xec   : > { %s673_s23 = sshll.u32 %s17328_s4, 4  ;;  %p17254_p2 = scmp.ne.s32.totalorder %s19253_s20, %s17253_s2  ;;  %s674_s23 = int_to_ptr.vmem [resolvable:$true] %s673_s23 }
  0xed   : > { %p17260_p0 = scmp.lt.u32.totalorder %s17253_s2, %s19253_s20 }
  0xee   : > { %p17256_p3 = pnand %p17254_p2, %p17481_p7 }
  0xf0   : > { %p17257_p13 = pneg %p17256_p3 }
  0xf2   : > { %p17262_p1 = pnand %p17260_p0, %p17257_p13 }
  0xf4   : > { %17265 = shalt.err (!%p17262_p1)
}
  0xf5   : > { %s17266_s30 = scalar_lea.vmem %s674_s23, 512  ;;  %p17274_p9 = scmp.lt.s32.totalorder %s674_s23, %s674_s23 }
  0xf6   : > { %p17267_p4 = scmp.ne.s32.totalorder %s674_s23, %s17266_s30  ;;  %p17275_p10 = scmp.lt.s32.totalorder %s17266_s30, %s17266_s30 }
  0xf8   : > { %p17269_p6 = pnand %p17267_p4, %p17481_p7  ;;  %p17276_p11 = por %p17275_p10, %p17274_p9 }
  0xfa   : > { %p17270_p8 = pneg %p17269_p6 }
  0xfc   : > { %p17277_p12 = pnand %p17276_p11, %p17270_p8 }
  0xfe   : > { %17280 = shalt.err (!%p17277_p12)
}
  0xff   : > { %16533 = dma.hbm_to_vmem [thread:$0]  (!%p17465_p5), %s19253_s20, 512, %s674_s23, [#allocation17], %s17326_s5, %s17326_s5, %s17327_s13  }
 0x100   : > { %p19287_p2 = scmp.ne.s32.totalorder %s19280_s26, 0 }
 0x101   : > { %p19288_p3 = scmp.eq.s32.totalorder (!%p19287_p2), %s17448_s25, 0 }
 0x102   : > { %704 = sbr.rel (%p19287_p2) target bundleno = 12535 (0x30f7), region = 104 }
 0x109   : > { %17286 = dma.done.wait (%p19288_p3), [#allocation3], 6272   ;;  %p19289_p7 = pmov %p19288_p3 }
 0x10a   : > { %p19290_p13 = pmov %p19288_p3 }
 0x10b   : > { %17288 = vsyncadd (%p19289_p7), [#allocation3], 4294961024 }
 0x10c   : > { %17290 = dma.done.wait (%p19290_p13), [#allocation5], 28032   ;;  %p19291_p0 = pmov %p19288_p3 }
 0x10e   : > { %17292 = vsyncadd (%p19291_p0), [#allocation5], 4294939264  ;;  %p19292_p1 = pmov %p19291_p0 }
 0x10f   : > { %p19293_p5 = pmov %p19291_p0 }
 0x110   : > { %17294 = dma.done.wait (%p19292_p1), [#allocation8], 9504  }
 0x111   : > { %17296 = vsyncadd (%p19293_p5), [#allocation8], 4294957792  ;;  %p19294_p4 = pmov %p19291_p0 }
 0x112   : > { %p19295_p6 = pmov %p19291_p0 }
 0x113   : > { %17298 = dma.done.wait (%p19294_p4), [#allocation11], 9792  }
 0x114   : > { %17300 = vsyncadd (%p19295_p6), [#allocation11], 4294957504  ;;  %p19296_p8 = pmov %p19291_p0 }
 0x115   : > { %p19297_p9 = pmov %p19291_p0 }
 0x116   : > { %17302 = dma.done.wait (%p19296_p8), [#allocation14], 2064  }
 0x117   : > { %17304 = vsyncadd (%p19297_p9), [#allocation14], 4294965232  ;;  %p19298_p10 = pmov %p19291_p0 }
 0x118   : > { %p19299_p11 = pmov %p19291_p0 }
 0x119   : > { %17306 = dma.done.wait (%p19298_p10), [#allocation17], 512  }
 0x11a   : > { %17308 = vsyncadd (%p19299_p11), [#allocation17], 4294966784  ;;  %p802_p12 = scmp.lt.s32.totalorder %s17448_s25, 1  ;;  %v17329_v0 = vmov 0.0   ;;  %vm17330_vm0 = vmmov 0   ;;  %s19300_s5 = sld [smem:[#allocation25_spill]] }
 0x11b   : > { %14321 = vmatprep.subr.bf16.mxu0 %v17329_v0  ;;  %14327 = vmatprep.subr.bf16.mxu1 %v17329_v0  ;;  %v16581_v4 = vld [vmem:[#allocation2] sm:$0xff]   ;;  %v16582_v5 = vld [vmem:[#allocation2 + $0x8] sm:$0xff]   ;;  %vm825_vm1 = vcmask 130048   ;;  %v16586_v9 = vld [vmem:[#allocation4 + $0x8] sm:$0xff]   ;;  %vm955_vm2 = vcmask 392192   ;;  %s19301_s23 = sld [smem:[#allocation30_spill]] }
 0x11c   : > { %s19312_s25 = smov (!%p802_p12, %s17448_s25), 1  ;;  %14323 = vmatprep.mubr.msk.bf16.mxu0 %vm17330_vm0, %v17329_v0  ;;  %14329 = vmatprep.mubr.msk.bf16.mxu1 %vm17330_vm0, %v17329_v0  ;;  %v16583_v6 = vld [vmem:[#allocation4 + $0x18] sm:$0xff]   ;;  %v16584_v7 = vld [vmem:[#allocation4] sm:$0xff]   ;;  %v16587_v10 = vld [vmem:[#allocation4 + $0x28] sm:$0xff]   ;;  %s19302_s1 = sld [smem:[#allocation29_spill]]  ;;  %vm8658_vm6 = vcmask 1043456  }
 0x11d   : > { %s13535_s21 = sshll.u32 %s19312_s25, 4  ;;  %v16585_v8 = vld [vmem:[#allocation4 + $0x20] sm:$0xff]   ;;  %v16588_v11 = vld [vmem:[#allocation4 + $0x10] sm:$0xff]   ;;  %v16589_v22 = vld [vmem:[#allocation2 + $0x10] sm:$0xff]   ;;  %s19303_s2 = sld [smem:[#allocation31_spill]]  ;;  %vm8654_vm7 = vcmask 64512  }
 0x11e   : > { %v16590_v23 = vld [vmem:[#allocation2 + $0x18] sm:$0xff]   ;;  %v16591_v24 = vld [vmem:[#allocation2 + $0x20] sm:$0xff]   ;;  %v16594_v27 = vld [vmem:[#allocation4 + $0x40] sm:$0xff]   ;;  %s19305_s10 = sld [smem:[#allocation33_spill]]  ;;  %s19306_s12 = sld [smem:[#allocation32_spill]]  ;;  %vm10226_vm9 = vcmask 1041408  }
 0x11f   : > { %v16592_v25 = vld [vmem:[#allocation4 + $0x30] sm:$0xff]   ;;  %v16593_v26 = vld [vmem:[#allocation4 + $0x38] sm:$0xff]   ;;  %v16597_v28 = vld [vmem:[#allocation4 + $0x60] sm:$0xff]   ;;  %vm10222_vm10 = vcmask 31744   ;;  %s19308_s27 = sld [smem:[#allocation34_spill]]  ;;  %vm12694_vm12 = vcmask 261120  }
 0x120   : > { %s806_s13 = scalar_lea.vmem %s19300_s5, %s13535_s21  ;;  %v16599_v29 = vld [vmem:[#allocation4 + $0x68] sm:$0xff]   ;;  %v16600_v30 = vld [vmem:[#allocation4 + $0x70] sm:$0xff]   ;;  %v16598_v51 = vld [vmem:[#allocation4 + $0x58] sm:$0xff]   ;;  %s12956_s21 = sshll.u32 %s19312_s25, 2 }
 0x121   : > { %v815_v1 = vld [vmem:[%s806_s13] sm:$0xff]  ;;  %v816_v2 = vld [vmem:[%s806_s13 + $0x8] sm:$0xff]  ;;  %v16595_v44 = vld [vmem:[#allocation4 + $0x48] sm:$0xff]   ;;  %s19307_s5 = sld [smem:[#allocation26_spill]]  ;;  %s19309_s30 = sld [smem:[#allocation35_spill]] }
 0x122   : > { %v17740_v3 = vpack.c.bf16 %v816_v2, %v815_v1  ;;  %v16596_v47 = vld [vmem:[#allocation4 + $0x50] sm:$0xff]   ;;  %v16601_v59 = vld [vmem:[#allocation2 + $0x28] sm:$0xff]   ;;  %v16602_v60 = vld [vmem:[#allocation2 + $0x30] sm:$0xff]  }
 0x123   : > { %v16603_v61 = vld [vmem:[#allocation4 + $0x78] sm:$0xff]   ;;  %v16604_v62 = vld [vmem:[#allocation4 + $0x80] sm:$0xff]   ;;  %v16605_v63 = vld [vmem:[#allocation4 + $0x88] sm:$0xff]   ;;  %s19304_s29 = smov %s19303_s2 }
 0x124   : > { %14322 = vmatpush3.bf16.msra.mxu0 %v17740_v3  ;;  %14328 = vmatpush3.bf16.msra.mxu1 %v17740_v3  ;;  %v16606_v1 = vld [vmem:[#allocation4 + $0x90] sm:$0xff]   ;;  %v16607_v2 = vld [vmem:[#allocation4 + $0x98] sm:$0xff]  }
 0x125   : > { %14333 = vmatprep.subr.bf16.mxu0 %v17329_v0  ;;  %14343 = vmatprep.subr.bf16.mxu1 %v17329_v0 }
 0x127   : > { %14324 = vmatmul.mubr.msk.bf16.vlgmr.msra.gmra.mrb[0].mxu0 %vm825_vm1, %v16581_v4  ;;  %14330 = vmatmul.mubr.msk.bf16.vlgmr.msra.gmra.mrb[0].mxu1 %vm825_vm1, %v16582_v5  ;;  %v16608_v4 = vld [vmem:[#allocation4 + $0xa0] sm:$0xff]   ;;  %s810_s13 = scalar_lea.vmem %s19307_s5, %s12956_s21  ;;  %s813_s3 = scalar_lea.vmem %s19309_s30, %s19312_s25 }
 0x128   : > { %14334 = vmatpush3.bf16.msra.mxu0 %v16583_v6  ;;  %14344 = vmatpush3.bf16.msra.mxu1 %v16584_v7 }
 0x129   : > { %14335 = vmatprep.subr.bf16.mxu0 %v17329_v0  ;;  %14345 = vmatprep.subr.bf16.mxu1 %v17329_v0 }
 0x12a   : > { %14339 = vmatprep.mubr.msk.bf16.mxu0 %vm17330_vm0, %v17329_v0  ;;  %14349 = vmatprep.mubr.msk.bf16.mxu1 %vm17330_vm0, %v17329_v0 }
 0x12c   : > { %14336 = vmatpush3.bf16.msra.mxu0 %v16585_v8  ;;  %14346 = vmatpush3.bf16.msra.mxu1 %v16586_v9 }
 0x12d   : > { %14337 = vmatprep.subr.bf16.mxu0 %v17329_v0  ;;  %14347 = vmatprep.subr.bf16.mxu1 %v17329_v0 }
 0x130   : > { %14338 = vmatpush3.bf16.msra.mxu0 %v16587_v10  ;;  %14348 = vmatpush3.bf16.msra.mxu1 %v16588_v11 }
 0x131   : > { %14353 = vmatprep.subr.bf16.mxu0 %v17329_v0  ;;  %14359 = vmatprep.subr.bf16.mxu1 %v17329_v0 }
 0x1fa   : > { %v863_v12 = vpop.f32.mrb[0].mxu0  ;;  %v922_v13 = vpop.f32.mrb[0].mxu1 }
 0x1fb   : > { %v14325_v14 = vpop.f32.mrb[1].mxu0  ;;  %v14331_v15 = vpop.f32.mrb[1].mxu1 }
 0x1fc   : > { %v866_v16 = vpop.f32.mrb[2].mxu0  ;;  %v925_v17 = vpop.f32.mrb[2].mxu1 }
 0x1fd   : > { %v870_v18 = vpack.c.bf16 %v866_v16, %v863_v12  ;;  %v929_v19 = vpack.c.bf16 %v925_v17, %v922_v13  ;;  %v14332_v20 = vpop.f32.mrb[3].mxu1  ;;  %v14326_v21 = vpop.f32.mrb[3].mxu0 }
 0x1ff   : > { %14340 = vmatmul.mubr.msk.bf16.vlgmr.msra.gmra.mrb[4].mxu0 %vm955_vm2, %v929_v19  ;;  %14350 = vmatmul.mubr.msk.bf16.vlgmr.msra.gmra.mrb[4].mxu1 %vm955_vm2, %v870_v18 }
 0x200   : > { %14354 = vmatpush3.bf16.msra.mxu0 %v17740_v3  ;;  %14355 = vmatprep.mubr.msk.bf16.mxu0 %vm17330_vm0, %v17329_v0 }
 0x201   : > { %14369 = vmatprep.subr.bf16.mxu0 %v17329_v0  ;;  %14365 = vmatprep.mubr.msk.bf16.mxu1 %vm17330_vm0, %v17329_v0 }
 0x202   : > { %14360 = vmatpush3.bf16.msra.mxu1 %v16592_v25 }
 0x203   : > { %14361 = vmatprep.subr.bf16.mxu1 %v17329_v0 }
 0x206   : > { %14362 = vmatpush3.bf16.msra.mxu1 %v16593_v26 }
 0x207   : > { %14356 = vmatmul.mubr.msk.bf16.vlgmr.msra.gmra.mrb[8].mxu0 %vm825_vm1, %v16589_v22  ;;  %14363 = vmatprep.subr.bf16.mxu1 %v17329_v0 }
 0x208   : > { %14370 = vmatpush3.bf16.msra.mxu0 %v17740_v3  ;;  %14371 = vmatprep.mubr.msk.bf16.mxu0 %vm17330_vm0, %v17329_v0 }
 0x209   : > { %14385 = vmatprep.subr.bf16.mxu0 %v17329_v0 }
 0x20a   : > { %14364 = vmatpush3.bf16.msra.mxu1 %v16594_v27 }
 0x20b   : > { %14375 = vmatprep.subr.bf16.mxu1 %v17329_v0 }
 0x20f   : > { %14372 = vmatmul.mubr.msk.bf16.vlgmr.msra.gmra.mrb[12].mxu0 %vm825_vm1, %v16590_v23 }
 0x210   : > { %14386 = vmatpush3.bf16.msra.mxu0 %v17740_v3  ;;  %14387 = vmatprep.mubr.msk.bf16.mxu0 %vm17330_vm0, %v17329_v0 }
 0x211   : > { %14391 = vmatprep.subr.bf16.mxu0 %v17329_v0 }
 0x217   : > { %14388 = vmatmul.mubr.msk.bf16.vlgmr.msra.gmra.mrb[16].mxu0 %vm825_vm1, %v16591_v24 }
 0x218   : > { %14397 = vmatprep.mubr.msk.bf16.mxu0 %vm17330_vm0, %v17329_v0  ;;  %14392 = vmatpush3.bf16.msra.mxu0 %v16597_v28 }
 0x219   : > { %14393 = vmatprep.subr.bf16.mxu0 %v17329_v0 }
 0x21c   : > { %14394 = vmatpush3.bf16.msra.mxu0 %v16599_v29 }
 0x21d   : > { %14395 = vmatprep.subr.bf16.mxu0 %v17329_v0 }
 0x220   : > { %14396 = vmatpush3.bf16.msra.mxu0 %v16600_v30  ;;  %v16609_v30 = vld [vmem:[#allocation2 + $0x38] sm:$0xff]  }
 0x221   : > { %14401 = vmatprep.subr.bf16.mxu0 %v17329_v0 }
 0x2d2   : > { %v993_v31 = vpop.f32.mrb[4].mxu0  ;;  %v1055_v32 = vpop.f32.mrb[4].mxu1 }
 0x2d3   : > { %v17785_v33 = vadd.f32 %v1055_v32, %v993_v31  ;;  %v14341_v34 = vpop.f32.mrb[5].mxu0  ;;  %v14351_v35 = vpop.f32.mrb[5].mxu1 }
 0x2d4   : > { %v996_v36 = vpop.f32.mrb[6].mxu0  ;;  %v1058_v37 = vpop.f32.mrb[6].mxu1  ;;  %v16610_v34 = vld [vmem:[#allocation2 + $0x40] sm:$0xff]   ;;  %v16611_v35 = vld [vmem:[#allocation4 + $0xa8] sm:$0xff]  }
 0x2d5   : > { %v17787_v38 = vadd.f32 %v1058_v37, %v996_v36  ;;  %v14342_v39 = vpop.f32.mrb[7].mxu0  ;;  %v14352_v40 = vpop.f32.mrb[7].mxu1  ;;  %v16612_v36 = vld [vmem:[#allocation4 + $0xb0] sm:$0xff]   ;;  %v16613_v37 = vld [vmem:[#allocation4 + $0xb8] sm:$0xff]  }
 0x2d6   : > { %v16615_v39 = vld [vmem:[#allocation4 + $0xc8] sm:$0xff]   ;;  %v16616_v40 = vld [vmem:[#allocation4 + $0xd0] sm:$0xff]  }
 0x2da   : > { %v1107_v41 = vpop.f32.mrb[8].mxu0 }
 0x2db   : > { %v14357_v42 = vpop.f32.mrb[9].mxu0 }
 0x2dc   : > { %v1110_v43 = vpop.f32.mrb[10].mxu0 }
 0x2dd   : > { %v1114_v45 = vpack.c.bf16 %v1110_v43, %v1107_v41  ;;  %v14358_v46 = vpop.f32.mrb[11].mxu0 }
 0x2df   : > { %14366 = vmatmul.mubr.msk.bf16.vlgmr.msra.gmra.mrb[8].mxu1 %vm955_vm2, %v1114_v45 }
 0x2e0   : > { %14376 = vmatpush3.bf16.msra.mxu1 %v16595_v44  ;;  %14381 = vmatprep.mubr.msk.bf16.mxu1 %vm17330_vm0, %v17329_v0 }
 0x2e1   : > { %14377 = vmatprep.subr.bf16.mxu1 %v17329_v0 }
 0x2e2   : > { %v1231_v48 = vpop.f32.mrb[12].mxu0 }
 0x2e3   : > { %v14373_v49 = vpop.f32.mrb[13].mxu0 }
 0x2e4   : > { %14378 = vmatpush3.bf16.msra.mxu1 %v16596_v47  ;;  %v1234_v50 = vpop.f32.mrb[14].mxu0 }
 0x2e5   : > { %v1238_v52 = vpack.c.bf16 %v1234_v50, %v1231_v48  ;;  %v14374_v53 = vpop.f32.mrb[15].mxu0  ;;  %14379 = vmatprep.subr.bf16.mxu1 %v17329_v0 }
 0x2e8   : > { %14380 = vmatpush3.bf16.msra.mxu1 %v16598_v51 }
 0x2e9   : > { %14407 = vmatprep.subr.bf16.mxu1 %v17329_v0 }
 0x2ea   : > { %v1355_v54 = vpop.f32.mrb[16].mxu0 }
 0x2eb   : > { %14382 = vmatmul.mubr.msk.bf16.vlgmr.msra.gmra.mrb[12].mxu1 %vm955_vm2, %v1238_v52  ;;  %v14389_v55 = vpop.f32.mrb[17].mxu0 }
 0x2ec   : > { %v1358_v56 = vpop.f32.mrb[18].mxu0  ;;  %14413 = vmatprep.mubr.msk.bf16.mxu1 %vm17330_vm0, %v17329_v0  ;;  %14408 = vmatpush3.bf16.msra.mxu1 %v16603_v61 }
 0x2ed   : > { %v1362_v57 = vpack.c.bf16 %v1358_v56, %v1355_v54  ;;  %v14390_v58 = vpop.f32.mrb[19].mxu0  ;;  %14409 = vmatprep.subr.bf16.mxu1 %v17329_v0 }
 0x2ef   : > { %14398 = vmatmul.mubr.msk.bf16.vlgmr.msra.gmra.mrb[20].mxu0 %vm955_vm2, %v1362_v57 }
 0x2f0   : > { %14402 = vmatpush3.bf16.msra.mxu0 %v17740_v3  ;;  %14403 = vmatprep.mubr.msk.bf16.mxu0 %vm17330_vm0, %v17329_v0 }
 0x2f1   : > { %14417 = vmatprep.subr.bf16.mxu0 %v17329_v0  ;;  %14410 = vmatpush3.bf16.msra.mxu1 %v16604_v62 }
 0x2f2   : > { %14411 = vmatprep.subr.bf16.mxu1 %v17329_v0 }
 0x2f5   : > { %14412 = vmatpush3.bf16.msra.mxu1 %v16605_v63 }
 0x2f6   : > { %14433 = vmatprep.subr.bf16.mxu1 %v17329_v0 }
 0x2f7   : > { %14404 = vmatmul.mubr.msk.bf16.vlgmr.msra.gmra.mrb[24].mxu0 %vm825_vm1, %v16601_v59 }
 0x2f8   : > { %14418 = vmatpush3.bf16.msra.mxu0 %v17740_v3  ;;  %14419 = vmatprep.mubr.msk.bf16.mxu0 %vm17330_vm0, %v17329_v0 }
 0x2f9   : > { %14423 = vmatprep.subr.bf16.mxu0 %v17329_v0 }
 0x2ff   : > { %14420 = vmatmul.mubr.msk.bf16.vlgmr.msra.gmra.mrb[28].mxu0 %vm825_vm1, %v16602_v60  ;;  %v16617_v60 = vld [vmem:[#allocation2 + $0x48] sm:$0xff]  }
 0x300   : > { %14429 = vmatprep.mubr.msk.bf16.mxu0 %vm17330_vm0, %v17329_v0  ;;  %14424 = vmatpush3.bf16.msra.mxu0 %v16606_v1  ;;  %v16618_v1 = vld [vmem:[#allocation2 + $0x50] sm:$0xff]  }
 0x301   : > { %14425 = vmatprep.subr.bf16.mxu0 %v17329_v0 }
 0x304   : > { %14426 = vmatpush3.bf16.msra.mxu0 %v16607_v2  ;;  %v16619_v2 = vld [vmem:[#allocation4 + $0xd8] sm:$0xff]  }
 0x305   : > { %14427 = vmatprep.subr.bf16.mxu0 %v17329_v0 }
 0x308   : > { %14428 = vmatpush3.bf16.msra.mxu0 %v16608_v4  ;;  %v16620_v4 = vld [vmem:[#allocation4 + $0xe0] sm:$0xff]  }
 0x309   : > { %14449 = vmatprep.subr.bf16.mxu0 %v17329_v0 }
 0x3b2   : > { %v1177_v5 = vpop.f32.mrb[8].mxu1 }
 0x3b3   : > { %v1184_v6 = vadd.f32 %v1177_v5, %v17785_v33  ;;  %v14367_v7 = vpop.f32.mrb[9].mxu1  ;;  %v16621_v5 = vld [vmem:[#allocation4 + $0xe8] sm:$0xff]  }
 0x3b4   : > { %v1180_v8 = vpop.f32.mrb[10].mxu1  ;;  %v16623_v7 = vld [vmem:[#allocation4 + $0xf8] sm:$0xff]  }
 0x3b5   : > { %v1185_v9 = vadd.f32 %v1180_v8, %v17787_v38  ;;  %v14368_v10 = vpop.f32.mrb[11].mxu1  ;;  %v16614_v38 = vld [vmem:[#allocation4 + $0xc0] sm:$0xff]  }
 0x3b6   : > { %v16624_v8 = vld [vmem:[#allocation4 + $0x100] sm:$0xff]  }
 0x3be   : > { %v1301_v11 = vpop.f32.mrb[12].mxu1 }
 0x3bf   : > { %v1308_v12 = vadd.f32 %v1301_v11, %v1184_v6  ;;  %v14383_v13 = vpop.f32.mrb[13].mxu1  ;;  %v16622_v6 = vld [vmem:[#allocation4 + $0xf0] sm:$0xff]  }
 0x3c0   : > { %v1304_v14 = vpop.f32.mrb[14].mxu1 }
 0x3c1   : > { %v1309_v15 = vadd.f32 %v1304_v14, %v1185_v9  ;;  %v14384_v16 = vpop.f32.mrb[15].mxu1 }
 0x3c2   : > { %v1425_v17 = vpop.f32.mrb[20].mxu0 }
 0x3c3   : > { %v1432_v18 = vadd.f32 %v1425_v17, %v1308_v12  ;;  %v14399_v19 = vpop.f32.mrb[21].mxu0 }
 0x3c4   : > { %v1428_v20 = vpop.f32.mrb[22].mxu0 }
 0x3c5   : > { %v1433_v21 = vadd.f32 %v1428_v20, %v1309_v15  ;;  %v14400_v22 = vpop.f32.mrb[23].mxu0 }
 0x3ca   : > { %v1479_v23 = vpop.f32.mrb[24].mxu0 }
 0x3cb   : > { %v14405_v24 = vpop.f32.mrb[25].mxu0 }
 0x3cc   : > { %v1482_v25 = vpop.f32.mrb[26].mxu0 }
 0x3cd   : > { %v1486_v26 = vpack.c.bf16 %v1482_v25, %v1479_v23  ;;  %v14406_v27 = vpop.f32.mrb[27].mxu0 }
 0x3cf   : > { %14414 = vmatmul.mubr.msk.bf16.vlgmr.msra.gmra.mrb[16].mxu1 %vm955_vm2, %v1486_v26 }
 0x3d0   : > { %14434 = vmatpush3.bf16.msra.mxu1 %v17740_v3  ;;  %14435 = vmatprep.mubr.msk.bf16.mxu1 %vm17330_vm0, %v17329_v0 }
 0x3d1   : > { %14439 = vmatprep.subr.bf16.mxu1 %v17329_v0 }
 0x3d2   : > { %v1603_v28 = vpop.f32.mrb[28].mxu0 }
 0x3d3   : > { %v14421_v29 = vpop.f32.mrb[29].mxu0 }
 0x3d4   : > { %v1606_v31 = vpop.f32.mrb[30].mxu0 }
 0x3d5   : > { %v1610_v32 = vpack.c.bf16 %v1606_v31, %v1603_v28  ;;  %v14422_v33 = vpop.f32.mrb[31].mxu0  ;;  %v16625_v28 = vld [vmem:[#allocation2 + $0x58] sm:$0xff]  }
 0x3d6   : > { %v16627_v33 = vld [vmem:[#allocation4 + $0x108] sm:$0xff]  }
 0x3d7   : > { %14430 = vmatmul.mubr.msk.bf16.vlgmr.msra.gmra.mrb[32].mxu0 %vm955_vm2, %v1610_v32  ;;  %14436 = vmatmul.mubr.msk.bf16.vlgmr.msra.gmra.mrb[20].mxu1 %vm825_vm1, %v16609_v30  ;;  %v16626_v32 = vld [vmem:[#allocation2 + $0x60] sm:$0xff]  }
 0x3d8   : > { %14450 = vmatpush3.bf16.msra.mxu0 %v17740_v3  ;;  %14451 = vmatprep.mubr.msk.bf16.mxu0 %vm17330_vm0, %v17329_v0 }
 0x3d9   : > { %14455 = vmatprep.subr.bf16.mxu0 %v17329_v0  ;;  %14445 = vmatprep.mubr.msk.bf16.mxu1 %vm17330_vm0, %v17329_v0 }
 0x3da   : > { %14440 = vmatpush3.bf16.msra.mxu1 %v16611_v35  ;;  %v16629_v35 = vld [vmem:[#allocation4 + $0x118] sm:$0xff]  }
 0x3db   : > { %14441 = vmatprep.subr.bf16.mxu1 %v17329_v0 }
 0x3de   : > { %14442 = vmatpush3.bf16.msra.mxu1 %v16612_v36  ;;  %v16630_v36 = vld [vmem:[#allocation4 + $0x120] sm:$0xff]  }
 0x3df   : > { %14452 = vmatmul.mubr.msk.bf16.vlgmr.msra.gmra.mrb[36].mxu0 %vm825_vm1, %v16610_v34  ;;  %14443 = vmatprep.subr.bf16.mxu1 %v17329_v0  ;;  %v16628_v34 = vld [vmem:[#allocation4 + $0x110] sm:$0xff]  }
 0x3e0   : > { %14461 = vmatprep.mubr.msk.bf16.mxu0 %vm17330_vm0, %v17329_v0  ;;  %14456 = vmatpush3.bf16.msra.mxu0 %v16614_v38  ;;  %v16632_v38 = vld [vmem:[#allocation4 + $0x130] sm:$0xff]  }
 0x3e1   : > { %14457 = vmatprep.subr.bf16.mxu0 %v17329_v0 }
 0x3e2   : > { %14444 = vmatpush3.bf16.msra.mxu1 %v16613_v37  ;;  %v16631_v37 = vld [vmem:[#allocation4 + $0x128] sm:$0xff]  }
 0x3e3   : > { %14465 = vmatprep.subr.bf16.mxu1 %v17329_v0 }
 0x3e4   : > { %14458 = vmatpush3.bf16.msra.mxu0 %v16615_v39 }
 0x3e5   : > { %14459 = vmatprep.subr.bf16.mxu0 %v17329_v0 }
 0x3e8   : > { %14460 = vmatpush3.bf16.msra.mxu0 %v16616_v40 }
 0x3e9   : > { %14481 = vmatprep.subr.bf16.mxu0 %v17329_v0 }
 0x4a2   : > { %v1549_v41 = vpop.f32.mrb[16].mxu1 }
 0x4a3   : > { %v1556_v42 = vadd.f32 %v1549_v41, %v1432_v18  ;;  %v14415_v43 = vpop.f32.mrb[17].mxu1 }
 0x4a4   : > { %v1552_v44 = vpop.f32.mrb[18].mxu1 }
 0x4a5   : > { %v1557_v45 = vadd.f32 %v1552_v44, %v1433_v21  ;;  %v14416_v46 = vpop.f32.mrb[19].mxu1 }
 0x4aa   : > { %v1673_v47 = vpop.f32.mrb[32].mxu0  ;;  %v1727_v48 = vpop.f32.mrb[20].mxu1 }
 0x4ab   : > { %v1680_v49 = vadd.f32 %v1673_v47, %v1556_v42  ;;  %v14431_v50 = vpop.f32.mrb[33].mxu0  ;;  %v14437_v51 = vpop.f32.mrb[21].mxu1 }
 0x4ac   : > { %v1676_v52 = vpop.f32.mrb[34].mxu0  ;;  %v1730_v53 = vpop.f32.mrb[22].mxu1 }
 0x4ad   : > { %v1681_v54 = vadd.f32 %v1676_v52, %v1557_v45  ;;  %v1734_v55 = vpack.c.bf16 %v1730_v53, %v1727_v48  ;;  %v14432_v56 = vpop.f32.mrb[35].mxu0  ;;  %v14438_v57 = vpop.f32.mrb[23].mxu1 }
 0x4af   : > { %14446 = vmatmul.mubr.msk.bf16.vlgmr.msra.gmra.mrb[24].mxu1 %vm955_vm2, %v1734_v55 }
 0x4b0   : > { %14466 = vmatpush3.bf16.msra.mxu1 %v17740_v3  ;;  %14467 = vmatprep.mubr.msk.bf16.mxu1 %vm17330_vm0, %v17329_v0 }
 0x4b1   : > { %14471 = vmatprep.subr.bf16.mxu1 %v17329_v0 }
 0x4b2   : > { %v1851_v58 = vpop.f32.mrb[36].mxu0 }
 0x4b3   : > { %v14453_v59 = vpop.f32.mrb[37].mxu0 }
 0x4b4   : > { %v1854_v61 = vpop.f32.mrb[38].mxu0 }
 0x4b5   : > { %v1858_v62 = vpack.c.bf16 %v1854_v61, %v1851_v58  ;;  %v14454_v63 = vpop.f32.mrb[39].mxu0  ;;  %v16633_v58 = vld [vmem:[#allocation2 + $0x68] sm:$0xff]  }
 0x4b6   : > { %v16635_v63 = vld [vmem:[#allocation4 + $0x138] sm:$0xff]  }
 0x4b7   : > { %14462 = vmatmul.mubr.msk.bf16.vlgmr.msra.gmra.mrb[40].mxu0 %vm955_vm2, %v1858_v62  ;;  %14468 = vmatmul.mubr.msk.bf16.vlgmr.msra.gmra.mrb[28].mxu1 %vm825_vm1, %v16617_v60  ;;  %v16634_v62 = vld [vmem:[#allocation2 + $0x70] sm:$0xff]  }
 0x4b8   : > { %14482 = vmatpush3.bf16.msra.mxu0 %v17740_v3  ;;  %14483 = vmatprep.mubr.msk.bf16.mxu0 %vm17330_vm0, %v17329_v0 }
 0x4b9   : > { %14487 = vmatprep.subr.bf16.mxu0 %v17329_v0  ;;  %14477 = vmatprep.mubr.msk.bf16.mxu1 %vm17330_vm0, %v17329_v0 }
 0x4ba   : > { %14472 = vmatpush3.bf16.msra.mxu1 %v16619_v2  ;;  %v16637_v2 = vld [vmem:[#allocation4 + $0x148] sm:$0xff]  }
 0x4bb   : > { %14473 = vmatprep.subr.bf16.mxu1 %v17329_v0 }
 0x4be   : > { %14474 = vmatpush3.bf16.msra.mxu1 %v16620_v4  ;;  %v16638_v4 = vld [vmem:[#allocation4 + $0x150] sm:$0xff]  }
 0x4bf   : > { %14484 = vmatmul.mubr.msk.bf16.vlgmr.msra.gmra.mrb[44].mxu0 %vm825_vm1, %v16618_v1  ;;  %14475 = vmatprep.subr.bf16.mxu1 %v17329_v0  ;;  %v16636_v1 = vld [vmem:[#allocation4 + $0x140] sm:$0xff]  }
 0x4c0   : > { %14493 = vmatprep.mubr.msk.bf16.mxu0 %vm17330_vm0, %v17329_v0  ;;  %14488 = vmatpush3.bf16.msra.mxu0 %v16622_v6  ;;  %v16640_v6 = vld [vmem:[#allocation4 + $0x160] sm:$0xff]  }
 0x4c1   : > { %14489 = vmatprep.subr.bf16.mxu0 %v17329_v0 }
 0x4c2   : > { %14476 = vmatpush3.bf16.msra.mxu1 %v16621_v5  ;;  %v16639_v5 = vld [vmem:[#allocation4 + $0x158] sm:$0xff]  }
 0x4c3   : > { %14497 = vmatprep.subr.bf16.mxu1 %v17329_v0 }
 0x4c4   : > { %14490 = vmatpush3.bf16.msra.mxu0 %v16623_v7 }
 0x4c5   : > { %14491 = vmatprep.subr.bf16.mxu0 %v17329_v0 }
 0x4c8   : > { %14492 = vmatpush3.bf16.msra.mxu0 %v16624_v8 }
 0x4c9   : > { %14513 = vmatprep.subr.bf16.mxu0 %v17329_v0 }
 0x582   : > { %v1797_v9 = vpop.f32.mrb[24].mxu1 }
 0x583   : > { %v1804_v10 = vadd.f32 %v1797_v9, %v1680_v49  ;;  %v14447_v11 = vpop.f32.mrb[25].mxu1 }
 0x584   : > { %v1800_v12 = vpop.f32.mrb[26].mxu1 }
 0x585   : > { %v1805_v13 = vadd.f32 %v1800_v12, %v1681_v54  ;;  %v14448_v14 = vpop.f32.mrb[27].mxu1 }
 0x58a   : > { %v1921_v15 = vpop.f32.mrb[40].mxu0  ;;  %v1975_v16 = vpop.f32.mrb[28].mxu1 }
 0x58b   : > { %v1928_v17 = vadd.f32 %v1921_v15, %v1804_v10  ;;  %v14463_v18 = vpop.f32.mrb[41].mxu0  ;;  %v14469_v19 = vpop.f32.mrb[29].mxu1 }
 0x58c   : > { %v1924_v20 = vpop.f32.mrb[42].mxu0  ;;  %v1978_v21 = vpop.f32.mrb[30].mxu1 }
 0x58d   : > { %v1929_v22 = vadd.f32 %v1924_v20, %v1805_v13  ;;  %v1982_v23 = vpack.c.bf16 %v1978_v21, %v1975_v16  ;;  %v14464_v24 = vpop.f32.mrb[43].mxu0  ;;  %v14470_v25 = vpop.f32.mrb[31].mxu1 }
 0x58f   : > { %14478 = vmatmul.mubr.msk.bf16.vlgmr.msra.gmra.mrb[32].mxu1 %vm955_vm2, %v1982_v23 }
 0x590   : > { %14498 = vmatpush3.bf16.msra.mxu1 %v17740_v3  ;;  %14499 = vmatprep.mubr.msk.bf16.mxu1 %vm17330_vm0, %v17329_v0 }
 0x591   : > { %14503 = vmatprep.subr.bf16.mxu1 %v17329_v0 }
 0x592   : > { %v2099_v26 = vpop.f32.mrb[44].mxu0 }
 0x593   : > { %v14485_v27 = vpop.f32.mrb[45].mxu0 }
 0x594   : > { %v2102_v29 = vpop.f32.mrb[46].mxu0 }
 0x595   : > { %v2106_v30 = vpack.c.bf16 %v2102_v29, %v2099_v26  ;;  %v14486_v31 = vpop.f32.mrb[47].mxu0  ;;  %v16641_v26 = vld [vmem:[#allocation2 + $0x78] sm:$0xff]  }
 0x596   : > { %v16643_v31 = vld [vmem:[#allocation4 + $0x168] sm:$0xff]  }
 0x597   : > { %14494 = vmatmul.mubr.msk.bf16.vlgmr.msra.gmra.mrb[48].mxu0 %vm955_vm2, %v2106_v30  ;;  %14500 = vmatmul.mubr.msk.bf16.vlgmr.msra.gmra.mrb[36].mxu1 %vm825_vm1, %v16625_v28  ;;  %v16642_v30 = vld [vmem:[#allocation2 + $0x80] sm:$0xff]  }
 0x598   : > { %14514 = vmatpush3.bf16.msra.mxu0 %v17740_v3  ;;  %14515 = vmatprep.mubr.msk.bf16.mxu0 %vm17330_vm0, %v17329_v0 }
 0x599   : > { %14519 = vmatprep.subr.bf16.mxu0 %v17329_v0  ;;  %14509 = vmatprep.mubr.msk.bf16.mxu1 %vm17330_vm0, %v17329_v0 }
 0x59a   : > { %14504 = vmatpush3.bf16.msra.mxu1 %v16627_v33  ;;  %v16645_v33 = vld [vmem:[#allocation4 + $0x178] sm:$0xff]  }
 0x59b   : > { %14505 = vmatprep.subr.bf16.mxu1 %v17329_v0 }
 0x59e   : > { %14506 = vmatpush3.bf16.msra.mxu1 %v16628_v34  ;;  %v16646_v34 = vld [vmem:[#allocation4 + $0x180] sm:$0xff]  }
 0x59f   : > { %14516 = vmatmul.mubr.msk.bf16.vlgmr.msra.gmra.mrb[52].mxu0 %vm825_vm1, %v16626_v32  ;;  %14507 = vmatprep.subr.bf16.mxu1 %v17329_v0  ;;  %v16644_v32 = vld [vmem:[#allocation4 + $0x170] sm:$0xff]  }
 0x5a0   : > { %14525 = vmatprep.mubr.msk.bf16.mxu0 %vm17330_vm0, %v17329_v0  ;;  %14520 = vmatpush3.bf16.msra.mxu0 %v16630_v36  ;;  %v16648_v36 = vld [vmem:[#allocation4 + $0x190] sm:$0xff]  }
 0x5a1   : > { %14521 = vmatprep.subr.bf16.mxu0 %v17329_v0 }
 0x5a2   : > { %14508 = vmatpush3.bf16.msra.mxu1 %v16629_v35  ;;  %v16647_v35 = vld [vmem:[#allocation4 + $0x188] sm:$0xff]  }
 0x5a3   : > { %14529 = vmatprep.subr.bf16.mxu1 %v17329_v0 }
 0x5a4   : > { %14522 = vmatpush3.bf16.msra.mxu0 %v16631_v37 }
 0x5a5   : > { %14523 = vmatprep.subr.bf16.mxu0 %v17329_v0 }
 0x5a8   : > { %14524 = vmatpush3.bf16.msra.mxu0 %v16632_v38 }
 0x5a9   : > { %14545 = vmatprep.subr.bf16.mxu0 %v17329_v0 }
 0x662   : > { %v2045_v39 = vpop.f32.mrb[32].mxu1 }
 0x663   : > { %v2052_v40 = vadd.f32 %v2045_v39, %v1928_v17  ;;  %v14479_v41 = vpop.f32.mrb[33].mxu1 }
 0x664   : > { %v2048_v42 = vpop.f32.mrb[34].mxu1 }
 0x665   : > { %v2053_v43 = vadd.f32 %v2048_v42, %v1929_v22  ;;  %v14480_v44 = vpop.f32.mrb[35].mxu1 }
 0x66a   : > { %v2169_v45 = vpop.f32.mrb[48].mxu0  ;;  %v2223_v46 = vpop.f32.mrb[36].mxu1 }
 0x66b   : > { %v2176_v47 = vadd.f32 %v2169_v45, %v2052_v40  ;;  %v14495_v48 = vpop.f32.mrb[49].mxu0  ;;  %v14501_v49 = vpop.f32.mrb[37].mxu1 }
 0x66c   : > { %v2172_v50 = vpop.f32.mrb[50].mxu0  ;;  %v2226_v51 = vpop.f32.mrb[38].mxu1 }
 0x66d   : > { %v2177_v52 = vadd.f32 %v2172_v50, %v2053_v43  ;;  %v2230_v53 = vpack.c.bf16 %v2226_v51, %v2223_v46  ;;  %v14496_v54 = vpop.f32.mrb[51].mxu0  ;;  %v14502_v55 = vpop.f32.mrb[39].mxu1 }
 0x66f   : > { %14510 = vmatmul.mubr.msk.bf16.vlgmr.msra.gmra.mrb[40].mxu1 %vm955_vm2, %v2230_v53 }
 0x670   : > { %14530 = vmatpush3.bf16.msra.mxu1 %v17740_v3  ;;  %14531 = vmatprep.mubr.msk.bf16.mxu1 %vm17330_vm0, %v17329_v0 }
 0x671   : > { %14535 = vmatprep.subr.bf16.mxu1 %v17329_v0 }
 0x672   : > { %v2347_v56 = vpop.f32.mrb[52].mxu0 }
 0x673   : > { %v14517_v57 = vpop.f32.mrb[53].mxu0 }
 0x674   : > { %v2350_v59 = vpop.f32.mrb[54].mxu0 }
 0x675   : > { %v2354_v60 = vpack.c.bf16 %v2350_v59, %v2347_v56  ;;  %v14518_v61 = vpop.f32.mrb[55].mxu0  ;;  %v16649_v56 = vld [vmem:[#allocation2 + $0x88] sm:$0xff]  }
 0x676   : > { %v16651_v61 = vld [vmem:[#allocation4 + $0x198] sm:$0xff]  }
 0x677   : > { %14526 = vmatmul.mubr.msk.bf16.vlgmr.msra.gmra.mrb[56].mxu0 %vm955_vm2, %v2354_v60  ;;  %14532 = vmatmul.mubr.msk.bf16.vlgmr.msra.gmra.mrb[44].mxu1 %vm825_vm1, %v16633_v58  ;;  %v16650_v60 = vld [vmem:[#allocation2 + $0x90] sm:$0xff]  }
 0x678   : > { %14546 = vmatpush3.bf16.msra.mxu0 %v17740_v3  ;;  %14547 = vmatprep.mubr.msk.bf16.mxu0 %vm17330_vm0, %v17329_v0 }
 0x679   : > { %14551 = vmatprep.subr.bf16.mxu0 %v17329_v0  ;;  %14541 = vmatprep.mubr.msk.bf16.mxu1 %vm17330_vm0, %v17329_v0 }
 0x67a   : > { %14536 = vmatpush3.bf16.msra.mxu1 %v16635_v63  ;;  %v16653_v63 = vld [vmem:[#allocation4 + $0x1a8] sm:$0xff]  }
 0x67b   : > { %14537 = vmatprep.subr.bf16.mxu1 %v17329_v0 }
 0x67e   : > { %14538 = vmatpush3.bf16.msra.mxu1 %v16636_v1  ;;  %v16654_v1 = vld [vmem:[#allocation4 + $0x1b0] sm:$0xff]  }
 0x67f   : > { %14548 = vmatmul.mubr.msk.bf16.vlgmr.msra.gmra.mrb[60].mxu0 %vm825_vm1, %v16634_v62  ;;  %14539 = vmatprep.subr.bf16.mxu1 %v17329_v0  ;;  %v16652_v62 = vld [vmem:[#allocation4 + $0x1a0] sm:$0xff]  }
 0x680   : > { %14557 = vmatprep.mubr.msk.bf16.mxu0 %vm17330_vm0, %v17329_v0  ;;  %14552 = vmatpush3.bf16.msra.mxu0 %v16638_v4  ;;  %v16656_v4 = vld [vmem:[#allocation4 + $0x1c0] sm:$0xff]  }
 0x681   : > { %14553 = vmatprep.subr.bf16.mxu0 %v17329_v0 }
 0x682   : > { %14540 = vmatpush3.bf16.msra.mxu1 %v16637_v2  ;;  %v16655_v2 = vld [vmem:[#allocation4 + $0x1b8] sm:$0xff]  }
 0x683   : > { %14561 = vmatprep.subr.bf16.mxu1 %v17329_v0 }
 0x684   : > { %14554 = vmatpush3.bf16.msra.mxu0 %v16639_v5 }
 0x685   : > { %14555 = vmatprep.subr.bf16.mxu0 %v17329_v0 }
 0x688   : > { %14556 = vmatpush3.bf16.msra.mxu0 %v16640_v6 }
 0x689   : > { %14577 = vmatprep.subr.bf16.mxu0 %v17329_v0 }
 0x742   : > { %v2293_v7 = vpop.f32.mrb[40].mxu1 }
 0x743   : > { %v2300_v8 = vadd.f32 %v2293_v7, %v2176_v47  ;;  %v14511_v9 = vpop.f32.mrb[41].mxu1 }
 0x744   : > { %v2296_v10 = vpop.f32.mrb[42].mxu1 }
 0x745   : > { %v2301_v11 = vadd.f32 %v2296_v10, %v2177_v52  ;;  %v14512_v12 = vpop.f32.mrb[43].mxu1 }
 0x74a   : > { %v2417_v13 = vpop.f32.mrb[56].mxu0  ;;  %v2471_v14 = vpop.f32.mrb[44].mxu1 }
 0x74b   : > { %v2424_v15 = vadd.f32 %v2417_v13, %v2300_v8  ;;  %v14527_v16 = vpop.f32.mrb[57].mxu0  ;;  %v14533_v17 = vpop.f32.mrb[45].mxu1 }
 0x74c   : > { %v2420_v18 = vpop.f32.mrb[58].mxu0  ;;  %v2474_v19 = vpop.f32.mrb[46].mxu1 }
 0x74d   : > { %v2425_v20 = vadd.f32 %v2420_v18, %v2301_v11  ;;  %v2478_v21 = vpack.c.bf16 %v2474_v19, %v2471_v14  ;;  %v14528_v22 = vpop.f32.mrb[59].mxu0  ;;  %v14534_v23 = vpop.f32.mrb[47].mxu1 }
 0x74f   : > { %14542 = vmatmul.mubr.msk.bf16.vlgmr.msra.gmra.mrb[48].mxu1 %vm955_vm2, %v2478_v21 }
 0x750   : > { %14562 = vmatpush3.bf16.msra.mxu1 %v17740_v3  ;;  %14563 = vmatprep.mubr.msk.bf16.mxu1 %vm17330_vm0, %v17329_v0 }
 0x751   : > { %14567 = vmatprep.subr.bf16.mxu1 %v17329_v0 }
 0x752   : > { %v2595_v24 = vpop.f32.mrb[60].mxu0 }
 0x753   : > { %v14549_v25 = vpop.f32.mrb[61].mxu0 }
 0x754   : > { %v2598_v27 = vpop.f32.mrb[62].mxu0 }
 0x755   : > { %v2602_v28 = vpack.c.bf16 %v2598_v27, %v2595_v24  ;;  %v14550_v29 = vpop.f32.mrb[63].mxu0  ;;  %v16657_v24 = vld [vmem:[#allocation2 + $0x98] sm:$0xff]  }
 0x756   : > { %v16659_v29 = vld [vmem:[#allocation4 + $0x1c8] sm:$0xff]  }
 0x757   : > { %14558 = vmatmul.mubr.msk.bf16.vlgmr.msra.gmra.mrb[64].mxu0 %vm955_vm2, %v2602_v28  ;;  %14564 = vmatmul.mubr.msk.bf16.vlgmr.msra.gmra.mrb[52].mxu1 %vm825_vm1, %v16641_v26  ;;  %v16658_v28 = vld [vmem:[#allocation2 + $0xa0] sm:$0xff]  }
 0x758   : > { %14578 = vmatpush3.bf16.msra.mxu0 %v17740_v3  ;;  %14579 = vmatprep.mubr.msk.bf16.mxu0 %vm17330_vm0, %v17329_v0 }
 0x759   : > { %14583 = vmatprep.subr.bf16.mxu0 %v17329_v0  ;;  %14573 = vmatprep.mubr.msk.bf16.mxu1 %vm17330_vm0, %v17329_v0 }
 0x75a   : > { %14568 = vmatpush3.bf16.msra.mxu1 %v16643_v31  ;;  %v16661_v31 = vld [vmem:[#allocation4 + $0x1d8] sm:$0xff]  }
 0x75b   : > { %14569 = vmatprep.subr.bf16.mxu1 %v17329_v0 }
 0x75e   : > { %14570 = vmatpush3.bf16.msra.mxu1 %v16644_v32  ;;  %v16662_v32 = vld [vmem:[#allocation4 + $0x1e0] sm:$0xff]  }
 0x75f   : > { %14580 = vmatmul.mubr.msk.bf16.vlgmr.msra.gmra.mrb[68].mxu0 %vm825_vm1, %v16642_v30  ;;  %14571 = vmatprep.subr.bf16.mxu1 %v17329_v0  ;;  %v16660_v30 = vld [vmem:[#allocation4 + $0x1d0] sm:$0xff]  }
 0x760   : > { %14589 = vmatprep.mubr.msk.bf16.mxu0 %vm17330_vm0, %v17329_v0  ;;  %14584 = vmatpush3.bf16.msra.mxu0 %v16646_v34  ;;  %v16664_v34 = vld [vmem:[#allocation4 + $0x1f0] sm:$0xff]  }
 0x761   : > { %14585 = vmatprep.subr.bf16.mxu0 %v17329_v0 }
 0x762   : > { %14572 = vmatpush3.bf16.msra.mxu1 %v16645_v33  ;;  %v16663_v33 = vld [vmem:[#allocation4 + $0x1e8] sm:$0xff]  }
 0x763   : > { %14593 = vmatprep.subr.bf16.mxu1 %v17329_v0 }
 0x764   : > { %14586 = vmatpush3.bf16.msra.mxu0 %v16647_v35 }
 0x765   : > { %14587 = vmatprep.subr.bf16.mxu0 %v17329_v0 }
 0x768   : > { %14588 = vmatpush3.bf16.msra.mxu0 %v16648_v36 }
 0x769   : > { %14609 = vmatprep.subr.bf16.mxu0 %v17329_v0 }
 0x822   : > { %v2541_v37 = vpop.f32.mrb[48].mxu1 }
 0x823   : > { %v2548_v38 = vadd.f32 %v2541_v37, %v2424_v15  ;;  %v14543_v39 = vpop.f32.mrb[49].mxu1 }
 0x824   : > { %v2544_v40 = vpop.f32.mrb[50].mxu1 }
 0x825   : > { %v2549_v41 = vadd.f32 %v2544_v40, %v2425_v20  ;;  %v14544_v42 = vpop.f32.mrb[51].mxu1 }
 0x82a   : > { %v2665_v43 = vpop.f32.mrb[64].mxu0  ;;  %v2719_v44 = vpop.f32.mrb[52].mxu1 }
 0x82b   : > { %v2672_v45 = vadd.f32 %v2665_v43, %v2548_v38  ;;  %v14559_v46 = vpop.f32.mrb[65].mxu0  ;;  %v14565_v47 = vpop.f32.mrb[53].mxu1 }
 0x82c   : > { %v2668_v48 = vpop.f32.mrb[66].mxu0  ;;  %v2722_v49 = vpop.f32.mrb[54].mxu1 }
 0x82d   : > { %v2673_v50 = vadd.f32 %v2668_v48, %v2549_v41  ;;  %v2726_v51 = vpack.c.bf16 %v2722_v49, %v2719_v44  ;;  %v14560_v52 = vpop.f32.mrb[67].mxu0  ;;  %v14566_v53 = vpop.f32.mrb[55].mxu1 }
 0x82f   : > { %14574 = vmatmul.mubr.msk.bf16.vlgmr.msra.gmra.mrb[56].mxu1 %vm955_vm2, %v2726_v51 }
 0x830   : > { %14594 = vmatpush3.bf16.msra.mxu1 %v17740_v3  ;;  %14595 = vmatprep.mubr.msk.bf16.mxu1 %vm17330_vm0, %v17329_v0 }
 0x831   : > { %14599 = vmatprep.subr.bf16.mxu1 %v17329_v0 }
 0x832   : > { %v2843_v54 = vpop.f32.mrb[68].mxu0 }
 0x833   : > { %v14581_v55 = vpop.f32.mrb[69].mxu0 }
 0x834   : > { %v2846_v57 = vpop.f32.mrb[70].mxu0 }
 0x835   : > { %v2850_v58 = vpack.c.bf16 %v2846_v57, %v2843_v54  ;;  %v14582_v59 = vpop.f32.mrb[71].mxu0  ;;  %v16665_v54 = vld [vmem:[#allocation2 + $0xa8] sm:$0xff]  }
 0x836   : > { %v16667_v59 = vld [vmem:[#allocation4 + $0x1f8] sm:$0xff]  }
 0x837   : > { %14590 = vmatmul.mubr.msk.bf16.vlgmr.msra.gmra.mrb[72].mxu0 %vm955_vm2, %v2850_v58  ;;  %14596 = vmatmul.mubr.msk.bf16.vlgmr.msra.gmra.mrb[60].mxu1 %vm825_vm1, %v16649_v56  ;;  %v16666_v58 = vld [vmem:[#allocation2 + $0xb0] sm:$0xff]  }
 0x838   : > { %14610 = vmatpush3.bf16.msra.mxu0 %v17740_v3  ;;  %14611 = vmatprep.mubr.msk.bf16.mxu0 %vm17330_vm0, %v17329_v0 }
 0x839   : > { %14615 = vmatprep.subr.bf16.mxu0 %v17329_v0  ;;  %14605 = vmatprep.mubr.msk.bf16.mxu1 %vm17330_vm0, %v17329_v0 }
 0x83a   : > { %14600 = vmatpush3.bf16.msra.mxu1 %v16651_v61  ;;  %v16669_v61 = vld [vmem:[#allocation4 + $0x208] sm:$0xff]  }
 0x83b   : > { %14601 = vmatprep.subr.bf16.mxu1 %v17329_v0 }
 0x83e   : > { %14602 = vmatpush3.bf16.msra.mxu1 %v16652_v62  ;;  %v16670_v62 = vld [vmem:[#allocation4 + $0x210] sm:$0xff]  }
 0x83f   : > { %14612 = vmatmul.mubr.msk.bf16.vlgmr.msra.gmra.mrb[76].mxu0 %vm825_vm1, %v16650_v60  ;;  %14603 = vmatprep.subr.bf16.mxu1 %v17329_v0  ;;  %v16668_v60 = vld [vmem:[#allocation4 + $0x200] sm:$0xff]  }
 0x840   : > { %14621 = vmatprep.mubr.msk.bf16.mxu0 %vm17330_vm0, %v17329_v0  ;;  %14616 = vmatpush3.bf16.msra.mxu0 %v16654_v1  ;;  %v16672_v1 = vld [vmem:[#allocation4 + $0x220] sm:$0xff]  }
 0x841   : > { %14617 = vmatprep.subr.bf16.mxu0 %v17329_v0 }
 0x842   : > { %14604 = vmatpush3.bf16.msra.mxu1 %v16653_v63  ;;  %v16671_v63 = vld [vmem:[#allocation4 + $0x218] sm:$0xff]  }
 0x843   : > { %14625 = vmatprep.subr.bf16.mxu1 %v17329_v0 }
 0x844   : > { %14618 = vmatpush3.bf16.msra.mxu0 %v16655_v2 }
 0x845   : > { %14619 = vmatprep.subr.bf16.mxu0 %v17329_v0 }
 0x848   : > { %14620 = vmatpush3.bf16.msra.mxu0 %v16656_v4 }
 0x849   : > { %14641 = vmatprep.subr.bf16.mxu0 %v17329_v0 }
 0x902   : > { %v2789_v5 = vpop.f32.mrb[56].mxu1 }
 0x903   : > { %v2796_v6 = vadd.f32 %v2789_v5, %v2672_v45  ;;  %v14575_v7 = vpop.f32.mrb[57].mxu1 }
 0x904   : > { %v2792_v8 = vpop.f32.mrb[58].mxu1 }
 0x905   : > { %v2797_v9 = vadd.f32 %v2792_v8, %v2673_v50  ;;  %v14576_v10 = vpop.f32.mrb[59].mxu1 }
 0x90a   : > { %v2913_v11 = vpop.f32.mrb[72].mxu0  ;;  %v2967_v12 = vpop.f32.mrb[60].mxu1 }
 0x90b   : > { %v2920_v13 = vadd.f32 %v2913_v11, %v2796_v6  ;;  %v14591_v14 = vpop.f32.mrb[73].mxu0  ;;  %v14597_v15 = vpop.f32.mrb[61].mxu1 }
 0x90c   : > { %v2916_v16 = vpop.f32.mrb[74].mxu0  ;;  %v2970_v17 = vpop.f32.mrb[62].mxu1 }
 0x90d   : > { %v2921_v18 = vadd.f32 %v2916_v16, %v2797_v9  ;;  %v2974_v19 = vpack.c.bf16 %v2970_v17, %v2967_v12  ;;  %v14592_v20 = vpop.f32.mrb[75].mxu0  ;;  %v14598_v21 = vpop.f32.mrb[63].mxu1 }
 0x90f   : > { %14606 = vmatmul.mubr.msk.bf16.vlgmr.msra.gmra.mrb[64].mxu1 %vm955_vm2, %v2974_v19 }
 0x910   : > { %14626 = vmatpush3.bf16.msra.mxu1 %v17740_v3  ;;  %14627 = vmatprep.mubr.msk.bf16.mxu1 %vm17330_vm0, %v17329_v0 }
 0x911   : > { %14631 = vmatprep.subr.bf16.mxu1 %v17329_v0 }
 0x912   : > { %v3091_v22 = vpop.f32.mrb[76].mxu0 }
 0x913   : > { %v14613_v23 = vpop.f32.mrb[77].mxu0 }
 0x914   : > { %v3094_v25 = vpop.f32.mrb[78].mxu0 }
 0x915   : > { %v3098_v26 = vpack.c.bf16 %v3094_v25, %v3091_v22  ;;  %v14614_v27 = vpop.f32.mrb[79].mxu0  ;;  %v16673_v22 = vld [vmem:[#allocation2 + $0xb8] sm:$0xff]  }
 0x916   : > { %v16675_v27 = vld [vmem:[#allocation4 + $0x228] sm:$0xff]  }
 0x917   : > { %14622 = vmatmul.mubr.msk.bf16.vlgmr.msra.gmra.mrb[80].mxu0 %vm955_vm2, %v3098_v26  ;;  %14628 = vmatmul.mubr.msk.bf16.vlgmr.msra.gmra.mrb[68].mxu1 %vm825_vm1, %v16657_v24  ;;  %v16674_v26 = vld [vmem:[#allocation2 + $0xc0] sm:$0xff]  }
 0x918   : > { %14642 = vmatpush3.bf16.msra.mxu0 %v17740_v3  ;;  %14643 = vmatprep.mubr.msk.bf16.mxu0 %vm17330_vm0, %v17329_v0 }
 0x919   : > { %14647 = vmatprep.subr.bf16.mxu0 %v17329_v0  ;;  %14637 = vmatprep.mubr.msk.bf16.mxu1 %vm17330_vm0, %v17329_v0 }
 0x91a   : > { %14632 = vmatpush3.bf16.msra.mxu1 %v16659_v29  ;;  %v16677_v29 = vld [vmem:[#allocation4 + $0x238] sm:$0xff]  }
 0x91b   : > { %14633 = vmatprep.subr.bf16.mxu1 %v17329_v0 }
 0x91e   : > { %14634 = vmatpush3.bf16.msra.mxu1 %v16660_v30  ;;  %v16678_v30 = vld [vmem:[#allocation4 + $0x240] sm:$0xff]  }
 0x91f   : > { %14644 = vmatmul.mubr.msk.bf16.vlgmr.msra.gmra.mrb[84].mxu0 %vm825_vm1, %v16658_v28  ;;  %14635 = vmatprep.subr.bf16.mxu1 %v17329_v0  ;;  %v16676_v28 = vld [vmem:[#allocation4 + $0x230] sm:$0xff]  }
 0x920   : > { %14653 = vmatprep.mubr.msk.bf16.mxu0 %vm17330_vm0, %v17329_v0  ;;  %14648 = vmatpush3.bf16.msra.mxu0 %v16662_v32  ;;  %v16680_v32 = vld [vmem:[#allocation4 + $0x250] sm:$0xff]  }
 0x921   : > { %14649 = vmatprep.subr.bf16.mxu0 %v17329_v0 }
 0x922   : > { %14636 = vmatpush3.bf16.msra.mxu1 %v16661_v31  ;;  %v16679_v31 = vld [vmem:[#allocation4 + $0x248] sm:$0xff]  }
 0x923   : > { %14657 = vmatprep.subr.bf16.mxu1 %v17329_v0 }
 0x924   : > { %14650 = vmatpush3.bf16.msra.mxu0 %v16663_v33 }
 0x925   : > { %14651 = vmatprep.subr.bf16.mxu0 %v17329_v0 }
 0x928   : > { %14652 = vmatpush3.bf16.msra.mxu0 %v16664_v34 }
 0x929   : > { %14673 = vmatprep.subr.bf16.mxu0 %v17329_v0 }
 0x9e2   : > { %v3037_v35 = vpop.f32.mrb[64].mxu1 }
 0x9e3   : > { %v3044_v36 = vadd.f32 %v3037_v35, %v2920_v13  ;;  %v14607_v37 = vpop.f32.mrb[65].mxu1 }
 0x9e4   : > { %v3040_v38 = vpop.f32.mrb[66].mxu1 }
 0x9e5   : > { %v3045_v39 = vadd.f32 %v3040_v38, %v2921_v18  ;;  %v14608_v40 = vpop.f32.mrb[67].mxu1 }
 0x9ea   : > { %v3161_v41 = vpop.f32.mrb[80].mxu0  ;;  %v3215_v42 = vpop.f32.mrb[68].mxu1 }
 0x9eb   : > { %v3168_v43 = vadd.f32 %v3161_v41, %v3044_v36  ;;  %v14623_v44 = vpop.f32.mrb[81].mxu0  ;;  %v14629_v45 = vpop.f32.mrb[69].mxu1 }
 0x9ec   : > { %v3164_v46 = vpop.f32.mrb[82].mxu0  ;;  %v3218_v47 = vpop.f32.mrb[70].mxu1 }
 0x9ed   : > { %v3169_v48 = vadd.f32 %v3164_v46, %v3045_v39  ;;  %v3222_v49 = vpack.c.bf16 %v3218_v47, %v3215_v42  ;;  %v14624_v50 = vpop.f32.mrb[83].mxu0  ;;  %v14630_v51 = vpop.f32.mrb[71].mxu1 }
 0x9ef   : > { %14638 = vmatmul.mubr.msk.bf16.vlgmr.msra.gmra.mrb[72].mxu1 %vm955_vm2, %v3222_v49 }
 0x9f0   : > { %14658 = vmatpush3.bf16.msra.mxu1 %v17740_v3  ;;  %14659 = vmatprep.mubr.msk.bf16.mxu1 %vm17330_vm0, %v17329_v0 }
 0x9f1   : > { %14663 = vmatprep.subr.bf16.mxu1 %v17329_v0 }
 0x9f2   : > { %v3339_v52 = vpop.f32.mrb[84].mxu0 }
 0x9f3   : > { %v14645_v53 = vpop.f32.mrb[85].mxu0 }
 0x9f4   : > { %v3342_v55 = vpop.f32.mrb[86].mxu0 }
 0x9f5   : > { %v3346_v56 = vpack.c.bf16 %v3342_v55, %v3339_v52  ;;  %v14646_v57 = vpop.f32.mrb[87].mxu0  ;;  %v16681_v52 = vld [vmem:[#allocation2 + $0xc8] sm:$0xff]  }
 0x9f6   : > { %v16683_v57 = vld [vmem:[#allocation4 + $0x258] sm:$0xff]  }
 0x9f7   : > { %14654 = vmatmul.mubr.msk.bf16.vlgmr.msra.gmra.mrb[88].mxu0 %vm955_vm2, %v3346_v56  ;;  %14660 = vmatmul.mubr.msk.bf16.vlgmr.msra.gmra.mrb[76].mxu1 %vm825_vm1, %v16665_v54  ;;  %v16682_v56 = vld [vmem:[#allocation2 + $0xd0] sm:$0xff]  }
 0x9f8   : > { %14674 = vmatpush3.bf16.msra.mxu0 %v17740_v3  ;;  %14675 = vmatprep.mubr.msk.bf16.mxu0 %vm17330_vm0, %v17329_v0 }
 0x9f9   : > { %14679 = vmatprep.subr.bf16.mxu0 %v17329_v0  ;;  %14669 = vmatprep.mubr.msk.bf16.mxu1 %vm17330_vm0, %v17329_v0 }
 0x9fa   : > { %14664 = vmatpush3.bf16.msra.mxu1 %v16667_v59  ;;  %v16685_v59 = vld [vmem:[#allocation4 + $0x268] sm:$0xff]  }
 0x9fb   : > { %14665 = vmatprep.subr.bf16.mxu1 %v17329_v0 }
 0x9fe   : > { %14666 = vmatpush3.bf16.msra.mxu1 %v16668_v60  ;;  %v16686_v60 = vld [vmem:[#allocation4 + $0x270] sm:$0xff]  }
 0x9ff   : > { %14676 = vmatmul.mubr.msk.bf16.vlgmr.msra.gmra.mrb[92].mxu0 %vm825_vm1, %v16666_v58  ;;  %14667 = vmatprep.subr.bf16.mxu1 %v17329_v0  ;;  %v16684_v58 = vld [vmem:[#allocation4 + $0x260] sm:$0xff]  }
 0xa00   : > { %14685 = vmatprep.mubr.msk.bf16.mxu0 %vm17330_vm0, %v17329_v0  ;;  %14680 = vmatpush3.bf16.msra.mxu0 %v16670_v62  ;;  %v16688_v62 = vld [vmem:[#allocation4 + $0x280] sm:$0xff]  }
 0xa01   : > { %14681 = vmatprep.subr.bf16.mxu0 %v17329_v0 }
 0xa02   : > { %14668 = vmatpush3.bf16.msra.mxu1 %v16669_v61  ;;  %v16687_v61 = vld [vmem:[#allocation4 + $0x278] sm:$0xff]  }
 0xa03   : > { %14689 = vmatprep.subr.bf16.mxu1 %v17329_v0 }
 0xa04   : > { %14682 = vmatpush3.bf16.msra.mxu0 %v16671_v63 }
 0xa05   : > { %14683 = vmatprep.subr.bf16.mxu0 %v17329_v0 }
 0xa08   : > { %14684 = vmatpush3.bf16.msra.mxu0 %v16672_v1 }
 0xa09   : > { %14705 = vmatprep.subr.bf16.mxu0 %v17329_v0 }
 0xac2   : > { %v3285_v2 = vpop.f32.mrb[72].mxu1 }
 0xac3   : > { %v3292_v4 = vadd.f32 %v3285_v2, %v3168_v43  ;;  %v14639_v5 = vpop.f32.mrb[73].mxu1 }
 0xac4   : > { %v3288_v6 = vpop.f32.mrb[74].mxu1 }
 0xac5   : > { %v3293_v7 = vadd.f32 %v3288_v6, %v3169_v48  ;;  %v14640_v8 = vpop.f32.mrb[75].mxu1 }
 0xaca   : > { %v3409_v9 = vpop.f32.mrb[88].mxu0  ;;  %v3463_v10 = vpop.f32.mrb[76].mxu1 }
 0xacb   : > { %v3416_v11 = vadd.f32 %v3409_v9, %v3292_v4  ;;  %v14655_v12 = vpop.f32.mrb[89].mxu0  ;;  %v14661_v13 = vpop.f32.mrb[77].mxu1 }
 0xacc   : > { %v3412_v14 = vpop.f32.mrb[90].mxu0  ;;  %v3466_v15 = vpop.f32.mrb[78].mxu1 }
 0xacd   : > { %v3470_v16 = vpack.c.bf16 %v3466_v15, %v3463_v10  ;;  %v14656_v17 = vpop.f32.mrb[91].mxu0  ;;  %v14662_v18 = vpop.f32.mrb[79].mxu1  ;;  %v3417_v19 = vadd.f32 %v3412_v14, %v3293_v7 }
 0xacf   : > { %14670 = vmatmul.mubr.msk.bf16.vlgmr.msra.gmra.mrb[80].mxu1 %vm955_vm2, %v3470_v16 }
 0xad0   : > { %14690 = vmatpush3.bf16.msra.mxu1 %v17740_v3  ;;  %14691 = vmatprep.mubr.msk.bf16.mxu1 %vm17330_vm0, %v17329_v0 }
 0xad1   : > { %14695 = vmatprep.subr.bf16.mxu1 %v17329_v0 }
 0xad2   : > { %v3587_v20 = vpop.f32.mrb[92].mxu0 }
 0xad3   : > { %v14677_v21 = vpop.f32.mrb[93].mxu0 }
 0xad4   : > { %v3590_v23 = vpop.f32.mrb[94].mxu0 }
 0xad5   : > { %v3594_v24 = vpack.c.bf16 %v3590_v23, %v3587_v20  ;;  %v14678_v25 = vpop.f32.mrb[95].mxu0  ;;  %v16689_v20 = vld [vmem:[#allocation2 + $0xd8] sm:$0xff]  }
 0xad6   : > { %v16691_v25 = vld [vmem:[#allocation4 + $0x288] sm:$0xff]  }
 0xad7   : > { %14686 = vmatmul.mubr.msk.bf16.vlgmr.msra.gmra.mrb[96].mxu0 %vm955_vm2, %v3594_v24  ;;  %14692 = vmatmul.mubr.msk.bf16.vlgmr.msra.gmra.mrb[84].mxu1 %vm825_vm1, %v16673_v22  ;;  %v16690_v24 = vld [vmem:[#allocation2 + $0xe0] sm:$0xff]  }
 0xad8   : > { %14706 = vmatpush3.bf16.msra.mxu0 %v17740_v3  ;;  %14707 = vmatprep.mubr.msk.bf16.mxu0 %vm17330_vm0, %v17329_v0 }
 0xad9   : > { %14711 = vmatprep.subr.bf16.mxu0 %v17329_v0  ;;  %14701 = vmatprep.mubr.msk.bf16.mxu1 %vm17330_vm0, %v17329_v0 }
 0xada   : > { %14696 = vmatpush3.bf16.msra.mxu1 %v16675_v27  ;;  %v16693_v27 = vld [vmem:[#allocation4 + $0x298] sm:$0xff]  }
 0xadb   : > { %14697 = vmatprep.subr.bf16.mxu1 %v17329_v0 }
 0xade   : > { %14698 = vmatpush3.bf16.msra.mxu1 %v16676_v28  ;;  %v16694_v28 = vld [vmem:[#allocation4 + $0x2a0] sm:$0xff]  }
 0xadf   : > { %14708 = vmatmul.mubr.msk.bf16.vlgmr.msra.gmra.mrb[100].mxu0 %vm825_vm1, %v16674_v26  ;;  %14699 = vmatprep.subr.bf16.mxu1 %v17329_v0  ;;  %v16692_v26 = vld [vmem:[#allocation4 + $0x290] sm:$0xff]  }
 0xae0   : > { %14717 = vmatprep.mubr.msk.bf16.mxu0 %vm17330_vm0, %v17329_v0  ;;  %14712 = vmatpush3.bf16.msra.mxu0 %v16678_v30  ;;  %v16696_v30 = vld [vmem:[#allocation4 + $0x2b0] sm:$0xff]  }
 0xae1   : > { %14713 = vmatprep.subr.bf16.mxu0 %v17329_v0 }
 0xae2   : > { %14700 = vmatpush3.bf16.msra.mxu1 %v16677_v29  ;;  %v16695_v29 = vld [vmem:[#allocation4 + $0x2a8] sm:$0xff]  }
 0xae3   : > { %14721 = vmatprep.subr.bf16.mxu1 %v17329_v0 }
 0xae4   : > { %14714 = vmatpush3.bf16.msra.mxu0 %v16679_v31 }
 0xae5   : > { %14715 = vmatprep.subr.bf16.mxu0 %v17329_v0 }
 0xae8   : > { %14716 = vmatpush3.bf16.msra.mxu0 %v16680_v32 }
 0xae9   : > { %14737 = vmatprep.subr.bf16.mxu0 %v17329_v0 }
 0xba2   : > { %v3533_v33 = vpop.f32.mrb[80].mxu1 }
 0xba3   : > { %v3540_v34 = vadd.f32 %v3533_v33, %v3416_v11  ;;  %v14671_v35 = vpop.f32.mrb[81].mxu1 }
 0xba4   : > { %v3536_v36 = vpop.f32.mrb[82].mxu1 }
 0xba5   : > { %v3541_v37 = vadd.f32 %v3536_v36, %v3417_v19  ;;  %v14672_v38 = vpop.f32.mrb[83].mxu1 }
 0xbaa   : > { %v3657_v39 = vpop.f32.mrb[96].mxu0  ;;  %v3711_v40 = vpop.f32.mrb[84].mxu1 }
 0xbab   : > { %v14687_v41 = vpop.f32.mrb[97].mxu0  ;;  %v14693_v42 = vpop.f32.mrb[85].mxu1  ;;  %v3664_v43 = vadd.f32 %v3657_v39, %v3540_v34 }
 0xbac   : > { %v3660_v44 = vpop.f32.mrb[98].mxu0  ;;  %v3714_v45 = vpop.f32.mrb[86].mxu1 }
 0xbad   : > { %v3718_v46 = vpack.c.bf16 %v3714_v45, %v3711_v40  ;;  %v14688_v47 = vpop.f32.mrb[99].mxu0  ;;  %v14694_v48 = vpop.f32.mrb[87].mxu1  ;;  %v3665_v49 = vadd.f32 %v3660_v44, %v3541_v37 }
 0xbaf   : > { %14702 = vmatmul.mubr.msk.bf16.vlgmr.msra.gmra.mrb[88].mxu1 %vm955_vm2, %v3718_v46 }
 0xbb0   : > { %14722 = vmatpush3.bf16.msra.mxu1 %v17740_v3  ;;  %14723 = vmatprep.mubr.msk.bf16.mxu1 %vm17330_vm0, %v17329_v0 }
 0xbb1   : > { %14727 = vmatprep.subr.bf16.mxu1 %v17329_v0 }
 0xbb2   : > { %v3835_v50 = vpop.f32.mrb[100].mxu0 }
 0xbb3   : > { %v14709_v51 = vpop.f32.mrb[101].mxu0 }
 0xbb4   : > { %v3838_v53 = vpop.f32.mrb[102].mxu0 }
 0xbb5   : > { %v3842_v54 = vpack.c.bf16 %v3838_v53, %v3835_v50  ;;  %v14710_v55 = vpop.f32.mrb[103].mxu0  ;;  %v16697_v50 = vld [vmem:[#allocation2 + $0xe8] sm:$0xff]  }
 0xbb6   : > { %v16699_v55 = vld [vmem:[#allocation4 + $0x2b8] sm:$0xff]  }
 0xbb7   : > { %14718 = vmatmul.mubr.msk.bf16.vlgmr.msra.gmra.mrb[104].mxu0 %vm955_vm2, %v3842_v54  ;;  %14724 = vmatmul.mubr.msk.bf16.vlgmr.msra.gmra.mrb[92].mxu1 %vm825_vm1, %v16681_v52  ;;  %v16698_v54 = vld [vmem:[#allocation2 + $0xf0] sm:$0xff]  }
 0xbb8   : > { %14738 = vmatpush3.bf16.msra.mxu0 %v17740_v3  ;;  %14739 = vmatprep.mubr.msk.bf16.mxu0 %vm17330_vm0, %v17329_v0 }
 0xbb9   : > { %14743 = vmatprep.subr.bf16.mxu0 %v17329_v0  ;;  %14733 = vmatprep.mubr.msk.bf16.mxu1 %vm17330_vm0, %v17329_v0 }
 0xbba   : > { %14728 = vmatpush3.bf16.msra.mxu1 %v16683_v57  ;;  %v16701_v57 = vld [vmem:[#allocation4 + $0x2c8] sm:$0xff]  }
 0xbbb   : > { %14729 = vmatprep.subr.bf16.mxu1 %v17329_v0 }
 0xbbe   : > { %14730 = vmatpush3.bf16.msra.mxu1 %v16684_v58  ;;  %v16702_v58 = vld [vmem:[#allocation4 + $0x2d0] sm:$0xff]  }
 0xbbf   : > { %14740 = vmatmul.mubr.msk.bf16.vlgmr.msra.gmra.mrb[108].mxu0 %vm825_vm1, %v16682_v56  ;;  %14731 = vmatprep.subr.bf16.mxu1 %v17329_v0  ;;  %v16700_v56 = vld [vmem:[#allocation4 + $0x2c0] sm:$0xff]  }
 0xbc0   : > { %14749 = vmatprep.mubr.msk.bf16.mxu0 %vm17330_vm0, %v17329_v0  ;;  %14744 = vmatpush3.bf16.msra.mxu0 %v16686_v60  ;;  %v16704_v60 = vld [vmem:[#allocation4 + $0x2e0] sm:$0xff]  }
 0xbc1   : > { %14745 = vmatprep.subr.bf16.mxu0 %v17329_v0 }
 0xbc2   : > { %14732 = vmatpush3.bf16.msra.mxu1 %v16685_v59  ;;  %v16703_v59 = vld [vmem:[#allocation4 + $0x2d8] sm:$0xff]  }
 0xbc3   : > { %14753 = vmatprep.subr.bf16.mxu1 %v17329_v0 }
 0xbc4   : > { %14746 = vmatpush3.bf16.msra.mxu0 %v16687_v61 }
 0xbc5   : > { %14747 = vmatprep.subr.bf16.mxu0 %v17329_v0 }
 0xbc8   : > { %14748 = vmatpush3.bf16.msra.mxu0 %v16688_v62 }
 0xbc9   : > { %14769 = vmatprep.subr.bf16.mxu0 %v17329_v0 }
 0xc82   : > { %v3781_v63 = vpop.f32.mrb[88].mxu1 }
 0xc83   : > { %v3788_v1 = vadd.f32 %v3781_v63, %v3664_v43  ;;  %v14703_v2 = vpop.f32.mrb[89].mxu1 }
 0xc84   : > { %v3784_v4 = vpop.f32.mrb[90].mxu1 }
 0xc85   : > { %v3789_v5 = vadd.f32 %v3784_v4, %v3665_v49  ;;  %v14704_v6 = vpop.f32.mrb[91].mxu1 }
 0xc8a   : > { %v3905_v7 = vpop.f32.mrb[104].mxu0  ;;  %v3959_v8 = vpop.f32.mrb[92].mxu1 }
 0xc8b   : > { %v14719_v9 = vpop.f32.mrb[105].mxu0  ;;  %v14725_v10 = vpop.f32.mrb[93].mxu1  ;;  %v3912_v11 = vadd.f32 %v3905_v7, %v3788_v1 }
 0xc8c   : > { %v3908_v12 = vpop.f32.mrb[106].mxu0  ;;  %v3962_v13 = vpop.f32.mrb[94].mxu1 }
 0xc8d   : > { %v3913_v14 = vadd.f32 %v3908_v12, %v3789_v5  ;;  %v3966_v15 = vpack.c.bf16 %v3962_v13, %v3959_v8  ;;  %v14720_v16 = vpop.f32.mrb[107].mxu0  ;;  %v14726_v17 = vpop.f32.mrb[95].mxu1 }
 0xc8f   : > { %14734 = vmatmul.mubr.msk.bf16.vlgmr.msra.gmra.mrb[96].mxu1 %vm955_vm2, %v3966_v15 }
 0xc90   : > { %14754 = vmatpush3.bf16.msra.mxu1 %v17740_v3  ;;  %14755 = vmatprep.mubr.msk.bf16.mxu1 %vm17330_vm0, %v17329_v0 }
 0xc91   : > { %14759 = vmatprep.subr.bf16.mxu1 %v17329_v0 }
 0xc92   : > { %v4083_v18 = vpop.f32.mrb[108].mxu0 }
 0xc93   : > { %v14741_v19 = vpop.f32.mrb[109].mxu0 }
 0xc94   : > { %v4086_v21 = vpop.f32.mrb[110].mxu0 }
 0xc95   : > { %v4090_v22 = vpack.c.bf16 %v4086_v21, %v4083_v18  ;;  %v14742_v23 = vpop.f32.mrb[111].mxu0  ;;  %v16705_v18 = vld [vmem:[#allocation2 + $0xf8] sm:$0xff]  }
 0xc96   : > { %v16707_v23 = vld [vmem:[#allocation4 + $0x2e8] sm:$0xff]  }
 0xc97   : > { %14750 = vmatmul.mubr.msk.bf16.vlgmr.msra.gmra.mrb[112].mxu0 %vm955_vm2, %v4090_v22  ;;  %14756 = vmatmul.mubr.msk.bf16.vlgmr.msra.gmra.mrb[100].mxu1 %vm825_vm1, %v16689_v20  ;;  %v16706_v22 = vld [vmem:[#allocation2 + $0x100] sm:$0xff]  }
 0xc98   : > { %14770 = vmatpush3.bf16.msra.mxu0 %v17740_v3  ;;  %14771 = vmatprep.mubr.msk.bf16.mxu0 %vm17330_vm0, %v17329_v0 }
 0xc99   : > { %14775 = vmatprep.subr.bf16.mxu0 %v17329_v0  ;;  %14765 = vmatprep.mubr.msk.bf16.mxu1 %vm17330_vm0, %v17329_v0 }
 0xc9a   : > { %14760 = vmatpush3.bf16.msra.mxu1 %v16691_v25  ;;  %v16709_v25 = vld [vmem:[#allocation4 + $0x2f8] sm:$0xff]  }
 0xc9b   : > { %14761 = vmatprep.subr.bf16.mxu1 %v17329_v0 }
 0xc9e   : > { %14762 = vmatpush3.bf16.msra.mxu1 %v16692_v26  ;;  %v16710_v26 = vld [vmem:[#allocation4 + $0x300] sm:$0xff]  }
 0xc9f   : > { %14772 = vmatmul.mubr.msk.bf16.vlgmr.msra.gmra.mrb[116].mxu0 %vm825_vm1, %v16690_v24  ;;  %14763 = vmatprep.subr.bf16.mxu1 %v17329_v0  ;;  %v16708_v24 = vld [vmem:[#allocation4 + $0x2f0] sm:$0xff]  }
 0xca0   : > { %14781 = vmatprep.mubr.msk.bf16.mxu0 %vm17330_vm0, %v17329_v0  ;;  %14776 = vmatpush3.bf16.msra.mxu0 %v16694_v28  ;;  %v16712_v28 = vld [vmem:[#allocation4 + $0x310] sm:$0xff]  }
 0xca1   : > { %14777 = vmatprep.subr.bf16.mxu0 %v17329_v0 }
 0xca2   : > { %14764 = vmatpush3.bf16.msra.mxu1 %v16693_v27  ;;  %v16711_v27 = vld [vmem:[#allocation4 + $0x308] sm:$0xff]  }
 0xca3   : > { %14785 = vmatprep.subr.bf16.mxu1 %v17329_v0 }
 0xca4   : > { %14778 = vmatpush3.bf16.msra.mxu0 %v16695_v29 }
 0xca5   : > { %14779 = vmatprep.subr.bf16.mxu0 %v17329_v0 }
 0xca8   : > { %14780 = vmatpush3.bf16.msra.mxu0 %v16696_v30 }
 0xca9   : > { %14801 = vmatprep.subr.bf16.mxu0 %v17329_v0 }
 0xd62   : > { %v4029_v31 = vpop.f32.mrb[96].mxu1 }
 0xd63   : > { %v4036_v32 = vadd.f32 %v4029_v31, %v3912_v11  ;;  %v14735_v33 = vpop.f32.mrb[97].mxu1 }
 0xd64   : > { %v4032_v34 = vpop.f32.mrb[98].mxu1 }
 0xd65   : > { %v4037_v35 = vadd.f32 %v4032_v34, %v3913_v14  ;;  %v14736_v36 = vpop.f32.mrb[99].mxu1 }
 0xd6a   : > { %v4153_v37 = vpop.f32.mrb[112].mxu0  ;;  %v4207_v38 = vpop.f32.mrb[100].mxu1 }
 0xd6b   : > { %v4160_v39 = vadd.f32 %v4153_v37, %v4036_v32  ;;  %v14751_v40 = vpop.f32.mrb[113].mxu0  ;;  %v14757_v41 = vpop.f32.mrb[101].mxu1 }
 0xd6c   : > { %v4156_v42 = vpop.f32.mrb[114].mxu0  ;;  %v4210_v43 = vpop.f32.mrb[102].mxu1 }
 0xd6d   : > { %v4161_v44 = vadd.f32 %v4156_v42, %v4037_v35  ;;  %v4214_v45 = vpack.c.bf16 %v4210_v43, %v4207_v38  ;;  %v14752_v46 = vpop.f32.mrb[115].mxu0  ;;  %v14758_v47 = vpop.f32.mrb[103].mxu1 }
 0xd6f   : > { %14766 = vmatmul.mubr.msk.bf16.vlgmr.msra.gmra.mrb[104].mxu1 %vm955_vm2, %v4214_v45 }
 0xd70   : > { %14786 = vmatpush3.bf16.msra.mxu1 %v17740_v3  ;;  %14787 = vmatprep.mubr.msk.bf16.mxu1 %vm17330_vm0, %v17329_v0 }
 0xd71   : > { %14791 = vmatprep.subr.bf16.mxu1 %v17329_v0 }
 0xd72   : > { %v4331_v48 = vpop.f32.mrb[116].mxu0 }
 0xd73   : > { %v14773_v49 = vpop.f32.mrb[117].mxu0 }
 0xd74   : > { %v4334_v51 = vpop.f32.mrb[118].mxu0 }
 0xd75   : > { %v4338_v52 = vpack.c.bf16 %v4334_v51, %v4331_v48  ;;  %v14774_v53 = vpop.f32.mrb[119].mxu0  ;;  %v16713_v48 = vld [vmem:[#allocation2 + $0x108] sm:$0xff]  }
 0xd76   : > { %v16715_v53 = vld [vmem:[#allocation4 + $0x318] sm:$0xff]  }
 0xd77   : > { %14782 = vmatmul.mubr.msk.bf16.vlgmr.msra.gmra.mrb[120].mxu0 %vm955_vm2, %v4338_v52  ;;  %14788 = vmatmul.mubr.msk.bf16.vlgmr.msra.gmra.mrb[108].mxu1 %vm825_vm1, %v16697_v50  ;;  %v16714_v52 = vld [vmem:[#allocation2 + $0x110] sm:$0xff]  }
 0xd78   : > { %14802 = vmatpush3.bf16.msra.mxu0 %v17740_v3  ;;  %14803 = vmatprep.mubr.msk.bf16.mxu0 %vm17330_vm0, %v17329_v0 }
 0xd79   : > { %14807 = vmatprep.subr.bf16.mxu0 %v17329_v0  ;;  %14797 = vmatprep.mubr.msk.bf16.mxu1 %vm17330_vm0, %v17329_v0 }
 0xd7a   : > { %14792 = vmatpush3.bf16.msra.mxu1 %v16699_v55  ;;  %v16717_v55 = vld [vmem:[#allocation4 + $0x328] sm:$0xff]  }
 0xd7b   : > { %14793 = vmatprep.subr.bf16.mxu1 %v17329_v0 }
 0xd7e   : > { %14794 = vmatpush3.bf16.msra.mxu1 %v16700_v56  ;;  %v16718_v56 = vld [vmem:[#allocation4 + $0x330] sm:$0xff]  }
 0xd7f   : > { %14804 = vmatmul.mubr.msk.bf16.vlgmr.msra.gmra.mrb[124].mxu0 %vm825_vm1, %v16698_v54  ;;  %14795 = vmatprep.subr.bf16.mxu1 %v17329_v0  ;;  %v16716_v54 = vld [vmem:[#allocation4 + $0x320] sm:$0xff]  }
 0xd80   : > { %14813 = vmatprep.mubr.msk.bf16.mxu0 %vm17330_vm0, %v17329_v0  ;;  %14808 = vmatpush3.bf16.msra.mxu0 %v16702_v58  ;;  %v16720_v58 = vld [vmem:[#allocation4 + $0x340] sm:$0xff]  }
 0xd81   : > { %14809 = vmatprep.subr.bf16.mxu0 %v17329_v0 }
 0xd82   : > { %14796 = vmatpush3.bf16.msra.mxu1 %v16701_v57  ;;  %v16719_v57 = vld [vmem:[#allocation4 + $0x338] sm:$0xff]  }
 0xd83   : > { %14817 = vmatprep.subr.bf16.mxu1 %v17329_v0 }
 0xd84   : > { %14810 = vmatpush3.bf16.msra.mxu0 %v16703_v59 }
 0xd85   : > { %14811 = vmatprep.subr.bf16.mxu0 %v17329_v0 }
 0xd88   : > { %14812 = vmatpush3.bf16.msra.mxu0 %v16704_v60 }
 0xd89   : > { %14833 = vmatprep.subr.bf16.mxu0 %v17329_v0 }
 0xe42   : > { %v4277_v61 = vpop.f32.mrb[104].mxu1 }
 0xe43   : > { %v4284_v62 = vadd.f32 %v4277_v61, %v4160_v39  ;;  %v14767_v63 = vpop.f32.mrb[105].mxu1 }
 0xe44   : > { %v4280_v1 = vpop.f32.mrb[106].mxu1 }
 0xe45   : > { %v4285_v2 = vadd.f32 %v4280_v1, %v4161_v44  ;;  %v14768_v4 = vpop.f32.mrb[107].mxu1 }
 0xe4a   : > { %v4401_v5 = vpop.f32.mrb[120].mxu0  ;;  %v4455_v6 = vpop.f32.mrb[108].mxu1 }
 0xe4b   : > { %v4408_v7 = vadd.f32 %v4401_v5, %v4284_v62  ;;  %v14783_v8 = vpop.f32.mrb[121].mxu0  ;;  %v14789_v9 = vpop.f32.mrb[109].mxu1 }
 0xe4c   : > { %v4404_v10 = vpop.f32.mrb[122].mxu0  ;;  %v4458_v11 = vpop.f32.mrb[110].mxu1 }
 0xe4d   : > { %v4409_v12 = vadd.f32 %v4404_v10, %v4285_v2  ;;  %v4462_v13 = vpack.c.bf16 %v4458_v11, %v4455_v6  ;;  %v14784_v14 = vpop.f32.mrb[123].mxu0  ;;  %v14790_v15 = vpop.f32.mrb[111].mxu1 }
 0xe4f   : > { %14798 = vmatmul.mubr.msk.bf16.vlgmr.msra.gmra.mrb[112].mxu1 %vm955_vm2, %v4462_v13 }
 0xe50   : > { %14818 = vmatpush3.bf16.msra.mxu1 %v17740_v3  ;;  %14819 = vmatprep.mubr.msk.bf16.mxu1 %vm17330_vm0, %v17329_v0 }
 0xe51   : > { %14823 = vmatprep.subr.bf16.mxu1 %v17329_v0 }
 0xe52   : > { %v4579_v16 = vpop.f32.mrb[124].mxu0 }
 0xe53   : > { %v14805_v17 = vpop.f32.mrb[125].mxu0 }
 0xe54   : > { %v4582_v19 = vpop.f32.mrb[126].mxu0 }
 0xe55   : > { %v4586_v20 = vpack.c.bf16 %v4582_v19, %v4579_v16  ;;  %v14806_v21 = vpop.f32.mrb[127].mxu0  ;;  %v16721_v16 = vld [vmem:[#allocation2 + $0x118] sm:$0xff]  }
 0xe56   : > { %v16723_v21 = vld [vmem:[#allocation4 + $0x348] sm:$0xff]  }
 0xe57   : > { %14814 = vmatmul.mubr.msk.bf16.vlgmr.msra.gmra.mrb[128].mxu0 %vm955_vm2, %v4586_v20  ;;  %14820 = vmatmul.mubr.msk.bf16.vlgmr.msra.gmra.mrb[116].mxu1 %vm825_vm1, %v16705_v18  ;;  %v16722_v20 = vld [vmem:[#allocation2 + $0x120] sm:$0xff]  }
 0xe58   : > { %14834 = vmatpush3.bf16.msra.mxu0 %v17740_v3  ;;  %14835 = vmatprep.mubr.msk.bf16.mxu0 %vm17330_vm0, %v17329_v0 }
 0xe59   : > { %14839 = vmatprep.subr.bf16.mxu0 %v17329_v0  ;;  %14829 = vmatprep.mubr.msk.bf16.mxu1 %vm17330_vm0, %v17329_v0 }
 0xe5a   : > { %14824 = vmatpush3.bf16.msra.mxu1 %v16707_v23  ;;  %v16725_v23 = vld [vmem:[#allocation4 + $0x358] sm:$0xff]  }
 0xe5b   : > { %14825 = vmatprep.subr.bf16.mxu1 %v17329_v0 }
 0xe5e   : > { %14826 = vmatpush3.bf16.msra.mxu1 %v16708_v24  ;;  %v16726_v24 = vld [vmem:[#allocation4 + $0x360] sm:$0xff]  }
 0xe5f   : > { %14836 = vmatmul.mubr.msk.bf16.vlgmr.msra.gmra.mrb[132].mxu0 %vm825_vm1, %v16706_v22  ;;  %14827 = vmatprep.subr.bf16.mxu1 %v17329_v0  ;;  %v16724_v22 = vld [vmem:[#allocation4 + $0x350] sm:$0xff]  }
 0xe60   : > { %14845 = vmatprep.mubr.msk.bf16.mxu0 %vm17330_vm0, %v17329_v0  ;;  %14840 = vmatpush3.bf16.msra.mxu0 %v16710_v26  ;;  %v16728_v26 = vld [vmem:[#allocation4 + $0x370] sm:$0xff]  }
 0xe61   : > { %14841 = vmatprep.subr.bf16.mxu0 %v17329_v0 }
 0xe62   : > { %14828 = vmatpush3.bf16.msra.mxu1 %v16709_v25  ;;  %v16727_v25 = vld [vmem:[#allocation4 + $0x368] sm:$0xff]  }
 0xe63   : > { %14849 = vmatprep.subr.bf16.mxu1 %v17329_v0 }
 0xe64   : > { %14842 = vmatpush3.bf16.msra.mxu0 %v16711_v27 }
 0xe65   : > { %14843 = vmatprep.subr.bf16.mxu0 %v17329_v0 }
 0xe68   : > { %14844 = vmatpush3.bf16.msra.mxu0 %v16712_v28 }
 0xe69   : > { %14865 = vmatprep.subr.bf16.mxu0 %v17329_v0 }
 0xf22   : > { %v4525_v29 = vpop.f32.mrb[112].mxu1 }
 0xf23   : > { %v4532_v30 = vadd.f32 %v4525_v29, %v4408_v7  ;;  %v14799_v31 = vpop.f32.mrb[113].mxu1 }
 0xf24   : > { %v4528_v32 = vpop.f32.mrb[114].mxu1 }
 0xf25   : > { %v4533_v33 = vadd.f32 %v4528_v32, %v4409_v12  ;;  %v14800_v34 = vpop.f32.mrb[115].mxu1 }
 0xf2a   : > { %v4649_v35 = vpop.f32.mrb[128].mxu0  ;;  %v4703_v36 = vpop.f32.mrb[116].mxu1 }
 0xf2b   : > { %v4656_v37 = vadd.f32 %v4649_v35, %v4532_v30  ;;  %v14815_v38 = vpop.f32.mrb[129].mxu0  ;;  %v14821_v39 = vpop.f32.mrb[117].mxu1 }
 0xf2c   : > { %v4652_v40 = vpop.f32.mrb[130].mxu0  ;;  %v4706_v41 = vpop.f32.mrb[118].mxu1 }
 0xf2d   : > { %v4657_v42 = vadd.f32 %v4652_v40, %v4533_v33  ;;  %v4710_v43 = vpack.c.bf16 %v4706_v41, %v4703_v36  ;;  %v14816_v44 = vpop.f32.mrb[131].mxu0  ;;  %v14822_v45 = vpop.f32.mrb[119].mxu1 }
 0xf2f   : > { %14830 = vmatmul.mubr.msk.bf16.vlgmr.msra.gmra.mrb[120].mxu1 %vm955_vm2, %v4710_v43 }
 0xf30   : > { %14850 = vmatpush3.bf16.msra.mxu1 %v17740_v3  ;;  %14851 = vmatprep.mubr.msk.bf16.mxu1 %vm17330_vm0, %v17329_v0 }
 0xf31   : > { %14855 = vmatprep.subr.bf16.mxu1 %v17329_v0 }
 0xf32   : > { %v4827_v46 = vpop.f32.mrb[132].mxu0 }
 0xf33   : > { %v14837_v47 = vpop.f32.mrb[133].mxu0 }
 0xf34   : > { %v4830_v49 = vpop.f32.mrb[134].mxu0 }
 0xf35   : > { %v4834_v50 = vpack.c.bf16 %v4830_v49, %v4827_v46  ;;  %v14838_v51 = vpop.f32.mrb[135].mxu0  ;;  %v16729_v46 = vld [vmem:[#allocation2 + $0x128] sm:$0xff]  }
 0xf36   : > { %v16731_v51 = vld [vmem:[#allocation4 + $0x378] sm:$0xff]  }
 0xf37   : > { %14846 = vmatmul.mubr.msk.bf16.vlgmr.msra.gmra.mrb[136].mxu0 %vm955_vm2, %v4834_v50  ;;  %14852 = vmatmul.mubr.msk.bf16.vlgmr.msra.gmra.mrb[124].mxu1 %vm825_vm1, %v16713_v48  ;;  %v16730_v50 = vld [vmem:[#allocation2 + $0x130] sm:$0xff]  }
 0xf38   : > { %14866 = vmatpush3.bf16.msra.mxu0 %v17740_v3  ;;  %14867 = vmatprep.mubr.msk.bf16.mxu0 %vm17330_vm0, %v17329_v0 }
 0xf39   : > { %14871 = vmatprep.subr.bf16.mxu0 %v17329_v0  ;;  %14861 = vmatprep.mubr.msk.bf16.mxu1 %vm17330_vm0, %v17329_v0 }
 0xf3a   : > { %14856 = vmatpush3.bf16.msra.mxu1 %v16715_v53  ;;  %v16733_v53 = vld [vmem:[#allocation4 + $0x388] sm:$0xff]  }
 0xf3b   : > { %14857 = vmatprep.subr.bf16.mxu1 %v17329_v0 }
 0xf3e   : > { %14858 = vmatpush3.bf16.msra.mxu1 %v16716_v54  ;;  %v16734_v54 = vld [vmem:[#allocation4 + $0x390] sm:$0xff]  }
 0xf3f   : > { %14868 = vmatmul.mubr.msk.bf16.vlgmr.msra.gmra.mrb[140].mxu0 %vm825_vm1, %v16714_v52  ;;  %14859 = vmatprep.subr.bf16.mxu1 %v17329_v0  ;;  %v16732_v52 = vld [vmem:[#allocation4 + $0x380] sm:$0xff]  }
 0xf40   : > { %14877 = vmatprep.mubr.msk.bf16.mxu0 %vm17330_vm0, %v17329_v0  ;;  %14872 = vmatpush3.bf16.msra.mxu0 %v16718_v56  ;;  %v16736_v56 = vld [vmem:[#allocation4 + $0x3a0] sm:$0xff]  }
 0xf41   : > { %14873 = vmatprep.subr.bf16.mxu0 %v17329_v0 }
 0xf42   : > { %14860 = vmatpush3.bf16.msra.mxu1 %v16717_v55  ;;  %v16735_v55 = vld [vmem:[#allocation4 + $0x398] sm:$0xff]  }
 0xf43   : > { %14881 = vmatprep.subr.bf16.mxu1 %v17329_v0 }
 0xf44   : > { %14874 = vmatpush3.bf16.msra.mxu0 %v16719_v57 }
 0xf45   : > { %14875 = vmatprep.subr.bf16.mxu0 %v17329_v0 }
 0xf48   : > { %14876 = vmatpush3.bf16.msra.mxu0 %v16720_v58 }
 0xf49   : > { %14897 = vmatprep.subr.bf16.mxu0 %v17329_v0 }
0x1002   : > { %v4773_v59 = vpop.f32.mrb[120].mxu1 }
0x1003   : > { %v4780_v60 = vadd.f32 %v4773_v59, %v4656_v37  ;;  %v14831_v61 = vpop.f32.mrb[121].mxu1 }
0x1004   : > { %v4776_v62 = vpop.f32.mrb[122].mxu1 }
0x1005   : > { %v4781_v63 = vadd.f32 %v4776_v62, %v4657_v42  ;;  %v14832_v1 = vpop.f32.mrb[123].mxu1 }
0x100a   : > { %v4897_v2 = vpop.f32.mrb[136].mxu0  ;;  %v4951_v4 = vpop.f32.mrb[124].mxu1 }
0x100b   : > { %v4904_v5 = vadd.f32 %v4897_v2, %v4780_v60  ;;  %v14847_v6 = vpop.f32.mrb[137].mxu0  ;;  %v14853_v7 = vpop.f32.mrb[125].mxu1 }
0x100c   : > { %v4900_v8 = vpop.f32.mrb[138].mxu0  ;;  %v4954_v9 = vpop.f32.mrb[126].mxu1 }
0x100d   : > { %v4905_v10 = vadd.f32 %v4900_v8, %v4781_v63  ;;  %v4958_v11 = vpack.c.bf16 %v4954_v9, %v4951_v4  ;;  %v14848_v12 = vpop.f32.mrb[139].mxu0  ;;  %v14854_v13 = vpop.f32.mrb[127].mxu1 }
0x100f   : > { %14862 = vmatmul.mubr.msk.bf16.vlgmr.msra.gmra.mrb[128].mxu1 %vm955_vm2, %v4958_v11 }
0x1010   : > { %14882 = vmatpush3.bf16.msra.mxu1 %v17740_v3  ;;  %14883 = vmatprep.mubr.msk.bf16.mxu1 %vm17330_vm0, %v17329_v0 }
0x1011   : > { %14887 = vmatprep.subr.bf16.mxu1 %v17329_v0 }
0x1012   : > { %v5075_v14 = vpop.f32.mrb[140].mxu0 }
0x1013   : > { %v14869_v15 = vpop.f32.mrb[141].mxu0 }
0x1014   : > { %v5078_v17 = vpop.f32.mrb[142].mxu0 }
0x1015   : > { %v5082_v18 = vpack.c.bf16 %v5078_v17, %v5075_v14  ;;  %v14870_v19 = vpop.f32.mrb[143].mxu0  ;;  %v16737_v14 = vld [vmem:[#allocation2 + $0x138] sm:$0xff]  }
0x1016   : > { %v16739_v19 = vld [vmem:[#allocation4 + $0x3a8] sm:$0xff]  }
0x1017   : > { %14878 = vmatmul.mubr.msk.bf16.vlgmr.msra.gmra.mrb[144].mxu0 %vm955_vm2, %v5082_v18  ;;  %14884 = vmatmul.mubr.msk.bf16.vlgmr.msra.gmra.mrb[132].mxu1 %vm825_vm1, %v16721_v16  ;;  %v16738_v18 = vld [vmem:[#allocation2 + $0x140] sm:$0xff]  }
0x1018   : > { %14898 = vmatpush3.bf16.msra.mxu0 %v17740_v3  ;;  %14899 = vmatprep.mubr.msk.bf16.mxu0 %vm17330_vm0, %v17329_v0 }
0x1019   : > { %14903 = vmatprep.subr.bf16.mxu0 %v17329_v0  ;;  %14893 = vmatprep.mubr.msk.bf16.mxu1 %vm17330_vm0, %v17329_v0 }
0x101a   : > { %14888 = vmatpush3.bf16.msra.mxu1 %v16723_v21  ;;  %v16741_v21 = vld [vmem:[#allocation4 + $0x3b8] sm:$0xff]  }
0x101b   : > { %14889 = vmatprep.subr.bf16.mxu1 %v17329_v0 }
0x101e   : > { %14890 = vmatpush3.bf16.msra.mxu1 %v16724_v22  ;;  %v16742_v22 = vld [vmem:[#allocation4 + $0x3c0] sm:$0xff]  }
0x101f   : > { %14900 = vmatmul.mubr.msk.bf16.vlgmr.msra.gmra.mrb[148].mxu0 %vm825_vm1, %v16722_v20  ;;  %14891 = vmatprep.subr.bf16.mxu1 %v17329_v0  ;;  %v16740_v20 = vld [vmem:[#allocation4 + $0x3b0] sm:$0xff]  }
0x1020   : > { %14909 = vmatprep.mubr.msk.bf16.mxu0 %vm17330_vm0, %v17329_v0  ;;  %14904 = vmatpush3.bf16.msra.mxu0 %v16726_v24  ;;  %v16744_v24 = vld [vmem:[#allocation4 + $0x3d0] sm:$0xff]  }
0x1021   : > { %14905 = vmatprep.subr.bf16.mxu0 %v17329_v0 }
0x1022   : > { %14892 = vmatpush3.bf16.msra.mxu1 %v16725_v23  ;;  %v16743_v23 = vld [vmem:[#allocation4 + $0x3c8] sm:$0xff]  }
0x1023   : > { %14913 = vmatprep.subr.bf16.mxu1 %v17329_v0 }
0x1024   : > { %14906 = vmatpush3.bf16.msra.mxu0 %v16727_v25 }
0x1025   : > { %14907 = vmatprep.subr.bf16.mxu0 %v17329_v0 }
0x1028   : > { %14908 = vmatpush3.bf16.msra.mxu0 %v16728_v26 }
0x1029   : > { %14929 = vmatprep.subr.bf16.mxu0 %v17329_v0 }
0x10e2   : > { %v5021_v27 = vpop.f32.mrb[128].mxu1 }
0x10e3   : > { %v5028_v28 = vadd.f32 %v5021_v27, %v4904_v5  ;;  %v14863_v29 = vpop.f32.mrb[129].mxu1 }
0x10e4   : > { %v5024_v30 = vpop.f32.mrb[130].mxu1 }
0x10e5   : > { %v5029_v31 = vadd.f32 %v5024_v30, %v4905_v10  ;;  %v14864_v32 = vpop.f32.mrb[131].mxu1 }
0x10ea   : > { %v5145_v33 = vpop.f32.mrb[144].mxu0  ;;  %v5199_v34 = vpop.f32.mrb[132].mxu1 }
0x10eb   : > { %v5152_v35 = vadd.f32 %v5145_v33, %v5028_v28  ;;  %v14879_v36 = vpop.f32.mrb[145].mxu0  ;;  %v14885_v37 = vpop.f32.mrb[133].mxu1 }
0x10ec   : > { %v5148_v38 = vpop.f32.mrb[146].mxu0  ;;  %v5202_v39 = vpop.f32.mrb[134].mxu1 }
0x10ed   : > { %v5153_v40 = vadd.f32 %v5148_v38, %v5029_v31  ;;  %v5206_v41 = vpack.c.bf16 %v5202_v39, %v5199_v34  ;;  %v14880_v42 = vpop.f32.mrb[147].mxu0  ;;  %v14886_v43 = vpop.f32.mrb[135].mxu1 }
0x10ef   : > { %14894 = vmatmul.mubr.msk.bf16.vlgmr.msra.gmra.mrb[136].mxu1 %vm955_vm2, %v5206_v41 }
0x10f0   : > { %14914 = vmatpush3.bf16.msra.mxu1 %v17740_v3  ;;  %14915 = vmatprep.mubr.msk.bf16.mxu1 %vm17330_vm0, %v17329_v0 }
0x10f1   : > { %14919 = vmatprep.subr.bf16.mxu1 %v17329_v0 }
0x10f2   : > { %v5323_v44 = vpop.f32.mrb[148].mxu0 }
0x10f3   : > { %v14901_v45 = vpop.f32.mrb[149].mxu0 }
0x10f4   : > { %v5326_v47 = vpop.f32.mrb[150].mxu0 }
0x10f5   : > { %v5330_v48 = vpack.c.bf16 %v5326_v47, %v5323_v44  ;;  %v14902_v49 = vpop.f32.mrb[151].mxu0  ;;  %v16745_v44 = vld [vmem:[#allocation2 + $0x148] sm:$0xff]  }
0x10f6   : > { %v16747_v49 = vld [vmem:[#allocation4 + $0x3d8] sm:$0xff]  }
0x10f7   : > { %14910 = vmatmul.mubr.msk.bf16.vlgmr.msra.gmra.mrb[152].mxu0 %vm955_vm2, %v5330_v48  ;;  %14916 = vmatmul.mubr.msk.bf16.vlgmr.msra.gmra.mrb[140].mxu1 %vm825_vm1, %v16729_v46  ;;  %v16746_v48 = vld [vmem:[#allocation2 + $0x150] sm:$0xff]  }
0x10f8   : > { %14930 = vmatpush3.bf16.msra.mxu0 %v17740_v3  ;;  %14931 = vmatprep.mubr.msk.bf16.mxu0 %vm17330_vm0, %v17329_v0 }
0x10f9   : > { %14935 = vmatprep.subr.bf16.mxu0 %v17329_v0  ;;  %14925 = vmatprep.mubr.msk.bf16.mxu1 %vm17330_vm0, %v17329_v0 }
0x10fa   : > { %14920 = vmatpush3.bf16.msra.mxu1 %v16731_v51  ;;  %v16749_v51 = vld [vmem:[#allocation4 + $0x3e8] sm:$0xff]  }
0x10fb   : > { %14921 = vmatprep.subr.bf16.mxu1 %v17329_v0 }
0x10fe   : > { %14922 = vmatpush3.bf16.msra.mxu1 %v16732_v52  ;;  %v16750_v52 = vld [vmem:[#allocation4 + $0x3f0] sm:$0xff]  }
0x10ff   : > { %14932 = vmatmul.mubr.msk.bf16.vlgmr.msra.gmra.mrb[156].mxu0 %vm825_vm1, %v16730_v50  ;;  %14923 = vmatprep.subr.bf16.mxu1 %v17329_v0  ;;  %v16748_v50 = vld [vmem:[#allocation4 + $0x3e0] sm:$0xff]  }
0x1100   : > { %14941 = vmatprep.mubr.msk.bf16.mxu0 %vm17330_vm0, %v17329_v0  ;;  %14936 = vmatpush3.bf16.msra.mxu0 %v16734_v54  ;;  %v16752_v54 = vld [vmem:[#allocation4 + $0x400] sm:$0xff]  }
0x1101   : > { %14937 = vmatprep.subr.bf16.mxu0 %v17329_v0 }
0x1102   : > { %14924 = vmatpush3.bf16.msra.mxu1 %v16733_v53  ;;  %v16751_v53 = vld [vmem:[#allocation4 + $0x3f8] sm:$0xff]  }
0x1103   : > { %14945 = vmatprep.subr.bf16.mxu1 %v17329_v0 }
0x1104   : > { %14938 = vmatpush3.bf16.msra.mxu0 %v16735_v55 }
0x1105   : > { %14939 = vmatprep.subr.bf16.mxu0 %v17329_v0 }
0x1108   : > { %14940 = vmatpush3.bf16.msra.mxu0 %v16736_v56 }
0x1109   : > { %14961 = vmatprep.subr.bf16.mxu0 %v17329_v0 }
0x11c2   : > { %v5269_v57 = vpop.f32.mrb[136].mxu1 }
0x11c3   : > { %v5276_v58 = vadd.f32 %v5269_v57, %v5152_v35  ;;  %v14895_v59 = vpop.f32.mrb[137].mxu1 }
0x11c4   : > { %v5272_v60 = vpop.f32.mrb[138].mxu1 }
0x11c5   : > { %v5277_v61 = vadd.f32 %v5272_v60, %v5153_v40  ;;  %v14896_v62 = vpop.f32.mrb[139].mxu1 }
0x11ca   : > { %v5393_v63 = vpop.f32.mrb[152].mxu0  ;;  %v5447_v1 = vpop.f32.mrb[140].mxu1 }
0x11cb   : > { %v5400_v2 = vadd.f32 %v5393_v63, %v5276_v58  ;;  %v14911_v4 = vpop.f32.mrb[153].mxu0  ;;  %v14917_v5 = vpop.f32.mrb[141].mxu1 }
0x11cc   : > { %v5396_v6 = vpop.f32.mrb[154].mxu0  ;;  %v5450_v7 = vpop.f32.mrb[142].mxu1 }
0x11cd   : > { %v5401_v8 = vadd.f32 %v5396_v6, %v5277_v61  ;;  %v5454_v9 = vpack.c.bf16 %v5450_v7, %v5447_v1  ;;  %v14912_v10 = vpop.f32.mrb[155].mxu0  ;;  %v14918_v11 = vpop.f32.mrb[143].mxu1 }
0x11cf   : > { %14926 = vmatmul.mubr.msk.bf16.vlgmr.msra.gmra.mrb[144].mxu1 %vm955_vm2, %v5454_v9 }
0x11d0   : > { %14946 = vmatpush3.bf16.msra.mxu1 %v17740_v3  ;;  %14947 = vmatprep.mubr.msk.bf16.mxu1 %vm17330_vm0, %v17329_v0 }
0x11d1   : > { %14951 = vmatprep.subr.bf16.mxu1 %v17329_v0 }
0x11d2   : > { %v5571_v12 = vpop.f32.mrb[156].mxu0 }
0x11d3   : > { %v14933_v13 = vpop.f32.mrb[157].mxu0 }
0x11d4   : > { %v5574_v15 = vpop.f32.mrb[158].mxu0 }
0x11d5   : > { %v5578_v16 = vpack.c.bf16 %v5574_v15, %v5571_v12  ;;  %v14934_v17 = vpop.f32.mrb[159].mxu0  ;;  %v16753_v12 = vld [vmem:[#allocation2 + $0x158] sm:$0xff]  }
0x11d6   : > { %v16755_v17 = vld [vmem:[#allocation4 + $0x408] sm:$0xff]  }
0x11d7   : > { %14942 = vmatmul.mubr.msk.bf16.vlgmr.msra.gmra.mrb[160].mxu0 %vm955_vm2, %v5578_v16  ;;  %14948 = vmatmul.mubr.msk.bf16.vlgmr.msra.gmra.mrb[148].mxu1 %vm825_vm1, %v16737_v14  ;;  %v16754_v16 = vld [vmem:[#allocation2 + $0x160] sm:$0xff]  }
0x11d8   : > { %14962 = vmatpush3.bf16.msra.mxu0 %v17740_v3  ;;  %14963 = vmatprep.mubr.msk.bf16.mxu0 %vm17330_vm0, %v17329_v0 }
0x11d9   : > { %14967 = vmatprep.subr.bf16.mxu0 %v17329_v0  ;;  %14957 = vmatprep.mubr.msk.bf16.mxu1 %vm17330_vm0, %v17329_v0 }
0x11da   : > { %14952 = vmatpush3.bf16.msra.mxu1 %v16739_v19  ;;  %v16757_v19 = vld [vmem:[#allocation4 + $0x418] sm:$0xff]  }
0x11db   : > { %14953 = vmatprep.subr.bf16.mxu1 %v17329_v0 }
0x11de   : > { %14954 = vmatpush3.bf16.msra.mxu1 %v16740_v20  ;;  %v16758_v20 = vld [vmem:[#allocation4 + $0x420] sm:$0xff]  }
0x11df   : > { %14964 = vmatmul.mubr.msk.bf16.vlgmr.msra.gmra.mrb[164].mxu0 %vm825_vm1, %v16738_v18  ;;  %14955 = vmatprep.subr.bf16.mxu1 %v17329_v0  ;;  %v16756_v18 = vld [vmem:[#allocation4 + $0x410] sm:$0xff]  }
0x11e0   : > { %14973 = vmatprep.mubr.msk.bf16.mxu0 %vm17330_vm0, %v17329_v0  ;;  %14968 = vmatpush3.bf16.msra.mxu0 %v16742_v22  ;;  %v16760_v22 = vld [vmem:[#allocation4 + $0x430] sm:$0xff]  }
0x11e1   : > { %14969 = vmatprep.subr.bf16.mxu0 %v17329_v0 }
0x11e2   : > { %14956 = vmatpush3.bf16.msra.mxu1 %v16741_v21  ;;  %v16759_v21 = vld [vmem:[#allocation4 + $0x428] sm:$0xff]  }
0x11e3   : > { %14977 = vmatprep.subr.bf16.mxu1 %v17329_v0 }
0x11e4   : > { %14970 = vmatpush3.bf16.msra.mxu0 %v16743_v23 }
0x11e5   : > { %14971 = vmatprep.subr.bf16.mxu0 %v17329_v0 }
0x11e8   : > { %14972 = vmatpush3.bf16.msra.mxu0 %v16744_v24 }
0x11e9   : > { %14993 = vmatprep.subr.bf16.mxu0 %v17329_v0 }
0x12a2   : > { %v5517_v25 = vpop.f32.mrb[144].mxu1 }
0x12a3   : > { %v5524_v26 = vadd.f32 %v5517_v25, %v5400_v2  ;;  %v14927_v27 = vpop.f32.mrb[145].mxu1 }
0x12a4   : > { %v5520_v28 = vpop.f32.mrb[146].mxu1 }
0x12a5   : > { %v5525_v29 = vadd.f32 %v5520_v28, %v5401_v8  ;;  %v14928_v30 = vpop.f32.mrb[147].mxu1 }
0x12aa   : > { %v5641_v31 = vpop.f32.mrb[160].mxu0  ;;  %v5695_v32 = vpop.f32.mrb[148].mxu1 }
0x12ab   : > { %v5648_v33 = vadd.f32 %v5641_v31, %v5524_v26  ;;  %v14943_v34 = vpop.f32.mrb[161].mxu0  ;;  %v14949_v35 = vpop.f32.mrb[149].mxu1 }
0x12ac   : > { %v5644_v36 = vpop.f32.mrb[162].mxu0  ;;  %v5698_v37 = vpop.f32.mrb[150].mxu1 }
0x12ad   : > { %v5649_v38 = vadd.f32 %v5644_v36, %v5525_v29  ;;  %v5702_v39 = vpack.c.bf16 %v5698_v37, %v5695_v32  ;;  %v14944_v40 = vpop.f32.mrb[163].mxu0  ;;  %v14950_v41 = vpop.f32.mrb[151].mxu1 }
0x12af   : > { %14958 = vmatmul.mubr.msk.bf16.vlgmr.msra.gmra.mrb[152].mxu1 %vm955_vm2, %v5702_v39 }
0x12b0   : > { %14978 = vmatpush3.bf16.msra.mxu1 %v17740_v3  ;;  %14979 = vmatprep.mubr.msk.bf16.mxu1 %vm17330_vm0, %v17329_v0 }
0x12b1   : > { %14983 = vmatprep.subr.bf16.mxu1 %v17329_v0 }
0x12b2   : > { %v5819_v42 = vpop.f32.mrb[164].mxu0 }
0x12b3   : > { %v14965_v43 = vpop.f32.mrb[165].mxu0 }
0x12b4   : > { %v5822_v45 = vpop.f32.mrb[166].mxu0 }
0x12b5   : > { %v5826_v46 = vpack.c.bf16 %v5822_v45, %v5819_v42  ;;  %v14966_v47 = vpop.f32.mrb[167].mxu0  ;;  %v16761_v42 = vld [vmem:[#allocation2 + $0x168] sm:$0xff]  }
0x12b6   : > { %v16763_v47 = vld [vmem:[#allocation4 + $0x438] sm:$0xff]  }
0x12b7   : > { %14974 = vmatmul.mubr.msk.bf16.vlgmr.msra.gmra.mrb[168].mxu0 %vm955_vm2, %v5826_v46  ;;  %14980 = vmatmul.mubr.msk.bf16.vlgmr.msra.gmra.mrb[156].mxu1 %vm825_vm1, %v16745_v44  ;;  %v16762_v46 = vld [vmem:[#allocation2 + $0x170] sm:$0xff]  }
0x12b8   : > { %14994 = vmatpush3.bf16.msra.mxu0 %v17740_v3  ;;  %14995 = vmatprep.mubr.msk.bf16.mxu0 %vm17330_vm0, %v17329_v0 }
0x12b9   : > { %14999 = vmatprep.subr.bf16.mxu0 %v17329_v0  ;;  %14989 = vmatprep.mubr.msk.bf16.mxu1 %vm17330_vm0, %v17329_v0 }
0x12ba   : > { %14984 = vmatpush3.bf16.msra.mxu1 %v16747_v49  ;;  %v16765_v49 = vld [vmem:[#allocation4 + $0x448] sm:$0xff]  }
0x12bb   : > { %14985 = vmatprep.subr.bf16.mxu1 %v17329_v0 }
0x12be   : > { %14986 = vmatpush3.bf16.msra.mxu1 %v16748_v50  ;;  %v16766_v50 = vld [vmem:[#allocation4 + $0x450] sm:$0xff]  }
0x12bf   : > { %14996 = vmatmul.mubr.msk.bf16.vlgmr.msra.gmra.mrb[172].mxu0 %vm825_vm1, %v16746_v48  ;;  %14987 = vmatprep.subr.bf16.mxu1 %v17329_v0  ;;  %v16764_v48 = vld [vmem:[#allocation4 + $0x440] sm:$0xff]  }
0x12c0   : > { %15005 = vmatprep.mubr.msk.bf16.mxu0 %vm17330_vm0, %v17329_v0  ;;  %15000 = vmatpush3.bf16.msra.mxu0 %v16750_v52  ;;  %v16768_v52 = vld [vmem:[#allocation4 + $0x460] sm:$0xff]  }
0x12c1   : > { %15001 = vmatprep.subr.bf16.mxu0 %v17329_v0 }
0x12c2   : > { %14988 = vmatpush3.bf16.msra.mxu1 %v16749_v51  ;;  %v16767_v51 = vld [vmem:[#allocation4 + $0x458] sm:$0xff]  }
0x12c3   : > { %15009 = vmatprep.subr.bf16.mxu1 %v17329_v0 }
0x12c4   : > { %15002 = vmatpush3.bf16.msra.mxu0 %v16751_v53 }
0x12c5   : > { %15003 = vmatprep.subr.bf16.mxu0 %v17329_v0 }
0x12c8   : > { %15004 = vmatpush3.bf16.msra.mxu0 %v16752_v54 }
0x12c9   : > { %15025 = vmatprep.subr.bf16.mxu0 %v17329_v0 }
0x1382   : > { %v5765_v55 = vpop.f32.mrb[152].mxu1 }
0x1383   : > { %v5772_v56 = vadd.f32 %v5765_v55, %v5648_v33  ;;  %v14959_v57 = vpop.f32.mrb[153].mxu1 }
0x1384   : > { %v5768_v58 = vpop.f32.mrb[154].mxu1 }
0x1385   : > { %v5773_v59 = vadd.f32 %v5768_v58, %v5649_v38  ;;  %v14960_v60 = vpop.f32.mrb[155].mxu1 }
0x138a   : > { %v5889_v61 = vpop.f32.mrb[168].mxu0  ;;  %v5943_v62 = vpop.f32.mrb[156].mxu1 }
0x138b   : > { %v5896_v63 = vadd.f32 %v5889_v61, %v5772_v56  ;;  %v14975_v1 = vpop.f32.mrb[169].mxu0  ;;  %v14981_v2 = vpop.f32.mrb[157].mxu1 }
0x138c   : > { %v5892_v4 = vpop.f32.mrb[170].mxu0  ;;  %v5946_v5 = vpop.f32.mrb[158].mxu1 }
0x138d   : > { %v5897_v6 = vadd.f32 %v5892_v4, %v5773_v59  ;;  %v5950_v7 = vpack.c.bf16 %v5946_v5, %v5943_v62  ;;  %v14976_v8 = vpop.f32.mrb[171].mxu0  ;;  %v14982_v9 = vpop.f32.mrb[159].mxu1 }
0x138f   : > { %14990 = vmatmul.mubr.msk.bf16.vlgmr.msra.gmra.mrb[160].mxu1 %vm955_vm2, %v5950_v7 }
0x1390   : > { %15010 = vmatpush3.bf16.msra.mxu1 %v17740_v3  ;;  %15011 = vmatprep.mubr.msk.bf16.mxu1 %vm17330_vm0, %v17329_v0 }
0x1391   : > { %15015 = vmatprep.subr.bf16.mxu1 %v17329_v0 }
0x1392   : > { %v6067_v10 = vpop.f32.mrb[172].mxu0 }
0x1393   : > { %v14997_v11 = vpop.f32.mrb[173].mxu0 }
0x1394   : > { %v6070_v13 = vpop.f32.mrb[174].mxu0 }
0x1395   : > { %v6074_v14 = vpack.c.bf16 %v6070_v13, %v6067_v10  ;;  %v14998_v15 = vpop.f32.mrb[175].mxu0  ;;  %v16769_v10 = vld [vmem:[#allocation2 + $0x178] sm:$0xff]  }
0x1396   : > { %v16771_v15 = vld [vmem:[#allocation4 + $0x468] sm:$0xff]  }
0x1397   : > { %15006 = vmatmul.mubr.msk.bf16.vlgmr.msra.gmra.mrb[176].mxu0 %vm955_vm2, %v6074_v14  ;;  %15012 = vmatmul.mubr.msk.bf16.vlgmr.msra.gmra.mrb[164].mxu1 %vm825_vm1, %v16753_v12  ;;  %v16770_v14 = vld [vmem:[#allocation2 + $0x180] sm:$0xff]  }
0x1398   : > { %15026 = vmatpush3.bf16.msra.mxu0 %v17740_v3  ;;  %15027 = vmatprep.mubr.msk.bf16.mxu0 %vm17330_vm0, %v17329_v0 }
0x1399   : > { %15031 = vmatprep.subr.bf16.mxu0 %v17329_v0  ;;  %15021 = vmatprep.mubr.msk.bf16.mxu1 %vm17330_vm0, %v17329_v0 }
0x139a   : > { %15016 = vmatpush3.bf16.msra.mxu1 %v16755_v17  ;;  %v16774_v17 = vld [vmem:[#allocation4 + $0x480] sm:$0xff]  }
0x139b   : > { %15017 = vmatprep.subr.bf16.mxu1 %v17329_v0 }
0x139e   : > { %15018 = vmatpush3.bf16.msra.mxu1 %v16756_v18  ;;  %v16775_v18 = vld [vmem:[#allocation4 + $0x488] sm:$0xff]  }
0x139f   : > { %15028 = vmatmul.mubr.msk.bf16.vlgmr.msra.gmra.mrb[180].mxu0 %vm825_vm1, %v16754_v16  ;;  %15019 = vmatprep.subr.bf16.mxu1 %v17329_v0  ;;  %v16772_v16 = vld [vmem:[#allocation4 + $0x470] sm:$0xff]  }
0x13a0   : > { %15037 = vmatprep.mubr.msk.bf16.mxu0 %vm17330_vm0, %v17329_v0  ;;  %15032 = vmatpush3.bf16.msra.mxu0 %v16758_v20  ;;  %v17331_v20 = vmov 0.0|0.0  }
0x13a1   : > { %15033 = vmatprep.subr.bf16.mxu0 %v17329_v0 }
0x13a2   : > { %15020 = vmatpush3.bf16.msra.mxu1 %v16757_v19  ;;  %v16776_v19 = vld [vmem:[#allocation4 + $0x490] sm:$0xff]  }
0x13a3   : > { %15041 = vmatprep.subr.bf16.mxu1 %v17329_v0 }
0x13a4   : > { %15034 = vmatpush3.bf16.msra.mxu0 %v16759_v21 }
0x13a5   : > { %15035 = vmatprep.subr.bf16.mxu0 %v17329_v0 }
0x13a8   : > { %15036 = vmatpush3.bf16.msra.mxu0 %v16760_v22 }
0x13a9   : > { %15057 = vmatprep.subr.bf16.mxu0 %v17329_v0 }
0x1462   : > { %v6013_v23 = vpop.f32.mrb[160].mxu1 }
0x1463   : > { %v6020_v24 = vadd.f32 %v6013_v23, %v5896_v63  ;;  %v14991_v25 = vpop.f32.mrb[161].mxu1 }
0x1464   : > { %v6016_v26 = vpop.f32.mrb[162].mxu1 }
0x1465   : > { %v6021_v27 = vadd.f32 %v6016_v26, %v5897_v6  ;;  %v14992_v28 = vpop.f32.mrb[163].mxu1 }
0x146a   : > { %v6137_v29 = vpop.f32.mrb[176].mxu0  ;;  %v6191_v30 = vpop.f32.mrb[164].mxu1 }
0x146b   : > { %v6144_v31 = vadd.f32 %v6137_v29, %v6020_v24  ;;  %v15007_v32 = vpop.f32.mrb[177].mxu0  ;;  %v15013_v33 = vpop.f32.mrb[165].mxu1 }
0x146c   : > { %v6140_v34 = vpop.f32.mrb[178].mxu0  ;;  %v6194_v35 = vpop.f32.mrb[166].mxu1 }
0x146d   : > { %v6145_v36 = vadd.f32 %v6140_v34, %v6021_v27  ;;  %v6198_v37 = vpack.c.bf16 %v6194_v35, %v6191_v30  ;;  %v15008_v38 = vpop.f32.mrb[179].mxu0  ;;  %v15014_v39 = vpop.f32.mrb[167].mxu1 }
0x146f   : > { %15022 = vmatmul.mubr.msk.bf16.vlgmr.msra.gmra.mrb[168].mxu1 %vm955_vm2, %v6198_v37 }
0x1470   : > { %15042 = vmatpush3.bf16.msra.mxu1 %v17740_v3  ;;  %15043 = vmatprep.mubr.msk.bf16.mxu1 %vm17330_vm0, %v17329_v0 }
0x1471   : > { %15047 = vmatprep.subr.bf16.mxu1 %v17329_v0 }
0x1472   : > { %v6315_v40 = vpop.f32.mrb[180].mxu0 }
0x1473   : > { %v15029_v41 = vpop.f32.mrb[181].mxu0 }
0x1474   : > { %v6318_v43 = vpop.f32.mrb[182].mxu0 }
0x1475   : > { %v6322_v44 = vpack.c.bf16 %v6318_v43, %v6315_v40  ;;  %v15030_v45 = vpop.f32.mrb[183].mxu0  ;;  %v6899_v43 = vld [vmem:[%s19301_s23] sm:$0xff] }
0x1477   : > { %15038 = vmatmul.mubr.msk.bf16.vlgmr.msra.gmra.mrb[184].mxu0 %vm955_vm2, %v6322_v44  ;;  %15044 = vmatmul.mubr.msk.bf16.vlgmr.msra.gmra.mrb[172].mxu1 %vm825_vm1, %v16761_v42  ;;  %v6900_v44 = vld [vmem:[%s19301_s23 + $0x8] sm:$0xff] }
0x1478   : > { %15058 = vmatpush3.bf16.msra.mxu0 %v17740_v3  ;;  %15059 = vmatprep.mubr.msk.bf16.mxu0 %vm17330_vm0, %v17329_v0  ;;  %v16242_v45 = vpack.c.bf16 %v6900_v44, %v6899_v43 }
0x1479   : > { %15063 = vmatprep.subr.bf16.mxu0 %v17329_v0  ;;  %15053 = vmatprep.mubr.msk.bf16.mxu1 %vm17330_vm0, %v17329_v0 }
0x147a   : > { %15048 = vmatpush3.bf16.msra.mxu1 %v16763_v47  ;;  %v6902_v47 = vld [vmem:[%s19301_s23 + $0x18] sm:$0xff] }
0x147b   : > { %15049 = vmatprep.subr.bf16.mxu1 %v17329_v0 }
0x147e   : > { %15050 = vmatpush3.bf16.msra.mxu1 %v16764_v48 }
0x147f   : > { %15060 = vmatmul.mubr.msk.bf16.vlgmr.msra.gmra.mrb[188].mxu0 %vm825_vm1, %v16762_v46  ;;  %15051 = vmatprep.subr.bf16.mxu1 %v17329_v0  ;;  %v6901_v46 = vld [vmem:[%s19301_s23 + $0x10] sm:$0xff] }
0x1480   : > { %15069 = vmatprep.mubr.msk.bf16.mxu0 %vm17330_vm0, %v17329_v0  ;;  %15064 = vmatpush3.bf16.msra.mxu0 %v16766_v50  ;;  %v16245_v48 = vpack.c.bf16 %v6902_v47, %v6901_v46  ;;  %v6904_v50 = vld [vmem:[%s19301_s23 + $0x28] sm:$0xff]  ;;  %v16779_v46 = vld [vmem:[#allocation6 + $0x40] sm:$0xff]  }
0x1481   : > { %15065 = vmatprep.subr.bf16.mxu0 %v17329_v0  ;;  %v16781_v47 = vld [vmem:[#allocation6 + $0x48] sm:$0xff]  }
0x1482   : > { %15052 = vmatpush3.bf16.msra.mxu1 %v16765_v49  ;;  %v6903_v49 = vld [vmem:[%s19301_s23 + $0x20] sm:$0xff] }
0x1483   : > { %15073 = vmatprep.subr.bf16.mxu1 %v17329_v0 }
0x1484   : > { %15066 = vmatpush3.bf16.msra.mxu0 %v16767_v51  ;;  %v16248_v51 = vpack.c.bf16 %v6904_v50, %v6903_v49  ;;  %v16785_v49 = vld [vmem:[#allocation6 + $0x58] sm:$0xff]   ;;  %v16787_v50 = vld [vmem:[#allocation6 + $0x60] sm:$0xff]  }
0x1485   : > { %15067 = vmatprep.subr.bf16.mxu0 %v17329_v0 }
0x1488   : > { %15068 = vmatpush3.bf16.msra.mxu0 %v16768_v52  ;;  %v6905_v52 = vld [vmem:[%s19301_s23 + $0x30] sm:$0xff] }
0x1489   : > { %15089 = vmatprep.subr.bf16.mxu0 %v17329_v0 }
0x1542   : > { %v6261_v53 = vpop.f32.mrb[168].mxu1 }
0x1543   : > { %v6268_v54 = vadd.f32 %v6261_v53, %v6144_v31  ;;  %v15023_v55 = vpop.f32.mrb[169].mxu1  ;;  %v6906_v53 = vld [vmem:[%s19301_s23 + $0x38] sm:$0xff] }
0x1544   : > { %v6264_v56 = vpop.f32.mrb[170].mxu1  ;;  %v6907_v55 = vld [vmem:[%s19301_s23 + $0x40] sm:$0xff] }
0x1545   : > { %v6269_v57 = vadd.f32 %v6264_v56, %v6145_v36  ;;  %v15024_v58 = vpop.f32.mrb[171].mxu1  ;;  %v6908_v56 = vld [vmem:[%s19301_s23 + $0x48] sm:$0xff] }
0x1546   : > { %v6909_v58 = vld [vmem:[%s19301_s23 + $0x50] sm:$0xff] }
0x154a   : > { %v6385_v59 = vpop.f32.mrb[184].mxu0  ;;  %v6439_v60 = vpop.f32.mrb[172].mxu1 }
0x154b   : > { %v6392_v61 = vadd.f32 %v6385_v59, %v6268_v54  ;;  %v15039_v62 = vpop.f32.mrb[185].mxu0  ;;  %v15045_v63 = vpop.f32.mrb[173].mxu1  ;;  %v16251_v54 = vpack.c.bf16 %v6906_v53, %v6905_v52  ;;  %v6910_v59 = vld [vmem:[%s19301_s23 + $0x58] sm:$0xff] }
0x154c   : > { %v6388_v1 = vpop.f32.mrb[186].mxu0  ;;  %v6442_v2 = vpop.f32.mrb[174].mxu1  ;;  %v6912_v62 = vld [vmem:[%s19301_s23 + $0x68] sm:$0xff] }
0x154d   : > { %v6393_v4 = vadd.f32 %v6388_v1, %v6269_v57  ;;  %v6446_v5 = vpack.c.bf16 %v6442_v2, %v6439_v60  ;;  %v15040_v6 = vpop.f32.mrb[187].mxu0  ;;  %v15046_v7 = vpop.f32.mrb[175].mxu1  ;;  %v16254_v57 = vpack.c.bf16 %v6908_v56, %v6907_v55  ;;  %v16257_v60 = vpack.c.bf16 %v6910_v59, %v6909_v58  ;;  %v6913_v1 = vld [vmem:[%s19301_s23 + $0x70] sm:$0xff]  ;;  %v6914_v2 = vld [vmem:[%s19301_s23 + $0x78] sm:$0xff] }
0x154f   : > { %15054 = vmatmul.mubr.msk.bf16.vlgmr.msra.gmra.mrb[176].mxu1 %vm955_vm2, %v6446_v5 }
0x1550   : > { %15074 = vmatpush3.bf16.msra.mxu1 %v17740_v3  ;;  %15075 = vmatprep.mubr.msk.bf16.mxu1 %vm17330_vm0, %v17329_v0 }
0x1551   : > { %15079 = vmatprep.subr.bf16.mxu1 %v17329_v0 }
0x1552   : > { %v6563_v8 = vpop.f32.mrb[188].mxu0 }
0x1553   : > { %v15061_v9 = vpop.f32.mrb[189].mxu0 }
0x1554   : > { %v6566_v11 = vpop.f32.mrb[190].mxu0 }
0x1555   : > { %v6570_v12 = vpack.c.bf16 %v6566_v11, %v6563_v8  ;;  %v15062_v13 = vpop.f32.mrb[191].mxu0 }
0x1557   : > { %15070 = vmatmul.mubr.msk.bf16.vlgmr.msra.gmra.mrb[192].mxu0 %vm955_vm2, %v6570_v12  ;;  %15076 = vmatmul.mubr.msk.bf16.vlgmr.msra.gmra.mrb[180].mxu1 %vm825_vm1, %v16769_v10 }
0x1558   : > { %15090 = vmatpush3.bf16.msra.mxu0 %v17740_v3  ;;  %15091 = vmatprep.mubr.msk.bf16.mxu0 %vm17330_vm0, %v17329_v0  ;;  %v16773_v3 = vld [vmem:[#allocation4 + $0x478] sm:$0xff]  }
0x1559   : > { %15095 = vmatprep.subr.bf16.mxu0 %v17329_v0  ;;  %15085 = vmatprep.mubr.msk.bf16.mxu1 %vm17330_vm0, %v17329_v0 }
0x155a   : > { %15080 = vmatpush3.bf16.msra.mxu1 %v16771_v15 }
0x155b   : > { %15081 = vmatprep.subr.bf16.mxu1 %v17329_v0 }
0x155e   : > { %15082 = vmatpush3.bf16.msra.mxu1 %v16772_v16 }
0x155f   : > { %15092 = vmatmul.mubr.msk.bf16.vlgmr.msra.gmra.mrb[196].mxu0 %vm825_vm1, %v16770_v14  ;;  %15083 = vmatprep.subr.bf16.mxu1 %v17329_v0  ;;  %v13251_v14 = vld [vmem:[%s19302_s1] ss:$0 sm:$0xff] }
0x1560   : > { %15101 = vmatprep.mubr.msk.bf16.mxu0 %vm17330_vm0, %v17329_v0  ;;  %15096 = vmatpush3.bf16.msra.mxu0 %v16774_v17 }
0x1561   : > { %15097 = vmatprep.subr.bf16.mxu0 %v17329_v0 }
0x1562   : > { %15084 = vmatpush3.bf16.msra.mxu1 %v16773_v3 }
0x1563   : > { %16241 = vmatprep.subr.bf16.mxu1 %v17331_v20 }
0x1564   : > { %15098 = vmatpush3.bf16.msra.mxu0 %v16775_v18 }
0x1565   : > { %15099 = vmatprep.subr.bf16.mxu0 %v17329_v0 }
0x1568   : > { %15100 = vmatpush3.bf16.msra.mxu0 %v16776_v19 }
0x1569   : > { %16265 = vmatprep.subr.bf16.mxu0 %v17331_v20 }
0x1622   : > { %v6509_v21 = vpop.f32.mrb[176].mxu1 }
0x1623   : > { %v6516_v22 = vadd.f32 %v6509_v21, %v6392_v61  ;;  %v15055_v23 = vpop.f32.mrb[177].mxu1  ;;  %v6911_v61 = vld [vmem:[%s19301_s23 + $0x60] sm:$0xff] }
0x1624   : > { %v6512_v24 = vpop.f32.mrb[178].mxu1  ;;  %v16260_v63 = vpack.c.bf16 %v6912_v62, %v6911_v61 }
0x1625   : > { %v6517_v25 = vadd.f32 %v6512_v24, %v6393_v4  ;;  %v15056_v26 = vpop.f32.mrb[179].mxu1  ;;  %v16263_v4 = vpack.c.bf16 %v6914_v2, %v6913_v1  ;;  %v7094_v1 = vld [vmem:[%s19239_s6] sm:$0xf]  ;;  %v13253_v2 = vld [vmem:[%s19239_s6 + $0x4] sm:$0xf] }
0x162a   : > { %v6633_v27 = vpop.f32.mrb[192].mxu0  ;;  %v6687_v28 = vpop.f32.mrb[180].mxu1 }
0x162b   : > { %v18281_v29 = vadd.f32 %v6633_v27, %v6516_v22  ;;  %v15071_v30 = vpop.f32.mrb[193].mxu0  ;;  %v15077_v31 = vpop.f32.mrb[181].mxu1 }
0x162c   : > { %v6636_v32 = vpop.f32.mrb[194].mxu0  ;;  %v6690_v33 = vpop.f32.mrb[182].mxu1 }
0x162d   : > { %v18283_v34 = vadd.f32 %v6636_v32, %v6517_v25  ;;  %v6694_v35 = vpack.c.bf16 %v6690_v33, %v6687_v28  ;;  %v15072_v36 = vpop.f32.mrb[195].mxu0  ;;  %v15078_v37 = vpop.f32.mrb[183].mxu1  ;;  %v6994_v28 = vlaneseq }
0x162f   : > { %15086 = vmatmul.mubr.msk.bf16.vlgmr.msra.gmra.mrb[184].mxu1 %vm955_vm2, %v6694_v35 }
0x1630   : > { %15137 = vmatprep.mubr.msk.f32.mxu1 %vm17330_vm0, %v17329_v0  ;;  %16243 = vmatpush3.bf16.msra.mxu1 %v16242_v45 }
0x1631   : > { %16244 = vmatprep.subr.bf16.mxu1 %v17331_v20 }
0x1632   : > { %v6811_v38 = vpop.f32.mrb[196].mxu0 }
0x1633   : > { %v15093_v39 = vpop.f32.mrb[197].mxu0 }
0x1634   : > { %v6814_v40 = vpop.f32.mrb[198].mxu0  ;;  %16246 = vmatpush3.bf16.msra.mxu1 %v16245_v48 }
0x1635   : > { %v6818_v41 = vpack.c.bf16 %v6814_v40, %v6811_v38  ;;  %v15094_v42 = vpop.f32.mrb[199].mxu0  ;;  %16247 = vmatprep.subr.bf16.mxu1 %v17331_v20 }
0x1637   : > { %15102 = vmatmul.mubr.msk.bf16.vlgmr.msra.gmra.mrb[200].mxu0 %vm955_vm2, %v6818_v41 }
0x1638   : > { %15172 = vmatprep.mubr.msk.f32.mxu0 %vm17330_vm0, %v17329_v0  ;;  %16267 = vmatpush3.bf16.msra.mxu0 %v16242_v45 }
0x1639   : > { %16268 = vmatprep.subr.bf16.mxu0 %v17331_v20  ;;  %16249 = vmatpush3.bf16.msra.mxu1 %v16248_v51 }
0x163a   : > { %16250 = vmatprep.subr.bf16.mxu1 %v17331_v20 }
0x163c   : > { %16270 = vmatpush3.bf16.msra.mxu0 %v16245_v48  ;;  %v16783_v48 = vld [vmem:[#allocation6 + $0x50] sm:$0xff]  }
0x163d   : > { %16271 = vmatprep.subr.bf16.mxu0 %v17331_v20  ;;  %16252 = vmatpush3.bf16.msra.mxu1 %v16251_v54 }
0x163e   : > { %16253 = vmatprep.subr.bf16.mxu1 %v17331_v20 }
0x1640   : > { %16273 = vmatpush3.bf16.msra.mxu0 %v16248_v51  ;;  %v16789_v51 = vld [vmem:[#allocation6 + $0x68] sm:$0xff]  }
0x1641   : > { %16274 = vmatprep.subr.bf16.mxu0 %v17331_v20  ;;  %16255 = vmatpush3.bf16.msra.mxu1 %v16254_v57 }
0x1642   : > { %16256 = vmatprep.subr.bf16.mxu1 %v17331_v20 }
0x1644   : > { %16276 = vmatpush3.bf16.msra.mxu0 %v16251_v54 }
0x1645   : > { %16277 = vmatprep.subr.bf16.mxu0 %v17331_v20  ;;  %16258 = vmatpush3.bf16.msra.mxu1 %v16257_v60 }
0x1646   : > { %16259 = vmatprep.subr.bf16.mxu1 %v17331_v20 }
0x1648   : > { %16279 = vmatpush3.bf16.msra.mxu0 %v16254_v57 }
0x1649   : > { %16280 = vmatprep.subr.bf16.mxu0 %v17331_v20  ;;  %16261 = vmatpush3.bf16.msra.mxu1 %v16260_v63 }
0x164a   : > { %16262 = vmatprep.subr.bf16.mxu1 %v17331_v20 }
0x164c   : > { %16282 = vmatpush3.bf16.msra.mxu0 %v16257_v60 }
0x164d   : > { %16283 = vmatprep.subr.bf16.mxu0 %v17331_v20  ;;  %16264 = vmatpush3.bf16.msra.mxu1 %v16263_v4 }
0x164e   : > { %15175 = vmatprep.subr.bf16.mxu1 %v17329_v0 }
0x1650   : > { %16285 = vmatpush3.bf16.msra.mxu0 %v16260_v63 }
0x1651   : > { %16286 = vmatprep.subr.bf16.mxu0 %v17331_v20 }
0x1654   : > { %16288 = vmatpush3.bf16.msra.mxu0 %v16263_v4  ;;  %v16777_v4 = vld [vmem:[#allocation6] sm:$0xff]  }
0x1655   : > { %15187 = vmatprep.subr.bf16.mxu0 %v17329_v0 }
0x1702   : > { %v6757_v5 = vpop.f32.mrb[184].mxu1 }
0x1703   : > { %v6764_v6 = vadd.f32 %v6757_v5, %v18281_v29  ;;  %v15087_v7 = vpop.f32.mrb[185].mxu1  ;;  %v6995_v29 = vshrl.u32 %v6994_v28, 7  ;;  %v16778_v5 = vld [vmem:[#allocation6 + $0x8] sm:$0xff]  }
0x1704   : > { %v6760_v8 = vpop.f32.mrb[186].mxu1  ;;  %v16782_v7 = vld [vmem:[#allocation6 + $0x18] sm:$0xff]   ;;  %v13271_v28 = vld [vmem:[%s19239_s6 + $0x8] sm:$0xf] }
0x1705   : > { %v6765_v9 = vadd.f32 %v6760_v8, %v18283_v34  ;;  %v15088_v10 = vpop.f32.mrb[187].mxu1  ;;  %v18362_v30 = vsub.s32 0, %v6995_v29  ;;  %v16784_v8 = vld [vmem:[#allocation6 + $0x20] sm:$0xff]   ;;  %v13281_v29 = vld [vmem:[%s19239_s6 + $0xc] sm:$0xf] }
0x1706   : > { %v16788_v10 = vld [vmem:[#allocation6 + $0x30] sm:$0xff]  }
0x170a   : > { %v6881_v11 = vpop.f32.mrb[200].mxu0 }
0x170b   : > { %v6888_v12 = vadd.f32 %v6881_v11, %v6764_v6  ;;  %v15103_v13 = vpop.f32.mrb[201].mxu0  ;;  %v16780_v6 = vld [vmem:[#allocation6 + $0x10] sm:$0xff]   ;;  %v16790_v11 = vld [vmem:[#allocation6 + $0x38] sm:$0xff]  }
0x170c   : > { %v6884_v15 = vpop.f32.mrb[202].mxu0  ;;  %v16792_v13 = vld [vmem:[#allocation6 + $0x78] sm:$0xff]  }
0x170d   : > { %v6889_v16 = vadd.f32 %v6884_v15, %v6765_v9  ;;  %v15104_v3 = vpop.f32.mrb[203].mxu0  ;;  %v6897_v17 = vadd.f32 %v13251_v14, %v6888_v12  ;;  %v16786_v9 = vld [vmem:[#allocation6 + $0x28] sm:$0xff]   ;;  %v16791_v12 = vld [vmem:[#allocation6 + $0x70] sm:$0xff]   ;;  %v16793_v15 = vld [vmem:[#allocation6 + $0x80] sm:$0xff]  }
0x170f   : > { %v6898_v18 = vadd.f32 %v13251_v14, %v6889_v16 }
0x1711   : > { %v6915_v19 = vadd.f32 %v6898_v18, %v6897_v17 }
0x1713   : > { %v6916_v21 = vrot.slane %v6915_v19, 4 }
0x1715   : > { %v6917_v22 = vadd.f32 %v6916_v21, %v6915_v19  ;;  %v16794_v19 = vld [vmem:[#allocation6 + $0x88] sm:$0xff]  }
0x1717   : > { %v6918_v23 = vrot.slane %v6917_v22, 2 }
0x1719   : > { %v6919_v24 = vadd.f32 %v6918_v23, %v6917_v22 }
0x171b   : > { %v6920_v25 = vrot.slane %v6919_v24, 1 }
0x171d   : > { %v6921_v26 = vadd.f32 %v6920_v25, %v6919_v24  ;;  %v16795_v24 = vld [vmem:[#allocation6 + $0x90] sm:$0xff]  }
0x171f   : > { %v6923_v27 = vmul.f32 0.0625, %v6921_v26 }
0x1721   : > { %15138 = vmatmul.mubr.f32.vlgmr.msra.gmra.mrb[188].mxu1 %v6923_v27  ;;  %v16797_v27 = vld [vmem:[#allocation6 + $0x98] sm:$0xff]  }
0x1722   : > { %15177 = vmatprep.mubr.msk.bf16.mxu1 %vm17330_vm0, %v17329_v0 }
0x17f4   : > { %v6990_v31 = vpop.f32.mrb[188].mxu1 }
0x17f5   : > { %v6997_v32 = vrot.slane %v6990_v31, %v18362_v30  ;;  %v15139_v33 = vpop.f32.mrb[189].mxu1  ;;  %v16796_v31 = vld [vmem:[#allocation6 + $0xc0] sm:$0xff]  }
0x17f6   : > { %v16799_v33 = vld [vmem:[#allocation6 + $0xa0] sm:$0xff]  }
0x17f7   : > { %v6998_v34 = vsub.f32 %v6897_v17, %v6997_v32  ;;  %v6999_v35 = vsub.f32 %v6898_v18, %v6997_v32  ;;  %v16798_v32 = vld [vmem:[#allocation6 + $0xc8] sm:$0xff]  }
0x17f9   : > { %v7000_v36 = vmul.f32 %v6998_v34, %v6998_v34  ;;  %v7001_v37 = vmul.f32 %v6999_v35, %v6999_v35 }
0x17fb   : > { %v7002_v38 = vadd.f32 %v7001_v37, %v7000_v36  ;;  %v16802_v36 = vld [vmem:[#allocation6 + $0xd8] sm:$0xff]   ;;  %v16803_v37 = vld [vmem:[#allocation6 + $0xb0] sm:$0xff]  }
0x17fd   : > { %v7003_v39 = vrot.slane %v7002_v38, 4 }
0x17ff   : > { %v7004_v40 = vadd.f32 %v7003_v39, %v7002_v38  ;;  %v16804_v38 = vld [vmem:[#allocation6 + $0xe0] sm:$0xff]   ;;  %v16805_v39 = vld [vmem:[#allocation6 + $0xb8] sm:$0xff]  }
0x1801   : > { %v7005_v41 = vrot.slane %v7004_v40, 2 }
0x1803   : > { %v7006_v42 = vadd.f32 %v7005_v41, %v7004_v40  ;;  %v16806_v40 = vld [vmem:[#allocation6 + $0xe8] sm:$0xff]   ;;  %v16807_v41 = vld [vmem:[#allocation6 + $0xf0] sm:$0xff]  }
0x1805   : > { %v7007_v43 = vrot.slane %v7006_v42, 1 }
0x1807   : > { %v7008_v44 = vadd.f32 %v7007_v43, %v7006_v42  ;;  %v16808_v42 = vld [vmem:[#allocation6 + $0xf8] sm:$0xff]  }
0x1809   : > { %v7009_v45 = vmul.f32 0.0625, %v7008_v44 }
0x180b   : > { %15173 = vmatmul.mubr.f32.vlgmr.msra.gmra.mrb[204].mxu0 %v7009_v45 }
0x180c   : > { %15203 = vmatprep.mubr.msk.bf16.mxu0 %vm17330_vm0, %v17329_v0  ;;  %15188 = vmatpush3.bf16.msra.mxu0 %v16779_v46 }
0x180d   : > { %15189 = vmatprep.subr.bf16.mxu0 %v17329_v0 }
0x1810   : > { %15190 = vmatpush3.bf16.msra.mxu0 %v16781_v47 }
0x1811   : > { %15191 = vmatprep.subr.bf16.mxu0 %v17329_v0 }
0x1814   : > { %15192 = vmatpush3.bf16.msra.mxu0 %v16783_v48 }
0x1815   : > { %15193 = vmatprep.subr.bf16.mxu0 %v17329_v0 }
0x1818   : > { %15194 = vmatpush3.bf16.msra.mxu0 %v16785_v49 }
0x1819   : > { %15195 = vmatprep.subr.bf16.mxu0 %v17329_v0 }
0x181c   : > { %15196 = vmatpush3.bf16.msra.mxu0 %v16787_v50 }
0x181d   : > { %15197 = vmatprep.subr.bf16.mxu0 %v17329_v0 }
0x1820   : > { %15198 = vmatpush3.bf16.msra.mxu0 %v16789_v51 }
0x1821   : > { %15199 = vmatprep.subr.bf16.mxu0 %v17329_v0 }
0x1824   : > { %15200 = vmatpush3.bf16.msra.mxu0 %v16791_v12  ;;  %v16817_v12 = vld [vmem:[#allocation6 + $0x128] sm:$0xff]  }
0x1825   : > { %15201 = vmatprep.subr.bf16.mxu0 %v17329_v0 }
0x1828   : > { %15202 = vmatpush3.bf16.msra.mxu0 %v16792_v13  ;;  %v16819_v13 = vld [vmem:[#allocation6 + $0x130] sm:$0xff]  }
0x1829   : > { %15227 = vmatprep.subr.bf16.mxu0 %v17329_v0 }
0x18de   : > { %v7076_v52 = vpop.f32.mrb[204].mxu0 }
0x18df   : > { %v7077_v53 = vadd.f32 1e-05, %v7076_v52  ;;  %v15174_v54 = vpop.f32.mrb[205].mxu0 }
0x18e1   : > { %16993 = vrsqrt.f32 %v7077_v53 }
0x18eb   : > { %v16994_v55 = vpop.eup %16993 }
0x18ec   : > { %v7084_v56 = vrot.slane %v16994_v55, %v18362_v30 }
0x18ee   : > { %v7085_v57 = vmul.f32 %v7084_v56, %v6998_v34  ;;  %v7086_v58 = vmul.f32 %v7084_v56, %v6999_v35  ;;  %v16800_v34 = vld [vmem:[#allocation6 + $0xd0] sm:$0xff]   ;;  %v16801_v35 = vld [vmem:[#allocation6 + $0xa8] sm:$0xff]  }
0x18f0   : > { %vm7087_vm3 = vcmp.ge.f32.partialorder %v7085_v57, 0.0  ;;  %vm7088_vm4 = vcmp.ge.f32.partialorder %v7086_v58, 0.0  ;;  %v7089_v59 = vmul.f32 0.2, %v7085_v57  ;;  %v7090_v60 = vmul.f32 0.2, %v7086_v58 }
0x18f2   : > { %v7091_v61 = vsel %vm7087_vm3, %v7085_v57, %v7089_v59  ;;  %v7092_v62 = vsel %vm7088_vm4, %v7086_v58, %v7090_v60  ;;  %v13291_v58 = vld [vmem:[%s19239_s6 + $0x10] sm:$0xf]  ;;  %v16809_v60 = vld [vmem:[#allocation6 + $0x100] sm:$0xff]  }
0x18f3   : > { %v18374_v63 = vpack.c.bf16 %v7092_v62, %v7091_v61 }
0x18f5   : > { %15176 = vmatpush3.bf16.msra.mxu1 %v18374_v63 }
0x18f6   : > { %15181 = vmatprep.subr.bf16.mxu1 %v17329_v0 }
0x18f8   : > { %15178 = vmatmul.mubr.msk.bf16.vlgmr.msra.gmra.mrb[192].mxu1 %vm825_vm1, %v7094_v1 }
0x18f9   : > { %15182 = vmatpush3.bf16.msra.mxu1 %v18374_v63  ;;  %15183 = vmatprep.mubr.msk.bf16.mxu1 %vm17330_vm0, %v17329_v0 }
0x18fa   : > { %15207 = vmatprep.subr.bf16.mxu1 %v17329_v0 }
0x1900   : > { %15184 = vmatmul.mubr.msk.bf16.vlgmr.msra.gmra.mrb[196].mxu1 %vm825_vm1, %v13253_v2  ;;  %v16810_v2 = vld [vmem:[#allocation6 + $0x108] sm:$0xff]  }
0x1901   : > { %15208 = vmatpush3.bf16.msra.mxu1 %v16777_v4  ;;  %15223 = vmatprep.mubr.msk.bf16.mxu1 %vm17330_vm0, %v17329_v0  ;;  %v13301_v4 = vld [vmem:[%s19239_s6 + $0x14] sm:$0xf] }
0x1902   : > { %15209 = vmatprep.subr.bf16.mxu1 %v17329_v0 }
0x1905   : > { %15210 = vmatpush3.bf16.msra.mxu1 %v16778_v5  ;;  %v16812_v5 = vld [vmem:[#allocation6 + $0x140] sm:$0xff]  }
0x1906   : > { %15211 = vmatprep.subr.bf16.mxu1 %v17329_v0 }
0x1909   : > { %15212 = vmatpush3.bf16.msra.mxu1 %v16780_v6  ;;  %v16811_v6 = vld [vmem:[#allocation6 + $0x110] sm:$0xff]  }
0x190a   : > { %15213 = vmatprep.subr.bf16.mxu1 %v17329_v0 }
0x190d   : > { %15214 = vmatpush3.bf16.msra.mxu1 %v16782_v7  ;;  %v16814_v7 = vld [vmem:[#allocation6 + $0x148] sm:$0xff]  }
0x190e   : > { %15215 = vmatprep.subr.bf16.mxu1 %v17329_v0 }
0x1911   : > { %15216 = vmatpush3.bf16.msra.mxu1 %v16784_v8  ;;  %v16813_v8 = vld [vmem:[#allocation6 + $0x118] sm:$0xff]  }
0x1912   : > { %15217 = vmatprep.subr.bf16.mxu1 %v17329_v0 }
0x1915   : > { %15218 = vmatpush3.bf16.msra.mxu1 %v16786_v9  ;;  %v16816_v9 = vld [vmem:[#allocation6 + $0x150] sm:$0xff]  }
0x1916   : > { %15219 = vmatprep.subr.bf16.mxu1 %v17329_v0 }
0x1919   : > { %15220 = vmatpush3.bf16.msra.mxu1 %v16788_v10  ;;  %v16815_v10 = vld [vmem:[#allocation6 + $0x120] sm:$0xff]  }
0x191a   : > { %15221 = vmatprep.subr.bf16.mxu1 %v17329_v0 }
0x191d   : > { %15222 = vmatpush3.bf16.msra.mxu1 %v16790_v11  ;;  %v16818_v11 = vld [vmem:[#allocation6 + $0x158] sm:$0xff]  }
0x191e   : > { %15233 = vmatprep.subr.bf16.mxu1 %v17329_v0 }
0x19cb   : > { %v7132_v14 = vpop.f32.mrb[192].mxu1 }
0x19cc   : > { %v7138_v16 = vpack.c.bf16 %v7132_v14, %v7132_v14  ;;  %v15179_v3 = vpop.f32.mrb[193].mxu1  ;;  %v16820_v14 = vld [vmem:[#allocation6 + $0x160] sm:$0xff]  }
0x19cd   : > { %v7135_v17 = vpop.f32.mrb[194].mxu1  ;;  %v16823_v3 = vld [vmem:[#allocation6 + $0x170] sm:$0xff]  }
0x19ce   : > { %v15180_v18 = vpop.f32.mrb[195].mxu1  ;;  %15224 = vmatmul.mubr.bf16.vlgmr.msra.gmra.mrb[200].mxu1 %v7138_v16  ;;  %v16822_v16 = vld [vmem:[#allocation6 + $0x168] sm:$0xff]   ;;  %v16824_v17 = vld [vmem:[#allocation6 + $0x178] sm:$0xff]  }
0x19cf   : > { %15234 = vmatpush3.bf16.msra.mxu1 %v16793_v15  ;;  %15249 = vmatprep.mubr.msk.bf16.mxu1 %vm17330_vm0, %v17329_v0  ;;  %v16821_v15 = vld [vmem:[#allocation6 + $0x138] sm:$0xff]  }
0x19d0   : > { %15235 = vmatprep.subr.bf16.mxu1 %v17329_v0 }
0x19d3   : > { %v7194_v21 = vpop.f32.mrb[196].mxu1  ;;  %15236 = vmatpush3.bf16.msra.mxu1 %v16794_v19 }
0x19d4   : > { %v7200_v22 = vpack.c.bf16 %v7194_v21, %v7194_v21  ;;  %v15185_v23 = vpop.f32.mrb[197].mxu1  ;;  %15237 = vmatprep.subr.bf16.mxu1 %v17329_v0 }
0x19d5   : > { %v7197_v25 = vpop.f32.mrb[198].mxu1 }
0x19d6   : > { %v15186_v26 = vpop.f32.mrb[199].mxu1  ;;  %15204 = vmatmul.mubr.bf16.vlgmr.msra.gmra.mrb[208].mxu0 %v7200_v22 }
0x19d7   : > { %15228 = vmatpush3.bf16.msra.mxu0 %v18374_v63  ;;  %15229 = vmatprep.mubr.msk.bf16.mxu0 %vm17330_vm0, %v17329_v0 }
0x19d8   : > { %15253 = vmatprep.subr.bf16.mxu0 %v17329_v0  ;;  %15238 = vmatpush3.bf16.msra.mxu1 %v16795_v24 }
0x19d9   : > { %15239 = vmatprep.subr.bf16.mxu1 %v17329_v0 }
0x19dc   : > { %15240 = vmatpush3.bf16.msra.mxu1 %v16797_v27 }
0x19dd   : > { %15241 = vmatprep.subr.bf16.mxu1 %v17329_v0 }
0x19de   : > { %15230 = vmatmul.mubr.msk.bf16.vlgmr.msra.gmra.mrb[212].mxu0 %vm825_vm1, %v13271_v28 }
0x19df   : > { %15254 = vmatpush3.bf16.msra.mxu0 %v18374_v63  ;;  %15255 = vmatprep.mubr.msk.bf16.mxu0 %vm17330_vm0, %v17329_v0 }
0x19e0   : > { %15259 = vmatprep.subr.bf16.mxu0 %v17329_v0  ;;  %15242 = vmatpush3.bf16.msra.mxu1 %v16799_v33 }
0x19e1   : > { %15243 = vmatprep.subr.bf16.mxu1 %v17329_v0 }
0x19e4   : > { %15244 = vmatpush3.bf16.msra.mxu1 %v16801_v35 }
0x19e5   : > { %15245 = vmatprep.subr.bf16.mxu1 %v17329_v0 }
0x19e6   : > { %15256 = vmatmul.mubr.msk.bf16.vlgmr.msra.gmra.mrb[216].mxu0 %vm825_vm1, %v13281_v29 }
0x19e7   : > { %15260 = vmatpush3.bf16.msra.mxu0 %v16796_v31  ;;  %15275 = vmatprep.mubr.msk.bf16.mxu0 %vm17330_vm0, %v17329_v0 }
0x19e8   : > { %15261 = vmatprep.subr.bf16.mxu0 %v17329_v0  ;;  %15246 = vmatpush3.bf16.msra.mxu1 %v16803_v37 }
0x19e9   : > { %15247 = vmatprep.subr.bf16.mxu1 %v17329_v0 }
0x19eb   : > { %15262 = vmatpush3.bf16.msra.mxu0 %v16798_v32 }
0x19ec   : > { %15263 = vmatprep.subr.bf16.mxu0 %v17329_v0  ;;  %15248 = vmatpush3.bf16.msra.mxu1 %v16805_v39 }
0x19ed   : > { %15279 = vmatprep.subr.bf16.mxu1 %v17329_v0 }
0x19ef   : > { %15264 = vmatpush3.bf16.msra.mxu0 %v16800_v34 }
0x19f0   : > { %15265 = vmatprep.subr.bf16.mxu0 %v17329_v0 }
0x19f3   : > { %15266 = vmatpush3.bf16.msra.mxu0 %v16802_v36  ;;  %v13311_v36 = vld [vmem:[%s19239_s6 + $0x18] sm:$0xf] }
0x19f4   : > { %15267 = vmatprep.subr.bf16.mxu0 %v17329_v0 }
0x19f7   : > { %15268 = vmatpush3.bf16.msra.mxu0 %v16804_v38  ;;  %v16825_v38 = vld [vmem:[#allocation6 + $0x180] sm:$0xff]  }
0x19f8   : > { %15269 = vmatprep.subr.bf16.mxu0 %v17329_v0 }
0x19fb   : > { %15270 = vmatpush3.bf16.msra.mxu0 %v16806_v40 }
0x19fc   : > { %15271 = vmatprep.subr.bf16.mxu0 %v17329_v0 }
0x19ff   : > { %15272 = vmatpush3.bf16.msra.mxu0 %v16807_v41 }
0x1a00   : > { %15273 = vmatprep.subr.bf16.mxu0 %v17329_v0 }
0x1a03   : > { %15274 = vmatpush3.bf16.msra.mxu0 %v16808_v42  ;;  %v16826_v42 = vld [vmem:[#allocation6 + $0x188] sm:$0xff]  }
0x1a04   : > { %15305 = vmatprep.subr.bf16.mxu0 %v17329_v0 }
0x1aa1   : > { %v7388_v43 = vpop.f32.mrb[200].mxu1 }
0x1aa2   : > { %v15225_v44 = vpop.f32.mrb[201].mxu1 }
0x1aa3   : > { %v7391_v45 = vpop.f32.mrb[202].mxu1  ;;  %v16828_v44 = vld [vmem:[#allocation6 + $0x1c0] sm:$0xff]  }
0x1aa4   : > { %v15226_v46 = vpop.f32.mrb[203].mxu1  ;;  %v16827_v45 = vld [vmem:[#allocation6 + $0x190] sm:$0xff]  }
0x1aa5   : > { %v16830_v46 = vld [vmem:[#allocation6 + $0x1c8] sm:$0xff]  }
0x1aa9   : > { %v7300_v47 = vpop.f32.mrb[208].mxu0 }
0x1aaa   : > { %v18438_v48 = vadd.f32 %v7388_v43, %v7300_v47  ;;  %v15205_v49 = vpop.f32.mrb[209].mxu0  ;;  %v13321_v43 = vld [vmem:[%s19239_s6 + $0x1c] sm:$0xf] }
0x1aab   : > { %v7303_v50 = vpop.f32.mrb[210].mxu0  ;;  %v16829_v47 = vld [vmem:[#allocation6 + $0x198] sm:$0xff]   ;;  %v16831_v49 = vld [vmem:[#allocation6 + $0x1a0] sm:$0xff]  }
0x1aac   : > { %v15206_v51 = vpop.f32.mrb[211].mxu0  ;;  %v16833_v50 = vld [vmem:[#allocation6 + $0x1a8] sm:$0xff]  }
0x1aad   : > { %v16834_v51 = vld [vmem:[#allocation6 + $0x1d8] sm:$0xff]  }
0x1ab1   : > { %v7433_v52 = vpop.f32.mrb[212].mxu0 }
0x1ab2   : > { %v7439_v53 = vpack.c.bf16 %v7433_v52, %v7433_v52  ;;  %v15231_v54 = vpop.f32.mrb[213].mxu0  ;;  %v16835_v52 = vld [vmem:[#allocation6 + $0x1b0] sm:$0xff]  }
0x1ab3   : > { %v7436_v55 = vpop.f32.mrb[214].mxu0  ;;  %v16837_v54 = vld [vmem:[#allocation6 + $0x1b8] sm:$0xff]  }
0x1ab4   : > { %v15232_v56 = vpop.f32.mrb[215].mxu0  ;;  %15250 = vmatmul.mubr.bf16.vlgmr.msra.gmra.mrb[204].mxu1 %v7439_v53  ;;  %v16836_v53 = vld [vmem:[#allocation6 + $0x1e0] sm:$0xff]   ;;  %v16838_v55 = vld [vmem:[#allocation6 + $0x1e8] sm:$0xff]  }
0x1ab5   : > { %15280 = vmatpush3.bf16.msra.mxu1 %v18374_v63  ;;  %15281 = vmatprep.mubr.msk.bf16.mxu1 %vm17330_vm0, %v17329_v0  ;;  %v16839_v56 = vld [vmem:[#allocation6 + $0x1f0] sm:$0xff]  }
0x1ab6   : > { %15285 = vmatprep.subr.bf16.mxu1 %v17329_v0 }
0x1ab9   : > { %v7585_v57 = vpop.f32.mrb[216].mxu0 }
0x1aba   : > { %v7591_v59 = vpack.c.bf16 %v7585_v57, %v7585_v57  ;;  %v15257_v61 = vpop.f32.mrb[217].mxu0  ;;  %v16840_v57 = vld [vmem:[#allocation6 + $0x1f8] sm:$0xff]  }
0x1abb   : > { %v7588_v62 = vpop.f32.mrb[218].mxu0 }
0x1abc   : > { %15276 = vmatmul.mubr.bf16.vlgmr.msra.gmra.mrb[220].mxu0 %v7591_v59  ;;  %15282 = vmatmul.mubr.msk.bf16.vlgmr.msra.gmra.mrb[208].mxu1 %vm825_vm1, %v13291_v58  ;;  %v15258_v1 = vpop.f32.mrb[219].mxu0 }
0x1abd   : > { %15306 = vmatpush3.bf16.msra.mxu0 %v18374_v63  ;;  %15307 = vmatprep.mubr.msk.bf16.mxu0 %vm17330_vm0, %v17329_v0 }
0x1abe   : > { %15286 = vmatpush3.bf16.msra.mxu1 %v16809_v60  ;;  %15311 = vmatprep.subr.bf16.mxu0 %v17329_v0 }
0x1abf   : > { %15287 = vmatprep.subr.bf16.mxu1 %v17329_v0  ;;  %15301 = vmatprep.mubr.msk.bf16.mxu1 %vm17330_vm0, %v17329_v0 }
0x1ac2   : > { %15288 = vmatpush3.bf16.msra.mxu1 %v16810_v2 }
0x1ac3   : > { %15289 = vmatprep.subr.bf16.mxu1 %v17329_v0 }
0x1ac4   : > { %15308 = vmatmul.mubr.msk.bf16.vlgmr.msra.gmra.mrb[224].mxu0 %vm825_vm1, %v13301_v4 }
0x1ac5   : > { %15312 = vmatpush3.bf16.msra.mxu0 %v16812_v5  ;;  %15327 = vmatprep.mubr.msk.bf16.mxu0 %vm17330_vm0, %v17329_v0 }
0x1ac6   : > { %15290 = vmatpush3.bf16.msra.mxu1 %v16811_v6  ;;  %15313 = vmatprep.subr.bf16.mxu0 %v17329_v0 }
0x1ac7   : > { %15291 = vmatprep.subr.bf16.mxu1 %v17329_v0 }
0x1ac9   : > { %15314 = vmatpush3.bf16.msra.mxu0 %v16814_v7 }
0x1aca   : > { %15292 = vmatpush3.bf16.msra.mxu1 %v16813_v8  ;;  %15315 = vmatprep.subr.bf16.mxu0 %v17329_v0 }
0x1acb   : > { %15293 = vmatprep.subr.bf16.mxu1 %v17329_v0 }
0x1acd   : > { %15316 = vmatpush3.bf16.msra.mxu0 %v16816_v9 }
0x1ace   : > { %15294 = vmatpush3.bf16.msra.mxu1 %v16815_v10  ;;  %15317 = vmatprep.subr.bf16.mxu0 %v17329_v0 }
0x1acf   : > { %15295 = vmatprep.subr.bf16.mxu1 %v17329_v0 }
0x1ad1   : > { %15318 = vmatpush3.bf16.msra.mxu0 %v16818_v11 }
0x1ad2   : > { %15296 = vmatpush3.bf16.msra.mxu1 %v16817_v12  ;;  %15319 = vmatprep.subr.bf16.mxu0 %v17329_v0 }
0x1ad3   : > { %15297 = vmatprep.subr.bf16.mxu1 %v17329_v0 }
0x1ad5   : > { %15320 = vmatpush3.bf16.msra.mxu0 %v16820_v14  ;;  %v16841_v14 = vld [vmem:[#allocation6 + $0x200] sm:$0xff]  }
0x1ad6   : > { %15298 = vmatpush3.bf16.msra.mxu1 %v16819_v13  ;;  %15321 = vmatprep.subr.bf16.mxu0 %v17329_v0  ;;  %v13331_v13 = vld [vmem:[%s19239_s6 + $0x20] sm:$0xf] }
0x1ad7   : > { %15299 = vmatprep.subr.bf16.mxu1 %v17329_v0 }
0x1ad9   : > { %15322 = vmatpush3.bf16.msra.mxu0 %v16822_v16 }
0x1ada   : > { %15300 = vmatpush3.bf16.msra.mxu1 %v16821_v15  ;;  %15323 = vmatprep.subr.bf16.mxu0 %v17329_v0 }
0x1adb   : > { %15331 = vmatprep.subr.bf16.mxu1 %v17329_v0 }
0x1add   : > { %15324 = vmatpush3.bf16.msra.mxu0 %v16823_v3 }
0x1ade   : > { %15325 = vmatprep.subr.bf16.mxu0 %v17329_v0 }
0x1ae1   : > { %15326 = vmatpush3.bf16.msra.mxu0 %v16824_v17 }
0x1ae2   : > { %15357 = vmatprep.subr.bf16.mxu0 %v17329_v0 }
0x1b87   : > { %v7539_v18 = vpop.f32.mrb[204].mxu1 }
0x1b88   : > { %v7545_v19 = vadd.f32 %v7539_v18, %v18438_v48  ;;  %v15251_v21 = vpop.f32.mrb[205].mxu1  ;;  %v16832_v48 = vld [vmem:[#allocation6 + $0x1d0] sm:$0xff]  }
0x1b89   : > { %v7542_v22 = vpop.f32.mrb[206].mxu1  ;;  %v16843_v18 = vld [vmem:[#allocation6 + $0x210] sm:$0xff]   ;;  %v16845_v21 = vld [vmem:[#allocation6 + $0x220] sm:$0xff]  }
0x1b8a   : > { %v15252_v23 = vpop.f32.mrb[207].mxu1  ;;  %v16846_v22 = vld [vmem:[#allocation6 + $0x228] sm:$0xff]  }
0x1b8b   : > { %v16847_v23 = vld [vmem:[#allocation6 + $0x230] sm:$0xff]  }
0x1b8f   : > { %v7691_v24 = vpop.f32.mrb[220].mxu0  ;;  %v7737_v25 = vpop.f32.mrb[208].mxu1 }
0x1b90   : > { %v18477_v26 = vadd.f32 %v7691_v24, %v7545_v19  ;;  %v7743_v27 = vpack.c.bf16 %v7737_v25, %v7737_v25  ;;  %v15283_v28 = vpop.f32.mrb[209].mxu1  ;;  %v15277_v29 = vpop.f32.mrb[221].mxu0  ;;  %v16844_v19 = vld [vmem:[#allocation6 + $0x218] sm:$0xff]   ;;  %v8466_v25 = vld [vmem:[%s19242_s9] sm:$0xff] }
0x1b91   : > { %v7740_v31 = vpop.f32.mrb[210].mxu1  ;;  %v7694_v32 = vpop.f32.mrb[222].mxu0  ;;  %v16848_v24 = vld [vmem:[#allocation6 + $0x238] sm:$0xff]  }
0x1b92   : > { %v15284_v33 = vpop.f32.mrb[211].mxu1  ;;  %15302 = vmatmul.mubr.bf16.vlgmr.msra.gmra.mrb[212].mxu1 %v7743_v27  ;;  %v15278_v34 = vpop.f32.mrb[223].mxu0  ;;  %v8468_v27 = vld [vmem:[%s19242_s9 + $0x10] sm:$0xff]  ;;  %v8469_v29 = vld [vmem:[%s19242_s9 + $0x18] sm:$0xff]  ;;  %v8470_v32 = vld [vmem:[%s19242_s9 + $0x20] sm:$0xff] }
0x1b93   : > { %15332 = vmatpush3.bf16.msra.mxu1 %v18374_v63  ;;  %15333 = vmatprep.mubr.msk.bf16.mxu1 %vm17330_vm0, %v17329_v0  ;;  %v16293_v31 = vpack.c.bf16 %v8469_v29, %v8468_v27  ;;  %v8471_v33 = vld [vmem:[%s19242_s9 + $0x28] sm:$0xff]  ;;  %v16849_v29 = vld [vmem:[#allocation7] sm:$0xff]  }
0x1b94   : > { %15337 = vmatprep.subr.bf16.mxu1 %v17329_v0  ;;  %v16296_v34 = vpack.c.bf16 %v8471_v33, %v8470_v32  ;;  %v16852_v32 = vld [vmem:[#allocation7 + $0x10] sm:$0xff]   ;;  %v16854_v33 = vld [vmem:[#allocation7 + $0x18] sm:$0xff]  }
0x1b97   : > { %v7889_v35 = vpop.f32.mrb[224].mxu0 }
0x1b98   : > { %v7895_v37 = vpack.c.bf16 %v7889_v35, %v7889_v35  ;;  %v15309_v39 = vpop.f32.mrb[225].mxu0 }
0x1b99   : > { %v7892_v40 = vpop.f32.mrb[226].mxu0 }
0x1b9a   : > { %15328 = vmatmul.mubr.bf16.vlgmr.msra.gmra.mrb[228].mxu0 %v7895_v37  ;;  %15334 = vmatmul.mubr.msk.bf16.vlgmr.msra.gmra.mrb[216].mxu1 %vm825_vm1, %v13311_v36  ;;  %v15310_v41 = vpop.f32.mrb[227].mxu0 }
0x1b9b   : > { %15358 = vmatpush3.bf16.msra.mxu0 %v18374_v63  ;;  %15359 = vmatprep.mubr.msk.bf16.mxu0 %vm17330_vm0, %v17329_v0 }
0x1b9c   : > { %15338 = vmatpush3.bf16.msra.mxu1 %v16825_v38  ;;  %15363 = vmatprep.subr.bf16.mxu0 %v17329_v0 }
0x1b9d   : > { %15339 = vmatprep.subr.bf16.mxu1 %v17329_v0  ;;  %15353 = vmatprep.mubr.msk.bf16.mxu1 %vm17330_vm0, %v17329_v0 }
0x1ba0   : > { %15340 = vmatpush3.bf16.msra.mxu1 %v16826_v42 }
0x1ba1   : > { %15341 = vmatprep.subr.bf16.mxu1 %v17329_v0 }
0x1ba2   : > { %15360 = vmatmul.mubr.msk.bf16.vlgmr.msra.gmra.mrb[232].mxu0 %vm825_vm1, %v13321_v43 }
0x1ba3   : > { %15364 = vmatpush3.bf16.msra.mxu0 %v16828_v44  ;;  %15379 = vmatprep.mubr.msk.bf16.mxu0 %vm17330_vm0, %v17329_v0 }
0x1ba4   : > { %15342 = vmatpush3.bf16.msra.mxu1 %v16827_v45  ;;  %15365 = vmatprep.subr.bf16.mxu0 %v17329_v0 }
0x1ba5   : > { %15343 = vmatprep.subr.bf16.mxu1 %v17329_v0 }
0x1ba7   : > { %15366 = vmatpush3.bf16.msra.mxu0 %v16830_v46 }
0x1ba8   : > { %15344 = vmatpush3.bf16.msra.mxu1 %v16829_v47  ;;  %15367 = vmatprep.subr.bf16.mxu0 %v17329_v0 }
0x1ba9   : > { %15345 = vmatprep.subr.bf16.mxu1 %v17329_v0 }
0x1bab   : > { %15368 = vmatpush3.bf16.msra.mxu0 %v16832_v48 }
0x1bac   : > { %15346 = vmatpush3.bf16.msra.mxu1 %v16831_v49  ;;  %15369 = vmatprep.subr.bf16.mxu0 %v17329_v0 }
0x1bad   : > { %15347 = vmatprep.subr.bf16.mxu1 %v17329_v0 }
0x1baf   : > { %15370 = vmatpush3.bf16.msra.mxu0 %v16834_v51  ;;  %v8473_v51 = vld [vmem:[%s19242_s9 + $0x38] sm:$0xff] }
0x1bb0   : > { %15348 = vmatpush3.bf16.msra.mxu1 %v16833_v50  ;;  %15371 = vmatprep.subr.bf16.mxu0 %v17329_v0  ;;  %v8472_v50 = vld [vmem:[%s19242_s9 + $0x30] sm:$0xff] }
0x1bb1   : > { %15349 = vmatprep.subr.bf16.mxu1 %v17329_v0 }
0x1bb3   : > { %15372 = vmatpush3.bf16.msra.mxu0 %v16836_v53  ;;  %v8474_v53 = vld [vmem:[%s19242_s9 + $0x40] sm:$0xff] }
0x1bb4   : > { %15350 = vmatpush3.bf16.msra.mxu1 %v16835_v52  ;;  %15373 = vmatprep.subr.bf16.mxu0 %v17329_v0  ;;  %v16299_v52 = vpack.c.bf16 %v8473_v51, %v8472_v50  ;;  %v16851_v50 = vld [vmem:[#allocation7 + $0x40] sm:$0xff]   ;;  %v16853_v51 = vld [vmem:[#allocation7 + $0x48] sm:$0xff]  }
0x1bb5   : > { %15351 = vmatprep.subr.bf16.mxu1 %v17329_v0 }
0x1bb7   : > { %15374 = vmatpush3.bf16.msra.mxu0 %v16838_v55 }
0x1bb8   : > { %15352 = vmatpush3.bf16.msra.mxu1 %v16837_v54  ;;  %15375 = vmatprep.subr.bf16.mxu0 %v17329_v0  ;;  %v8475_v54 = vld [vmem:[%s19242_s9 + $0x48] sm:$0xff] }
0x1bb9   : > { %15383 = vmatprep.subr.bf16.mxu1 %v17329_v0  ;;  %v16302_v55 = vpack.c.bf16 %v8475_v54, %v8474_v53  ;;  %v16857_v53 = vld [vmem:[#allocation7 + $0x58] sm:$0xff]   ;;  %v16859_v54 = vld [vmem:[#allocation7 + $0x60] sm:$0xff]  }
0x1bbb   : > { %15376 = vmatpush3.bf16.msra.mxu0 %v16839_v56  ;;  %v8476_v56 = vld [vmem:[%s19242_s9 + $0x50] sm:$0xff] }
0x1bbc   : > { %15377 = vmatprep.subr.bf16.mxu0 %v17329_v0 }
0x1bbf   : > { %15378 = vmatpush3.bf16.msra.mxu0 %v16840_v57  ;;  %v8477_v57 = vld [vmem:[%s19242_s9 + $0x58] sm:$0xff] }
0x1bc0   : > { %16289 = vmatprep.subr.bf16.mxu0 %v17331_v20 }
0x1c65   : > { %v7843_v58 = vpop.f32.mrb[212].mxu1 }
0x1c66   : > { %v7849_v59 = vadd.f32 %v7843_v58, %v18477_v26  ;;  %v15303_v60 = vpop.f32.mrb[213].mxu1  ;;  %v8467_v26 = vld [vmem:[%s19242_s9 + $0x8] sm:$0xff]  ;;  %v16305_v58 = vpack.c.bf16 %v8477_v57, %v8476_v56  ;;  %v16863_v56 = vld [vmem:[#allocation7 + $0x70] sm:$0xff]   ;;  %v16864_v57 = vld [vmem:[#allocation7 + $0x78] sm:$0xff]  }
0x1c67   : > { %v7846_v61 = vpop.f32.mrb[214].mxu1  ;;  %v16290_v28 = vpack.c.bf16 %v8467_v26, %v8466_v25  ;;  %v8479_v60 = vld [vmem:[%s19242_s9 + $0x68] sm:$0xff] }
0x1c68   : > { %v15304_v62 = vpop.f32.mrb[215].mxu1 }
0x1c69   : > { %v8480_v62 = vld [vmem:[%s19242_s9 + $0x70] sm:$0xff] }
0x1c6d   : > { %v7995_v1 = vpop.f32.mrb[228].mxu0  ;;  %v8041_v2 = vpop.f32.mrb[216].mxu1 }
0x1c6e   : > { %v8001_v4 = vadd.f32 %v7995_v1, %v7849_v59  ;;  %v8047_v5 = vpack.c.bf16 %v8041_v2, %v8041_v2  ;;  %v15335_v6 = vpop.f32.mrb[217].mxu1  ;;  %v15329_v7 = vpop.f32.mrb[229].mxu0  ;;  %v8478_v59 = vld [vmem:[%s19242_s9 + $0x60] sm:$0xff]  ;;  %v8481_v1 = vld [vmem:[%s19242_s9 + $0x78] sm:$0xff] }
0x1c6f   : > { %v8044_v8 = vpop.f32.mrb[218].mxu1  ;;  %v7998_v9 = vpop.f32.mrb[230].mxu0  ;;  %v16308_v61 = vpack.c.bf16 %v8479_v60, %v8478_v59  ;;  %v16311_v2 = vpack.c.bf16 %v8481_v1, %v8480_v62 }
0x1c70   : > { %v15336_v10 = vpop.f32.mrb[219].mxu1  ;;  %15354 = vmatmul.mubr.bf16.vlgmr.msra.gmra.mrb[220].mxu1 %v8047_v5  ;;  %v15330_v11 = vpop.f32.mrb[231].mxu0  ;;  %v13341_v5 = vld [vmem:[%s19241_s8] ss:$0 sm:$0xff] }
0x1c71   : > { %15384 = vmatpush3.bf16.msra.mxu1 %v18374_v63  ;;  %15385 = vmatprep.mubr.msk.bf16.mxu1 %vm17330_vm0, %v17329_v0  ;;  %v16842_v63 = vld [vmem:[#allocation6 + $0x208] sm:$0xff]  }
0x1c72   : > { %15389 = vmatprep.subr.bf16.mxu1 %v17329_v0 }
0x1c75   : > { %v8193_v12 = vpop.f32.mrb[232].mxu0 }
0x1c76   : > { %v8199_v15 = vpack.c.bf16 %v8193_v12, %v8193_v12  ;;  %v15361_v16 = vpop.f32.mrb[233].mxu0 }
0x1c77   : > { %v8196_v3 = vpop.f32.mrb[234].mxu0 }
0x1c78   : > { %15380 = vmatmul.mubr.bf16.vlgmr.msra.gmra.mrb[236].mxu0 %v8199_v15  ;;  %15386 = vmatmul.mubr.msk.bf16.vlgmr.msra.gmra.mrb[224].mxu1 %vm825_vm1, %v13331_v13  ;;  %v15362_v17 = vpop.f32.mrb[235].mxu0 }
0x1c79   : > { %15390 = vmatpush3.bf16.msra.mxu1 %v16841_v14  ;;  %15405 = vmatprep.mubr.msk.bf16.mxu1 %vm17330_vm0, %v17329_v0 }
0x1c7a   : > { %15391 = vmatprep.subr.bf16.mxu1 %v17329_v0  ;;  %15441 = vmatprep.mubr.msk.f32.mxu0 %vm17330_vm0, %v17329_v0 }
0x1c7b   : > { %16291 = vmatpush3.bf16.msra.mxu0 %v16290_v28 }
0x1c7c   : > { %16292 = vmatprep.subr.bf16.mxu0 %v17331_v20 }
0x1c7d   : > { %15392 = vmatpush3.bf16.msra.mxu1 %v16842_v63 }
0x1c7e   : > { %15393 = vmatprep.subr.bf16.mxu1 %v17329_v0 }
0x1c7f   : > { %16294 = vmatpush3.bf16.msra.mxu0 %v16293_v31 }
0x1c80   : > { %16295 = vmatprep.subr.bf16.mxu0 %v17331_v20 }
0x1c81   : > { %15394 = vmatpush3.bf16.msra.mxu1 %v16843_v18 }
0x1c82   : > { %15395 = vmatprep.subr.bf16.mxu1 %v17329_v0 }
0x1c83   : > { %16297 = vmatpush3.bf16.msra.mxu0 %v16296_v34 }
0x1c84   : > { %16298 = vmatprep.subr.bf16.mxu0 %v17331_v20 }
0x1c85   : > { %15396 = vmatpush3.bf16.msra.mxu1 %v16844_v19 }
0x1c86   : > { %15397 = vmatprep.subr.bf16.mxu1 %v17329_v0 }
0x1c87   : > { %16300 = vmatpush3.bf16.msra.mxu0 %v16299_v52 }
0x1c88   : > { %16301 = vmatprep.subr.bf16.mxu0 %v17331_v20 }
0x1c89   : > { %15398 = vmatpush3.bf16.msra.mxu1 %v16845_v21 }
0x1c8a   : > { %15399 = vmatprep.subr.bf16.mxu1 %v17329_v0 }
0x1c8b   : > { %16303 = vmatpush3.bf16.msra.mxu0 %v16302_v55 }
0x1c8c   : > { %16304 = vmatprep.subr.bf16.mxu0 %v17331_v20 }
0x1c8d   : > { %15400 = vmatpush3.bf16.msra.mxu1 %v16846_v22 }
0x1c8e   : > { %15401 = vmatprep.subr.bf16.mxu1 %v17329_v0 }
0x1c8f   : > { %16306 = vmatpush3.bf16.msra.mxu0 %v16305_v58 }
0x1c90   : > { %16307 = vmatprep.subr.bf16.mxu0 %v17331_v20 }
0x1c91   : > { %15402 = vmatpush3.bf16.msra.mxu1 %v16847_v23 }
0x1c92   : > { %15403 = vmatprep.subr.bf16.mxu1 %v17329_v0 }
0x1c93   : > { %16309 = vmatpush3.bf16.msra.mxu0 %v16308_v61 }
0x1c94   : > { %16310 = vmatprep.subr.bf16.mxu0 %v17331_v20 }
0x1c95   : > { %15404 = vmatpush3.bf16.msra.mxu1 %v16848_v24 }
0x1c96   : > { %16313 = vmatprep.subr.bf16.mxu1 %v17331_v20 }
0x1c97   : > { %16312 = vmatpush3.bf16.msra.mxu0 %v16311_v2 }
0x1c98   : > { %15479 = vmatprep.subr.bf16.mxu0 %v17329_v0 }
0x1d43   : > { %v8147_v35 = vpop.f32.mrb[220].mxu1 }
0x1d44   : > { %v8153_v36 = vadd.f32 %v8147_v35, %v8001_v4  ;;  %v15355_v37 = vpop.f32.mrb[221].mxu1  ;;  %v16858_v35 = vld [vmem:[#allocation7 + $0x28] sm:$0xff]  }
0x1d45   : > { %v8150_v38 = vpop.f32.mrb[222].mxu1  ;;  %v16862_v37 = vld [vmem:[#allocation7 + $0x38] sm:$0xff]  }
0x1d46   : > { %v15356_v39 = vpop.f32.mrb[223].mxu1 }
0x1d4b   : > { %v8299_v40 = vpop.f32.mrb[236].mxu0  ;;  %v8345_v41 = vpop.f32.mrb[224].mxu1 }
0x1d4c   : > { %v8305_v42 = vadd.f32 %v8299_v40, %v8153_v36  ;;  %v8351_v43 = vpack.c.bf16 %v8345_v41, %v8345_v41  ;;  %v15387_v44 = vpop.f32.mrb[225].mxu1  ;;  %v15381_v45 = vpop.f32.mrb[237].mxu0  ;;  %v16860_v36 = vld [vmem:[#allocation7 + $0x30] sm:$0xff]  }
0x1d4d   : > { %v8348_v46 = vpop.f32.mrb[226].mxu1  ;;  %v8302_v47 = vpop.f32.mrb[238].mxu0 }
0x1d4e   : > { %v15388_v48 = vpop.f32.mrb[227].mxu1  ;;  %15406 = vmatmul.mubr.bf16.vlgmr.msra.gmra.mrb[228].mxu1 %v8351_v43  ;;  %v15382_v49 = vpop.f32.mrb[239].mxu0 }
0x1d4f   : > { %16315 = vmatpush3.bf16.msra.mxu1 %v16290_v28  ;;  %15476 = vmatprep.mubr.msk.f32.mxu1 %vm17330_vm0, %v17329_v0  ;;  %v8653_v48 = vld [vmem:[%s19303_s2] sm:$0x3]  ;;  %v13343_v49 = vld [vmem:[%s19304_s29 + $0x2] sm:$0x3] }
0x1d50   : > { %16316 = vmatprep.subr.bf16.mxu1 %v17331_v20 }
0x1d53   : > { %16318 = vmatpush3.bf16.msra.mxu1 %v16293_v31  ;;  %v16850_v31 = vld [vmem:[#allocation7 + $0x8] sm:$0xff]  }
0x1d54   : > { %16319 = vmatprep.subr.bf16.mxu1 %v17331_v20 }
0x1d57   : > { %16321 = vmatpush3.bf16.msra.mxu1 %v16296_v34  ;;  %v16856_v34 = vld [vmem:[#allocation7 + $0x20] sm:$0xff]  }
0x1d58   : > { %16322 = vmatprep.subr.bf16.mxu1 %v17331_v20 }
0x1d5b   : > { %16324 = vmatpush3.bf16.msra.mxu1 %v16299_v52  ;;  %v16855_v52 = vld [vmem:[#allocation7 + $0x50] sm:$0xff]  }
0x1d5c   : > { %16325 = vmatprep.subr.bf16.mxu1 %v17331_v20 }
0x1d5f   : > { %16327 = vmatpush3.bf16.msra.mxu1 %v16302_v55  ;;  %v16861_v55 = vld [vmem:[#allocation7 + $0x68] sm:$0xff]  }
0x1d60   : > { %16328 = vmatprep.subr.bf16.mxu1 %v17331_v20 }
0x1d63   : > { %16330 = vmatpush3.bf16.msra.mxu1 %v16305_v58 }
0x1d64   : > { %16331 = vmatprep.subr.bf16.mxu1 %v17331_v20 }
0x1d67   : > { %16333 = vmatpush3.bf16.msra.mxu1 %v16308_v61 }
0x1d68   : > { %16334 = vmatprep.subr.bf16.mxu1 %v17331_v20 }
0x1d6b   : > { %16336 = vmatpush3.bf16.msra.mxu1 %v16311_v2  ;;  %v13371_v2 = vld [vmem:[%s19304_s29 + $0x6] sm:$0x3] }
0x1d6c   : > { %15511 = vmatprep.subr.bf16.mxu1 %v17329_v0 }
0x1e21   : > { %v8451_v4 = vpop.f32.mrb[228].mxu1 }
0x1e22   : > { %v8457_v6 = vadd.f32 %v8451_v4, %v8305_v42  ;;  %v15407_v7 = vpop.f32.mrb[229].mxu1 }
0x1e23   : > { %v8454_v8 = vpop.f32.mrb[230].mxu1 }
0x1e24   : > { %v8465_v9 = vadd.f32 %v13341_v5, %v8457_v6  ;;  %v15408_v10 = vpop.f32.mrb[231].mxu1  ;;  %v16865_v6 = vld [vmem:[#allocation7 + $0xc0] sm:$0xff]  }
0x1e25   : > { %v13361_v10 = vld [vmem:[%s19304_s29 + $0x4] sm:$0x3] }
0x1e26   : > { %v8482_v11 = vrot.slane %v8465_v9, 4 }
0x1e28   : > { %v8483_v12 = vadd.f32 %v8482_v11, %v8465_v9  ;;  %v16867_v11 = vld [vmem:[#allocation7 + $0x80] sm:$0xff]  }
0x1e2a   : > { %v8484_v13 = vrot.slane %v8483_v12, 2 }
0x1e2c   : > { %v8485_v14 = vadd.f32 %v8484_v13, %v8483_v12  ;;  %v16868_v12 = vld [vmem:[#allocation7 + $0xd0] sm:$0xff]   ;;  %v16869_v13 = vld [vmem:[#allocation7 + $0x88] sm:$0xff]  }
0x1e2e   : > { %v8486_v15 = vrot.slane %v8485_v14, 1 }
0x1e30   : > { %v8487_v16 = vadd.f32 %v8486_v15, %v8485_v14  ;;  %v16870_v14 = vld [vmem:[#allocation7 + $0xd8] sm:$0xff]   ;;  %v16871_v15 = vld [vmem:[#allocation7 + $0x90] sm:$0xff]  }
0x1e32   : > { %v8489_v3 = vmul.f32 0.125, %v8487_v16  ;;  %v16872_v16 = vld [vmem:[#allocation7 + $0xe0] sm:$0xff]  }
0x1e34   : > { %15442 = vmatmul.mubr.f32.vlgmr.msra.gmra.mrb[206].mxu0 %v8489_v3  ;;  %v16873_v3 = vld [vmem:[#allocation7 + $0x98] sm:$0xff]  }
0x1e35   : > { %15481 = vmatprep.mubr.msk.bf16.mxu0 %vm17330_vm0, %v17329_v0 }
0x1f07   : > { %v8556_v17 = vpop.f32.mrb[206].mxu0 }
0x1f08   : > { %v8563_v63 = vrot.slane %v8556_v17, %v18362_v30  ;;  %v15443_v18 = vpop.f32.mrb[207].mxu0  ;;  %v16874_v17 = vld [vmem:[#allocation7 + $0xe8] sm:$0xff]  }
0x1f09   : > { %v16876_v18 = vld [vmem:[#allocation7 + $0xf0] sm:$0xff]  }
0x1f0a   : > { %v8564_v19 = vsub.f32 %v8465_v9, %v8563_v63  ;;  %v16866_v9 = vld [vmem:[#allocation7 + $0xc8] sm:$0xff]   ;;  %v16875_v63 = vld [vmem:[#allocation7 + $0xa0] sm:$0xff]  }
0x1f0c   : > { %v8565_v21 = vmul.f32 %v8564_v19, %v8564_v19 }
0x1f0e   : > { %v8566_v22 = vrot.slane %v8565_v21, 4 }
0x1f10   : > { %v8567_v23 = vadd.f32 %v8566_v22, %v8565_v21  ;;  %v16878_v21 = vld [vmem:[#allocation7 + $0xf8] sm:$0xff]   ;;  %v16879_v22 = vld [vmem:[#allocation7 + $0xb0] sm:$0xff]  }
0x1f12   : > { %v8568_v24 = vrot.slane %v8567_v23, 2 }
0x1f14   : > { %v8569_v25 = vadd.f32 %v8568_v24, %v8567_v23  ;;  %v16880_v23 = vld [vmem:[#allocation7 + $0xb8] sm:$0xff]  }
0x1f16   : > { %v8570_v26 = vrot.slane %v8569_v25, 1 }
0x1f18   : > { %v8571_v27 = vadd.f32 %v8570_v26, %v8569_v25 }
0x1f1a   : > { %v8572_v28 = vmul.f32 0.125, %v8571_v27 }
0x1f1c   : > { %15477 = vmatmul.mubr.f32.vlgmr.msra.gmra.mrb[190].mxu1 %v8572_v28 }
0x1f1d   : > { %15527 = vmatprep.mubr.msk.bf16.mxu1 %vm17330_vm0, %v17329_v0  ;;  %15512 = vmatpush3.bf16.msra.mxu1 %v16849_v29 }
0x1f1e   : > { %15513 = vmatprep.subr.bf16.mxu1 %v17329_v0 }
0x1f21   : > { %15514 = vmatpush3.bf16.msra.mxu1 %v16850_v31 }
0x1f22   : > { %15515 = vmatprep.subr.bf16.mxu1 %v17329_v0 }
0x1f25   : > { %15516 = vmatpush3.bf16.msra.mxu1 %v16852_v32 }
0x1f26   : > { %15517 = vmatprep.subr.bf16.mxu1 %v17329_v0 }
0x1f29   : > { %15518 = vmatpush3.bf16.msra.mxu1 %v16854_v33 }
0x1f2a   : > { %15519 = vmatprep.subr.bf16.mxu1 %v17329_v0 }
0x1f2d   : > { %15520 = vmatpush3.bf16.msra.mxu1 %v16856_v34 }
0x1f2e   : > { %15521 = vmatprep.subr.bf16.mxu1 %v17329_v0 }
0x1f31   : > { %15522 = vmatpush3.bf16.msra.mxu1 %v16858_v35 }
0x1f32   : > { %15523 = vmatprep.subr.bf16.mxu1 %v17329_v0 }
0x1f35   : > { %15524 = vmatpush3.bf16.msra.mxu1 %v16860_v36 }
0x1f36   : > { %15525 = vmatprep.subr.bf16.mxu1 %v17329_v0 }
0x1f39   : > { %15526 = vmatpush3.bf16.msra.mxu1 %v16862_v37 }
0x1f3a   : > { %15557 = vmatprep.subr.bf16.mxu1 %v17329_v0 }
0x1fef   : > { %v8639_v38 = vpop.f32.mrb[190].mxu1 }
0x1ff0   : > { %v8640_v39 = vadd.f32 1e-05, %v8639_v38  ;;  %v15478_v40 = vpop.f32.mrb[191].mxu1 }
0x1ff1   : > { %v13391_v40 = vld [vmem:[%s19304_s29 + $0xa] sm:$0x3] }
0x1ff2   : > { %16995 = vrsqrt.f32 %v8640_v39 }
0x1ffc   : > { %v16996_v41 = vpop.eup %16995 }
0x1ffd   : > { %v8647_v42 = vrot.slane %v16996_v41, %v18362_v30 }
0x1fff   : > { %v8648_v43 = vmul.f32 %v8647_v42, %v8564_v19  ;;  %v16877_v19 = vld [vmem:[#allocation7 + $0xa8] sm:$0xff]  }
0x2001   : > { %vm8649_vm5 = vcmp.ge.f32.partialorder %v8648_v43, 0.0  ;;  %v8650_v44 = vmul.f32 0.2, %v8648_v43 }
0x2003   : > { %v8651_v45 = vsel %vm8649_vm5, %v8648_v43, %v8650_v44  ;;  %v16881_v43 = vld [vmem:[#allocation7 + $0x140] sm:$0xff]  }
0x2004   : > { %v8652_v46 = vpack.c.bf16 %v8651_v45, %v8651_v45 }
0x2006   : > { %v18620_v47 = vsel %vm8658_vm6, %v8652_v46, 0  ;;  %v16882_v46 = vld [vmem:[#allocation7 + $0x148] sm:$0xff]  }
0x2007   : > { %15480 = vmatpush3.bf16.msra.mxu0 %v18620_v47 }
0x2008   : > { %15485 = vmatprep.subr.bf16.mxu0 %v17329_v0 }
0x200a   : > { %15482 = vmatmul.mubr.msk.bf16.vlgmr.msra.gmra.mrb[240].mxu0 %vm8654_vm7, %v8653_v48  ;;  %v13381_v48 = vld [vmem:[%s19304_s29 + $0x8] sm:$0x3] }
0x200b   : > { %15486 = vmatpush3.bf16.msra.mxu0 %v18620_v47  ;;  %15487 = vmatprep.mubr.msk.bf16.mxu0 %vm17330_vm0, %v17329_v0 }
0x200c   : > { %15491 = vmatprep.subr.bf16.mxu0 %v17329_v0 }
0x2012   : > { %15488 = vmatmul.mubr.msk.bf16.vlgmr.msra.gmra.mrb[244].mxu0 %vm8654_vm7, %v13343_v49  ;;  %v16883_v49 = vld [vmem:[#allocation7 + $0x100] sm:$0xff]  }
0x2013   : > { %15492 = vmatpush3.bf16.msra.mxu0 %v16851_v50  ;;  %15507 = vmatprep.mubr.msk.bf16.mxu0 %vm17330_vm0, %v17329_v0  ;;  %v16884_v50 = vld [vmem:[#allocation7 + $0x150] sm:$0xff]  }
0x2014   : > { %15493 = vmatprep.subr.bf16.mxu0 %v17329_v0 }
0x2017   : > { %15494 = vmatpush3.bf16.msra.mxu0 %v16853_v51  ;;  %v16885_v51 = vld [vmem:[#allocation7 + $0x108] sm:$0xff]  }
0x2018   : > { %15495 = vmatprep.subr.bf16.mxu0 %v17329_v0 }
0x201b   : > { %15496 = vmatpush3.bf16.msra.mxu0 %v16855_v52  ;;  %v16886_v52 = vld [vmem:[#allocation7 + $0x158] sm:$0xff]  }
0x201c   : > { %15497 = vmatprep.subr.bf16.mxu0 %v17329_v0 }
0x201f   : > { %15498 = vmatpush3.bf16.msra.mxu0 %v16857_v53  ;;  %v16887_v53 = vld [vmem:[#allocation7 + $0x110] sm:$0xff]  }
0x2020   : > { %15499 = vmatprep.subr.bf16.mxu0 %v17329_v0 }
0x2023   : > { %15500 = vmatpush3.bf16.msra.mxu0 %v16859_v54  ;;  %v16888_v54 = vld [vmem:[#allocation7 + $0x160] sm:$0xff]  }
0x2024   : > { %15501 = vmatprep.subr.bf16.mxu0 %v17329_v0 }
0x2027   : > { %15502 = vmatpush3.bf16.msra.mxu0 %v16861_v55  ;;  %v16889_v55 = vld [vmem:[#allocation7 + $0x118] sm:$0xff]  }
0x2028   : > { %15503 = vmatprep.subr.bf16.mxu0 %v17329_v0 }
0x202b   : > { %15504 = vmatpush3.bf16.msra.mxu0 %v16863_v56  ;;  %v16890_v56 = vld [vmem:[#allocation7 + $0x168] sm:$0xff]  }
0x202c   : > { %15505 = vmatprep.subr.bf16.mxu0 %v17329_v0 }
0x202f   : > { %15506 = vmatpush3.bf16.msra.mxu0 %v16864_v57  ;;  %v16891_v57 = vld [vmem:[#allocation7 + $0x120] sm:$0xff]  }
0x2030   : > { %15531 = vmatprep.subr.bf16.mxu0 %v17329_v0 }
0x20dd   : > { %v8696_v58 = vpop.f32.mrb[240].mxu0 }
0x20de   : > { %v8702_v59 = vpack.c.bf16 %v8696_v58, %v8696_v58  ;;  %v15483_v60 = vpop.f32.mrb[241].mxu0  ;;  %v16892_v58 = vld [vmem:[#allocation7 + $0x170] sm:$0xff]  }
0x20df   : > { %v8699_v61 = vpop.f32.mrb[242].mxu0  ;;  %v16894_v60 = vld [vmem:[#allocation7 + $0x178] sm:$0xff]  }
0x20e0   : > { %v15484_v62 = vpop.f32.mrb[243].mxu0  ;;  %15528 = vmatmul.mubr.bf16.vlgmr.msra.gmra.mrb[232].mxu1 %v8702_v59  ;;  %v16893_v59 = vld [vmem:[#allocation7 + $0x128] sm:$0xff]   ;;  %v16895_v61 = vld [vmem:[#allocation7 + $0x130] sm:$0xff]  }
0x20e1   : > { %15558 = vmatpush3.bf16.msra.mxu1 %v18620_v47  ;;  %15559 = vmatprep.mubr.msk.bf16.mxu1 %vm17330_vm0, %v17329_v0  ;;  %v16896_v62 = vld [vmem:[#allocation7 + $0x138] sm:$0xff]  }
0x20e2   : > { %15563 = vmatprep.subr.bf16.mxu1 %v17329_v0 }
0x20e5   : > { %v8758_v1 = vpop.f32.mrb[244].mxu0 }
0x20e6   : > { %v8764_v4 = vpack.c.bf16 %v8758_v1, %v8758_v1  ;;  %v15489_v5 = vpop.f32.mrb[245].mxu0 }
0x20e7   : > { %v8761_v7 = vpop.f32.mrb[246].mxu0 }
0x20e8   : > { %v15490_v8 = vpop.f32.mrb[247].mxu0  ;;  %15508 = vmatmul.mubr.bf16.vlgmr.msra.gmra.mrb[248].mxu0 %v8764_v4  ;;  %15560 = vmatmul.mubr.msk.bf16.vlgmr.msra.gmra.mrb[236].mxu1 %vm8654_vm7, %v13371_v2 }
0x20e9   : > { %15532 = vmatpush3.bf16.msra.mxu0 %v18620_v47  ;;  %15533 = vmatprep.mubr.msk.bf16.mxu0 %vm17330_vm0, %v17329_v0 }
0x20ea   : > { %15564 = vmatpush3.bf16.msra.mxu1 %v16865_v6  ;;  %15537 = vmatprep.subr.bf16.mxu0 %v17329_v0 }
0x20eb   : > { %15565 = vmatprep.subr.bf16.mxu1 %v17329_v0  ;;  %15579 = vmatprep.mubr.msk.bf16.mxu1 %vm17330_vm0, %v17329_v0 }
0x20ee   : > { %15566 = vmatpush3.bf16.msra.mxu1 %v16866_v9 }
0x20ef   : > { %15567 = vmatprep.subr.bf16.mxu1 %v17329_v0 }
0x20f0   : > { %15534 = vmatmul.mubr.msk.bf16.vlgmr.msra.gmra.mrb[252].mxu0 %vm8654_vm7, %v13361_v10 }
0x20f1   : > { %15538 = vmatpush3.bf16.msra.mxu0 %v16867_v11  ;;  %15553 = vmatprep.mubr.msk.bf16.mxu0 %vm17330_vm0, %v17329_v0 }
0x20f2   : > { %15568 = vmatpush3.bf16.msra.mxu1 %v16868_v12  ;;  %15539 = vmatprep.subr.bf16.mxu0 %v17329_v0 }
0x20f3   : > { %15569 = vmatprep.subr.bf16.mxu1 %v17329_v0 }
0x20f5   : > { %15540 = vmatpush3.bf16.msra.mxu0 %v16869_v13 }
0x20f6   : > { %15570 = vmatpush3.bf16.msra.mxu1 %v16870_v14  ;;  %15541 = vmatprep.subr.bf16.mxu0 %v17329_v0 }
0x20f7   : > { %15571 = vmatprep.subr.bf16.mxu1 %v17329_v0 }
0x20f9   : > { %15542 = vmatpush3.bf16.msra.mxu0 %v16871_v15 }
0x20fa   : > { %15572 = vmatpush3.bf16.msra.mxu1 %v16872_v16  ;;  %15543 = vmatprep.subr.bf16.mxu0 %v17329_v0 }
0x20fb   : > { %15573 = vmatprep.subr.bf16.mxu1 %v17329_v0 }
0x20fd   : > { %15544 = vmatpush3.bf16.msra.mxu0 %v16873_v3 }
0x20fe   : > { %15574 = vmatpush3.bf16.msra.mxu1 %v16874_v17  ;;  %15545 = vmatprep.subr.bf16.mxu0 %v17329_v0  ;;  %v13411_v17 = vld [vmem:[%s19304_s29 + $0xe] sm:$0x3] }
0x20ff   : > { %15575 = vmatprep.subr.bf16.mxu1 %v17329_v0 }
0x2101   : > { %15546 = vmatpush3.bf16.msra.mxu0 %v16875_v63 }
0x2102   : > { %15576 = vmatpush3.bf16.msra.mxu1 %v16876_v18  ;;  %15547 = vmatprep.subr.bf16.mxu0 %v17329_v0 }
0x2103   : > { %15577 = vmatprep.subr.bf16.mxu1 %v17329_v0 }
0x2105   : > { %15548 = vmatpush3.bf16.msra.mxu0 %v16877_v19  ;;  %v16898_v19 = vld [vmem:[#allocation7 + $0x1c0] sm:$0xff]  }
0x2106   : > { %15578 = vmatpush3.bf16.msra.mxu1 %v16878_v21  ;;  %15549 = vmatprep.subr.bf16.mxu0 %v17329_v0 }
0x2107   : > { %15609 = vmatprep.subr.bf16.mxu1 %v17329_v0 }
0x2109   : > { %15550 = vmatpush3.bf16.msra.mxu0 %v16879_v22 }
0x210a   : > { %15551 = vmatprep.subr.bf16.mxu0 %v17329_v0 }
0x210d   : > { %15552 = vmatpush3.bf16.msra.mxu0 %v16880_v23  ;;  %v16900_v23 = vld [vmem:[#allocation7 + $0x1c8] sm:$0xff]  }
0x210e   : > { %15583 = vmatprep.subr.bf16.mxu0 %v17329_v0 }
0x21b3   : > { %v8952_v24 = vpop.f32.mrb[232].mxu1 }
0x21b4   : > { %v15529_v25 = vpop.f32.mrb[233].mxu1 }
0x21b5   : > { %v8955_v26 = vpop.f32.mrb[234].mxu1  ;;  %v16897_v25 = vld [vmem:[#allocation7 + $0x180] sm:$0xff]  }
0x21b6   : > { %v15530_v27 = vpop.f32.mrb[235].mxu1  ;;  %v16902_v26 = vld [vmem:[#allocation7 + $0x1d0] sm:$0xff]  }
0x21b7   : > { %v16899_v27 = vld [vmem:[#allocation7 + $0x188] sm:$0xff]  }
0x21bb   : > { %v8864_v28 = vpop.f32.mrb[248].mxu0  ;;  %v9149_v29 = vpop.f32.mrb[236].mxu1 }
0x21bc   : > { %v18682_v31 = vadd.f32 %v8952_v24, %v8864_v28  ;;  %v9155_v32 = vpack.c.bf16 %v9149_v29, %v9149_v29  ;;  %v15509_v33 = vpop.f32.mrb[249].mxu0  ;;  %v15561_v34 = vpop.f32.mrb[237].mxu1  ;;  %v13401_v24 = vld [vmem:[%s19304_s29 + $0xc] sm:$0x3]  ;;  %v16904_v28 = vld [vmem:[#allocation7 + $0x1d8] sm:$0xff]   ;;  %v16901_v29 = vld [vmem:[#allocation7 + $0x190] sm:$0xff]  }
0x21bd   : > { %v8867_v35 = vpop.f32.mrb[250].mxu0  ;;  %v9152_v36 = vpop.f32.mrb[238].mxu1  ;;  %v16905_v33 = vld [vmem:[#allocation7 + $0x1a0] sm:$0xff]   ;;  %v16907_v34 = vld [vmem:[#allocation7 + $0x1a8] sm:$0xff]  }
0x21be   : > { %v15510_v37 = vpop.f32.mrb[251].mxu0  ;;  %15580 = vmatmul.mubr.bf16.vlgmr.msra.gmra.mrb[240].mxu1 %v9155_v32  ;;  %v15562_v38 = vpop.f32.mrb[239].mxu1  ;;  %v16903_v32 = vld [vmem:[#allocation7 + $0x198] sm:$0xff]   ;;  %v16908_v35 = vld [vmem:[#allocation7 + $0x1e8] sm:$0xff]   ;;  %v16909_v36 = vld [vmem:[#allocation7 + $0x1b0] sm:$0xff]  }
0x21bf   : > { %15610 = vmatpush3.bf16.msra.mxu1 %v18620_v47  ;;  %15611 = vmatprep.mubr.msk.bf16.mxu1 %vm17330_vm0, %v17329_v0  ;;  %v16910_v37 = vld [vmem:[#allocation7 + $0x1f0] sm:$0xff]   ;;  %v16911_v38 = vld [vmem:[#allocation7 + $0x1b8] sm:$0xff]  }
0x21c0   : > { %15615 = vmatprep.subr.bf16.mxu1 %v17329_v0 }
0x21c3   : > { %v8997_v39 = vpop.f32.mrb[252].mxu0 }
0x21c4   : > { %v9003_v41 = vpack.c.bf16 %v8997_v39, %v8997_v39  ;;  %v15535_v42 = vpop.f32.mrb[253].mxu0  ;;  %v16912_v39 = vld [vmem:[#allocation7 + $0x1f8] sm:$0xff]  }
0x21c5   : > { %v9000_v44 = vpop.f32.mrb[254].mxu0 }
0x21c6   : > { %v15536_v45 = vpop.f32.mrb[255].mxu0  ;;  %15554 = vmatmul.mubr.bf16.vlgmr.msra.gmra.mrb[0].mxu0 %v9003_v41  ;;  %15612 = vmatmul.mubr.msk.bf16.vlgmr.msra.gmra.mrb[244].mxu1 %vm8654_vm7, %v13391_v40 }
0x21c7   : > { %15584 = vmatpush3.bf16.msra.mxu0 %v18620_v47  ;;  %15585 = vmatprep.mubr.msk.bf16.mxu0 %vm17330_vm0, %v17329_v0 }
0x21c8   : > { %15616 = vmatpush3.bf16.msra.mxu1 %v16881_v43  ;;  %15589 = vmatprep.subr.bf16.mxu0 %v17329_v0 }
0x21c9   : > { %15617 = vmatprep.subr.bf16.mxu1 %v17329_v0  ;;  %15631 = vmatprep.mubr.msk.bf16.mxu1 %vm17330_vm0, %v17329_v0 }
0x21cc   : > { %15618 = vmatpush3.bf16.msra.mxu1 %v16882_v46 }
0x21cd   : > { %15619 = vmatprep.subr.bf16.mxu1 %v17329_v0 }
0x21ce   : > { %15586 = vmatmul.mubr.msk.bf16.vlgmr.msra.gmra.mrb[4].mxu0 %vm8654_vm7, %v13381_v48 }
0x21cf   : > { %15590 = vmatpush3.bf16.msra.mxu0 %v16883_v49  ;;  %15605 = vmatprep.mubr.msk.bf16.mxu0 %vm17330_vm0, %v17329_v0 }
0x21d0   : > { %15620 = vmatpush3.bf16.msra.mxu1 %v16884_v50  ;;  %15591 = vmatprep.subr.bf16.mxu0 %v17329_v0 }
0x21d1   : > { %15621 = vmatprep.subr.bf16.mxu1 %v17329_v0 }
0x21d3   : > { %15592 = vmatpush3.bf16.msra.mxu0 %v16885_v51 }
0x21d4   : > { %15622 = vmatpush3.bf16.msra.mxu1 %v16886_v52  ;;  %15593 = vmatprep.subr.bf16.mxu0 %v17329_v0 }
0x21d5   : > { %15623 = vmatprep.subr.bf16.mxu1 %v17329_v0 }
0x21d7   : > { %15594 = vmatpush3.bf16.msra.mxu0 %v16887_v53 }
0x21d8   : > { %15624 = vmatpush3.bf16.msra.mxu1 %v16888_v54  ;;  %15595 = vmatprep.subr.bf16.mxu0 %v17329_v0 }
0x21d9   : > { %15625 = vmatprep.subr.bf16.mxu1 %v17329_v0 }
0x21db   : > { %15596 = vmatpush3.bf16.msra.mxu0 %v16889_v55 }
0x21dc   : > { %15626 = vmatpush3.bf16.msra.mxu1 %v16890_v56  ;;  %15597 = vmatprep.subr.bf16.mxu0 %v17329_v0 }
0x21dd   : > { %15627 = vmatprep.subr.bf16.mxu1 %v17329_v0 }
0x21df   : > { %15598 = vmatpush3.bf16.msra.mxu0 %v16891_v57 }
0x21e0   : > { %15628 = vmatpush3.bf16.msra.mxu1 %v16892_v58  ;;  %15599 = vmatprep.subr.bf16.mxu0 %v17329_v0 }
0x21e1   : > { %15629 = vmatprep.subr.bf16.mxu1 %v17329_v0 }
0x21e3   : > { %15600 = vmatpush3.bf16.msra.mxu0 %v16893_v59 }
0x21e4   : > { %15630 = vmatpush3.bf16.msra.mxu1 %v16894_v60  ;;  %15601 = vmatprep.subr.bf16.mxu0 %v17329_v0 }
0x21e5   : > { %15661 = vmatprep.subr.bf16.mxu1 %v17329_v0 }
0x21e7   : > { %15602 = vmatpush3.bf16.msra.mxu0 %v16895_v61  ;;  %v13421_v61 = vld [vmem:[%s19304_s29 + $0x10] sm:$0x3] }
0x21e8   : > { %15603 = vmatprep.subr.bf16.mxu0 %v17329_v0 }
0x21eb   : > { %15604 = vmatpush3.bf16.msra.mxu0 %v16896_v62  ;;  %v16913_v62 = vld [vmem:[#allocation7 + $0x200] sm:$0xff]  }
0x21ec   : > { %15635 = vmatprep.subr.bf16.mxu0 %v17329_v0 }
0x2291   : > { %v9255_v1 = vpop.f32.mrb[240].mxu1 }
0x2292   : > { %v15581_v2 = vpop.f32.mrb[241].mxu1 }
0x2293   : > { %v9258_v4 = vpop.f32.mrb[242].mxu1  ;;  %v16916_v2 = vld [vmem:[#allocation7 + $0x218] sm:$0xff]  }
0x2294   : > { %v15582_v5 = vpop.f32.mrb[243].mxu1  ;;  %v16917_v4 = vld [vmem:[#allocation7 + $0x220] sm:$0xff]  }
0x2295   : > { %v16918_v5 = vld [vmem:[#allocation7 + $0x228] sm:$0xff]  }
0x2299   : > { %v9103_v6 = vpop.f32.mrb[0].mxu0  ;;  %v9453_v7 = vpop.f32.mrb[244].mxu1 }
0x229a   : > { %v9109_v8 = vadd.f32 %v9103_v6, %v18682_v31  ;;  %v9459_v9 = vpack.c.bf16 %v9453_v7, %v9453_v7  ;;  %v15555_v10 = vpop.f32.mrb[1].mxu0  ;;  %v15613_v11 = vpop.f32.mrb[245].mxu1  ;;  %v16906_v31 = vld [vmem:[#allocation7 + $0x1e0] sm:$0xff]   ;;  %v16919_v6 = vld [vmem:[#allocation7 + $0x230] sm:$0xff]   ;;  %v16920_v7 = vld [vmem:[#allocation7 + $0x238] sm:$0xff]  }
0x229b   : > { %v9106_v12 = vpop.f32.mrb[2].mxu0  ;;  %v9456_v13 = vpop.f32.mrb[246].mxu1  ;;  %v10032_v10 = vld [vmem:[%s19305_s10 + $0x10] sm:$0xff] }
0x229c   : > { %v15556_v14 = vpop.f32.mrb[3].mxu0  ;;  %15632 = vmatmul.mubr.bf16.vlgmr.msra.gmra.mrb[248].mxu1 %v9459_v9  ;;  %v18721_v15 = vadd.f32 %v9255_v1, %v9109_v8  ;;  %v15614_v16 = vpop.f32.mrb[247].mxu1  ;;  %v16914_v1 = vld [vmem:[#allocation7 + $0x208] sm:$0xff]   ;;  %v10030_v8 = vld [vmem:[%s19305_s10] sm:$0xff]  ;;  %v10033_v12 = vld [vmem:[%s19305_s10 + $0x18] sm:$0xff] }
0x229d   : > { %15662 = vmatpush3.bf16.msra.mxu1 %v18620_v47  ;;  %15663 = vmatprep.mubr.msk.bf16.mxu1 %vm17330_vm0, %v17329_v0  ;;  %v10031_v9 = vld [vmem:[%s19305_s10 + $0x8] sm:$0xff]  ;;  %v16341_v13 = vpack.c.bf16 %v10033_v12, %v10032_v10  ;;  %v10034_v14 = vld [vmem:[%s19305_s10 + $0x20] sm:$0xff] }
0x229e   : > { %15667 = vmatprep.subr.bf16.mxu1 %v17329_v0  ;;  %v16338_v11 = vpack.c.bf16 %v10031_v9, %v10030_v8 }
0x22a1   : > { %v9301_v3 = vpop.f32.mrb[4].mxu0 }
0x22a2   : > { %v9307_v63 = vpack.c.bf16 %v9301_v3, %v9301_v3  ;;  %v15587_v18 = vpop.f32.mrb[5].mxu0 }
0x22a3   : > { %v9304_v21 = vpop.f32.mrb[6].mxu0 }
0x22a4   : > { %v15588_v22 = vpop.f32.mrb[7].mxu0  ;;  %15606 = vmatmul.mubr.bf16.vlgmr.msra.gmra.mrb[8].mxu0 %v9307_v63  ;;  %15664 = vmatmul.mubr.msk.bf16.vlgmr.msra.gmra.mrb[252].mxu1 %vm8654_vm7, %v13411_v17 }
0x22a5   : > { %15636 = vmatpush3.bf16.msra.mxu0 %v18620_v47  ;;  %15637 = vmatprep.mubr.msk.bf16.mxu0 %vm17330_vm0, %v17329_v0 }
0x22a6   : > { %15641 = vmatprep.subr.bf16.mxu0 %v17329_v0  ;;  %15668 = vmatpush3.bf16.msra.mxu1 %v16898_v19 }
0x22a7   : > { %15669 = vmatprep.subr.bf16.mxu1 %v17329_v0  ;;  %15683 = vmatprep.mubr.msk.bf16.mxu1 %vm17330_vm0, %v17329_v0 }
0x22aa   : > { %15670 = vmatpush3.bf16.msra.mxu1 %v16900_v23 }
0x22ab   : > { %15671 = vmatprep.subr.bf16.mxu1 %v17329_v0 }
0x22ac   : > { %15638 = vmatmul.mubr.msk.bf16.vlgmr.msra.gmra.mrb[12].mxu0 %vm8654_vm7, %v13401_v24 }
0x22ad   : > { %15642 = vmatpush3.bf16.msra.mxu0 %v16897_v25  ;;  %15657 = vmatprep.mubr.msk.bf16.mxu0 %vm17330_vm0, %v17329_v0 }
0x22ae   : > { %15643 = vmatprep.subr.bf16.mxu0 %v17329_v0  ;;  %15672 = vmatpush3.bf16.msra.mxu1 %v16902_v26 }
0x22af   : > { %15673 = vmatprep.subr.bf16.mxu1 %v17329_v0 }
0x22b1   : > { %15644 = vmatpush3.bf16.msra.mxu0 %v16899_v27 }
0x22b2   : > { %15645 = vmatprep.subr.bf16.mxu0 %v17329_v0  ;;  %15674 = vmatpush3.bf16.msra.mxu1 %v16904_v28 }
0x22b3   : > { %15675 = vmatprep.subr.bf16.mxu1 %v17329_v0 }
0x22b5   : > { %15646 = vmatpush3.bf16.msra.mxu0 %v16901_v29 }
0x22b6   : > { %15647 = vmatprep.subr.bf16.mxu0 %v17329_v0  ;;  %15676 = vmatpush3.bf16.msra.mxu1 %v16906_v31 }
0x22b7   : > { %15677 = vmatprep.subr.bf16.mxu1 %v17329_v0 }
0x22b9   : > { %15648 = vmatpush3.bf16.msra.mxu0 %v16903_v32  ;;  %v10036_v32 = vld [vmem:[%s19305_s10 + $0x30] sm:$0xff] }
0x22ba   : > { %15649 = vmatprep.subr.bf16.mxu0 %v17329_v0  ;;  %15678 = vmatpush3.bf16.msra.mxu1 %v16908_v35  ;;  %v10038_v35 = vld [vmem:[%s19305_s10 + $0x40] sm:$0xff] }
0x22bb   : > { %15679 = vmatprep.subr.bf16.mxu1 %v17329_v0 }
0x22bd   : > { %15650 = vmatpush3.bf16.msra.mxu0 %v16905_v33  ;;  %v10037_v33 = vld [vmem:[%s19305_s10 + $0x38] sm:$0xff] }
0x22be   : > { %15651 = vmatprep.subr.bf16.mxu0 %v17329_v0  ;;  %15680 = vmatpush3.bf16.msra.mxu1 %v16910_v37 }
0x22bf   : > { %15681 = vmatprep.subr.bf16.mxu1 %v17329_v0 }
0x22c1   : > { %15652 = vmatpush3.bf16.msra.mxu0 %v16907_v34  ;;  %v16347_v34 = vpack.c.bf16 %v10037_v33, %v10036_v32  ;;  %v18869_v32 = vld [vmem:[#allocation9] sm:$0x3]  ;;  %v18878_v33 = vld [vmem:[#allocation9 + $0x2] sm:$0x3] }
0x22c2   : > { %15653 = vmatprep.subr.bf16.mxu0 %v17329_v0  ;;  %15682 = vmatpush3.bf16.msra.mxu1 %v16912_v39  ;;  %v10041_v39 = vld [vmem:[%s19305_s10 + $0x58] sm:$0xff] }
0x22c3   : > { %16337 = vmatprep.subr.bf16.mxu1 %v17331_v20 }
0x22c5   : > { %15654 = vmatpush3.bf16.msra.mxu0 %v16909_v36  ;;  %v10039_v36 = vld [vmem:[%s19305_s10 + $0x48] sm:$0xff] }
0x22c6   : > { %15655 = vmatprep.subr.bf16.mxu0 %v17329_v0  ;;  %v16350_v37 = vpack.c.bf16 %v10039_v36, %v10038_v35  ;;  %v16925_v35 = vld [vmem:[#allocation10 + $0x48] sm:$0xff]   ;;  %v16927_v36 = vld [vmem:[#allocation10 + $0x50] sm:$0xff]  }
0x22c9   : > { %15656 = vmatpush3.bf16.msra.mxu0 %v16911_v38  ;;  %v10040_v38 = vld [vmem:[%s19305_s10 + $0x50] sm:$0xff] }
0x22ca   : > { %15687 = vmatprep.subr.bf16.mxu0 %v17329_v0 }
0x236f   : > { %v9559_v40 = vpop.f32.mrb[248].mxu1 }
0x2370   : > { %v15633_v41 = vpop.f32.mrb[249].mxu1 }
0x2371   : > { %v9562_v42 = vpop.f32.mrb[250].mxu1  ;;  %v10042_v41 = vld [vmem:[%s19305_s10 + $0x60] sm:$0xff] }
0x2372   : > { %v15634_v43 = vpop.f32.mrb[251].mxu1  ;;  %v10043_v42 = vld [vmem:[%s19305_s10 + $0x68] sm:$0xff] }
0x2373   : > { %v16356_v43 = vpack.c.bf16 %v10043_v42, %v10042_v41  ;;  %v16936_v41 = vld [vmem:[#allocation10 + $0x78] sm:$0xff]  }
0x2377   : > { %v9407_v44 = vpop.f32.mrb[8].mxu0  ;;  %v9757_v45 = vpop.f32.mrb[252].mxu1 }
0x2378   : > { %v9413_v46 = vadd.f32 %v9407_v44, %v18721_v15  ;;  %v15607_v48 = vpop.f32.mrb[9].mxu0  ;;  %v9763_v49 = vpack.c.bf16 %v9757_v45, %v9757_v45  ;;  %v15665_v50 = vpop.f32.mrb[253].mxu1  ;;  %v10035_v15 = vld [vmem:[%s19305_s10 + $0x28] sm:$0xff]  ;;  %v10044_v44 = vld [vmem:[%s19305_s10 + $0x70] sm:$0xff]  ;;  %v10045_v45 = vld [vmem:[%s19305_s10 + $0x78] sm:$0xff] }
0x2379   : > { %v9410_v51 = vpop.f32.mrb[10].mxu0  ;;  %v9760_v52 = vpop.f32.mrb[254].mxu1  ;;  %v16344_v16 = vpack.c.bf16 %v10035_v15, %v10034_v14  ;;  %v16921_v14 = vld [vmem:[#allocation10] sm:$0xff]   ;;  %v16922_v15 = vld [vmem:[#allocation10 + $0x8] sm:$0xff]  }
0x237a   : > { %v9565_v53 = vadd.f32 %v9559_v40, %v9413_v46  ;;  %v15608_v54 = vpop.f32.mrb[11].mxu0  ;;  %15684 = vmatmul.mubr.bf16.vlgmr.msra.gmra.mrb[0].mxu1 %v9763_v49  ;;  %v15666_v55 = vpop.f32.mrb[255].mxu1  ;;  %v16353_v40 = vpack.c.bf16 %v10041_v39, %v10040_v38  ;;  %v16359_v46 = vpack.c.bf16 %v10045_v45, %v10044_v44  ;;  %v13431_v49 = vld [vmem:[%s19306_s12] ss:$0 sm:$0xff]  ;;  %v16931_v38 = vld [vmem:[#allocation10 + $0x60] sm:$0xff]  }
0x237b   : > { %15745 = vmatprep.mubr.msk.f32.mxu1 %vm17330_vm0, %v17329_v0  ;;  %16339 = vmatpush3.bf16.msra.mxu1 %v16338_v11  ;;  %v16933_v39 = vld [vmem:[#allocation10 + $0x68] sm:$0xff]  }
0x237c   : > { %16340 = vmatprep.subr.bf16.mxu1 %v17331_v20 }
0x237f   : > { %v9605_v56 = vpop.f32.mrb[12].mxu0  ;;  %16342 = vmatpush3.bf16.msra.mxu1 %v16341_v13 }
0x2380   : > { %v9611_v57 = vpack.c.bf16 %v9605_v56, %v9605_v56  ;;  %v15639_v58 = vpop.f32.mrb[13].mxu0  ;;  %16343 = vmatprep.subr.bf16.mxu1 %v17331_v20 }
0x2381   : > { %v9608_v59 = vpop.f32.mrb[14].mxu0 }
0x2382   : > { %v15640_v60 = vpop.f32.mrb[15].mxu0  ;;  %15658 = vmatmul.mubr.bf16.vlgmr.msra.gmra.mrb[16].mxu0 %v9611_v57 }
0x2383   : > { %15688 = vmatpush3.bf16.msra.mxu0 %v18620_v47  ;;  %15689 = vmatprep.mubr.msk.bf16.mxu0 %vm17330_vm0, %v17329_v0  ;;  %v16915_v47 = vld [vmem:[#allocation7 + $0x210] sm:$0xff]  }
0x2384   : > { %15693 = vmatprep.subr.bf16.mxu0 %v17329_v0  ;;  %16345 = vmatpush3.bf16.msra.mxu1 %v16344_v16 }
0x2385   : > { %16346 = vmatprep.subr.bf16.mxu1 %v17331_v20 }
0x2388   : > { %16348 = vmatpush3.bf16.msra.mxu1 %v16347_v34 }
0x2389   : > { %16349 = vmatprep.subr.bf16.mxu1 %v17331_v20 }
0x238a   : > { %15690 = vmatmul.mubr.msk.bf16.vlgmr.msra.gmra.mrb[20].mxu0 %vm8654_vm7, %v13421_v61 }
0x238b   : > { %15694 = vmatpush3.bf16.msra.mxu0 %v16913_v62  ;;  %15709 = vmatprep.mubr.msk.bf16.mxu0 %vm17330_vm0, %v17329_v0 }
0x238c   : > { %15695 = vmatprep.subr.bf16.mxu0 %v17329_v0  ;;  %16351 = vmatpush3.bf16.msra.mxu1 %v16350_v37 }
0x238d   : > { %16352 = vmatprep.subr.bf16.mxu1 %v17331_v20 }
0x238f   : > { %15696 = vmatpush3.bf16.msra.mxu0 %v16914_v1 }
0x2390   : > { %15697 = vmatprep.subr.bf16.mxu0 %v17329_v0  ;;  %16354 = vmatpush3.bf16.msra.mxu1 %v16353_v40 }
0x2391   : > { %16355 = vmatprep.subr.bf16.mxu1 %v17331_v20 }
0x2393   : > { %15698 = vmatpush3.bf16.msra.mxu0 %v16915_v47 }
0x2394   : > { %15699 = vmatprep.subr.bf16.mxu0 %v17329_v0  ;;  %16357 = vmatpush3.bf16.msra.mxu1 %v16356_v43 }
0x2395   : > { %16358 = vmatprep.subr.bf16.mxu1 %v17331_v20 }
0x2397   : > { %15700 = vmatpush3.bf16.msra.mxu0 %v16916_v2 }
0x2398   : > { %15701 = vmatprep.subr.bf16.mxu0 %v17329_v0  ;;  %16360 = vmatpush3.bf16.msra.mxu1 %v16359_v46 }
0x2399   : > { %15783 = vmatprep.subr.bf16.mxu1 %v17329_v0 }
0x239b   : > { %15702 = vmatpush3.bf16.msra.mxu0 %v16917_v4 }
0x239c   : > { %15703 = vmatprep.subr.bf16.mxu0 %v17329_v0 }
0x239f   : > { %15704 = vmatpush3.bf16.msra.mxu0 %v16918_v5 }
0x23a0   : > { %15705 = vmatprep.subr.bf16.mxu0 %v17329_v0 }
0x23a3   : > { %15706 = vmatpush3.bf16.msra.mxu0 %v16919_v6 }
0x23a4   : > { %15707 = vmatprep.subr.bf16.mxu0 %v17329_v0 }
0x23a7   : > { %15708 = vmatpush3.bf16.msra.mxu0 %v16920_v7 }
0x23a8   : > { %16361 = vmatprep.subr.bf16.mxu0 %v17331_v20 }
0x244d   : > { %v9863_v3 = vpop.f32.mrb[0].mxu1 }
0x244e   : > { %v15685_v17 = vpop.f32.mrb[1].mxu1 }
0x244f   : > { %v9866_v63 = vpop.f32.mrb[2].mxu1  ;;  %v16928_v17 = vld [vmem:[#allocation10 + $0x20] sm:$0xff]  }
0x2450   : > { %v15686_v18 = vpop.f32.mrb[3].mxu1  ;;  %v16930_v63 = vld [vmem:[#allocation10 + $0x28] sm:$0xff]  }
0x2451   : > { %v16932_v18 = vld [vmem:[#allocation10 + $0x30] sm:$0xff]  }
0x2455   : > { %v9711_v19 = vpop.f32.mrb[16].mxu0 }
0x2456   : > { %v9717_v21 = vadd.f32 %v9711_v19, %v9565_v53  ;;  %v15659_v22 = vpop.f32.mrb[17].mxu0  ;;  %v16934_v19 = vld [vmem:[#allocation10 + $0x38] sm:$0xff]  }
0x2457   : > { %v9714_v23 = vpop.f32.mrb[18].mxu0 }
0x2458   : > { %v9869_v24 = vadd.f32 %v9863_v3, %v9717_v21  ;;  %v15660_v25 = vpop.f32.mrb[19].mxu0  ;;  %v16926_v3 = vld [vmem:[#allocation10 + $0x18] sm:$0xff]  }
0x245d   : > { %v9909_v26 = vpop.f32.mrb[20].mxu0 }
0x245e   : > { %v9915_v27 = vpack.c.bf16 %v9909_v26, %v9909_v26  ;;  %v15691_v28 = vpop.f32.mrb[21].mxu0 }
0x245f   : > { %v9912_v29 = vpop.f32.mrb[22].mxu0 }
0x2460   : > { %v15692_v31 = vpop.f32.mrb[23].mxu0  ;;  %15710 = vmatmul.mubr.bf16.vlgmr.msra.gmra.mrb[24].mxu0 %v9915_v27 }
0x2461   : > { %16363 = vmatpush3.bf16.msra.mxu0 %v16338_v11  ;;  %15780 = vmatprep.mubr.msk.f32.mxu0 %vm17330_vm0, %v17329_v0 }
0x2462   : > { %16364 = vmatprep.subr.bf16.mxu0 %v17331_v20 }
0x2465   : > { %16366 = vmatpush3.bf16.msra.mxu0 %v16341_v13 }
0x2466   : > { %16367 = vmatprep.subr.bf16.mxu0 %v17331_v20 }
0x2469   : > { %16369 = vmatpush3.bf16.msra.mxu0 %v16344_v16  ;;  %v16924_v16 = vld [vmem:[#allocation10 + $0x10] sm:$0xff]  }
0x246a   : > { %16370 = vmatprep.subr.bf16.mxu0 %v17331_v20 }
0x246d   : > { %16372 = vmatpush3.bf16.msra.mxu0 %v16347_v34  ;;  %v16923_v34 = vld [vmem:[#allocation10 + $0x40] sm:$0xff]  }
0x246e   : > { %16373 = vmatprep.subr.bf16.mxu0 %v17331_v20 }
0x2471   : > { %16375 = vmatpush3.bf16.msra.mxu0 %v16350_v37  ;;  %v16929_v37 = vld [vmem:[#allocation10 + $0x58] sm:$0xff]  }
0x2472   : > { %16376 = vmatprep.subr.bf16.mxu0 %v17331_v20 }
0x2475   : > { %16378 = vmatpush3.bf16.msra.mxu0 %v16353_v40  ;;  %v16935_v40 = vld [vmem:[#allocation10 + $0x70] sm:$0xff]  }
0x2476   : > { %16379 = vmatprep.subr.bf16.mxu0 %v17331_v20 }
0x2479   : > { %16381 = vmatpush3.bf16.msra.mxu0 %v16356_v43 }
0x247a   : > { %16382 = vmatprep.subr.bf16.mxu0 %v17331_v20 }
0x247d   : > { %16384 = vmatpush3.bf16.msra.mxu0 %v16359_v46 }
0x247e   : > { %15815 = vmatprep.subr.bf16.mxu0 %v17329_v0 }
0x2533   : > { %v10015_v48 = vpop.f32.mrb[24].mxu0 }
0x2534   : > { %v10021_v50 = vadd.f32 %v10015_v48, %v9869_v24  ;;  %v15711_v51 = vpop.f32.mrb[25].mxu0 }
0x2535   : > { %v10018_v52 = vpop.f32.mrb[26].mxu0 }
0x2536   : > { %v10029_v53 = vadd.f32 %v13431_v49, %v10021_v50  ;;  %v15712_v54 = vpop.f32.mrb[27].mxu0  ;;  %v18896_v49 = vld [vmem:[#allocation9 + $0x6] sm:$0x3]  ;;  %v16937_v52 = vld [vmem:[#allocation10 + $0xc0] sm:$0xff]  }
0x2538   : > { %v10046_v55 = vsel %vm8658_vm6, %v10029_v53, 0.0 }
0x2539   : > { %v10047_v56 = vrot.slane %v10046_v55, 4 }
0x253b   : > { %v10048_v57 = vadd.f32 %v10047_v56, %v10046_v55  ;;  %v16938_v55 = vld [vmem:[#allocation10 + $0xc8] sm:$0xff]   ;;  %v18907_v56 = vld [vmem:[#allocation9 + $0x4] sm:$0x3] }
0x253d   : > { %v10049_v58 = vrot.slane %v10048_v57, 2 }
0x253f   : > { %v10050_v59 = vadd.f32 %v10049_v58, %v10048_v57  ;;  %v16939_v57 = vld [vmem:[#allocation10 + $0x80] sm:$0xff]   ;;  %v16940_v58 = vld [vmem:[#allocation10 + $0xd0] sm:$0xff]  }
0x2541   : > { %v10051_v60 = vrot.slane %v10050_v59, 1 }
0x2543   : > { %v10052_v61 = vadd.f32 %v10051_v60, %v10050_v59  ;;  %v16941_v59 = vld [vmem:[#allocation10 + $0x88] sm:$0xff]   ;;  %v16942_v60 = vld [vmem:[#allocation10 + $0xd8] sm:$0xff]  }
0x2545   : > { %v10054_v62 = vmul.f32 0.25, %v10052_v61  ;;  %v16943_v61 = vld [vmem:[#allocation10 + $0x90] sm:$0xff]  }
0x2547   : > { %15746 = vmatmul.mubr.f32.vlgmr.msra.gmra.mrb[4].mxu1 %v10054_v62  ;;  %v16944_v62 = vld [vmem:[#allocation10 + $0xe0] sm:$0xff]  }
0x2548   : > { %15785 = vmatprep.mubr.msk.bf16.mxu1 %vm17330_vm0, %v17329_v0 }
0x261a   : > { %v10121_v1 = vpop.f32.mrb[4].mxu1 }
0x261b   : > { %v10128_v47 = vrot.slane %v10121_v1, %v18362_v30  ;;  %v15747_v2 = vpop.f32.mrb[5].mxu1  ;;  %v16945_v1 = vld [vmem:[#allocation10 + $0x98] sm:$0xff]  }
0x261c   : > { %v16947_v2 = vld [vmem:[#allocation10 + $0xa0] sm:$0xff]  }
0x261d   : > { %v10129_v4 = vsub.f32 %v10029_v53, %v10128_v47  ;;  %v16946_v47 = vld [vmem:[#allocation10 + $0xe8] sm:$0xff]  }
0x261f   : > { %v10130_v5 = vmul.f32 %v10129_v4, %v10129_v4 }
0x2621   : > { %v10131_v6 = vsel %vm8658_vm6, %v10130_v5, 0.0  ;;  %v16949_v5 = vld [vmem:[#allocation10 + $0xa8] sm:$0xff]  }
0x2622   : > { %v10132_v7 = vrot.slane %v10131_v6, 4 }
0x2624   : > { %v10133_v8 = vadd.f32 %v10132_v7, %v10131_v6  ;;  %v16950_v6 = vld [vmem:[#allocation10 + $0xf8] sm:$0xff]   ;;  %v16951_v7 = vld [vmem:[#allocation10 + $0xb0] sm:$0xff]  }
0x2626   : > { %v10134_v9 = vrot.slane %v10133_v8, 2 }
0x2628   : > { %v10135_v10 = vadd.f32 %v10134_v9, %v10133_v8  ;;  %v16952_v8 = vld [vmem:[#allocation10 + $0xb8] sm:$0xff]  }
0x262a   : > { %v10136_v11 = vrot.slane %v10135_v10, 1 }
0x262c   : > { %v10137_v12 = vadd.f32 %v10136_v11, %v10135_v10 }
0x262e   : > { %v10138_v13 = vmul.f32 0.25, %v10137_v12 }
0x2630   : > { %15781 = vmatmul.mubr.f32.vlgmr.msra.gmra.mrb[28].mxu0 %v10138_v13 }
0x2631   : > { %15831 = vmatprep.mubr.msk.bf16.mxu0 %vm17330_vm0, %v17329_v0  ;;  %15816 = vmatpush3.bf16.msra.mxu0 %v16921_v14 }
0x2632   : > { %15817 = vmatprep.subr.bf16.mxu0 %v17329_v0 }
0x2635   : > { %15818 = vmatpush3.bf16.msra.mxu0 %v16922_v15 }
0x2636   : > { %15819 = vmatprep.subr.bf16.mxu0 %v17329_v0 }
0x2639   : > { %15820 = vmatpush3.bf16.msra.mxu0 %v16924_v16 }
0x263a   : > { %15821 = vmatprep.subr.bf16.mxu0 %v17329_v0 }
0x263d   : > { %15822 = vmatpush3.bf16.msra.mxu0 %v16926_v3 }
0x263e   : > { %15823 = vmatprep.subr.bf16.mxu0 %v17329_v0 }
0x2641   : > { %15824 = vmatpush3.bf16.msra.mxu0 %v16928_v17 }
0x2642   : > { %15825 = vmatprep.subr.bf16.mxu0 %v17329_v0 }
0x2645   : > { %15826 = vmatpush3.bf16.msra.mxu0 %v16930_v63 }
0x2646   : > { %15827 = vmatprep.subr.bf16.mxu0 %v17329_v0 }
0x2649   : > { %15828 = vmatpush3.bf16.msra.mxu0 %v16932_v18 }
0x264a   : > { %15829 = vmatprep.subr.bf16.mxu0 %v17329_v0 }
0x264d   : > { %15830 = vmatpush3.bf16.msra.mxu0 %v16934_v19 }
0x264e   : > { %15861 = vmatprep.subr.bf16.mxu0 %v17329_v0 }
0x2703   : > { %v10205_v21 = vpop.f32.mrb[28].mxu0 }
0x2704   : > { %v10206_v22 = vadd.f32 1e-05, %v10205_v21  ;;  %v15782_v23 = vpop.f32.mrb[29].mxu0 }
0x2705   : > { %v18934_v23 = vld [vmem:[#allocation9 + $0xa] sm:$0x3] }
0x2706   : > { %16997 = vrsqrt.f32 %v10206_v22 }
0x2710   : > { %v16998_v24 = vpop.eup %16997 }
0x2711   : > { %v10213_v25 = vrot.slane %v16998_v24, %v18362_v30 }
0x2713   : > { %v10214_v26 = vmul.f32 %v10213_v25, %v10129_v4  ;;  %v16948_v4 = vld [vmem:[#allocation10 + $0xf0] sm:$0xff]  }
0x2715   : > { %vm10215_vm8 = vcmp.ge.f32.partialorder %v10214_v26, 0.0  ;;  %v10216_v27 = vmul.f32 0.2, %v10214_v26 }
0x2717   : > { %v10217_v28 = vsel %vm10215_vm8, %v10214_v26, %v10216_v27  ;;  %v16953_v26 = vld [vmem:[#allocation10 + $0x140] sm:$0xff]  }
0x2718   : > { %v10218_v29 = vpack.c.bf16 %v10217_v28, %v10217_v28 }
0x271a   : > { %v18866_v31 = vsel %vm10226_vm9, %v10218_v29, 0  ;;  %v16954_v29 = vld [vmem:[#allocation10 + $0x148] sm:$0xff]  }
0x271b   : > { %15784 = vmatpush3.bf16.msra.mxu1 %v18866_v31 }
0x271c   : > { %15789 = vmatprep.subr.bf16.mxu1 %v17329_v0 }
0x271e   : > { %15786 = vmatmul.mubr.msk.bf16.vlgmr.msra.gmra.mrb[8].mxu1 %vm10222_vm10, %v18869_v32 }
0x271f   : > { %15790 = vmatpush3.bf16.msra.mxu1 %v18866_v31  ;;  %15791 = vmatprep.mubr.msk.bf16.mxu1 %vm17330_vm0, %v17329_v0 }
0x2720   : > { %15795 = vmatprep.subr.bf16.mxu1 %v17329_v0 }
0x2726   : > { %15792 = vmatmul.mubr.msk.bf16.vlgmr.msra.gmra.mrb[12].mxu1 %vm10222_vm10, %v18878_v33 }
0x2727   : > { %15796 = vmatpush3.bf16.msra.mxu1 %v16923_v34  ;;  %15811 = vmatprep.mubr.msk.bf16.mxu1 %vm17330_vm0, %v17329_v0  ;;  %v18945_v34 = vld [vmem:[#allocation9 + $0x8] sm:$0x3] }
0x2728   : > { %15797 = vmatprep.subr.bf16.mxu1 %v17329_v0 }
0x272b   : > { %15798 = vmatpush3.bf16.msra.mxu1 %v16925_v35  ;;  %v16955_v35 = vld [vmem:[#allocation10 + $0x100] sm:$0xff]  }
0x272c   : > { %15799 = vmatprep.subr.bf16.mxu1 %v17329_v0 }
0x272f   : > { %15800 = vmatpush3.bf16.msra.mxu1 %v16927_v36  ;;  %v16956_v36 = vld [vmem:[#allocation10 + $0x150] sm:$0xff]  }
0x2730   : > { %15801 = vmatprep.subr.bf16.mxu1 %v17329_v0 }
0x2733   : > { %15802 = vmatpush3.bf16.msra.mxu1 %v16929_v37  ;;  %v16957_v37 = vld [vmem:[#allocation10 + $0x108] sm:$0xff]  }
0x2734   : > { %15803 = vmatprep.subr.bf16.mxu1 %v17329_v0 }
0x2737   : > { %15804 = vmatpush3.bf16.msra.mxu1 %v16931_v38  ;;  %v16958_v38 = vld [vmem:[#allocation10 + $0x158] sm:$0xff]  }
0x2738   : > { %15805 = vmatprep.subr.bf16.mxu1 %v17329_v0 }
0x273b   : > { %15806 = vmatpush3.bf16.msra.mxu1 %v16933_v39  ;;  %v16959_v39 = vld [vmem:[#allocation10 + $0x110] sm:$0xff]  }
0x273c   : > { %15807 = vmatprep.subr.bf16.mxu1 %v17329_v0 }
0x273f   : > { %15808 = vmatpush3.bf16.msra.mxu1 %v16935_v40  ;;  %v16960_v40 = vld [vmem:[#allocation10 + $0x160] sm:$0xff]  }
0x2740   : > { %15809 = vmatprep.subr.bf16.mxu1 %v17329_v0 }
0x2743   : > { %15810 = vmatpush3.bf16.msra.mxu1 %v16936_v41  ;;  %v16961_v41 = vld [vmem:[#allocation10 + $0x118] sm:$0xff]  }
0x2744   : > { %15835 = vmatprep.subr.bf16.mxu1 %v17329_v0 }
0x27f1   : > { %v10264_v42 = vpop.f32.mrb[8].mxu1 }
0x27f2   : > { %v10270_v43 = vpack.c.bf16 %v10264_v42, %v10264_v42  ;;  %v15787_v44 = vpop.f32.mrb[9].mxu1  ;;  %v16962_v42 = vld [vmem:[#allocation10 + $0x168] sm:$0xff]  }
0x27f3   : > { %v10267_v45 = vpop.f32.mrb[10].mxu1  ;;  %v16964_v44 = vld [vmem:[#allocation10 + $0x170] sm:$0xff]  }
0x27f4   : > { %v15788_v46 = vpop.f32.mrb[11].mxu1  ;;  %15832 = vmatmul.mubr.bf16.vlgmr.msra.gmra.mrb[32].mxu0 %v10270_v43  ;;  %v16963_v43 = vld [vmem:[#allocation10 + $0x120] sm:$0xff]   ;;  %v16965_v45 = vld [vmem:[#allocation10 + $0x128] sm:$0xff]  }
0x27f5   : > { %15862 = vmatpush3.bf16.msra.mxu0 %v18866_v31  ;;  %15863 = vmatprep.mubr.msk.bf16.mxu0 %vm17330_vm0, %v17329_v0  ;;  %v16966_v46 = vld [vmem:[#allocation10 + $0x178] sm:$0xff]  }
0x27f6   : > { %15867 = vmatprep.subr.bf16.mxu0 %v17329_v0 }
0x27f9   : > { %v10326_v48 = vpop.f32.mrb[12].mxu1 }
0x27fa   : > { %v10332_v50 = vpack.c.bf16 %v10326_v48, %v10326_v48  ;;  %v15793_v51 = vpop.f32.mrb[13].mxu1  ;;  %v16967_v48 = vld [vmem:[#allocation10 + $0x130] sm:$0xff]  }
0x27fb   : > { %v10329_v53 = vpop.f32.mrb[14].mxu1 }
0x27fc   : > { %v15794_v54 = vpop.f32.mrb[15].mxu1  ;;  %15812 = vmatmul.mubr.bf16.vlgmr.msra.gmra.mrb[16].mxu1 %v10332_v50  ;;  %15864 = vmatmul.mubr.msk.bf16.vlgmr.msra.gmra.mrb[36].mxu0 %vm10222_vm10, %v18896_v49  ;;  %v16968_v50 = vld [vmem:[#allocation10 + $0x138] sm:$0xff]  }
0x27fd   : > { %15836 = vmatpush3.bf16.msra.mxu1 %v18866_v31  ;;  %15837 = vmatprep.mubr.msk.bf16.mxu1 %vm17330_vm0, %v17329_v0 }
0x27fe   : > { %15868 = vmatpush3.bf16.msra.mxu0 %v16937_v52  ;;  %15841 = vmatprep.subr.bf16.mxu1 %v17329_v0 }
0x27ff   : > { %15869 = vmatprep.subr.bf16.mxu0 %v17329_v0  ;;  %15883 = vmatprep.mubr.msk.bf16.mxu0 %vm17330_vm0, %v17329_v0 }
0x2802   : > { %15870 = vmatpush3.bf16.msra.mxu0 %v16938_v55 }
0x2803   : > { %15871 = vmatprep.subr.bf16.mxu0 %v17329_v0 }
0x2804   : > { %15838 = vmatmul.mubr.msk.bf16.vlgmr.msra.gmra.mrb[20].mxu1 %vm10222_vm10, %v18907_v56 }
0x2805   : > { %15842 = vmatpush3.bf16.msra.mxu1 %v16939_v57  ;;  %15857 = vmatprep.mubr.msk.bf16.mxu1 %vm17330_vm0, %v17329_v0 }
0x2806   : > { %15872 = vmatpush3.bf16.msra.mxu0 %v16940_v58  ;;  %15843 = vmatprep.subr.bf16.mxu1 %v17329_v0 }
0x2807   : > { %15873 = vmatprep.subr.bf16.mxu0 %v17329_v0 }
0x2809   : > { %15844 = vmatpush3.bf16.msra.mxu1 %v16941_v59 }
0x280a   : > { %15874 = vmatpush3.bf16.msra.mxu0 %v16942_v60  ;;  %15845 = vmatprep.subr.bf16.mxu1 %v17329_v0 }
0x280b   : > { %15875 = vmatprep.subr.bf16.mxu0 %v17329_v0 }
0x280d   : > { %15846 = vmatpush3.bf16.msra.mxu1 %v16943_v61 }
0x280e   : > { %15876 = vmatpush3.bf16.msra.mxu0 %v16944_v62  ;;  %15847 = vmatprep.subr.bf16.mxu1 %v17329_v0 }
0x280f   : > { %15877 = vmatprep.subr.bf16.mxu0 %v17329_v0 }
0x2811   : > { %15848 = vmatpush3.bf16.msra.mxu1 %v16945_v1 }
0x2812   : > { %15878 = vmatpush3.bf16.msra.mxu0 %v16946_v47  ;;  %15849 = vmatprep.subr.bf16.mxu1 %v17329_v0 }
0x2813   : > { %15879 = vmatprep.subr.bf16.mxu0 %v17329_v0 }
0x2815   : > { %15850 = vmatpush3.bf16.msra.mxu1 %v16947_v2 }
0x2816   : > { %15880 = vmatpush3.bf16.msra.mxu0 %v16948_v4  ;;  %15851 = vmatprep.subr.bf16.mxu1 %v17329_v0 }
0x2817   : > { %15881 = vmatprep.subr.bf16.mxu0 %v17329_v0 }
0x2819   : > { %15852 = vmatpush3.bf16.msra.mxu1 %v16949_v5 }
0x281a   : > { %15882 = vmatpush3.bf16.msra.mxu0 %v16950_v6  ;;  %15853 = vmatprep.subr.bf16.mxu1 %v17329_v0  ;;  %v18973_v6 = vld [vmem:[#allocation9 + $0xe] sm:$0x3] }
0x281b   : > { %15913 = vmatprep.subr.bf16.mxu0 %v17329_v0 }
0x281d   : > { %15854 = vmatpush3.bf16.msra.mxu1 %v16951_v7 }
0x281e   : > { %15855 = vmatprep.subr.bf16.mxu1 %v17329_v0 }
0x2821   : > { %15856 = vmatpush3.bf16.msra.mxu1 %v16952_v8 }
0x2822   : > { %15887 = vmatprep.subr.bf16.mxu1 %v17329_v0 }
0x28c7   : > { %v10520_v9 = vpop.f32.mrb[32].mxu0 }
0x28c8   : > { %v15833_v10 = vpop.f32.mrb[33].mxu0 }
0x28c9   : > { %v10523_v11 = vpop.f32.mrb[34].mxu0 }
0x28ca   : > { %v15834_v12 = vpop.f32.mrb[35].mxu0 }
0x28cb   : > { %v16972_v12 = vld [vmem:[#allocation10 + $0x1c8] sm:$0xff]  }
0x28cf   : > { %v10432_v13 = vpop.f32.mrb[16].mxu1  ;;  %v10717_v14 = vpop.f32.mrb[36].mxu0 }
0x28d0   : > { %v18928_v15 = vadd.f32 %v10520_v9, %v10432_v13  ;;  %v10723_v16 = vpack.c.bf16 %v10717_v14, %v10717_v14  ;;  %v15813_v3 = vpop.f32.mrb[17].mxu1  ;;  %v15865_v17 = vpop.f32.mrb[37].mxu0  ;;  %v16970_v9 = vld [vmem:[#allocation10 + $0x1c0] sm:$0xff]   ;;  %v18984_v13 = vld [vmem:[#allocation9 + $0xc] sm:$0x3] }
0x28d1   : > { %v10435_v63 = vpop.f32.mrb[18].mxu1  ;;  %v10720_v18 = vpop.f32.mrb[38].mxu0  ;;  %v16969_v14 = vld [vmem:[#allocation10 + $0x180] sm:$0xff]   ;;  %v16976_v3 = vld [vmem:[#allocation10 + $0x1d8] sm:$0xff]   ;;  %v16973_v17 = vld [vmem:[#allocation10 + $0x190] sm:$0xff]  }
0x28d2   : > { %v15814_v19 = vpop.f32.mrb[19].mxu1  ;;  %15884 = vmatmul.mubr.bf16.vlgmr.msra.gmra.mrb[40].mxu0 %v10723_v16  ;;  %v15866_v21 = vpop.f32.mrb[39].mxu0  ;;  %v16971_v16 = vld [vmem:[#allocation10 + $0x188] sm:$0xff]   ;;  %v16978_v63 = vld [vmem:[#allocation10 + $0x1e0] sm:$0xff]   ;;  %v16975_v18 = vld [vmem:[#allocation10 + $0x198] sm:$0xff]  }
0x28d3   : > { %15914 = vmatpush3.bf16.msra.mxu0 %v18866_v31  ;;  %15915 = vmatprep.mubr.msk.bf16.mxu0 %vm17330_vm0, %v17329_v0  ;;  %v16977_v19 = vld [vmem:[#allocation10 + $0x1a0] sm:$0xff]   ;;  %v16979_v21 = vld [vmem:[#allocation10 + $0x1a8] sm:$0xff]  }
0x28d4   : > { %15919 = vmatprep.subr.bf16.mxu0 %v17329_v0 }
0x28d7   : > { %v10565_v22 = vpop.f32.mrb[20].mxu1 }
0x28d8   : > { %v10571_v24 = vpack.c.bf16 %v10565_v22, %v10565_v22  ;;  %v15839_v25 = vpop.f32.mrb[21].mxu1  ;;  %v16980_v22 = vld [vmem:[#allocation10 + $0x1e8] sm:$0xff]  }
0x28d9   : > { %v10568_v27 = vpop.f32.mrb[22].mxu1  ;;  %v16982_v25 = vld [vmem:[#allocation10 + $0x1f0] sm:$0xff]  }
0x28da   : > { %v15840_v28 = vpop.f32.mrb[23].mxu1  ;;  %15858 = vmatmul.mubr.bf16.vlgmr.msra.gmra.mrb[24].mxu1 %v10571_v24  ;;  %15916 = vmatmul.mubr.msk.bf16.vlgmr.msra.gmra.mrb[44].mxu0 %vm10222_vm10, %v18934_v23  ;;  %v16981_v24 = vld [vmem:[#allocation10 + $0x1b0] sm:$0xff]   ;;  %v16984_v27 = vld [vmem:[#allocation10 + $0x1f8] sm:$0xff]  }
0x28db   : > { %15888 = vmatpush3.bf16.msra.mxu1 %v18866_v31  ;;  %15889 = vmatprep.mubr.msk.bf16.mxu1 %vm17330_vm0, %v17329_v0 }
0x28dc   : > { %15920 = vmatpush3.bf16.msra.mxu0 %v16953_v26  ;;  %15893 = vmatprep.subr.bf16.mxu1 %v17329_v0  ;;  %v16983_v26 = vld [vmem:[#allocation10 + $0x1b8] sm:$0xff]  }
0x28dd   : > { %15921 = vmatprep.subr.bf16.mxu0 %v17329_v0  ;;  %15935 = vmatprep.mubr.msk.bf16.mxu0 %vm17330_vm0, %v17329_v0 }
0x28e0   : > { %15922 = vmatpush3.bf16.msra.mxu0 %v16954_v29 }
0x28e1   : > { %15923 = vmatprep.subr.bf16.mxu0 %v17329_v0 }
0x28e2   : > { %15890 = vmatmul.mubr.msk.bf16.vlgmr.msra.gmra.mrb[28].mxu1 %vm10222_vm10, %v18945_v34 }
0x28e3   : > { %15894 = vmatpush3.bf16.msra.mxu1 %v16955_v35  ;;  %15909 = vmatprep.mubr.msk.bf16.mxu1 %vm17330_vm0, %v17329_v0 }
0x28e4   : > { %15924 = vmatpush3.bf16.msra.mxu0 %v16956_v36  ;;  %15895 = vmatprep.subr.bf16.mxu1 %v17329_v0  ;;  %v10219_v36 = vld [vmem:[%s810_s13] sm:$0xf] }
0x28e5   : > { %15925 = vmatprep.subr.bf16.mxu0 %v17329_v0 }
0x28e7   : > { %15896 = vmatpush3.bf16.msra.mxu1 %v16957_v37 }
0x28e8   : > { %15926 = vmatpush3.bf16.msra.mxu0 %v16958_v38  ;;  %15897 = vmatprep.subr.bf16.mxu1 %v17329_v0  ;;  %v10220_v38 = vpack.c.bf16 %v10219_v36, %v10219_v36 }
0x28e9   : > { %15927 = vmatprep.subr.bf16.mxu0 %v17329_v0 }
0x28eb   : > { %15898 = vmatpush3.bf16.msra.mxu1 %v16959_v39 }
0x28ec   : > { %15928 = vmatpush3.bf16.msra.mxu0 %v16960_v40  ;;  %15899 = vmatprep.subr.bf16.mxu1 %v17329_v0 }
0x28ed   : > { %15929 = vmatprep.subr.bf16.mxu0 %v17329_v0 }
0x28ef   : > { %15900 = vmatpush3.bf16.msra.mxu1 %v16961_v41 }
0x28f0   : > { %15930 = vmatpush3.bf16.msra.mxu0 %v16962_v42  ;;  %15901 = vmatprep.subr.bf16.mxu1 %v17329_v0 }
0x28f1   : > { %15931 = vmatprep.subr.bf16.mxu0 %v17329_v0 }
0x28f3   : > { %15902 = vmatpush3.bf16.msra.mxu1 %v16963_v43 }
0x28f4   : > { %15932 = vmatpush3.bf16.msra.mxu0 %v16964_v44  ;;  %15903 = vmatprep.subr.bf16.mxu1 %v17329_v0  ;;  %v19011_v44 = vsel %vm10226_vm9, %v10220_v38, 0 }
0x28f5   : > { %15933 = vmatprep.subr.bf16.mxu0 %v17329_v0 }
0x28f7   : > { %15904 = vmatpush3.bf16.msra.mxu1 %v16965_v45 }
0x28f8   : > { %15934 = vmatpush3.bf16.msra.mxu0 %v16966_v46  ;;  %15905 = vmatprep.subr.bf16.mxu1 %v17329_v0 }
0x28f9   : > { %15965 = vmatprep.subr.bf16.mxu0 %v17329_v0 }
0x28fb   : > { %15906 = vmatpush3.bf16.msra.mxu1 %v16967_v48 }
0x28fc   : > { %15907 = vmatprep.subr.bf16.mxu1 %v17329_v0 }
0x28ff   : > { %15908 = vmatpush3.bf16.msra.mxu1 %v16968_v50 }
0x2900   : > { %15939 = vmatprep.subr.bf16.mxu1 %v17329_v0 }
0x29a5   : > { %v10823_v51 = vpop.f32.mrb[40].mxu0 }
0x29a6   : > { %v15885_v52 = vpop.f32.mrb[41].mxu0 }
0x29a7   : > { %v10826_v53 = vpop.f32.mrb[42].mxu0 }
0x29a8   : > { %v15886_v54 = vpop.f32.mrb[43].mxu0 }
0x29ad   : > { %v10671_v55 = vpop.f32.mrb[24].mxu1  ;;  %v11021_v57 = vpop.f32.mrb[44].mxu0 }
0x29ae   : > { %v10677_v58 = vadd.f32 %v10671_v55, %v18928_v15  ;;  %v11027_v59 = vpack.c.bf16 %v11021_v57, %v11021_v57  ;;  %v15859_v60 = vpop.f32.mrb[25].mxu1  ;;  %v15917_v61 = vpop.f32.mrb[45].mxu0  ;;  %v16974_v15 = vld [vmem:[#allocation10 + $0x1d0] sm:$0xff]  }
0x29af   : > { %v10674_v62 = vpop.f32.mrb[26].mxu1  ;;  %v11024_v1 = vpop.f32.mrb[46].mxu0  ;;  %v16985_v60 = vld [vmem:[#allocation10 + $0x200] sm:$0xff]   ;;  %v16988_v61 = vld [vmem:[#allocation10 + $0x218] sm:$0xff]  }
0x29b0   : > { %v15860_v47 = vpop.f32.mrb[27].mxu1  ;;  %15936 = vmatmul.mubr.bf16.vlgmr.msra.gmra.mrb[48].mxu0 %v11027_v59  ;;  %v15918_v2 = vpop.f32.mrb[47].mxu0  ;;  %v18967_v4 = vadd.f32 %v10823_v51, %v10677_v58  ;;  %v19027_v59 = vld [vmem:[#allocation9 + $0x10] sm:$0x3]  ;;  %v16990_v62 = vld [vmem:[#allocation10 + $0x228] sm:$0xff]   ;;  %v16991_v1 = vld [vmem:[#allocation10 + $0x230] sm:$0xff]  }
0x29b1   : > { %15966 = vmatpush3.bf16.msra.mxu0 %v18866_v31  ;;  %15967 = vmatprep.mubr.msk.bf16.mxu0 %vm17330_vm0, %v17329_v0  ;;  %v16992_v47 = vld [vmem:[#allocation10 + $0x238] sm:$0xff]   ;;  %v11677_v2 = vld [vmem:[#allocation12 + $0x4] sm:$0xf] }
0x29b2   : > { %15971 = vmatprep.subr.bf16.mxu0 %v17329_v0 }
0x29b5   : > { %v10869_v5 = vpop.f32.mrb[28].mxu1 }
0x29b6   : > { %v10875_v7 = vpack.c.bf16 %v10869_v5, %v10869_v5  ;;  %v15891_v8 = vpop.f32.mrb[29].mxu1 }
0x29b7   : > { %v10872_v10 = vpop.f32.mrb[30].mxu1 }
0x29b8   : > { %v15892_v11 = vpop.f32.mrb[31].mxu1  ;;  %15910 = vmatmul.mubr.bf16.vlgmr.msra.gmra.mrb[32].mxu1 %v10875_v7  ;;  %15968 = vmatmul.mubr.msk.bf16.vlgmr.msra.gmra.mrb[52].mxu0 %vm10222_vm10, %v18973_v6 }
0x29b9   : > { %15940 = vmatpush3.bf16.msra.mxu1 %v18866_v31  ;;  %15941 = vmatprep.mubr.msk.bf16.mxu1 %vm17330_vm0, %v17329_v0 }
0x29ba   : > { %15945 = vmatprep.subr.bf16.mxu1 %v17329_v0  ;;  %15972 = vmatpush3.bf16.msra.mxu0 %v16970_v9 }
0x29bb   : > { %15973 = vmatprep.subr.bf16.mxu0 %v17329_v0  ;;  %15987 = vmatprep.mubr.msk.bf16.mxu0 %vm17330_vm0, %v17329_v0 }
0x29be   : > { %15974 = vmatpush3.bf16.msra.mxu0 %v16972_v12 }
0x29bf   : > { %15975 = vmatprep.subr.bf16.mxu0 %v17329_v0 }
0x29c0   : > { %15942 = vmatmul.mubr.msk.bf16.vlgmr.msra.gmra.mrb[36].mxu1 %vm10222_vm10, %v18984_v13 }
0x29c1   : > { %15946 = vmatpush3.bf16.msra.mxu1 %v16969_v14  ;;  %15961 = vmatprep.mubr.msk.bf16.mxu1 %vm17330_vm0, %v17329_v0 }
0x29c2   : > { %15947 = vmatprep.subr.bf16.mxu1 %v17329_v0  ;;  %15976 = vmatpush3.bf16.msra.mxu0 %v16974_v15 }
0x29c3   : > { %15977 = vmatprep.subr.bf16.mxu0 %v17329_v0 }
0x29c5   : > { %15948 = vmatpush3.bf16.msra.mxu1 %v16971_v16 }
0x29c6   : > { %15949 = vmatprep.subr.bf16.mxu1 %v17329_v0  ;;  %15978 = vmatpush3.bf16.msra.mxu0 %v16976_v3 }
0x29c7   : > { %15979 = vmatprep.subr.bf16.mxu0 %v17329_v0 }
0x29c9   : > { %15950 = vmatpush3.bf16.msra.mxu1 %v16973_v17 }
0x29ca   : > { %15951 = vmatprep.subr.bf16.mxu1 %v17329_v0  ;;  %15980 = vmatpush3.bf16.msra.mxu0 %v16978_v63 }
0x29cb   : > { %15981 = vmatprep.subr.bf16.mxu0 %v17329_v0 }
0x29cd   : > { %15952 = vmatpush3.bf16.msra.mxu1 %v16975_v18 }
0x29ce   : > { %15953 = vmatprep.subr.bf16.mxu1 %v17329_v0  ;;  %15982 = vmatpush3.bf16.msra.mxu0 %v16980_v22 }
0x29cf   : > { %15983 = vmatprep.subr.bf16.mxu0 %v17329_v0 }
0x29d1   : > { %15954 = vmatpush3.bf16.msra.mxu1 %v16977_v19  ;;  %v11634_v19 = vld [vmem:[#allocation12] sm:$0xf] }
0x29d2   : > { %15955 = vmatprep.subr.bf16.mxu1 %v17329_v0  ;;  %15984 = vmatpush3.bf16.msra.mxu0 %v16982_v25 }
0x29d3   : > { %15985 = vmatprep.subr.bf16.mxu0 %v17329_v0 }
0x29d5   : > { %15956 = vmatpush3.bf16.msra.mxu1 %v16979_v21 }
0x29d6   : > { %15957 = vmatprep.subr.bf16.mxu1 %v17329_v0  ;;  %15986 = vmatpush3.bf16.msra.mxu0 %v16984_v27 }
0x29d7   : > { %16017 = vmatprep.subr.bf16.mxu0 %v17329_v0 }
0x29d9   : > { %15958 = vmatpush3.bf16.msra.mxu1 %v16981_v24 }
0x29da   : > { %15959 = vmatprep.subr.bf16.mxu1 %v17329_v0 }
0x29dd   : > { %15960 = vmatpush3.bf16.msra.mxu1 %v16983_v26 }
0x29de   : > { %15991 = vmatprep.subr.bf16.mxu1 %v17329_v0 }
0x2a83   : > { %v11127_v28 = vpop.f32.mrb[48].mxu0 }
0x2a84   : > { %v15937_v29 = vpop.f32.mrb[49].mxu0 }
0x2a85   : > { %v11130_v35 = vpop.f32.mrb[50].mxu0  ;;  %v11728_v29 = vsel %vm8658_vm6, %v11634_v19, 0 }
0x2a86   : > { %v15938_v37 = vpop.f32.mrb[51].mxu0 }
0x2a8b   : > { %v10975_v39 = vpop.f32.mrb[32].mxu1  ;;  %v11325_v40 = vpop.f32.mrb[52].mxu0 }
0x2a8c   : > { %v10981_v41 = vadd.f32 %v10975_v39, %v18967_v4  ;;  %v15911_v42 = vpop.f32.mrb[33].mxu1  ;;  %v11331_v43 = vpack.c.bf16 %v11325_v40, %v11325_v40  ;;  %v15969_v45 = vpop.f32.mrb[53].mxu0  ;;  %v11682_v4 = vsel %vm8658_vm6, %v11677_v2, 0 }
0x2a8d   : > { %v10978_v46 = vpop.f32.mrb[34].mxu1  ;;  %v11328_v48 = vpop.f32.mrb[54].mxu0 }
0x2a8e   : > { %v11133_v50 = vadd.f32 %v11127_v28, %v10981_v41  ;;  %v15912_v51 = vpop.f32.mrb[35].mxu1  ;;  %15988 = vmatmul.mubr.bf16.vlgmr.msra.gmra.mrb[56].mxu0 %v11331_v43  ;;  %v15970_v52 = vpop.f32.mrb[55].mxu0 }
0x2a8f   : > { %16018 = vmatpush3.bf16.msra.mxu0 %v19011_v44  ;;  %16019 = vmatprep.mubr.msk.bf16.mxu0 %vm17330_vm0, %v17329_v0 }
0x2a90   : > { %16023 = vmatprep.subr.bf16.mxu0 %v17329_v0 }
0x2a93   : > { %v11173_v53 = vpop.f32.mrb[36].mxu1 }
0x2a94   : > { %v11179_v54 = vpack.c.bf16 %v11173_v53, %v11173_v53  ;;  %v15943_v55 = vpop.f32.mrb[37].mxu1 }
0x2a95   : > { %v11176_v57 = vpop.f32.mrb[38].mxu1 }
0x2a96   : > { %v15944_v58 = vpop.f32.mrb[39].mxu1  ;;  %15962 = vmatmul.mubr.bf16.vlgmr.msra.gmra.mrb[40].mxu1 %v11179_v54  ;;  %16020 = vmatmul.mubr.msk.bf16.vlgmr.msra.gmra.mrb[60].mxu0 %vm10222_vm10, %v18869_v32  ;;  %v16987_v32 = vld [vmem:[#allocation10 + $0x210] sm:$0xff]  }
0x2a97   : > { %15992 = vmatpush3.bf16.msra.mxu1 %v18866_v31  ;;  %15993 = vmatprep.mubr.msk.bf16.mxu1 %vm17330_vm0, %v17329_v0  ;;  %v16986_v31 = vld [vmem:[#allocation10 + $0x208] sm:$0xff]  }
0x2a98   : > { %15997 = vmatprep.subr.bf16.mxu1 %v17329_v0  ;;  %16024 = vmatpush3.bf16.msra.mxu0 %v19011_v44 }
0x2a99   : > { %16025 = vmatprep.mubr.msk.bf16.mxu0 %vm17330_vm0, %v17329_v0  ;;  %16029 = vmatprep.subr.bf16.mxu0 %v17329_v0 }
0x2a9e   : > { %15994 = vmatmul.mubr.msk.bf16.vlgmr.msra.gmra.mrb[44].mxu1 %vm10222_vm10, %v19027_v59  ;;  %16026 = vmatmul.mubr.msk.bf16.vlgmr.msra.gmra.mrb[64].mxu0 %vm10222_vm10, %v18878_v33  ;;  %v16989_v33 = vld [vmem:[#allocation10 + $0x220] sm:$0xff]  }
0x2a9f   : > { %15998 = vmatpush3.bf16.msra.mxu1 %v16985_v60  ;;  %16013 = vmatprep.mubr.msk.bf16.mxu1 %vm17330_vm0, %v17329_v0 }
0x2aa0   : > { %15999 = vmatprep.subr.bf16.mxu1 %v17329_v0  ;;  %16031 = vmatprep.mubr.msk.bf16.mxu0 %vm17330_vm0, %v17329_v0 }
0x2aa1   : > { %16030 = vmatpush3.bf16.msra.mxu0 %v11682_v4 }
0x2aa2   : > { %16035 = vmatprep.subr.bf16.mxu0 %v17329_v0 }
0x2aa3   : > { %16000 = vmatpush3.bf16.msra.mxu1 %v16986_v31 }
0x2aa4   : > { %16001 = vmatprep.subr.bf16.mxu1 %v17329_v0 }
0x2aa7   : > { %16002 = vmatpush3.bf16.msra.mxu1 %v16987_v32 }
0x2aa8   : > { %16003 = vmatprep.subr.bf16.mxu1 %v17329_v0 }
0x2aab   : > { %16004 = vmatpush3.bf16.msra.mxu1 %v16988_v61 }
0x2aac   : > { %16005 = vmatprep.subr.bf16.mxu1 %v17329_v0 }
0x2aaf   : > { %16006 = vmatpush3.bf16.msra.mxu1 %v16989_v33 }
0x2ab0   : > { %16007 = vmatprep.subr.bf16.mxu1 %v17329_v0 }
0x2ab3   : > { %16008 = vmatpush3.bf16.msra.mxu1 %v16990_v62 }
0x2ab4   : > { %16009 = vmatprep.subr.bf16.mxu1 %v17329_v0 }
0x2ab7   : > { %16010 = vmatpush3.bf16.msra.mxu1 %v16991_v1  ;;  %v12082_v1 = vld [vmem:[#allocation12 + $0x14] sm:$0xf] }
0x2ab8   : > { %16011 = vmatprep.subr.bf16.mxu1 %v17329_v0 }
0x2abb   : > { %16012 = vmatpush3.bf16.msra.mxu1 %v16992_v47 }
0x2abc   : > { %16041 = vmatprep.subr.bf16.mxu1 %v17329_v0 }
0x2b61   : > { %v11431_v5 = vpop.f32.mrb[56].mxu0 }
0x2b62   : > { %v15989_v7 = vpop.f32.mrb[57].mxu0 }
0x2b63   : > { %v11434_v8 = vpop.f32.mrb[58].mxu0 }
0x2b64   : > { %v15990_v9 = vpop.f32.mrb[59].mxu0 }
0x2b65   : > { %v12172_v9 = vld [vmem:[#allocation12 + $0x18] sm:$0xf] }
0x2b69   : > { %v11279_v10 = vpop.f32.mrb[40].mxu1  ;;  %v11627_v11 = vpop.f32.mrb[60].mxu0 }
0x2b6a   : > { %v11285_v12 = vadd.f32 %v11279_v10, %v11133_v50  ;;  %v15963_v14 = vpop.f32.mrb[41].mxu1  ;;  %v16021_v15 = vpop.f32.mrb[61].mxu0  ;;  %v11633_v38 = vpack.c.bf16 %v11627_v11, %v11627_v11 }
0x2b6b   : > { %v11282_v16 = vpop.f32.mrb[42].mxu1  ;;  %v11630_v3 = vpop.f32.mrb[62].mxu0  ;;  %v12177_v14 = vsel %vm8658_vm6, %v12172_v9, 0 }
0x2b6c   : > { %v11437_v17 = vadd.f32 %v11431_v5, %v11285_v12  ;;  %v15964_v63 = vpop.f32.mrb[43].mxu1  ;;  %v16022_v18 = vpop.f32.mrb[63].mxu0  ;;  %v12087_v5 = vsel %vm8658_vm6, %v12082_v1, 0  ;;  %v12262_v3 = vld [vmem:[#allocation12 + $0x1c] sm:$0xf] }
0x2b6d   : > { %v12267_v19 = vsel %vm8658_vm6, %v12262_v3, 0 }
0x2b71   : > { %v11477_v21 = vpop.f32.mrb[44].mxu1  ;;  %v11669_v22 = vpop.f32.mrb[64].mxu0 }
0x2b72   : > { %v11483_v24 = vpack.c.bf16 %v11477_v21, %v11477_v21  ;;  %v15995_v25 = vpop.f32.mrb[45].mxu1  ;;  %v11675_v26 = vpack.c.bf16 %v11669_v22, %v11669_v22  ;;  %v16027_v27 = vpop.f32.mrb[65].mxu0 }
0x2b73   : > { %v11480_v28 = vpop.f32.mrb[46].mxu1  ;;  %v11672_v35 = vpop.f32.mrb[66].mxu0 }
0x2b74   : > { %v15996_v36 = vpop.f32.mrb[47].mxu1  ;;  %16014 = vmatmul.mubr.bf16.vlgmr.msra.gmra.mrb[48].mxu1 %v11483_v24  ;;  %16032 = vmatmul.mubr.msk.bf16.vlgmr.msra.gmra.mrb[68].mxu0 %vm8654_vm7, %v11675_v26  ;;  %v16028_v37 = vpop.f32.mrb[67].mxu0  ;;  %v12352_v24 = vld [vmem:[#allocation12 + $0x20] sm:$0xf] }
0x2b75   : > { %16042 = vmatpush3.bf16.msra.mxu1 %v19011_v44  ;;  %16043 = vmatprep.mubr.msk.bf16.mxu1 %vm17330_vm0, %v17329_v0  ;;  %v12357_v28 = vsel %vm8658_vm6, %v12352_v24, 0 }
0x2b76   : > { %16053 = vmatprep.subr.bf16.mxu1 %v17329_v0  ;;  %16036 = vmatpush3.bf16.msra.mxu0 %v11728_v29 }
0x2b77   : > { %16037 = vmatprep.mubr.msk.bf16.mxu0 %vm17330_vm0, %v17329_v0  ;;  %16047 = vmatprep.subr.bf16.mxu0 %v17329_v0 }
0x2b7c   : > { %16044 = vmatmul.mubr.msk.bf16.vlgmr.msra.gmra.mrb[52].mxu1 %vm10222_vm10, %v18907_v56  ;;  %16038 = vmatmul.mubr.msk.bf16.vlgmr.msra.gmra.mrb[72].mxu0 %vm8654_vm7, %v11633_v38 }
0x2b7d   : > { %16054 = vmatpush3.bf16.msra.mxu1 %v19011_v44  ;;  %16055 = vmatprep.mubr.msk.bf16.mxu1 %vm17330_vm0, %v17329_v0 }
0x2b7e   : > { %16065 = vmatprep.subr.bf16.mxu1 %v17329_v0  ;;  %16049 = vmatprep.mubr.msk.bf16.mxu0 %vm17330_vm0, %v17329_v0 }
0x2b84   : > { %16056 = vmatmul.mubr.msk.bf16.vlgmr.msra.gmra.mrb[56].mxu1 %vm10222_vm10, %v18896_v49  ;;  %v11812_v49 = vld [vmem:[#allocation12 + $0x8] sm:$0xf] }
0x2b85   : > { %16066 = vmatpush3.bf16.msra.mxu1 %v19011_v44  ;;  %16067 = vmatprep.mubr.msk.bf16.mxu1 %vm17330_vm0, %v17329_v0  ;;  %v11817_v56 = vsel %vm8658_vm6, %v11812_v49, 0 }
0x2b86   : > { %16077 = vmatprep.subr.bf16.mxu1 %v17329_v0  ;;  %16048 = vmatpush3.bf16.msra.mxu0 %v11817_v56 }
0x2b87   : > { %16059 = vmatprep.subr.bf16.mxu0 %v17329_v0 }
0x2b8c   : > { %16068 = vmatmul.mubr.msk.bf16.vlgmr.msra.gmra.mrb[60].mxu1 %vm10222_vm10, %v18945_v34 }
0x2b8d   : > { %16078 = vmatpush3.bf16.msra.mxu1 %v19011_v44  ;;  %16079 = vmatprep.mubr.msk.bf16.mxu1 %vm17330_vm0, %v17329_v0 }
0x2b8e   : > { %16089 = vmatprep.subr.bf16.mxu1 %v17329_v0 }
0x2b94   : > { %16080 = vmatmul.mubr.msk.bf16.vlgmr.msra.gmra.mrb[64].mxu1 %vm10222_vm10, %v18934_v23 }
0x2b95   : > { %16090 = vmatpush3.bf16.msra.mxu1 %v19011_v44  ;;  %16091 = vmatprep.mubr.msk.bf16.mxu1 %vm17330_vm0, %v17329_v0 }
0x2b96   : > { %16101 = vmatprep.subr.bf16.mxu1 %v17329_v0 }
0x2b9c   : > { %16092 = vmatmul.mubr.msk.bf16.vlgmr.msra.gmra.mrb[68].mxu1 %vm10222_vm10, %v18984_v13 }
0x2b9d   : > { %16102 = vmatpush3.bf16.msra.mxu1 %v19011_v44  ;;  %16103 = vmatprep.mubr.msk.bf16.mxu1 %vm17330_vm0, %v17329_v0 }
0x2b9e   : > { %16113 = vmatprep.subr.bf16.mxu1 %v17329_v0 }
0x2ba4   : > { %16104 = vmatmul.mubr.msk.bf16.vlgmr.msra.gmra.mrb[72].mxu1 %vm10222_vm10, %v18973_v6 }
0x2ba5   : > { %16114 = vmatpush3.bf16.msra.mxu1 %v19011_v44  ;;  %16115 = vmatprep.mubr.msk.bf16.mxu1 %vm17330_vm0, %v17329_v0  ;;  %v11902_v44 = vld [vmem:[#allocation12 + $0xc] sm:$0xf] }
0x2ba6   : > { %16385 = vmatprep.subr.bf16.mxu1 %v17331_v20  ;;  %v11907_v51 = vsel %vm8658_vm6, %v11902_v44, 0 }
0x2bac   : > { %16116 = vmatmul.mubr.msk.bf16.vlgmr.msra.gmra.mrb[76].mxu1 %vm10222_vm10, %v19027_v59  ;;  %v11992_v59 = vld [vmem:[#allocation12 + $0x10] sm:$0xf] }
0x2bad   : > { %16157 = vmatprep.mubr.msk.f32.mxu1 %vm17330_vm0, %v17329_v0  ;;  %v11997_v61 = vsel %vm8658_vm6, %v11992_v59, 0  ;;  %v12422_v59 = vld [vmem:[%s19308_s27 + $0x68] sm:$0xff] }
0x2c47   : > { %v11583_v23 = vpop.f32.mrb[48].mxu1  ;;  %v11718_v34 = vpop.f32.mrb[68].mxu0 }
0x2c48   : > { %v19101_v6 = vadd.f32 %v11583_v23, %v11437_v17  ;;  %v16015_v13 = vpop.f32.mrb[49].mxu1  ;;  %v16033_v39 = vpop.f32.mrb[69].mxu0  ;;  %v12409_v23 = vld [vmem:[%s19308_s27] sm:$0xff] }
0x2c49   : > { %v11586_v40 = vpop.f32.mrb[50].mxu1  ;;  %v11721_v41 = vpop.f32.mrb[70].mxu0  ;;  %v12411_v39 = vld [vmem:[%s19308_s27 + $0x10] sm:$0xff] }
0x2c4a   : > { %v16016_v42 = vpop.f32.mrb[51].mxu1  ;;  %v16034_v43 = vpop.f32.mrb[71].mxu0  ;;  %v12412_v40 = vld [vmem:[%s19308_s27 + $0x18] sm:$0xff] }
0x2c4b   : > { %v16389_v41 = vpack.c.bf16 %v12412_v40, %v12411_v39  ;;  %v12413_v42 = vld [vmem:[%s19308_s27 + $0x20] sm:$0xff]  ;;  %v12414_v43 = vld [vmem:[%s19308_s27 + $0x28] sm:$0xff] }
0x2c4c   : > { %v16392_v44 = vpack.c.bf16 %v12414_v43, %v12413_v42 }
0x2c4f   : > { %v11804_v45 = vpop.f32.mrb[52].mxu1  ;;  %v11764_v46 = vpop.f32.mrb[72].mxu0 }
0x2c50   : > { %v11810_v48 = vpack.c.bf16 %v11804_v45, %v11804_v45  ;;  %v16045_v50 = vpop.f32.mrb[53].mxu1  ;;  %v19104_v52 = vadd.f32 %v11764_v46, %v11718_v34  ;;  %v16039_v53 = vpop.f32.mrb[73].mxu0  ;;  %v12410_v34 = vld [vmem:[%s19308_s27 + $0x8] sm:$0xff]  ;;  %v12415_v45 = vld [vmem:[%s19308_s27 + $0x30] sm:$0xff]  ;;  %v12416_v46 = vld [vmem:[%s19308_s27 + $0x38] sm:$0xff] }
0x2c51   : > { %v11807_v54 = vpop.f32.mrb[54].mxu1  ;;  %v11767_v55 = vpop.f32.mrb[74].mxu0  ;;  %v16386_v13 = vpack.c.bf16 %v12410_v34, %v12409_v23  ;;  %v12417_v50 = vld [vmem:[%s19308_s27 + $0x40] sm:$0xff] }
0x2c52   : > { %v16046_v57 = vpop.f32.mrb[55].mxu1  ;;  %16050 = vmatmul.mubr.msk.bf16.vlgmr.msra.gmra.mrb[76].mxu0 %vm8654_vm7, %v11810_v48  ;;  %v16040_v58 = vpop.f32.mrb[75].mxu0  ;;  %v16395_v48 = vpack.c.bf16 %v12416_v46, %v12415_v45  ;;  %v12419_v54 = vld [vmem:[%s19308_s27 + $0x50] sm:$0xff]  ;;  %v12420_v55 = vld [vmem:[%s19308_s27 + $0x58] sm:$0xff] }
0x2c53   : > { %16060 = vmatpush3.bf16.msra.mxu0 %v11907_v51  ;;  %16061 = vmatprep.mubr.msk.bf16.mxu0 %vm17330_vm0, %v17329_v0  ;;  %v12418_v51 = vld [vmem:[%s19308_s27 + $0x48] sm:$0xff]  ;;  %v16401_v57 = vpack.c.bf16 %v12420_v55, %v12419_v54  ;;  %v12421_v58 = vld [vmem:[%s19308_s27 + $0x60] sm:$0xff] }
0x2c54   : > { %16071 = vmatprep.subr.bf16.mxu0 %v17329_v0  ;;  %16387 = vmatpush3.bf16.msra.mxu1 %v16386_v13  ;;  %v16398_v53 = vpack.c.bf16 %v12418_v51, %v12417_v50 }
0x2c55   : > { %16388 = vmatprep.subr.bf16.mxu1 %v17331_v20 }
0x2c57   : > { %v11894_v60 = vpop.f32.mrb[56].mxu1 }
0x2c58   : > { %v11900_v31 = vpack.c.bf16 %v11894_v60, %v11894_v60  ;;  %v16057_v32 = vpop.f32.mrb[57].mxu1  ;;  %16390 = vmatpush3.bf16.msra.mxu1 %v16389_v41  ;;  %v16404_v60 = vpack.c.bf16 %v12422_v59, %v12421_v58 }
0x2c59   : > { %v11897_v33 = vpop.f32.mrb[58].mxu1  ;;  %16391 = vmatprep.subr.bf16.mxu1 %v17331_v20  ;;  %v12424_v32 = vld [vmem:[%s19308_s27 + $0x78] sm:$0xff] }
0x2c5a   : > { %v16058_v62 = vpop.f32.mrb[59].mxu1  ;;  %16062 = vmatmul.mubr.msk.bf16.vlgmr.msra.gmra.mrb[80].mxu0 %vm8654_vm7, %v11900_v31  ;;  %v12423_v31 = vld [vmem:[%s19308_s27 + $0x70] sm:$0xff] }
0x2c5b   : > { %16072 = vmatpush3.bf16.msra.mxu0 %v11997_v61  ;;  %16073 = vmatprep.mubr.msk.bf16.mxu0 %vm17330_vm0, %v17329_v0  ;;  %v16407_v61 = vpack.c.bf16 %v12424_v32, %v12423_v31  ;;  %v12604_v32 = vld [vmem:[#allocation15] sm:$0xff] }
0x2c5c   : > { %16083 = vmatprep.subr.bf16.mxu0 %v17329_v0  ;;  %16393 = vmatpush3.bf16.msra.mxu1 %v16392_v44 }
0x2c5d   : > { %16394 = vmatprep.subr.bf16.mxu1 %v17331_v20 }
0x2c5f   : > { %v11984_v47 = vpop.f32.mrb[60].mxu1 }
0x2c60   : > { %v11990_v2 = vpack.c.bf16 %v11984_v47, %v11984_v47  ;;  %v16069_v4 = vpop.f32.mrb[61].mxu1  ;;  %16396 = vmatpush3.bf16.msra.mxu1 %v16395_v48 }
0x2c61   : > { %v11987_v7 = vpop.f32.mrb[62].mxu1  ;;  %16397 = vmatprep.subr.bf16.mxu1 %v17331_v20 }
0x2c62   : > { %v16070_v8 = vpop.f32.mrb[63].mxu1  ;;  %16074 = vmatmul.mubr.msk.bf16.vlgmr.msra.gmra.mrb[84].mxu0 %vm8654_vm7, %v11990_v2 }
0x2c63   : > { %16084 = vmatpush3.bf16.msra.mxu0 %v12087_v5  ;;  %16085 = vmatprep.mubr.msk.bf16.mxu0 %vm17330_vm0, %v17329_v0 }
0x2c64   : > { %16095 = vmatprep.subr.bf16.mxu0 %v17329_v0  ;;  %16399 = vmatpush3.bf16.msra.mxu1 %v16398_v53 }
0x2c65   : > { %16400 = vmatprep.subr.bf16.mxu1 %v17331_v20 }
0x2c67   : > { %v12074_v10 = vpop.f32.mrb[64].mxu1 }
0x2c68   : > { %v12080_v11 = vpack.c.bf16 %v12074_v10, %v12074_v10  ;;  %v16081_v12 = vpop.f32.mrb[65].mxu1  ;;  %16402 = vmatpush3.bf16.msra.mxu1 %v16401_v57 }
0x2c69   : > { %v12077_v15 = vpop.f32.mrb[66].mxu1  ;;  %16403 = vmatprep.subr.bf16.mxu1 %v17331_v20 }
0x2c6a   : > { %v16082_v16 = vpop.f32.mrb[67].mxu1  ;;  %16086 = vmatmul.mubr.msk.bf16.vlgmr.msra.gmra.mrb[88].mxu0 %vm8654_vm7, %v12080_v11 }
0x2c6b   : > { %16096 = vmatpush3.bf16.msra.mxu0 %v12177_v14  ;;  %16097 = vmatprep.mubr.msk.bf16.mxu0 %vm17330_vm0, %v17329_v0 }
0x2c6c   : > { %16107 = vmatprep.subr.bf16.mxu0 %v17329_v0  ;;  %16405 = vmatpush3.bf16.msra.mxu1 %v16404_v60 }
0x2c6d   : > { %16406 = vmatprep.subr.bf16.mxu1 %v17331_v20 }
0x2c6f   : > { %v12164_v17 = vpop.f32.mrb[68].mxu1 }
0x2c70   : > { %v12170_v63 = vpack.c.bf16 %v12164_v17, %v12164_v17  ;;  %v16093_v18 = vpop.f32.mrb[69].mxu1  ;;  %16408 = vmatpush3.bf16.msra.mxu1 %v16407_v61 }
0x2c71   : > { %v12167_v21 = vpop.f32.mrb[70].mxu1  ;;  %16433 = vmatprep.subr.bf16.mxu1 %v17331_v20 }
0x2c72   : > { %v16094_v22 = vpop.f32.mrb[71].mxu1  ;;  %16098 = vmatmul.mubr.msk.bf16.vlgmr.msra.gmra.mrb[92].mxu0 %vm8654_vm7, %v12170_v63 }
0x2c73   : > { %16108 = vmatpush3.bf16.msra.mxu0 %v12267_v19  ;;  %16109 = vmatprep.mubr.msk.bf16.mxu0 %vm17330_vm0, %v17329_v0 }
0x2c74   : > { %16119 = vmatprep.subr.bf16.mxu0 %v17329_v0 }
0x2c77   : > { %v12254_v25 = vpop.f32.mrb[72].mxu1 }
0x2c78   : > { %v12260_v26 = vpack.c.bf16 %v12254_v25, %v12254_v25  ;;  %v16105_v27 = vpop.f32.mrb[73].mxu1 }
0x2c79   : > { %v12257_v29 = vpop.f32.mrb[74].mxu1 }
0x2c7a   : > { %v16106_v35 = vpop.f32.mrb[75].mxu1  ;;  %16110 = vmatmul.mubr.msk.bf16.vlgmr.msra.gmra.mrb[96].mxu0 %vm8654_vm7, %v12260_v26 }
0x2c7b   : > { %16120 = vmatpush3.bf16.msra.mxu0 %v12357_v28  ;;  %16121 = vmatprep.mubr.msk.bf16.mxu0 %vm17330_vm0, %v17329_v0 }
0x2c7c   : > { %16409 = vmatprep.subr.bf16.mxu0 %v17331_v20 }
0x2c7f   : > { %v12344_v36 = vpop.f32.mrb[76].mxu1 }
0x2c80   : > { %v12350_v37 = vpack.c.bf16 %v12344_v36, %v12344_v36  ;;  %v16117_v38 = vpop.f32.mrb[77].mxu1 }
0x2c81   : > { %v12347_v49 = vpop.f32.mrb[78].mxu1  ;;  %v13531_v38 = vld [vmem:[#allocation13] ss:$0 sm:$0xff] }
0x2c82   : > { %v16118_v56 = vpop.f32.mrb[79].mxu1  ;;  %16122 = vmatmul.mubr.msk.bf16.vlgmr.msra.gmra.mrb[100].mxu0 %vm8654_vm7, %v12350_v37 }
0x2c83   : > { %16192 = vmatprep.mubr.msk.f32.mxu0 %vm17330_vm0, %v17329_v0  ;;  %16411 = vmatpush3.bf16.msra.mxu0 %v16386_v13 }
0x2c84   : > { %16412 = vmatprep.subr.bf16.mxu0 %v17331_v20 }
0x2c87   : > { %16414 = vmatpush3.bf16.msra.mxu0 %v16389_v41 }
0x2c88   : > { %16415 = vmatprep.subr.bf16.mxu0 %v17331_v20 }
0x2c8b   : > { %16417 = vmatpush3.bf16.msra.mxu0 %v16392_v44 }
0x2c8c   : > { %16418 = vmatprep.subr.bf16.mxu0 %v17331_v20 }
0x2c8f   : > { %16420 = vmatpush3.bf16.msra.mxu0 %v16395_v48 }
0x2c90   : > { %16421 = vmatprep.subr.bf16.mxu0 %v17331_v20 }
0x2c93   : > { %16423 = vmatpush3.bf16.msra.mxu0 %v16398_v53 }
0x2c94   : > { %16424 = vmatprep.subr.bf16.mxu0 %v17331_v20 }
0x2c97   : > { %16426 = vmatpush3.bf16.msra.mxu0 %v16401_v57 }
0x2c98   : > { %16427 = vmatprep.subr.bf16.mxu0 %v17331_v20 }
0x2c9b   : > { %16429 = vmatpush3.bf16.msra.mxu0 %v16404_v60 }
0x2c9c   : > { %16430 = vmatprep.subr.bf16.mxu0 %v17331_v20 }
0x2c9f   : > { %16432 = vmatpush3.bf16.msra.mxu0 %v16407_v61  ;;  %v12605_v61 = vld [vmem:[#allocation15 + $0x8] sm:$0xff] }
0x2ca0   : > { %16457 = vmatprep.subr.bf16.mxu0 %v17331_v20 }
0x2d25   : > { %v11853_v33 = vpop.f32.mrb[76].mxu0 }
0x2d26   : > { %v11859_v62 = vadd.f32 %v11853_v33, %v19104_v52  ;;  %v16051_v1 = vpop.f32.mrb[77].mxu0  ;;  %v16434_v33 = vpack.c.bf16 %v12605_v61, %v12604_v32 }
0x2d27   : > { %v11856_v47 = vpop.f32.mrb[78].mxu0  ;;  %v12607_v1 = vld [vmem:[#allocation15 + $0x18] sm:$0xff] }
0x2d28   : > { %v16052_v2 = vpop.f32.mrb[79].mxu0 }
0x2d29   : > { %v12608_v2 = vld [vmem:[#allocation15 + $0x20] sm:$0xff] }
0x2d2d   : > { %v11943_v4 = vpop.f32.mrb[80].mxu0 }
0x2d2e   : > { %v11949_v5 = vadd.f32 %v11943_v4, %v11859_v62  ;;  %v16063_v7 = vpop.f32.mrb[81].mxu0  ;;  %v12606_v62 = vld [vmem:[#allocation15 + $0x10] sm:$0xff]  ;;  %v12609_v4 = vld [vmem:[#allocation15 + $0x28] sm:$0xff] }
0x2d2f   : > { %v11946_v8 = vpop.f32.mrb[82].mxu0  ;;  %v16437_v47 = vpack.c.bf16 %v12607_v1, %v12606_v62  ;;  %v12610_v7 = vld [vmem:[#allocation15 + $0x30] sm:$0xff] }
0x2d30   : > { %v16064_v9 = vpop.f32.mrb[83].mxu0 }
0x2d31   : > { %v12612_v9 = vld [vmem:[#allocation15 + $0x40] sm:$0xff] }
0x2d35   : > { %v12033_v10 = vpop.f32.mrb[84].mxu0 }
0x2d36   : > { %v12039_v11 = vadd.f32 %v12033_v10, %v11949_v5  ;;  %v16075_v12 = vpop.f32.mrb[85].mxu0  ;;  %v16440_v5 = vpack.c.bf16 %v12609_v4, %v12608_v2  ;;  %v12613_v10 = vld [vmem:[#allocation15 + $0x48] sm:$0xff] }
0x2d37   : > { %v12036_v14 = vpop.f32.mrb[86].mxu0  ;;  %v12614_v12 = vld [vmem:[#allocation15 + $0x50] sm:$0xff] }
0x2d38   : > { %v16076_v15 = vpop.f32.mrb[87].mxu0  ;;  %v12615_v14 = vld [vmem:[#allocation15 + $0x58] sm:$0xff] }
0x2d39   : > { %v16449_v15 = vpack.c.bf16 %v12615_v14, %v12614_v12 }
0x2d3d   : > { %v12123_v16 = vpop.f32.mrb[88].mxu0 }
0x2d3e   : > { %v12129_v3 = vadd.f32 %v12123_v16, %v12039_v11  ;;  %v16087_v17 = vpop.f32.mrb[89].mxu0  ;;  %v16446_v11 = vpack.c.bf16 %v12613_v10, %v12612_v9  ;;  %v12616_v16 = vld [vmem:[#allocation15 + $0x60] sm:$0xff] }
0x2d3f   : > { %v12126_v63 = vpop.f32.mrb[90].mxu0 }
0x2d40   : > { %v16088_v18 = vpop.f32.mrb[91].mxu0  ;;  %v12618_v63 = vld [vmem:[#allocation15 + $0x70] sm:$0xff] }
0x2d41   : > { %v12619_v18 = vld [vmem:[#allocation15 + $0x78] sm:$0xff] }
0x2d45   : > { %v12213_v19 = vpop.f32.mrb[92].mxu0 }
0x2d46   : > { %v12219_v52 = vadd.f32 %v12213_v19, %v12129_v3  ;;  %v16099_v21 = vpop.f32.mrb[93].mxu0  ;;  %v12617_v3 = vld [vmem:[#allocation15 + $0x68] sm:$0xff]  ;;  %v16455_v19 = vpack.c.bf16 %v12619_v18, %v12618_v63 }
0x2d47   : > { %v12216_v22 = vpop.f32.mrb[94].mxu0  ;;  %v16452_v17 = vpack.c.bf16 %v12617_v3, %v12616_v16  ;;  %v12691_v21 = vld [vmem:[#allocation16 + $0x8] sm:$0xff] }
0x2d48   : > { %v16100_v24 = vpop.f32.mrb[95].mxu0  ;;  %v12692_v22 = vld [vmem:[#allocation16 + $0x10] sm:$0xff] }
0x2d4d   : > { %v12303_v25 = vpop.f32.mrb[96].mxu0 }
0x2d4e   : > { %v12309_v26 = vadd.f32 %v12303_v25, %v12219_v52  ;;  %v16111_v27 = vpop.f32.mrb[97].mxu0  ;;  %v12690_v52 = vld [vmem:[#allocation16] sm:$0xff]  ;;  %v12693_v25 = vld [vmem:[#allocation16 + $0x18] sm:$0xff] }
0x2d4f   : > { %v12306_v28 = vpop.f32.mrb[98].mxu0  ;;  %v16458_v24 = vpack.c.bf16 %v12691_v21, %v12690_v52 }
0x2d50   : > { %v16112_v29 = vpop.f32.mrb[99].mxu0 }
0x2d55   : > { %v12393_v35 = vpop.f32.mrb[100].mxu0 }
0x2d56   : > { %v12399_v36 = vadd.f32 %v12393_v35, %v12309_v26  ;;  %v16123_v37 = vpop.f32.mrb[101].mxu0  ;;  %v16461_v26 = vpack.c.bf16 %v12693_v25, %v12692_v22 }
0x2d57   : > { %v12396_v49 = vpop.f32.mrb[102].mxu0 }
0x2d58   : > { %v12400_v56 = vadd.f32 %v12399_v36, %v19101_v6  ;;  %v16124_v23 = vpop.f32.mrb[103].mxu0 }
0x2d5a   : > { %v12408_v34 = vadd.f32 %v13531_v38, %v12400_v56 }
0x2d5c   : > { %v12425_v13 = vsel %vm8658_vm6, %v12408_v34, 0.0 }
0x2d5d   : > { %v12426_v39 = vrot.slane %v12425_v13, 4 }
0x2d5f   : > { %v12427_v40 = vadd.f32 %v12426_v39, %v12425_v13 }
0x2d61   : > { %v12428_v41 = vrot.slane %v12427_v40, 2 }
0x2d63   : > { %v12429_v42 = vadd.f32 %v12428_v41, %v12427_v40 }
0x2d65   : > { %v12430_v43 = vrot.slane %v12429_v42, 1 }
0x2d67   : > { %v12431_v44 = vadd.f32 %v12430_v43, %v12429_v42 }
0x2d69   : > { %v12432_v45 = vmul.f32 0.25, %v12431_v44 }
0x2d6b   : > { %16158 = vmatmul.mubr.f32.vlgmr.msra.gmra.mrb[6].mxu1 %v12432_v45 }
0x2d6c   : > { %16227 = vmatprep.mubr.msk.f32.mxu1 %vm17330_vm0, %v17329_v0  ;;  %16435 = vmatpush3.bf16.msra.mxu1 %v16434_v33 }
0x2d6d   : > { %16436 = vmatprep.subr.bf16.mxu1 %v17331_v20 }
0x2d70   : > { %16438 = vmatpush3.bf16.msra.mxu1 %v16437_v47 }
0x2d71   : > { %16439 = vmatprep.subr.bf16.mxu1 %v17331_v20 }
0x2d74   : > { %16441 = vmatpush3.bf16.msra.mxu1 %v16440_v5 }
0x2d75   : > { %16442 = vmatprep.subr.bf16.mxu1 %v17331_v20 }
0x2e3e   : > { %v12499_v46 = vpop.f32.mrb[6].mxu1 }
0x2e3f   : > { %v12506_v48 = vrot.slane %v12499_v46, %v18362_v30  ;;  %v16159_v50 = vpop.f32.mrb[7].mxu1 }
0x2e41   : > { %v19208_v6 = vsub.f32 %v12408_v34, %v12506_v48 }
0x2e43   : > { %v12508_v51 = vmul.f32 %v19208_v6, %v19208_v6 }
0x2e45   : > { %v12509_v53 = vsel %vm8658_vm6, %v12508_v51, 0.0 }
0x2e46   : > { %v12510_v54 = vrot.slane %v12509_v53, 4 }
0x2e48   : > { %v12511_v55 = vadd.f32 %v12510_v54, %v12509_v53 }
0x2e4a   : > { %v12512_v57 = vrot.slane %v12511_v55, 2 }
0x2e4c   : > { %v12513_v58 = vadd.f32 %v12512_v57, %v12511_v55 }
0x2e4e   : > { %v12514_v59 = vrot.slane %v12513_v58, 1 }
0x2e50   : > { %v12515_v60 = vadd.f32 %v12514_v59, %v12513_v58 }
0x2e52   : > { %v12516_v31 = vmul.f32 0.25, %v12515_v60 }
0x2e54   : > { %16193 = vmatmul.mubr.f32.vlgmr.msra.gmra.mrb[30].mxu0 %v12516_v31 }
0x2e55   : > { %16238 = vmatprep.mubr.msk.f32.mxu0 %vm17330_vm0, %v17329_v0  ;;  %v12611_v0 = vld [vmem:[#allocation15 + $0x38] sm:$0xff]  ;;  %16459 = vmatpush3.bf16.msra.mxu0 %v16458_v24 }
0x2e56   : > { %v16443_v8 = vpack.c.bf16 %v12611_v0, %v12610_v7  ;;  %16460 = vmatprep.subr.bf16.mxu0 %v17331_v20 }
0x2e58   : > { %16444 = vmatpush3.bf16.msra.mxu1 %v16443_v8 }
0x2e59   : > { %16445 = vmatprep.subr.bf16.mxu1 %v17331_v20  ;;  %16462 = vmatpush3.bf16.msra.mxu0 %v16461_v26 }
0x2e5c   : > { %16447 = vmatpush3.bf16.msra.mxu1 %v16446_v11 }
0x2e5d   : > { %16448 = vmatprep.subr.bf16.mxu1 %v17331_v20 }
0x2e60   : > { %16450 = vmatpush3.bf16.msra.mxu1 %v16449_v15 }
0x2e61   : > { %16451 = vmatprep.subr.bf16.mxu1 %v17331_v20 }
0x2e64   : > { %16453 = vmatpush3.bf16.msra.mxu1 %v16452_v17 }
0x2e65   : > { %16454 = vmatprep.subr.bf16.mxu1 %v17331_v20 }
0x2e68   : > { %16456 = vmatpush3.bf16.msra.mxu1 %v16455_v19 }
0x2f27   : > { %v12583_v27 = vpop.f32.mrb[30].mxu0 }
0x2f28   : > { %v12584_v28 = vadd.f32 1e-05, %v12583_v27  ;;  %v16194_v29 = vpop.f32.mrb[31].mxu0 }
0x2f2a   : > { %16999 = vrsqrt.f32 %v12584_v28 }
0x2f34   : > { %v17000_v35 = vpop.eup %16999 }
0x2f35   : > { %v12591_v36 = vrot.slane %v17000_v35, %v18362_v30 }
0x2f37   : > { %v12592_v37 = vmul.f32 %v12591_v36, %v19208_v6 }
0x2f39   : > { %vm12593_vm11 = vcmp.ge.f32.partialorder %v12592_v37, 0.0  ;;  %v12594_v38 = vmul.f32 0.2, %v12592_v37 }
0x2f3b   : > { %v12595_v49 = vsel %vm12593_vm11, %v12592_v37, %v12594_v38 }
0x2f3c   : > { %v12596_v56 = vsel %vm8658_vm6, %v12595_v49, 0.0 }
0x2f3d   : > { %v12597_v23 = vrot.slane %v12596_v56, 4 }
0x2f3f   : > { %v12598_v34 = vadd.f32 %v12597_v23, %v12596_v56 }
0x2f41   : > { %v12599_v13 = vrot.slane %v12598_v34, 2 }
0x2f43   : > { %v12600_v20 = vadd.f32 %v12599_v13, %v12598_v34 }
0x2f45   : > { %v12601_v39 = vrot.slane %v12600_v20, 1 }
0x2f47   : > { %v12602_v40 = vadd.f32 %v12601_v39, %v12600_v20 }
0x2f49   : > { %v12603_v41 = vmul.f32 0.25, %v12602_v40 }
0x2f4b   : > { %16228 = vmatmul.mubr.f32.vlgmr.msra.gmra.mrb[80].mxu1 %v12603_v41 }
0x301e   : > { %v12686_v42 = vpop.f32.mrb[80].mxu1 }
0x301f   : > { %v16229_v43 = vpop.f32.mrb[81].mxu1  ;;  %16239 = vmatmul.mubr.msk.f32.vlgmr.msra.gmra.mrb[104].mxu0 %vm12694_vm12, %v12686_v42 }
0x30f2   : > { %v12764_v30 = vpop.f32.mrb[104].mxu0 }
0x30f3   : > { %vm12768_vm13 = vcmp.ge.f32.partialorder %v12764_v30, 0.0  ;;  %v12769_v44 = vmul.f32 0.2, %v12764_v30  ;;  %v16240_v45 = vpop.f32.mrb[105].mxu0 }
0x30f5   : > { %v12770_v46 = vsel %vm12768_vm13, %v12764_v30, %v12769_v44 }
0x30f6   : > { %12771 = vst [vmem:[%s813_s3] sm:$0x1] %v12770_v46 }
0x30f7 PF: > { %s19310_s12 = sld [smem:[#allocation24_spill]] }
0x30fd   : > { %s37_s2 = sadd.s32 1, %s19310_s12  }
0x30fe   : > { %p34_p2 = scmp.ge.s32.totalorder %s37_s2, 4  }
0x3100   :  { %36 = sbr.rel (!%p34_p2) target bundleno = 18 (0x12), region = 330 }
0x3107   :  { %12789 = vsyncpa [#allocation3], 1 }
0x3108   :  { %12791 = vsyncpa [#allocation3 + $0x1], 1 }
0x3109   :  { %12792 = vsyncpa [#allocation5], 1 }
0x310a   :  { %12793 = vsyncpa [#allocation8], 1 }
0x310b   :  { %12794 = vsyncpa [#allocation11], 1 }
0x310c   :  { %12795 = vsyncpa [#allocation14], 1 }
0x310d   :  { %12796 = vsyncpa [#allocation17], 1 }

</bundles_post_ra>
